<compile_context>
chip_gen: v6e
topology: v6e:2x2x1
jax: 0.10.0
libtpu: 0.0.40
codegen_flags: <defaults>
</compile_context>

<pallas_src>
import jax
import jax.numpy as jnp
from jax.experimental import pallas as pl
from jax.experimental.pallas import tpu as pltpu


# ----------------------------------------------------------------------------
# Fused kernel.  Grid = (nc, D // (nc*tn)):
#   axis 0 ("parallel")  : splits the layer-2 output tiles across TensorCores
#   axis 1 ("arbitrary") : streams W2 tiles; layer-3 accumulated per core
# refs: x(B,K)bf16 w1(K,D)bf16 b1(1,D)f32 w2(D,tn)bf16 b2(1,tn)f32 w3(1,tn)f32
#       -> o(1,B,1)f32 partial;  scratch: h1(B,D)bf16, acc(B,1)f32
# ----------------------------------------------------------------------------
def _fused_mlp_kernel(x_ref, w1_ref, b1_ref, w2_ref, b2_ref, w3_ref,
                      o_ref, h1_ref, acc_ref):
    j = pl.program_id(1)

    @pl.when(j == 0)
    def _():
        # Layer 1 (+ReLU), computed once per core; stays VMEM-resident (bf16).
        h1 = jnp.dot(x_ref[...], w1_ref[...],
                     preferred_element_type=jnp.float32)
        h1_ref[...] = jnp.maximum(h1 + b1_ref[...], 0.0).astype(jnp.bfloat16)
        acc_ref[...] = jnp.zeros_like(acc_ref)

    # Layer 2 tile (+bias, ReLU): bf16 (B,D) @ bf16 (D,tn) -> f32, native MXU.
    h2 = jnp.dot(h1_ref[...], w2_ref[...],
                 preferred_element_type=jnp.float32)
    h2 = jnp.maximum(h2 + b2_ref[...], 0.0)

    # Layer 3 contribution for this tile: VPU multiply + lane reduction.
    acc_ref[...] += jnp.sum(h2 * w3_ref[...], axis=-1, keepdims=True)

    @pl.when(j == pl.num_programs(1) - 1)
    def _():
        o_ref[...] = acc_ref[...].reshape(o_ref.shape).astype(o_ref.dtype)


def fused_mlp(x, w1, b1, w2, b2, w3, *, tn=1024, nc=2):
    """Fused 3-layer MLP forward (without final bias).

    x:(B,K) bf16; w1:(K,D) bf16; w2:(D,D) bf16; w3:(1,D) f32.
    Returns (B, 1) f32 = relu(relu(x@w1+b1)@w2+b2) @ w3.T
    """
    B, K = x.shape
    K2, D = w1.shape
    assert K == K2
    assert w2.shape == (D, D)
    assert w3.shape == (1, D)
    assert b1.shape == (1, D) and b2.shape == (1, D)
    assert D % (nc * tn) == 0, "hidden dim must divide by nc * tn"

    num_j = D // (nc * tn)

    flops = 2 * B * (K * D + D * D + D)
    bytes_accessed = int(
        x.size * x.dtype.itemsize + w1.size * w1.dtype.itemsize +
        b1.size * b1.dtype.itemsize + w2.size * w2.dtype.itemsize +
        b2.size * b2.dtype.itemsize + w3.size * w3.dtype.itemsize +
        nc * B * 4)

    partials = pl.pallas_call(
        _fused_mlp_kernel,
        out_shape=jax.ShapeDtypeStruct((nc, B, 1), jnp.float32),
        grid_spec=pltpu.PrefetchScalarGridSpec(
            num_scalar_prefetch=0,
            grid=(nc, num_j),
            in_specs=[
                pl.BlockSpec((B, K), lambda c, j: (0, 0)),   # x   (fetched once)
                pl.BlockSpec((K, D), lambda c, j: (0, 0)),   # w1  (fetched once)
                pl.BlockSpec((1, D), lambda c, j: (0, 0)),   # b1  (fetched once)
                pl.BlockSpec((D, tn),                        # w2 tile (streamed)
                             lambda c, j: (0, c * num_j + j)),
                pl.BlockSpec((1, tn),                        # b2 tile
                             lambda c, j: (0, c * num_j + j)),
                pl.BlockSpec((1, tn),                        # w3 tile (lane-dense)
                             lambda c, j: (0, c * num_j + j)),
            ],
            out_specs=pl.BlockSpec((1, B, 1), lambda c, j: (c, 0, 0)),
            scratch_shapes=[
                pltpu.VMEM((B, D), jnp.bfloat16),            # resident h1 (per core)
                pltpu.VMEM((B, 1), jnp.float32),             # layer-3 accumulator
            ],
        ),
        compiler_params=pltpu.CompilerParams(
            # axis 0: independent output tiles -> shard across TCs on v7x.
            # axis 1: reduction (resident h1 + running acc) -> sequential.
            dimension_semantics=("parallel", "arbitrary"),
            # 2 x 8 MiB double-buffered bf16 W2 tiles + ~1 MiB rest: raise the
            # scoped limit above v5e's 16 MiB default, stay < v7x's 64 MiB.
            vmem_limit_bytes=40 * 1024 * 1024,
        ),
        cost_estimate=pl.CostEstimate(
            flops=flops, transcendentals=0, bytes_accessed=bytes_accessed),
    )(x, w1, b1, w2, b2, w3)

    # Combine the per-core partial layer-3 sums (trivial XLA add).
    return partials.sum(axis=0)


# ----------------------------------------------------------------------------
# Parameters: PyTorch-style uniform init, transposed ONCE to (in, out) layout;
# matmul weights stored bf16 (MXU-native), biases + W3 kept f32.
# ----------------------------------------------------------------------------
def init_params(key, input_dims, dims=4096):
    def linear_init(k, fan_in, fan_out):
        kw, kb = jax.random.split(k)
        bound = 1.0 / jnp.sqrt(jnp.float32(fan_in))
        # PyTorch stores weight as (out_features, in_features).
        w = jax.random.uniform(kw, (fan_out, fan_in), jnp.float32, -bound, bound)
        b = jax.random.uniform(kb, (fan_out,), jnp.float32, -bound, bound)
        return w, b

    k1, k2, k3 = jax.random.split(key, 3)
    w1, b1 = linear_init(k1, input_dims, dims)
    w2, b2 = linear_init(k2, dims, dims)
    w3, b3 = linear_init(k3, dims, 1)
    return {
        "w1": w1.T.astype(jnp.bfloat16),   # (input_dims, dims)
        "b1": b1.reshape(1, dims),
        "w2": w2.T.astype(jnp.bfloat16),   # (dims, dims)
        "b2": b2.reshape(1, dims),
        "w3": w3,                          # (1, dims), f32, lane-dense
        "b3": b3.reshape(1, 1),
    }


@jax.jit
def my_model_forward(params, x):
    out = fused_mlp(x.astype(jnp.bfloat16),
                    params["w1"], params["b1"],
                    params["w2"], params["b2"],
                    params["w3"])
    return out + params["b3"]


def reference_forward(params, x):
    """Pure-JAX reference mirroring the kernel's precision path."""
    hp = jax.lax.Precision.HIGHEST
    xb = x.astype(jnp.bfloat16).astype(jnp.float32)
    w1 = params["w1"].astype(jnp.float32)
    w2 = params["w2"].astype(jnp.float32)
    h = jnp.maximum(jnp.dot(xb, w1, precision=hp) + params["b1"], 0.0)
    h = h.astype(jnp.bfloat16).astype(jnp.float32)   # kernel keeps h1 in bf16
    h = jnp.maximum(jnp.dot(h, w2, precision=hp) + params["b2"], 0.0)
    return jnp.dot(h, params["w3"].T, precision=hp) + params["b3"]


if __name__ == "__main__":
    key = jax.random.PRNGKey(0)
    kp, kx = jax.random.split(key)

    batch, input_dims = 8, 32
    params = init_params(kp, input_dims, dims=4096)
    x = jax.random.normal(kx, (batch, input_dims), jnp.float32)

    y = my_model_forward(params, x)
    y = jax.block_until_ready(y)
    assert y.shape == (batch, 1), y.shape

    # Reference uses the same bf16-rounded weights/activations; only
    # accumulation order differs, so a modest tolerance is ample.
    y_ref = reference_forward(params, x)
    assert jnp.allclose(y, y_ref, atol=1e-2, rtol=1e-2), (
        float(jnp.max(jnp.abs(y - y_ref)))
    )

    print("KERNEL_OK")
</pallas_src>

<mosaic_0001>
module attributes {stable_mosaic.version = 11 : i64} {
  func.func @_fused_mlp_kernel(%arg0: i32, %arg1: i32, %arg2: memref<8x32xbf16, #tpu.memory_space<vmem>>, %arg3: memref<32x4096xbf16, #tpu.memory_space<vmem>>, %arg4: memref<1x4096xf32, #tpu.memory_space<vmem>>, %arg5: memref<4096x1024xbf16, #tpu.memory_space<vmem>>, %arg6: memref<1x1024xf32, #tpu.memory_space<vmem>>, %arg7: memref<1x1024xf32, #tpu.memory_space<vmem>>, %arg8: memref<1x8x1xf32, #tpu.memory_space<vmem>>, %arg9: memref<8x4096xbf16, #tpu.memory_space<vmem>>, %arg10: memref<8x1xf32, #tpu.memory_space<vmem>>) attributes {dimension_semantics = [#tpu.dimension_semantics<parallel>, #tpu.dimension_semantics<arbitrary>], iteration_bounds = array<i64: 2, 2>, scalar_prefetch = 0 : i64, scratch_operands = 2 : i64, tpu.core_type = #tpu.core_type<tc>, window_params = [{pipeline_mode = #tpu.pipeline_mode<synchronous>, transform_indices = @transform_0, window_bounds = array<i64: 8, 32>}, {pipeline_mode = #tpu.pipeline_mode<synchronous>, transform_indices = @transform_1, window_bounds = array<i64: 32, 4096>}, {pipeline_mode = #tpu.pipeline_mode<synchronous>, transform_indices = @transform_2, window_bounds = array<i64: 1, 4096>}, {transform_indices = @transform_3, window_bounds = array<i64: 4096, 1024>}, {transform_indices = @transform_4, window_bounds = array<i64: 1, 1024>}, {transform_indices = @transform_5, window_bounds = array<i64: 1, 1024>}, {transform_indices = @transform_6, window_bounds = array<i64: 1, 8, 1>}]} {
    %c0_i32 = arith.constant 0 : i32
    %0 = arith.cmpi eq, %arg1, %c0_i32 : i32
    %1 = arith.extui %0 : i1 to i32
    %c0_i32_0 = arith.constant 0 : i32
    %2 = arith.cmpi ne, %1, %c0_i32_0 : i32
    scf.if %2 {
      %c0_15 = arith.constant 0 : index
      %c0_16 = arith.constant 0 : index
      %22 = vector.load %arg2[%c0_15, %c0_16] : memref<8x32xbf16, #tpu.memory_space<vmem>>, vector<8x32xbf16>
      %c0_17 = arith.constant 0 : index
      %c0_18 = arith.constant 0 : index
      %23 = vector.load %arg3[%c0_17, %c0_18] : memref<32x4096xbf16, #tpu.memory_space<vmem>>, vector<32x4096xbf16>
      %cst_19 = arith.constant dense<0.000000e+00> : vector<8x4096xf32>
      %24 = tpu.matmul %22, %23, %cst_19 {dimension_numbers = #tpu.dot_dimension_numbers<[1], [0], [0], [1], [0, 0, 1, 1], [], []>} : vector<8x32xbf16>, vector<32x4096xbf16>, vector<8x4096xf32> -> vector<8x4096xf32>
      %c0_20 = arith.constant 0 : index
      %c0_21 = arith.constant 0 : index
      %25 = vector.load %arg4[%c0_20, %c0_21] : memref<1x4096xf32, #tpu.memory_space<vmem>>, vector<1x4096xf32>
      %26 = vector.broadcast %25 : vector<1x4096xf32> to vector<8x4096xf32>
      %27 = arith.addf %24, %26 : vector<8x4096xf32>
      %cst_22 = arith.constant 0.000000e+00 : f32
      %28 = vector.broadcast %cst_22 : f32 to vector<8x4096xf32>
      %29 = arith.maximumf %27, %28 : vector<8x4096xf32>
      %30 = arith.truncf %29 : vector<8x4096xf32> to vector<8x4096xbf16>
      %c0_23 = arith.constant 0 : index
      %c0_24 = arith.constant 0 : index
      %31 = vector.load %arg9[%c0_23, %c0_24] : memref<8x4096xbf16, #tpu.memory_space<vmem>>, vector<8x4096xbf16>
      tpu.vector_store %arg9[%c0_23, %c0_24], %30 {strides = array<i32>} : memref<8x4096xbf16, #tpu.memory_space<vmem>>, vector<8x4096xbf16>,
      %cst_25 = arith.constant 0.000000e+00 : f32
      %32 = vector.broadcast %cst_25 : f32 to vector<8x1xf32>
      %c0_26 = arith.constant 0 : index
      %c0_27 = arith.constant 0 : index
      %33 = vector.load %arg10[%c0_26, %c0_27] : memref<8x1xf32, #tpu.memory_space<vmem>>, vector<8x1xf32>
      tpu.vector_store %arg10[%c0_26, %c0_27], %32 {strides = array<i32>} : memref<8x1xf32, #tpu.memory_space<vmem>>, vector<8x1xf32>,
    } else {
    }
    %c0 = arith.constant 0 : index
    %c0_1 = arith.constant 0 : index
    %3 = vector.load %arg9[%c0, %c0_1] : memref<8x4096xbf16, #tpu.memory_space<vmem>>, vector<8x4096xbf16>
    %c0_2 = arith.constant 0 : index
    %c0_3 = arith.constant 0 : index
    %4 = vector.load %arg5[%c0_2, %c0_3] : memref<4096x1024xbf16, #tpu.memory_space<vmem>>, vector<4096x1024xbf16>
    %cst = arith.constant dense<0.000000e+00> : vector<8x1024xf32>
    %5 = tpu.matmul %3, %4, %cst {dimension_numbers = #tpu.dot_dimension_numbers<[1], [0], [0], [1], [0, 0, 1, 1], [], []>} : vector<8x4096xbf16>, vector<4096x1024xbf16>, vector<8x1024xf32> -> vector<8x1024xf32>
    %c0_4 = arith.constant 0 : index
    %c0_5 = arith.constant 0 : index
    %6 = vector.load %arg6[%c0_4, %c0_5] : memref<1x1024xf32, #tpu.memory_space<vmem>>, vector<1x1024xf32>
    %7 = vector.broadcast %6 : vector<1x1024xf32> to vector<8x1024xf32>
    %8 = arith.addf %5, %7 : vector<8x1024xf32>
    %cst_6 = arith.constant 0.000000e+00 : f32
    %9 = vector.broadcast %cst_6 : f32 to vector<8x1024xf32>
    %10 = arith.maximumf %8, %9 : vector<8x1024xf32>
    %c0_7 = arith.constant 0 : index
    %c0_8 = arith.constant 0 : index
    %11 = vector.load %arg10[%c0_7, %c0_8] : memref<8x1xf32, #tpu.memory_space<vmem>>, vector<8x1xf32>
    %c0_9 = arith.constant 0 : index
    %c0_10 = arith.constant 0 : index
    %12 = vector.load %arg7[%c0_9, %c0_10] : memref<1x1024xf32, #tpu.memory_space<vmem>>, vector<1x1024xf32>
    %13 = vector.broadcast %12 : vector<1x1024xf32> to vector<8x1024xf32>
    %14 = arith.mulf %10, %13 : vector<8x1024xf32>
    %cst_11 = arith.constant dense<0.000000e+00> : vector<8xf32>
    %15 = vector.multi_reduction <add>, %14, %cst_11 [1] : vector<8x1024xf32> to vector<8xf32>
    %16 = vector.shape_cast %15 : vector<8xf32> to vector<8x1xf32>
    %17 = arith.addf %11, %16 : vector<8x1xf32>
    %c0_12 = arith.constant 0 : index
    %c0_13 = arith.constant 0 : index
    %18 = vector.load %arg10[%c0_12, %c0_13] : memref<8x1xf32, #tpu.memory_space<vmem>>, vector<8x1xf32>
    tpu.vector_store %arg10[%c0_12, %c0_13], %17 {strides = array<i32>} : memref<8x1xf32, #tpu.memory_space<vmem>>, vector<8x1xf32>,
    %c1_i32 = arith.constant 1 : i32
    %19 = arith.cmpi eq, %arg1, %c1_i32 : i32
    %20 = arith.extui %19 : i1 to i32
    %c0_i32_14 = arith.constant 0 : i32
    %21 = arith.cmpi ne, %20, %c0_i32_14 : i32
    scf.if %21 {
      %c0_15 = arith.constant 0 : index
      %c0_16 = arith.constant 0 : index
      %22 = vector.load %arg10[%c0_15, %c0_16] : memref<8x1xf32, #tpu.memory_space<vmem>>, vector<8x1xf32>
      %23 = vector.shape_cast %22 : vector<8x1xf32> to vector<1x8x1xf32>
      %c0_17 = arith.constant 0 : index
      %c0_18 = arith.constant 0 : index
      %c0_19 = arith.constant 0 : index
      %24 = vector.load %arg8[%c0_17, %c0_18, %c0_19] : memref<1x8x1xf32, #tpu.memory_space<vmem>>, vector<1x8x1xf32>
      tpu.vector_store %arg8[%c0_17, %c0_18, %c0_19], %23 {strides = array<i32>} : memref<1x8x1xf32, #tpu.memory_space<vmem>>, vector<1x8x1xf32>,
    } else {
    }
    return
  }
  func.func @transform_0(%arg0: i32, %arg1: i32) -> (i32, i32) {
    %c0_i32 = arith.constant 0 : i32
    %c0_i32_0 = arith.constant 0 : i32
    %c0_i32_1 = arith.constant 0 : i32
    return %c0_i32, %c0_i32_0 : i32, i32
  }
  func.func @transform_1(%arg0: i32, %arg1: i32) -> (i32, i32) {
    %c0_i32 = arith.constant 0 : i32
    %c0_i32_0 = arith.constant 0 : i32
    %c0_i32_1 = arith.constant 0 : i32
    return %c0_i32, %c0_i32_0 : i32, i32
  }
  func.func @transform_2(%arg0: i32, %arg1: i32) -> (i32, i32) {
    %c0_i32 = arith.constant 0 : i32
    %c0_i32_0 = arith.constant 0 : i32
    %c0_i32_1 = arith.constant 0 : i32
    return %c0_i32, %c0_i32_0 : i32, i32
  }
  func.func @transform_3(%arg0: i32, %arg1: i32) -> (i32, i32) {
    %c2_i32 = arith.constant 2 : i32
    %0 = arith.muli %arg0, %c2_i32 : i32
    %1 = arith.addi %0, %arg1 : i32
    %c0_i32 = arith.constant 0 : i32
    %c0_i32_0 = arith.constant 0 : i32
    return %c0_i32, %1 : i32, i32
  }
  func.func @transform_4(%arg0: i32, %arg1: i32) -> (i32, i32) {
    %c2_i32 = arith.constant 2 : i32
    %0 = arith.muli %arg0, %c2_i32 : i32
    %1 = arith.addi %0, %arg1 : i32
    %c0_i32 = arith.constant 0 : i32
    %c0_i32_0 = arith.constant 0 : i32
    return %c0_i32, %1 : i32, i32
  }
  func.func @transform_5(%arg0: i32, %arg1: i32) -> (i32, i32) {
    %c2_i32 = arith.constant 2 : i32
    %0 = arith.muli %arg0, %c2_i32 : i32
    %1 = arith.addi %0, %arg1 : i32
    %c0_i32 = arith.constant 0 : i32
    %c0_i32_0 = arith.constant 0 : i32
    return %c0_i32, %1 : i32, i32
  }
  func.func @transform_6(%arg0: i32, %arg1: i32) -> (i32, i32, i32) {
    %c0_i32 = arith.constant 0 : i32
    %c0_i32_0 = arith.constant 0 : i32
    %c0_i32_1 = arith.constant 0 : i32
    return %arg0, %c0_i32, %c0_i32_0 : i32, i32, i32
  }
}

</mosaic_0001>

<bundles_post_ra>
// kernel: my_model_forward.1
= control target key start
LH: loop header
LB: loop body
LE: loop exit
PB: predicated region body
PF: predicated region fallthrough
CT: control target
= control target key end

     0   :  { %s22600_s0 = inlined_call_operand.vmem [shape: bf16[8,32], index: 0, kind: input, shape index: {}]   ;;  %s22601_s1 = inlined_call_operand.hbm [shape: bf16[32,4096], index: 1, kind: input, shape index: {}]   ;;  %s22602_s2 = inlined_call_operand.hbm [shape: f32[1,4096], index: 2, kind: input, shape index: {}]   ;;  %s22603_s3 = inlined_call_operand.hbm [shape: bf16[4096,4096], index: 3, kind: input, shape index: {}]   ;;  %s22604_s4 = inlined_call_operand.hbm [shape: f32[1,4096], index: 4, kind: input, shape index: {}]   ;;  %s22605_s5 = inlined_call_operand.hbm [shape: f32[1,4096], index: 5, kind: input, shape index: {}]   ;;  %s22606_s6 = inlined_call_operand.vmem [shape: f32[2,8,1], index: 6, kind: output, shape index: {}]  }
   0x1   :  { %22614 = sst [smem:[#allocation19_spill]] %s22600_s0 }
   0x2   :  { %22615 = sst [smem:[#allocation20_spill]] %s22601_s1 }
   0x3   :  { %22616 = sst [smem:[#allocation21_spill]] %s22603_s3 }
   0x4   :  { %22617 = sst [smem:[#allocation22_spill]] %s22606_s6 }
   0x5   :  { %11 = vsyncpa [#allocation5], 0 }
   0x6   :  { %12 = vsyncpa [#allocation7], 0  ;;  %s19734_s21 = smov 0   ;;  %s19736_s22 = smov 0  }
   0x7   :  { %s19738_s23 = smov 0   ;;  %s19740_s24 = smov 0  }
   0x8   :  { %s19742_s25 = smov 0   ;;  %s19744_s26 = smov 0  }
   0x9   :  { %s19746_s27 = smov 0   ;;  %s19748_s28 = smov 0  }
   0xa LB: > { %22618 = sst [smem:[#allocation14_spill]] %s19670_s24  ;;  %s22608_s29 = sadd.s32 4294967295, %s19686_s28   ;;  %s19686_s28 = sphi %s19748_s28, %s18_s28   ;;  %s19682_s27 = sphi %s19746_s27, %s22642_s27   ;;  %s19678_s26 = sphi %s19744_s26, %s22641_s26   ;;  %s19674_s25 = sphi %s19742_s25, %s22640_s25   ;;  %s19670_s24 = sphi %s19740_s24, %s22639_s24   ;;  %s19666_s23 = sphi %s19738_s23, %s22645_s23   ;;  %s19662_s22 = sphi %s19736_s22, %s22644_s22   ;;  %s19658_s21 = sphi %s19734_s21, %s22643_s21  }
   0xb   : > { %22619 = sst [smem:[#allocation15_spill]] %s19678_s26  ;;  %p111_p0 = scmp.ne.s32.totalorder %s19666_s23, %s19662_s22 }
   0xc   : > { %22620 = sst [smem:[#allocation16_spill]] %s19682_s27  ;;  %p112_p1 = scmp.eq.s32.totalorder %s19686_s28, 0 }
   0xd   : > { %p117_p2 = scmp.ne.s32.totalorder %s19662_s22, %s19658_s21  ;;  %p19780_p3 = scmp.eq.s32.totalorder %s22608_s29, 0 }
   0xe   : > { %p113_p4 = por %p112_p1, %p111_p0  ;;  %p17108_p5 = scmp.ge.s32.totalorder %s19686_s28, 1 }
   0xf   : > { %p19787_p6 = por %p19780_p3, %p117_p2  ;;  %p214_p7 = scmp.lt.s32.totalorder %s19686_s28, 5 }
  0x10   : > { %s19688_s10 = smov [#allocation4]   ;;  %p19363_p10 = scmp.lt.s32.totalorder %s19686_s28, 4 }
  0x11   : > { %s22622_s8 = scalar_select %p19787_p6, 1, 0 }
  0x12   : > { %p19792_p8 = pnand %p17108_p5, %p214_p7  ;;  %s229_s11 = sshll.u32 %s19688_s10, 4  ;;  %s230_s11 = int_to_ptr.vmem [resolvable:$true] %s229_s11 }
  0x13   : > { %p19805_p12 = pnand %p19363_p10, %p113_p4  ;;  %s19487_s14 = scalar_lea.vmem %s230_s11, 8192 }
  0x14   : > { %p19344_p9 = pneg %p19792_p8  ;;  %p19488_p0 = scmp.ne.s32.totalorder %s230_s11, %s19487_s14 }
  0x15   : > { %p19495_p5 = scmp.lt.s32.totalorder %s230_s11, %s230_s11  ;;  %p19496_p7 = scmp.lt.s32.totalorder %s19487_s14, %s19487_s14 }
  0x16   : > { %p19801_p11 = pnand %p19344_p9, %p19780_p3 }
  0x17   : > { %p19497_p9 = por %p19496_p7, %p19495_p5 }
  0x18   : > { %p19478_p13 = pneg %p19801_p11 }
  0x1a   : > { %p19490_p1 = pnand %p19488_p0, %p19478_p13 }
  0x1c   : > { %p19491_p2 = pneg %p19490_p1 }
  0x1e   : > { %p19498_p6 = pnand %p19497_p9, %p19491_p2 }
  0x20   : > { %19501 = shalt.err (!%p19498_p6)
}
  0x21   : > { %s22609_s15 = smov 2048   ;;  %s19690_s16 = smov 128  }
  0x22   : > { %s22626_s1 = sld [smem:[#allocation20_spill]]  ;;  %s27_s19 = sadd.s32 1, %s19678_s26 }
  0x23   : > { %s30_s20 = sadd.s32 1, %s19682_s27  ;;  %p28_p4 = scmp.ge.s32.totalorder %s27_s19, 2 }
  0x24   : > { %s17102_s21 = sshll.u32 %s19682_s27, 1  ;;  %s254_s14 = sand.u32 1, %s19686_s28  }
  0x25   : > { %s19825_s10 = sadd.s32 %s19678_s26, %s17102_s21  ;;  %s22647_s19 = smov (%p28_p4, %s27_s19), 0 }
  0x26   : > { %22627 = sst [smem:[#allocation17_spill]] %s22647_s19  ;;  %s22649_s20 = smov (!%p28_p4, %s30_s20), %s19682_s27 }
  0x27   : > { %s256_s29 = sand.u32 1, %s19666_s23   ;;  %p32_p6 = scmp.ge.s32.totalorder %s22649_s20, 2 }
  0x28   : > { %19347 = dma.hbm_to_vmem [thread:$0]  (!%p19801_p11), %s22626_s1, 8192, %s230_s11, [#allocation5], %s22609_s15, %s22609_s15, %s19690_s16  }
  0x29   : > { %s17112_s30 = sshll.u32 %s256_s29, 14  ;;  %s19311_s17 = sshll.u32 %s19825_s10, 9 }
  0x2a   : > { %s22651_s20 = smov (%p32_p6, %s22649_s20), 0  ;;  %s22629_s3 = sld [smem:[#allocation21_spill]] }
  0x2b   : > { %22628 = sst [smem:[#allocation18_spill]] %s22651_s20  ;;  %s258_s21 = scalar_lea.vmem [#allocation8], %s17112_s30 }
  0x2c   : > { %s267_s15 = sshll.u32 %s258_s21, 4  ;;  %s17103_s1 = sshll.u32 %s22651_s20, 1  ;;  %s268_s15 = int_to_ptr.vmem [resolvable:$true] %s267_s15 }
  0x2d   : > { %s100_s26 = sadd.s32 %s17103_s1, %s22647_s19  ;;  %s19847_s24 = sshll.u32 %s256_s29, 3 }
  0x2e   : > { %s101_s27 = ssub.s32 %s19825_s10, %s100_s26  ;;  %s19849_s6 = scalar_lea.sflag [#allocation5], %s254_s14 }
  0x2f   : > { %p19843_p10 = scmp.eq.s32.totalorder %s101_s27, 0  ;;  %p19504_p0 = pneg %p19805_p12 }
  0x30   : > { %s19838_s18 = scalar_lea.hbm %s22629_s3, %s19311_s17  ;;  %s19515_s11 = scalar_lea.vmem %s268_s15, 262144 }
  0x31   : > { %p19516_p1 = scmp.ne.s32.totalorder %s268_s15, %s19515_s11  ;;  %s19691_s30 = smov [#allocation8]  }
  0x32   : > { %s19520_s17 = sshll.u32 %s19691_s30, 4  ;;  %s19521_s17 = int_to_ptr.vmem [resolvable:$false] %s19520_s17 }
  0x33   : > { %p19518_p2 = pnand %p19516_p1, %p19504_p0  ;;  %s19522_s1 = scalar_lea.vmem %s19521_s17, 524288 }
  0x34   : > { %p19523_p7 = scmp.lt.s32.totalorder %s268_s15, %s19521_s17  ;;  %p19524_p9 = scmp.lt.s32.totalorder %s19522_s1, %s19515_s11 }
  0x35   : > { %p19519_p5 = pneg %p19518_p2 }
  0x36   : > { %p19525_p4 = por %p19524_p9, %p19523_p7 }
  0x38   : > { %p19526_p6 = pnand %p19525_p4, %p19519_p5 }
  0x3a   : > { %19529 = shalt.err (!%p19526_p6)
}
  0x3b   : > { %s19692_s26 = smov 512   ;;  %s19693_s27 = smov 32  }
  0x3c   : > { %s22631_s29 = smov 2048   ;;  %s22632_s14 = sadd.s32 1, %s19666_s23 }
  0x3d   : > { %19354 = dma.hbm_to_vmem [thread:$0]  (!%p19805_p12), %s19838_s18, 262144, %s268_s15, %s19849_s6, %s22631_s29, %s19692_s26, %s19693_s27  }
  0x3e   : > { %s19866_s16 = scalar_select %p19843_p10, %s19666_s23, %s22632_s14  }
  0x3f   : > { %s19312_s21 = sshll.u32 %s19825_s10, 7  ;;  %s281_s1 = scalar_lea.vmem [#allocation9], %s19847_s24 }
  0x40   : > { %s289_s17 = scalar_lea.hbm %s22604_s4, %s19312_s21  ;;  %s291_s3 = sshll.u32 %s281_s1, 4  ;;  %s292_s3 = int_to_ptr.vmem [resolvable:$true] %s291_s3 }
  0x41   : > { %s19543_s20 = scalar_lea.vmem %s292_s3, 128  ;;  %s19694_s19 = smov [#allocation9]  }
  0x42   : > { %p19544_p1 = scmp.ne.s32.totalorder %s292_s3, %s19543_s20  ;;  %s19548_s15 = sshll.u32 %s19694_s19, 4  ;;  %s19549_s15 = int_to_ptr.vmem [resolvable:$false] %s19548_s15 }
  0x43   : > { %s19550_s0 = scalar_lea.vmem %s19549_s15, 256  ;;  %p19551_p10 = scmp.lt.s32.totalorder %s292_s3, %s19549_s15 }
  0x44   : > { %p19546_p2 = pnand %p19544_p1, %p19504_p0  ;;  %p19552_p7 = scmp.lt.s32.totalorder %s19550_s0, %s19543_s20 }
  0x46   : > { %p19547_p5 = pneg %p19546_p2  ;;  %p19553_p9 = por %p19552_p7, %p19551_p10 }
  0x48   : > { %p19554_p4 = pnand %p19553_p9, %p19547_p5 }
  0x4a   : > { %19557 = shalt.err (!%p19554_p4)
}
  0x4b   : > { %19357 = dma.hbm_to_vmem [thread:$0]  (!%p19805_p12), %s289_s17, 128, %s292_s3, %s19849_s6  }
  0x4c   : > { %s19695_s10 = smov [#allocation6]   ;;  %s310_s29 = scalar_lea.hbm %s22605_s5, %s19312_s21 }
  0x4d   : > { %s243_s18 = sshll.u32 %s19695_s10, 4  ;;  %s244_s18 = int_to_ptr.vmem [resolvable:$true] %s243_s18 }
  0x4e   : > { %s19569_s19 = scalar_lea.vmem %s244_s18, 512  ;;  %p19577_p5 = scmp.lt.s32.totalorder %s244_s18, %s244_s18 }
  0x4f   : > { %p19570_p6 = scmp.ne.s32.totalorder %s244_s18, %s19569_s19  ;;  %p19578_p10 = scmp.lt.s32.totalorder %s19569_s19, %s19569_s19 }
  0x51   : > { %p19572_p1 = pnand %p19570_p6, %p19478_p13  ;;  %p19579_p7 = por %p19578_p10, %p19577_p5 }
  0x53   : > { %p19573_p2 = pneg %p19572_p1 }
  0x55   : > { %p19580_p9 = pnand %p19579_p7, %p19573_p2 }
  0x57   : > { %19583 = shalt.err (!%p19580_p9)
}
  0x58   : > { %19350 = dma.hbm_to_vmem [thread:$0]  (!%p19801_p11), %s22602_s2, 512, %s244_s18, [#allocation7]  }
  0x59   : > { %s302_s14 = scalar_lea.vmem [#allocation10], %s19847_s24  ;;  %s19696_s30 = smov [#allocation10]  }
  0x5a   : > { %s312_s21 = sshll.u32 %s302_s14, 4  ;;  %s19602_s17 = sshll.u32 %s19696_s30, 4  ;;  %s313_s21 = int_to_ptr.vmem [resolvable:$true] %s312_s21  ;;  %s19603_s17 = int_to_ptr.vmem [resolvable:$false] %s19602_s17 }
  0x5b   : > { %s19597_s11 = scalar_lea.vmem %s313_s21, 128  ;;  %s19604_s1 = scalar_lea.vmem %s19603_s17, 256 }
  0x5c   : > { %p19598_p4 = scmp.ne.s32.totalorder %s313_s21, %s19597_s11  ;;  %p19605_p1 = scmp.lt.s32.totalorder %s313_s21, %s19603_s17 }
  0x5d   : > { %p19606_p2 = scmp.lt.s32.totalorder %s19604_s1, %s19597_s11 }
  0x5e   : > { %p19600_p13 = pnand %p19598_p4, %p19504_p0 }
  0x5f   : > { %p19607_p5 = por %p19606_p2, %p19605_p1 }
  0x60   : > { %p19601_p6 = pneg %p19600_p13 }
  0x62   : > { %p19608_p10 = pnand %p19607_p5, %p19601_p6 }
  0x64   : > { %19611 = shalt.err (!%p19608_p10)
}
  0x65   : > { %19360 = dma.hbm_to_vmem [thread:$0]  (!%p19805_p12), %s310_s29, 128, %s313_s21, %s19849_s6  }
  0x66   : > { %321 = sbr.rel (%p19792_p8) target bundleno = 2813 (0xafd), region = 44 }
  0x6b   : > { %19645 = dma.done.wait (%p19780_p3), [#allocation5], 8192  }
  0x6c   : > { %19647 = vsyncadd (%p19780_p3), [#allocation5], 4294959104 }
  0x6d   : > { %19649 = dma.done.wait (%p19780_p3), [#allocation7], 512  }
  0x6e   : > { %19651 = vsyncadd (%p19780_p3), [#allocation7], 4294966784  ;;  %s22633_s24 = sadd.s32 4294967295, %s19686_s28   ;;  %s333_s12 = sand.u32 1, %s19662_s22  }
  0x6f   : > { %s331_s6 = sand.u32 1, %s22633_s24   ;;  %s17127_s9 = sshll.u32 %s333_s12, 14 }
  0x70   : > { %s332_s13 = scalar_lea.sflag [#allocation5], %s331_s6  ;;  %s19910_s15 = scalar_lea.vmem [#allocation8], %s17127_s9 }
  0x71   : > { %p22634_p8 = scmp.ne.s32.totalorder %s22622_s8, 0 }
  0x73   : > { %19653 = dma.done.wait (%p22634_p8), %s332_s13, 262400  }
  0x74   : > { %19655 = vsyncadd (%p22634_p8), %s332_s13, 4294704896  ;;  %s17128_s0 = sshll.u32 %s333_s12, 3  ;;  %p400_p11 = scmp.lt.s32.totalorder %s19674_s25, 1 }
  0x75   : > { %s22635_s26 = sld [smem:[#allocation22_spill]]  ;;  %s19923_s29 = scalar_lea.vmem [#allocation9], %s17128_s0 }
  0x76   : > { %s22653_s25 = smov (!%p400_p11, %s19674_s25), 1  ;;  %s19925_s19 = scalar_lea.vmem [#allocation10], %s17128_s0 }
  0x77   : > { %s17130_s7 = sshll.u32 %s22653_s25, 3  ;;  %s22636_s3 = sld [smem:[#allocation14_spill]] }
  0x7b   : > { %s19921_s27 = scalar_lea.vmem %s22635_s26, %s17130_s7 }
  0x7d   : > { %p17131_p3 = scmp.ne.s32.totalorder %s22636_s3, 0 }
  0x7e   : > { %s22637_s20 = sld [smem:[#allocation19_spill]] (!%p17131_p3) }
  0x7f   : > { %408 = sbr.rel (%p17131_p3) target bundleno = 402 (0x192), region = 68 }
  0x84   : > { %v442_v0 = vld [vmem:[#allocation4 + $0x100] sm:$0xff]  ;;  %v443_v2 = vld [vmem:[#allocation4 + $0x108] sm:$0xff]  ;;  %v19697_v8 = vmov 0   ;;  %v444_v15 = vld [vmem:[#allocation4 + $0x110] sm:$0xff]  ;;  %vm962_vm0 = vcmask 261120   ;;  %vm1798_vm1 = vcmask 7168  }
  0x85   : > { %v458_v1 = vld [vmem:[#allocation4 + $0x180] sm:$0xff]  ;;  %v459_v4 = vld [vmem:[#allocation4 + $0x188] sm:$0xff]  ;;  %998 = vmatprep.mubr.bf16.mxu0 %v19697_v8  ;;  %1039 = vmatprep.mubr.bf16.mxu1 %v19697_v8  ;;  %v460_v16 = vld [vmem:[#allocation4 + $0x190] sm:$0xff] }
  0x86   : > { %v17165_v3 = vcombine.high %v442_v0, %v458_v1  ;;  %v17164_v5 = vcombine.low %v442_v0, %v458_v1  ;;  %v410_v6 = vld [vmem:[#allocation4] sm:$0xff]  ;;  %v17167_v9 = vcombine.high %v443_v2, %v459_v4  ;;  %v17166_v10 = vcombine.low %v443_v2, %v459_v4  ;;  %v411_v12 = vld [vmem:[#allocation4 + $0x8] sm:$0xff]  ;;  %v445_v17 = vld [vmem:[#allocation4 + $0x118] sm:$0xff] }
  0x87   : > { %v426_v7 = vld [vmem:[#allocation4 + $0x80] sm:$0xff]  ;;  %v427_v13 = vld [vmem:[#allocation4 + $0x88] sm:$0xff]  ;;  %v461_v19 = vld [vmem:[#allocation4 + $0x198] sm:$0xff]  ;;  %v17169_v21 = vcombine.high %v444_v15, %v460_v16  ;;  %v17168_v28 = vcombine.low %v444_v15, %v460_v16 }
  0x88   : > { %v17133_v11 = vcombine.high %v410_v6, %v426_v7  ;;  %978 = vmatprep.subr.bf16.mxu0 %v17165_v3  ;;  %v17135_v14 = vcombine.high %v411_v12, %v427_v13  ;;  %1019 = vmatprep.subr.bf16.mxu1 %v17167_v9  ;;  %v17132_v18 = vcombine.low %v410_v6, %v426_v7  ;;  %v412_v23 = vld [vmem:[#allocation4 + $0x10] sm:$0xff]  ;;  %v413_v25 = vld [vmem:[#allocation4 + $0x18] sm:$0xff]  ;;  %v446_v32 = vld [vmem:[#allocation4 + $0x120] sm:$0xff] }
  0x89   : > { %979 = vmatpush1.bf16.msra.mxu0 %v17164_v5  ;;  %1020 = vmatpush1.bf16.msra.mxu1 %v17166_v10  ;;  %v17134_v20 = vcombine.low %v411_v12, %v427_v13  ;;  %v17171_v22 = vcombine.high %v445_v17, %v461_v19  ;;  %v428_v24 = vld [vmem:[#allocation4 + $0x90] sm:$0xff]  ;;  %v429_v26 = vld [vmem:[#allocation4 + $0x98] sm:$0xff]  ;;  %v17170_v29 = vcombine.low %v445_v17, %v461_v19  ;;  %v462_v33 = vld [vmem:[#allocation4 + $0x1a0] sm:$0xff] }
  0x8a   : > { %980 = vmatprep.subr.bf16.mxu0 %v17133_v11  ;;  %1021 = vmatprep.subr.bf16.mxu1 %v17135_v14  ;;  %v19933_v27 = vld [vmem:[%s22637_s20] sm:$0xf]  ;;  %v17137_v30 = vcombine.high %v412_v23, %v428_v24  ;;  %v17139_v31 = vcombine.high %v413_v25, %v429_v26  ;;  %v447_v34 = vld [vmem:[#allocation4 + $0x128] sm:$0xff]  ;;  %v17136_v36 = vcombine.low %v412_v23, %v428_v24  ;;  %v414_v40 = vld [vmem:[#allocation4 + $0x20] sm:$0xff] }
  0x8b   : > { %v463_v35 = vld [vmem:[#allocation4 + $0x1a8] sm:$0xff]  ;;  %v17138_v37 = vcombine.low %v413_v25, %v429_v26  ;;  %v17173_v38 = vcombine.high %v446_v32, %v462_v33  ;;  %v430_v41 = vld [vmem:[#allocation4 + $0xa0] sm:$0xff]  ;;  %v17172_v44 = vcombine.low %v446_v32, %v462_v33  ;;  %v448_v48 = vld [vmem:[#allocation4 + $0x130] sm:$0xff] }
  0x8c   : > { %v17175_v39 = vcombine.high %v447_v34, %v463_v35  ;;  %v415_v42 = vld [vmem:[#allocation4 + $0x28] sm:$0xff]  ;;  %v17174_v45 = vcombine.low %v447_v34, %v463_v35  ;;  %v17141_v46 = vcombine.high %v414_v40, %v430_v41  ;;  %v464_v49 = vld [vmem:[#allocation4 + $0x1b0] sm:$0xff]  ;;  %v449_v50 = vld [vmem:[#allocation4 + $0x138] sm:$0xff]  ;;  %v17140_v52 = vcombine.low %v414_v40, %v430_v41 }
  0x8d   : > { %981 = vmatpush1.bf16.msra.mxu0 %v17132_v18  ;;  %1022 = vmatpush1.bf16.msra.mxu1 %v17134_v20  ;;  %v431_v43 = vld [vmem:[#allocation4 + $0xa8] sm:$0xff]  ;;  %v465_v51 = vld [vmem:[#allocation4 + $0x1b8] sm:$0xff]  ;;  %v17177_v54 = vcombine.high %v448_v48, %v464_v49  ;;  %v416_v56 = vld [vmem:[#allocation4 + $0x30] sm:$0xff]  ;;  %v17176_v60 = vcombine.low %v448_v48, %v464_v49 }
  0x8e   : > { %1060 = vmatprep.subr.bf16.mxu0 %v17169_v21  ;;  %1101 = vmatprep.subr.bf16.mxu1 %v17171_v22  ;;  %v17143_v47 = vcombine.high %v415_v42, %v431_v43  ;;  %v17142_v53 = vcombine.low %v415_v42, %v431_v43  ;;  %v17179_v55 = vcombine.high %v449_v50, %v465_v51  ;;  %v432_v57 = vld [vmem:[#allocation4 + $0xb0] sm:$0xff]  ;;  %v417_v58 = vld [vmem:[#allocation4 + $0x38] sm:$0xff]  ;;  %v450_v0 = vld [vmem:[#allocation4 + $0x140] sm:$0xff] }
  0x8f   : > { %v433_v59 = vld [vmem:[#allocation4 + $0xb8] sm:$0xff]  ;;  %v17178_v61 = vcombine.low %v449_v50, %v465_v51  ;;  %v17145_v62 = vcombine.high %v416_v56, %v432_v57  ;;  %v466_v1 = vld [vmem:[#allocation4 + $0x1c0] sm:$0xff]  ;;  %v451_v2 = vld [vmem:[#allocation4 + $0x148] sm:$0xff]  ;;  %v17144_v4 = vcombine.low %v416_v56, %v432_v57 }
  0x90   : > { %17196 = vmatmul.mubr.msk.bf16.vlgmr.msra.gmra.mxu0 %vm962_vm0, %v19933_v27  ;;  %17197 = vmatmul.mubr.msk.bf16.vlgmr.msra.gmra.mxu1 %vm962_vm0, %v19933_v27  ;;  %v17147_v63 = vcombine.high %v417_v58, %v433_v59  ;;  %v467_v3 = vld [vmem:[#allocation4 + $0x1c8] sm:$0xff]  ;;  %v17146_v5 = vcombine.low %v417_v58, %v433_v59  ;;  %v17181_v6 = vcombine.high %v450_v0, %v466_v1  ;;  %v418_v9 = vld [vmem:[#allocation4 + $0x40] sm:$0xff]  ;;  %v452_v17 = vld [vmem:[#allocation4 + $0x150] sm:$0xff] }
  0x91   : > { %1061 = vmatpush1.bf16.msra.mxu0 %v17168_v28  ;;  %1102 = vmatpush1.bf16.msra.mxu1 %v17170_v29  ;;  %v17183_v7 = vcombine.high %v451_v2, %v467_v3  ;;  %v434_v10 = vld [vmem:[#allocation4 + $0xc0] sm:$0xff]  ;;  %v419_v11 = vld [vmem:[#allocation4 + $0x48] sm:$0xff]  ;;  %v17180_v13 = vcombine.low %v450_v0, %v466_v1  ;;  %v17182_v14 = vcombine.low %v451_v2, %v467_v3  ;;  %v468_v18 = vld [vmem:[#allocation4 + $0x1d0] sm:$0xff] }
  0x92   : > { %1062 = vmatprep.subr.bf16.mxu0 %v17137_v30  ;;  %1103 = vmatprep.subr.bf16.mxu1 %v17139_v31  ;;  %v435_v12 = vld [vmem:[#allocation4 + $0xc8] sm:$0xff]  ;;  %v17149_v15 = vcombine.high %v418_v9, %v434_v10  ;;  %v453_v19 = vld [vmem:[#allocation4 + $0x158] sm:$0xff]  ;;  %v17148_v21 = vcombine.low %v418_v9, %v434_v10  ;;  %v17185_v23 = vcombine.high %v452_v17, %v468_v18  ;;  %v420_v25 = vld [vmem:[#allocation4 + $0x50] sm:$0xff] }
  0x93   : > { %1080 = vmatprep.mubr.bf16.mxu0 %v19697_v8  ;;  %1121 = vmatprep.mubr.bf16.mxu1 %v19697_v8  ;;  %v17151_v16 = vcombine.high %v419_v11, %v435_v12  ;;  %v469_v20 = vld [vmem:[#allocation4 + $0x1d8] sm:$0xff]  ;;  %v17150_v22 = vcombine.low %v419_v11, %v435_v12  ;;  %v436_v26 = vld [vmem:[#allocation4 + $0xd0] sm:$0xff]  ;;  %v17184_v30 = vcombine.low %v452_v17, %v468_v18  ;;  %v454_v34 = vld [vmem:[#allocation4 + $0x160] sm:$0xff] }
  0x94   : > { %v17187_v24 = vcombine.high %v453_v19, %v469_v20  ;;  %v421_v28 = vld [vmem:[#allocation4 + $0x58] sm:$0xff]  ;;  %v17186_v31 = vcombine.low %v453_v19, %v469_v20  ;;  %v17153_v32 = vcombine.high %v420_v25, %v436_v26  ;;  %v470_v35 = vld [vmem:[#allocation4 + $0x1e0] sm:$0xff]  ;;  %v456_v50 = vld [vmem:[#allocation4 + $0x170] sm:$0xff] }
  0x95   : > { %1063 = vmatpush1.bf16.msra.mxu0 %v17136_v36  ;;  %1104 = vmatpush1.bf16.msra.mxu1 %v17138_v37  ;;  %v437_v29 = vld [vmem:[#allocation4 + $0xd8] sm:$0xff]  ;;  %v455_v36 = vld [vmem:[#allocation4 + $0x168] sm:$0xff]  ;;  %v17189_v40 = vcombine.high %v454_v34, %v470_v35  ;;  %v422_v42 = vld [vmem:[#allocation4 + $0x60] sm:$0xff] }
  0x96   : > { %1142 = vmatprep.subr.bf16.mxu0 %v17173_v38  ;;  %1183 = vmatprep.subr.bf16.mxu1 %v17175_v39  ;;  %v17155_v33 = vcombine.high %v421_v28, %v437_v29  ;;  %v471_v37 = vld [vmem:[#allocation4 + $0x1e8] sm:$0xff]  ;;  %v17152_v38 = vcombine.low %v420_v25, %v436_v26  ;;  %v17154_v39 = vcombine.low %v421_v28, %v437_v29  ;;  %v438_v43 = vld [vmem:[#allocation4 + $0xe0] sm:$0xff]  ;;  %v472_v51 = vld [vmem:[#allocation4 + $0x1f0] sm:$0xff] }
  0x97   : > { %v17191_v41 = vcombine.high %v455_v36, %v471_v37  ;;  %v17157_v48 = vcombine.high %v422_v42, %v438_v43  ;;  %v17193_v56 = vcombine.high %v456_v50, %v472_v51  ;;  %v424_v58 = vld [vmem:[#allocation4 + $0x70] sm:$0xff]  ;;  %v474_v9 = vld [vmem:[#allocation6] sm:$0xff] }
  0x98   : > { %17198 = vmatmul.mubr.msk.bf16.vlgmr.msra.gmra.mxu0 %vm962_vm0, %v19933_v27  ;;  %17199 = vmatmul.mubr.msk.bf16.vlgmr.msra.gmra.mxu1 %vm962_vm0, %v19933_v27  ;;  %v440_v59 = vld [vmem:[#allocation4 + $0xf0] sm:$0xff] }
  0x99   : > { %1143 = vmatpush1.bf16.msra.mxu0 %v17172_v44  ;;  %1184 = vmatpush1.bf16.msra.mxu1 %v17174_v45  ;;  %v423_v44 = vld [vmem:[#allocation4 + $0x68] sm:$0xff]  ;;  %v17161_v0 = vcombine.high %v424_v58, %v440_v59  ;;  %v17160_v2 = vcombine.low %v424_v58, %v440_v59 }
  0x9a   : > { %1144 = vmatprep.subr.bf16.mxu0 %v17141_v46  ;;  %1185 = vmatprep.subr.bf16.mxu1 %v17143_v47  ;;  %v439_v45 = vld [vmem:[#allocation4 + $0xe8] sm:$0xff]  ;;  %v17188_v46 = vcombine.low %v454_v34, %v470_v35  ;;  %v17190_v47 = vcombine.low %v455_v36, %v471_v37 }
  0x9b   : > { %1162 = vmatprep.mubr.bf16.mxu0 %v19697_v8  ;;  %1203 = vmatprep.mubr.bf16.mxu1 %v19697_v8  ;;  %v17159_v49 = vcombine.high %v423_v44, %v439_v45 }
  0x9d   : > { %1145 = vmatpush1.bf16.msra.mxu0 %v17140_v52  ;;  %1186 = vmatpush1.bf16.msra.mxu1 %v17142_v53  ;;  %v457_v52 = vld [vmem:[#allocation4 + $0x178] sm:$0xff] }
  0x9e   : > { %1224 = vmatprep.subr.bf16.mxu0 %v17177_v54  ;;  %1265 = vmatprep.subr.bf16.mxu1 %v17179_v55  ;;  %v473_v53 = vld [vmem:[#allocation4 + $0x1f8] sm:$0xff]  ;;  %v17156_v54 = vcombine.low %v422_v42, %v438_v43  ;;  %v17158_v55 = vcombine.low %v423_v44, %v439_v45 }
  0x9f   : > { %v17195_v57 = vcombine.high %v457_v52, %v473_v53 }
  0xa0   : > { %17200 = vmatmul.mubr.msk.bf16.vlgmr.msra.gmra.mxu0 %vm962_vm0, %v19933_v27  ;;  %17201 = vmatmul.mubr.msk.bf16.vlgmr.msra.gmra.mxu1 %vm962_vm0, %v19933_v27 }
  0xa1   : > { %1225 = vmatpush1.bf16.msra.mxu0 %v17176_v60  ;;  %1266 = vmatpush1.bf16.msra.mxu1 %v17178_v61  ;;  %v425_v60 = vld [vmem:[#allocation4 + $0x78] sm:$0xff] }
  0xa2   : > { %1226 = vmatprep.subr.bf16.mxu0 %v17145_v62  ;;  %1267 = vmatprep.subr.bf16.mxu1 %v17147_v63  ;;  %v441_v61 = vld [vmem:[#allocation4 + $0xf8] sm:$0xff]  ;;  %v17192_v62 = vcombine.low %v456_v50, %v472_v51  ;;  %v17194_v63 = vcombine.low %v457_v52, %v473_v53 }
  0xa3   : > { %1244 = vmatprep.mubr.bf16.mxu0 %v19697_v8  ;;  %1285 = vmatprep.mubr.bf16.mxu1 %v19697_v8  ;;  %v17163_v1 = vcombine.high %v425_v60, %v441_v61  ;;  %v17162_v3 = vcombine.low %v425_v60, %v441_v61 }
  0xa5   : > { %1227 = vmatpush1.bf16.msra.mxu0 %v17144_v4  ;;  %1268 = vmatpush1.bf16.msra.mxu1 %v17146_v5  ;;  %v19698_v4 = vmov 0.0   ;;  %v482_v5 = vlaneseq }
  0xa6   : > { %1306 = vmatprep.subr.bf16.mxu0 %v17181_v6  ;;  %1347 = vmatprep.subr.bf16.mxu1 %v17183_v7  ;;  %1799 = vst.msk [vmem:[#allocation3] sm:$0xff] %vm1798_vm1, %v19698_v4 }
  0xa7   : > { %v483_v6 = vshrl.u32 %v482_v5, 7 }
  0xa8   : > { %17202 = vmatmul.mubr.msk.bf16.vlgmr.msra.gmra.mxu0 %vm962_vm0, %v19933_v27  ;;  %17203 = vmatmul.mubr.msk.bf16.vlgmr.msra.gmra.mxu1 %vm962_vm0, %v19933_v27 }
  0xa9   : > { %1307 = vmatpush1.bf16.msra.mxu0 %v17180_v13  ;;  %1348 = vmatpush1.bf16.msra.mxu1 %v17182_v14  ;;  %v19981_v7 = vsub.s32 0, %v483_v6  ;;  %v19983_v10 = vsub.s32 2, %v483_v6  ;;  %v19985_v11 = vsub.s32 1, %v483_v6  ;;  %v19993_v18 = vsub.s32 4, %v483_v6 }
  0xaa   : > { %1308 = vmatprep.subr.bf16.mxu0 %v17149_v15  ;;  %1349 = vmatprep.subr.bf16.mxu1 %v17151_v16  ;;  %v19999_v28 = vsub.s32 7, %v483_v6 }
  0xab   : > { %1326 = vmatprep.mubr.bf16.mxu0 %v19697_v8  ;;  %1367 = vmatprep.mubr.bf16.mxu1 %v19697_v8  ;;  %v485_v12 = vrot.slane %v474_v9, %v19981_v7  ;;  %v493_v13 = vrot.slane %v474_v9, %v19983_v10 }
  0xac   : > { %v513_v42 = vrot.slane %v474_v9, %v19999_v28 }
  0xad   : > { %1309 = vmatpush1.bf16.msra.mxu0 %v17148_v21  ;;  %1350 = vmatpush1.bf16.msra.mxu1 %v17150_v22  ;;  %v19995_v21 = vsub.s32 6, %v483_v6 }
  0xae   : > { %1388 = vmatprep.subr.bf16.mxu0 %v17185_v23  ;;  %1429 = vmatprep.subr.bf16.mxu1 %v17187_v24  ;;  %v19997_v24 = vsub.s32 5, %v483_v6 }
  0xaf   : > { %v509_v36 = vrot.slane %v474_v9, %v19995_v21 }
  0xb0   : > { %17204 = vmatmul.mubr.msk.bf16.vlgmr.msra.gmra.mxu0 %vm962_vm0, %v19933_v27  ;;  %17205 = vmatmul.mubr.msk.bf16.vlgmr.msra.gmra.mxu1 %vm962_vm0, %v19933_v27 }
  0xb1   : > { %1389 = vmatpush1.bf16.msra.mxu0 %v17184_v30  ;;  %1430 = vmatpush1.bf16.msra.mxu1 %v17186_v31 }
  0xb2   : > { %1390 = vmatprep.subr.bf16.mxu0 %v17153_v32  ;;  %1431 = vmatprep.subr.bf16.mxu1 %v17155_v33  ;;  %v501_v32 = vrot.slane %v474_v9, %v19993_v18 }
  0xb3   : > { %1408 = vmatprep.mubr.bf16.mxu0 %v19697_v8  ;;  %1449 = vmatprep.mubr.bf16.mxu1 %v19697_v8 }
  0xb5   : > { %1391 = vmatpush1.bf16.msra.mxu0 %v17152_v38  ;;  %1432 = vmatpush1.bf16.msra.mxu1 %v17154_v39  ;;  %v505_v39 = vrot.slane %v474_v9, %v19997_v24 }
  0xb6   : > { %1470 = vmatprep.subr.bf16.mxu0 %v17189_v40  ;;  %1511 = vmatprep.subr.bf16.mxu1 %v17191_v41 }
  0xb8   : > { %17206 = vmatmul.mubr.msk.bf16.vlgmr.msra.gmra.mxu0 %vm962_vm0, %v19933_v27  ;;  %17207 = vmatmul.mubr.msk.bf16.vlgmr.msra.gmra.mxu1 %vm962_vm0, %v19933_v27 }
  0xb9   : > { %1471 = vmatpush1.bf16.msra.mxu0 %v17188_v46  ;;  %1512 = vmatpush1.bf16.msra.mxu1 %v17190_v47  ;;  %v475_v47 = vld [vmem:[#allocation6 + $0x8] sm:$0xff] }
  0xba   : > { %1472 = vmatprep.subr.bf16.mxu0 %v17157_v48  ;;  %1513 = vmatprep.subr.bf16.mxu1 %v17159_v49  ;;  %v525_v59 = vrot.slane %v475_v47, %v19983_v10 }
  0xbb   : > { %1490 = vmatprep.mubr.bf16.mxu0 %v19697_v8  ;;  %1531 = vmatprep.mubr.bf16.mxu1 %v19697_v8 }
  0xbd   : > { %1473 = vmatpush1.bf16.msra.mxu0 %v17156_v54  ;;  %1514 = vmatpush1.bf16.msra.mxu1 %v17158_v55  ;;  %v517_v55 = vrot.slane %v475_v47, %v19981_v7 }
  0xbe   : > { %1552 = vmatprep.subr.bf16.mxu0 %v17193_v56  ;;  %1593 = vmatprep.subr.bf16.mxu1 %v17195_v57 }
  0xc0   : > { %17208 = vmatmul.mubr.msk.bf16.vlgmr.msra.gmra.mxu0 %vm962_vm0, %v19933_v27  ;;  %17209 = vmatmul.mubr.msk.bf16.vlgmr.msra.gmra.mxu1 %vm962_vm0, %v19933_v27 }
  0xc1   : > { %1553 = vmatpush1.bf16.msra.mxu0 %v17192_v62  ;;  %1594 = vmatpush1.bf16.msra.mxu1 %v17194_v63  ;;  %v521_v62 = vrot.slane %v475_v47, %v19985_v11 }
  0xc2   : > { %1554 = vmatprep.subr.bf16.mxu0 %v17161_v0  ;;  %1595 = vmatprep.subr.bf16.mxu1 %v17163_v1 }
  0xc3   : > { %1572 = vmatprep.mubr.bf16.mxu0 %v19697_v8  ;;  %1613 = vmatprep.mubr.bf16.mxu1 %v19697_v8  ;;  %v19987_v8 = vsub.s32 3, %v483_v6 }
  0xc5   : > { %1555 = vmatpush1.bf16.msra.mxu0 %v17160_v2  ;;  %1596 = vmatpush1.bf16.msra.mxu1 %v17162_v3  ;;  %v497_v15 = vrot.slane %v474_v9, %v19987_v8  ;;  %v529_v1 = vrot.slane %v475_v47, %v19987_v8 }
  0xc8   : > { %17210 = vmatmul.mubr.msk.bf16.vlgmr.msra.gmra.mxu0 %vm962_vm0, %v19933_v27  ;;  %17211 = vmatmul.mubr.msk.bf16.vlgmr.msra.gmra.mxu1 %vm962_vm0, %v19933_v27  ;;  %v489_v27 = vrot.slane %v474_v9, %v19985_v11 }
 0x150   : > { %v1000_v14 = vpop.f32.mrf.mxu0  ;;  %v1041_v17 = vpop.f32.mrf.mxu1 }
 0x151   : > { %v1001_v16 = vadd.f32 %v1000_v14, %v485_v12  ;;  %v1042_v19 = vadd.f32 %v1041_v17, %v493_v13 }
 0x152   : > { %v1002_v20 = vpop.f32.mrf.mxu0  ;;  %v1043_v23 = vpop.f32.mrf.mxu1 }
 0x153   : > { %v1003_v22 = vadd.f32 %v1002_v20, %v489_v27  ;;  %v1044_v25 = vadd.f32 %v1043_v23, %v497_v15  ;;  %v1622_v29 = vmax.f32 %v1001_v16, 0.0  ;;  %v1624_v33 = vmax.f32 %v1042_v19, 0.0 }
 0x154   : > { %v1004_v26 = vpop.f32.mrf.mxu0  ;;  %v1045_v31 = vpop.f32.mrf.mxu1  ;;  %v533_v16 = vrot.slane %v475_v47, %v19993_v18 }
 0x155   : > { %v1623_v30 = vmax.f32 %v1003_v22, 0.0  ;;  %v1625_v34 = vmax.f32 %v1044_v25, 0.0  ;;  %v541_v22 = vrot.slane %v475_v47, %v19995_v21  ;;  %v537_v26 = vrot.slane %v475_v47, %v19997_v24 }
 0x156   : > { %v1005_v35 = vpop.f32.mrf.mxu0  ;;  %v1046_v38 = vpop.f32.mrf.mxu1  ;;  %v545_v31 = vrot.slane %v475_v47, %v19999_v28 }
 0x157   : > { %v19314_v37 = vpack.c.bf16 %v1623_v30, %v1622_v29  ;;  %v19315_v40 = vpack.c.bf16 %v1625_v34, %v1624_v33 }
 0x158   : > { %v1082_v41 = vpop.f32.mrf.mxu0  ;;  %v1123_v44 = vpop.f32.mrf.mxu1 }
 0x159   : > { %1782 = vst [vmem:[#allocation2 + $0x30] sm:$0xff] %v19314_v37  ;;  %v1083_v43 = vadd.f32 %v1082_v41, %v501_v32  ;;  %1783 = vst [vmem:[#allocation2] sm:$0xff] %v19315_v40  ;;  %v1124_v45 = vadd.f32 %v1123_v44, %v509_v36  ;;  %v476_v36 = vld [vmem:[#allocation6 + $0x10] sm:$0xff] }
 0x15a   : > { %v1084_v46 = vpop.f32.mrf.mxu0  ;;  %v1125_v49 = vpop.f32.mrf.mxu1  ;;  %v549_v44 = vrot.slane %v476_v36, %v19981_v7  ;;  %v557_v47 = vrot.slane %v476_v36, %v19983_v10 }
 0x15b   : > { %v1085_v48 = vadd.f32 %v1084_v46, %v505_v39  ;;  %v1126_v50 = vadd.f32 %v1125_v49, %v513_v42  ;;  %v1626_v52 = vmax.f32 %v1083_v43, 0.0  ;;  %v1628_v56 = vmax.f32 %v1124_v45, 0.0 }
 0x15c   : > { %v1086_v51 = vpop.f32.mrf.mxu0  ;;  %v1127_v54 = vpop.f32.mrf.mxu1 }
 0x15d   : > { %v1627_v53 = vmax.f32 %v1085_v48, 0.0  ;;  %v1629_v57 = vmax.f32 %v1126_v50, 0.0  ;;  %v553_v51 = vrot.slane %v476_v36, %v19985_v11  ;;  %v561_v54 = vrot.slane %v476_v36, %v19987_v8 }
 0x15e   : > { %v1087_v58 = vpop.f32.mrf.mxu0  ;;  %v1128_v61 = vpop.f32.mrf.mxu1 }
 0x15f   : > { %v19316_v60 = vpack.c.bf16 %v1627_v53, %v1626_v52  ;;  %v19317_v63 = vpack.c.bf16 %v1629_v57, %v1628_v56 }
 0x160   : > { %v1164_v0 = vpop.f32.mrf.mxu0  ;;  %v1205_v3 = vpop.f32.mrf.mxu1 }
 0x161   : > { %1784 = vst [vmem:[#allocation2 + $0x58] sm:$0xff] %v19316_v60  ;;  %v1165_v2 = vadd.f32 %v1164_v0, %v517_v55  ;;  %1785 = vst [vmem:[#allocation2 + $0x18] sm:$0xff] %v19317_v63  ;;  %v1206_v4 = vadd.f32 %v1205_v3, %v525_v59 }
 0x162   : > { %v1166_v5 = vpop.f32.mrf.mxu0  ;;  %v1207_v9 = vpop.f32.mrf.mxu1 }
 0x163   : > { %v1167_v6 = vadd.f32 %v1166_v5, %v521_v62  ;;  %v1208_v12 = vadd.f32 %v1207_v9, %v529_v1  ;;  %v1630_v27 = vmax.f32 %v1165_v2, 0.0  ;;  %v1632_v17 = vmax.f32 %v1206_v4, 0.0 }
 0x164   : > { %v1168_v13 = vpop.f32.mrf.mxu0  ;;  %v1209_v15 = vpop.f32.mrf.mxu1  ;;  %v565_v2 = vrot.slane %v476_v36, %v19993_v18 }
 0x165   : > { %v1631_v14 = vmax.f32 %v1167_v6, 0.0  ;;  %v1633_v19 = vmax.f32 %v1208_v12, 0.0  ;;  %v573_v6 = vrot.slane %v476_v36, %v19995_v21  ;;  %v569_v13 = vrot.slane %v476_v36, %v19997_v24 }
 0x166   : > { %v1169_v20 = vpop.f32.mrf.mxu0  ;;  %v1210_v25 = vpop.f32.mrf.mxu1  ;;  %v577_v15 = vrot.slane %v476_v36, %v19999_v28 }
 0x167   : > { %v19318_v23 = vpack.c.bf16 %v1631_v14, %v1630_v27  ;;  %v19319_v29 = vpack.c.bf16 %v1633_v19, %v1632_v17 }
 0x168   : > { %v1246_v30 = vpop.f32.mrf.mxu0  ;;  %v1287_v33 = vpop.f32.mrf.mxu1 }
 0x169   : > { %1786 = vst [vmem:[#allocation2 + $0x50] sm:$0xff] %v19318_v23  ;;  %v1247_v32 = vadd.f32 %v1246_v30, %v533_v16  ;;  %1787 = vst [vmem:[#allocation2 + $0x68] sm:$0xff] %v19319_v29  ;;  %v1288_v34 = vadd.f32 %v1287_v33, %v541_v22  ;;  %v477_v22 = vld [vmem:[#allocation6 + $0x18] sm:$0xff] }
 0x16a   : > { %v1248_v35 = vpop.f32.mrf.mxu0  ;;  %v1289_v38 = vpop.f32.mrf.mxu1  ;;  %v581_v33 = vrot.slane %v477_v22, %v19981_v7  ;;  %v589_v36 = vrot.slane %v477_v22, %v19983_v10 }
 0x16b   : > { %v1249_v37 = vadd.f32 %v1248_v35, %v537_v26  ;;  %v1290_v39 = vadd.f32 %v1289_v38, %v545_v31  ;;  %v1634_v41 = vmax.f32 %v1247_v32, 0.0  ;;  %v1636_v45 = vmax.f32 %v1288_v34, 0.0 }
 0x16c   : > { %v1250_v40 = vpop.f32.mrf.mxu0  ;;  %v1291_v43 = vpop.f32.mrf.mxu1 }
 0x16d   : > { %v1635_v42 = vmax.f32 %v1249_v37, 0.0  ;;  %v1637_v46 = vmax.f32 %v1290_v39, 0.0  ;;  %v585_v40 = vrot.slane %v477_v22, %v19985_v11  ;;  %v593_v43 = vrot.slane %v477_v22, %v19987_v8 }
 0x16e   : > { %v1251_v48 = vpop.f32.mrf.mxu0  ;;  %v1292_v50 = vpop.f32.mrf.mxu1  ;;  %v605_v8 = vrot.slane %v477_v22, %v19995_v21 }
 0x16f   : > { %v19320_v49 = vpack.c.bf16 %v1635_v42, %v1634_v41  ;;  %v19321_v52 = vpack.c.bf16 %v1637_v46, %v1636_v45 }
 0x170   : > { %v1328_v53 = vpop.f32.mrf.mxu0  ;;  %v1369_v56 = vpop.f32.mrf.mxu1 }
 0x171   : > { %1788 = vst [vmem:[#allocation2 + $0x8] sm:$0xff] %v19320_v49  ;;  %v1329_v55 = vadd.f32 %v1328_v53, %v549_v44  ;;  %1789 = vst [vmem:[#allocation2 + $0x48] sm:$0xff] %v19321_v52  ;;  %v1370_v57 = vadd.f32 %v1369_v56, %v557_v47  ;;  %v597_v53 = vrot.slane %v477_v22, %v19993_v18 }
 0x172   : > { %v1330_v58 = vpop.f32.mrf.mxu0  ;;  %v1371_v60 = vpop.f32.mrf.mxu1 }
 0x173   : > { %v1331_v59 = vadd.f32 %v1330_v58, %v553_v51  ;;  %v1372_v61 = vadd.f32 %v1371_v60, %v561_v54  ;;  %v1638_v63 = vmax.f32 %v1329_v55, 0.0  ;;  %v1640_v3 = vmax.f32 %v1370_v57, 0.0 }
 0x174   : > { %v1332_v62 = vpop.f32.mrf.mxu0  ;;  %v1373_v1 = vpop.f32.mrf.mxu1  ;;  %v601_v58 = vrot.slane %v477_v22, %v19997_v24 }
 0x175   : > { %v1639_v0 = vmax.f32 %v1331_v59, 0.0  ;;  %v1641_v4 = vmax.f32 %v1372_v61, 0.0  ;;  %v609_v61 = vrot.slane %v477_v22, %v19999_v28 }
 0x176   : > { %v1333_v5 = vpop.f32.mrf.mxu0  ;;  %v1374_v12 = vpop.f32.mrf.mxu1 }
 0x177   : > { %v19322_v9 = vpack.c.bf16 %v1639_v0, %v1638_v63  ;;  %v19323_v27 = vpack.c.bf16 %v1641_v4, %v1640_v3 }
 0x178   : > { %v1410_v14 = vpop.f32.mrf.mxu0  ;;  %v1451_v17 = vpop.f32.mrf.mxu1 }
 0x179   : > { %1790 = vst [vmem:[#allocation2 + $0x40] sm:$0xff] %v19322_v9  ;;  %v1411_v16 = vadd.f32 %v1410_v14, %v565_v2  ;;  %1791 = vst [vmem:[#allocation2 + $0x20] sm:$0xff] %v19323_v27  ;;  %v1452_v19 = vadd.f32 %v1451_v17, %v573_v6 }
 0x17a   : > { %v1412_v20 = vpop.f32.mrf.mxu0  ;;  %v1453_v25 = vpop.f32.mrf.mxu1 }
 0x17b   : > { %v1413_v23 = vadd.f32 %v1412_v20, %v569_v13  ;;  %v1454_v26 = vadd.f32 %v1453_v25, %v577_v15  ;;  %v1642_v30 = vmax.f32 %v1411_v16, 0.0  ;;  %v1644_v34 = vmax.f32 %v1452_v19, 0.0 }
 0x17c   : > { %v1414_v29 = vpop.f32.mrf.mxu0  ;;  %v1455_v32 = vpop.f32.mrf.mxu1 }
 0x17d   : > { %v1643_v31 = vmax.f32 %v1413_v23, 0.0  ;;  %v1645_v35 = vmax.f32 %v1454_v26, 0.0 }
 0x17e   : > { %v1415_v37 = vpop.f32.mrf.mxu0  ;;  %v1456_v39 = vpop.f32.mrf.mxu1 }
 0x17f   : > { %v19324_v38 = vpack.c.bf16 %v1643_v31, %v1642_v30  ;;  %v19325_v41 = vpack.c.bf16 %v1645_v35, %v1644_v34 }
 0x180   : > { %v1492_v42 = vpop.f32.mrf.mxu0  ;;  %v1533_v45 = vpop.f32.mrf.mxu1 }
 0x181   : > { %1792 = vst [vmem:[#allocation2 + $0x10] sm:$0xff] %v19324_v38  ;;  %v1493_v44 = vadd.f32 %v1492_v42, %v581_v33  ;;  %1793 = vst [vmem:[#allocation2 + $0x38] sm:$0xff] %v19325_v41  ;;  %v1534_v46 = vadd.f32 %v1533_v45, %v589_v36 }
 0x182   : > { %v1494_v48 = vpop.f32.mrf.mxu0  ;;  %v1535_v47 = vpop.f32.mrf.mxu1 }
 0x183   : > { %v1495_v7 = vadd.f32 %v1494_v48, %v585_v40  ;;  %v1536_v49 = vadd.f32 %v1535_v47, %v593_v43  ;;  %v1646_v51 = vmax.f32 %v1493_v44, 0.0  ;;  %v1648_v11 = vmax.f32 %v1534_v46, 0.0 }
 0x184   : > { %v1496_v50 = vpop.f32.mrf.mxu0  ;;  %v1537_v52 = vpop.f32.mrf.mxu1 }
 0x185   : > { %v1647_v10 = vmax.f32 %v1495_v7, 0.0  ;;  %v1649_v54 = vmax.f32 %v1536_v49, 0.0 }
 0x186   : > { %v1497_v55 = vpop.f32.mrf.mxu0  ;;  %v1538_v57 = vpop.f32.mrf.mxu1 }
 0x187   : > { %v19326_v56 = vpack.c.bf16 %v1647_v10, %v1646_v51  ;;  %v19327_v59 = vpack.c.bf16 %v1649_v54, %v1648_v11 }
 0x188   : > { %v1574_v60 = vpop.f32.mrf.mxu0  ;;  %v1615_v63 = vpop.f32.mrf.mxu1 }
 0x189   : > { %1794 = vst [vmem:[#allocation2 + $0x60] sm:$0xff] %v19326_v56  ;;  %v1575_v62 = vadd.f32 %v1574_v60, %v597_v53  ;;  %1795 = vst [vmem:[#allocation2 + $0x70] sm:$0xff] %v19327_v59  ;;  %v1616_v0 = vadd.f32 %v1615_v63, %v605_v8 }
 0x18a   : > { %v1576_v1 = vpop.f32.mrf.mxu0  ;;  %v1617_v2 = vpop.f32.mrf.mxu1 }
 0x18b   : > { %v1577_v18 = vadd.f32 %v1576_v1, %v601_v58  ;;  %v1618_v3 = vadd.f32 %v1617_v2, %v609_v61  ;;  %v1650_v5 = vmax.f32 %v1575_v62, 0.0  ;;  %v1652_v9 = vmax.f32 %v1616_v0, 0.0 }
 0x18c   : > { %v1578_v4 = vpop.f32.mrf.mxu0  ;;  %v1619_v6 = vpop.f32.mrf.mxu1 }
 0x18d   : > { %v1651_v21 = vmax.f32 %v1577_v18, 0.0  ;;  %v1653_v12 = vmax.f32 %v1618_v3, 0.0 }
 0x18e   : > { %v1579_v24 = vpop.f32.mrf.mxu0  ;;  %v1620_v27 = vpop.f32.mrf.mxu1 }
 0x18f   : > { %v19328_v13 = vpack.c.bf16 %v1651_v21, %v1650_v5  ;;  %v19329_v14 = vpack.c.bf16 %v1653_v12, %v1652_v9 }
 0x191   : > { %1796 = vst [vmem:[#allocation2 + $0x78] sm:$0xff] %v19328_v13  ;;  %1797 = vst [vmem:[#allocation2 + $0x28] sm:$0xff] %v19329_v14 }
 0x192 PF: > { %v1872_v28 = vld [vmem:[%s19910_s15 + $0x1c0] sm:$0xff]  ;;  %v20057_v3 = vld [vmem:[#allocation2 + $0x30] sm:$0xff]  ;;  %v20059_v4 = vld [vmem:[#allocation2] sm:$0xff]  ;;  %vm16951_vm2 = vcmask 7168   ;;  %s22638_s14 = sld [smem:[#allocation14_spill]] }
 0x193   : > { %v1876_v15 = vld [vmem:[%s19910_s15 + $0x1e0] sm:$0xff]  ;;  %v20065_v9 = vcombine.high %v20057_v3, %v20057_v3  ;;  %v20069_v12 = vcombine.high %v20059_v4, %v20059_v4 }
 0x194   : > { %v2000_v16 = vld [vmem:[%s19910_s15 + $0x5c0] sm:$0xff]  ;;  %v17317_v17 = vcombine.high %v1872_v28, %v1876_v15  ;;  %v17316_v20 = vcombine.low %v1872_v28, %v1876_v15 }
 0x195   : > { %v2004_v19 = vld [vmem:[%s19910_s15 + $0x5e0] sm:$0xff]  ;;  %14290 = vmatprep.mubr.bf16.mxu0 %v20065_v9  ;;  %14331 = vmatprep.mubr.bf16.mxu1 %v20069_v12 }
 0x196   : > { %v1864_v22 = vld [vmem:[%s19910_s15 + $0x180] sm:$0xff]  ;;  %v17445_v25 = vcombine.high %v2000_v16, %v2004_v19  ;;  %v17444_v26 = vcombine.low %v2000_v16, %v2004_v19  ;;  %14258 = vmatprep.subr.bf16.mxu0 %v17317_v17 }
 0x197   : > { %v1868_v23 = vld [vmem:[%s19910_s15 + $0x1a0] sm:$0xff]  ;;  %14259 = vmatpush1.bf16.msra.mxu0 %v17316_v20 }
 0x198   : > { %v17309_v29 = vcombine.high %v1864_v22, %v1868_v23  ;;  %v1992_v30 = vld [vmem:[%s19910_s15 + $0x580] sm:$0xff]  ;;  %14299 = vmatprep.subr.bf16.mxu1 %v17445_v25  ;;  %v17308_v36 = vcombine.low %v1864_v22, %v1868_v23  ;;  %p19308_p12 = scmp.ne.s32.totalorder %s22638_s14, 1 }
 0x199   : > { %v1996_v31 = vld [vmem:[%s19910_s15 + $0x5a0] sm:$0xff]  ;;  %14300 = vmatpush1.bf16.msra.mxu1 %v17444_v26 }
 0x19a   : > { %v1856_v32 = vld [vmem:[%s19910_s15 + $0x140] sm:$0xff]  ;;  %v17437_v33 = vcombine.high %v1992_v30, %v1996_v31  ;;  %14260 = vmatprep.subr.bf16.mxu0 %v17309_v29  ;;  %v17436_v38 = vcombine.low %v1992_v30, %v1996_v31 }
 0x19b   : > { %v1860_v34 = vld [vmem:[%s19910_s15 + $0x160] sm:$0xff]  ;;  %14261 = vmatpush1.bf16.msra.mxu0 %v17308_v36 }
 0x19c   : > { %v1984_v35 = vld [vmem:[%s19910_s15 + $0x540] sm:$0xff]  ;;  %v17301_v39 = vcombine.high %v1856_v32, %v1860_v34  ;;  %14301 = vmatprep.subr.bf16.mxu1 %v17437_v33  ;;  %v17300_v45 = vcombine.low %v1856_v32, %v1860_v34 }
 0x19d   : > { %v1988_v37 = vld [vmem:[%s19910_s15 + $0x560] sm:$0xff]  ;;  %14302 = vmatpush1.bf16.msra.mxu1 %v17436_v38 }
 0x19e   : > { %v17429_v40 = vcombine.high %v1984_v35, %v1988_v37  ;;  %v1848_v41 = vld [vmem:[%s19910_s15 + $0x100] sm:$0xff]  ;;  %14262 = vmatprep.subr.bf16.mxu0 %v17301_v39  ;;  %v17428_v46 = vcombine.low %v1984_v35, %v1988_v37 }
 0x19f   : > { %v1852_v42 = vld [vmem:[%s19910_s15 + $0x120] sm:$0xff]  ;;  %14263 = vmatpush1.bf16.msra.mxu0 %v17300_v45 }
 0x1a0   : > { %v1976_v43 = vld [vmem:[%s19910_s15 + $0x500] sm:$0xff]  ;;  %v17293_v48 = vcombine.high %v1848_v41, %v1852_v42  ;;  %14303 = vmatprep.subr.bf16.mxu1 %v17429_v40  ;;  %v17292_v10 = vcombine.low %v1848_v41, %v1852_v42 }
 0x1a1   : > { %v1980_v44 = vld [vmem:[%s19910_s15 + $0x520] sm:$0xff]  ;;  %14304 = vmatpush1.bf16.msra.mxu1 %v17428_v46 }
 0x1a2   : > { %v17421_v7 = vcombine.high %v1976_v43, %v1980_v44  ;;  %v1840_v47 = vld [vmem:[%s19910_s15 + $0xc0] sm:$0xff]  ;;  %14264 = vmatprep.subr.bf16.mxu0 %v17293_v48  ;;  %v17420_v52 = vcombine.low %v1976_v43, %v1980_v44 }
 0x1a3   : > { %v1844_v49 = vld [vmem:[%s19910_s15 + $0xe0] sm:$0xff]  ;;  %14265 = vmatpush1.bf16.msra.mxu0 %v17292_v10 }
 0x1a4   : > { %v1968_v50 = vld [vmem:[%s19910_s15 + $0x4c0] sm:$0xff]  ;;  %v17285_v53 = vcombine.high %v1840_v47, %v1844_v49  ;;  %14305 = vmatprep.subr.bf16.mxu1 %v17421_v7  ;;  %v17284_v57 = vcombine.low %v1840_v47, %v1844_v49 }
 0x1a5   : > { %v1972_v51 = vld [vmem:[%s19910_s15 + $0x4e0] sm:$0xff]  ;;  %14306 = vmatpush1.bf16.msra.mxu1 %v17420_v52 }
 0x1a6   : > { %v17413_v11 = vcombine.high %v1968_v50, %v1972_v51  ;;  %v1832_v54 = vld [vmem:[%s19910_s15 + $0x80] sm:$0xff]  ;;  %14266 = vmatprep.subr.bf16.mxu0 %v17285_v53  ;;  %v17412_v58 = vcombine.low %v1968_v50, %v1972_v51 }
 0x1a7   : > { %v1836_v55 = vld [vmem:[%s19910_s15 + $0xa0] sm:$0xff]  ;;  %14267 = vmatpush1.bf16.msra.mxu0 %v17284_v57 }
 0x1a8   : > { %v1960_v8 = vld [vmem:[%s19910_s15 + $0x480] sm:$0xff]  ;;  %v17277_v59 = vcombine.high %v1832_v54, %v1836_v55  ;;  %14307 = vmatprep.subr.bf16.mxu1 %v17413_v11  ;;  %v17276_v1 = vcombine.low %v1832_v54, %v1836_v55 }
 0x1a9   : > { %v1964_v56 = vld [vmem:[%s19910_s15 + $0x4a0] sm:$0xff]  ;;  %14308 = vmatpush1.bf16.msra.mxu1 %v17412_v58 }
 0x1aa   : > { %v17405_v60 = vcombine.high %v1960_v8, %v1964_v56  ;;  %v1824_v61 = vld [vmem:[%s19910_s15 + $0x40] sm:$0xff]  ;;  %14268 = vmatprep.subr.bf16.mxu0 %v17277_v59  ;;  %v17404_v18 = vcombine.low %v1960_v8, %v1964_v56 }
 0x1ab   : > { %v1828_v62 = vld [vmem:[%s19910_s15 + $0x60] sm:$0xff]  ;;  %14269 = vmatpush1.bf16.msra.mxu0 %v17276_v1 }
 0x1ac   : > { %v1952_v63 = vld [vmem:[%s19910_s15 + $0x440] sm:$0xff]  ;;  %v17269_v2 = vcombine.high %v1824_v61, %v1828_v62  ;;  %14309 = vmatprep.subr.bf16.mxu1 %v17405_v60  ;;  %v17268_v27 = vcombine.low %v1824_v61, %v1828_v62 }
 0x1ad   : > { %v1956_v0 = vld [vmem:[%s19910_s15 + $0x460] sm:$0xff]  ;;  %14310 = vmatpush1.bf16.msra.mxu1 %v17404_v18 }
 0x1ae   : > { %v17397_v5 = vcombine.high %v1952_v63, %v1956_v0  ;;  %v1816_v21 = vld [vmem:[%s19910_s15] sm:$0xff]  ;;  %14270 = vmatprep.subr.bf16.mxu0 %v17269_v2  ;;  %v17396_v14 = vcombine.low %v1952_v63, %v1956_v0 }
 0x1af   : > { %v1820_v6 = vld [vmem:[%s19910_s15 + $0x20] sm:$0xff]  ;;  %14271 = vmatpush1.bf16.msra.mxu0 %v17268_v27 }
 0x1b0   : > { %v1944_v24 = vld [vmem:[%s19910_s15 + $0x400] sm:$0xff]  ;;  %v17261_v28 = vcombine.high %v1816_v21, %v1820_v6  ;;  %14311 = vmatprep.subr.bf16.mxu1 %v17397_v5  ;;  %v17260_v22 = vcombine.low %v1816_v21, %v1820_v6 }
 0x1b1   : > { %v1948_v13 = vld [vmem:[%s19910_s15 + $0x420] sm:$0xff]  ;;  %14312 = vmatpush1.bf16.msra.mxu1 %v17396_v14 }
 0x1b2   : > { %v17389_v15 = vcombine.high %v1944_v24, %v1948_v13  ;;  %v1936_v16 = vld [vmem:[%s19910_s15 + $0x3c0] sm:$0xff]  ;;  %14272 = vmatprep.subr.bf16.mxu0 %v17261_v28  ;;  %v17388_v23 = vcombine.low %v1944_v24, %v1948_v13 }
 0x1b3   : > { %v1940_v17 = vld [vmem:[%s19910_s15 + $0x3e0] sm:$0xff]  ;;  %14273 = vmatpush1.bf16.msra.mxu0 %v17260_v22 }
 0x1b4   : > { %v2064_v19 = vld [vmem:[%s19910_s15 + $0x7c0] sm:$0xff]  ;;  %v17381_v25 = vcombine.high %v1936_v16, %v1940_v17  ;;  %14313 = vmatprep.subr.bf16.mxu1 %v17389_v15  ;;  %v17380_v33 = vcombine.low %v1936_v16, %v1940_v17 }
 0x1b5   : > { %v2068_v20 = vld [vmem:[%s19910_s15 + $0x7e0] sm:$0xff]  ;;  %14314 = vmatpush1.bf16.msra.mxu1 %v17388_v23 }
 0x1b6   : > { %v17509_v26 = vcombine.high %v2064_v19, %v2068_v20  ;;  %v1928_v29 = vld [vmem:[%s19910_s15 + $0x380] sm:$0xff]  ;;  %14274 = vmatprep.subr.bf16.mxu0 %v17381_v25  ;;  %v17508_v34 = vcombine.low %v2064_v19, %v2068_v20 }
 0x1b7   : > { %v1932_v30 = vld [vmem:[%s19910_s15 + $0x3a0] sm:$0xff]  ;;  %14275 = vmatpush2.bf16.msra.mxu0 %v17380_v33 }
 0x1b8   : > { %v2056_v31 = vld [vmem:[%s19910_s15 + $0x780] sm:$0xff]  ;;  %v17373_v35 = vcombine.high %v1928_v29, %v1932_v30  ;;  %14315 = vmatprep.subr.bf16.mxu1 %v17509_v26  ;;  %v17372_v41 = vcombine.low %v1928_v29, %v1932_v30 }
 0x1b9   : > { %v2060_v32 = vld [vmem:[%s19910_s15 + $0x7a0] sm:$0xff]  ;;  %14316 = vmatpush2.bf16.msra.mxu1 %v17508_v34 }
 0x1ba   : > { %v17501_v37 = vcombine.high %v2056_v31, %v2060_v32  ;;  %v1920_v36 = vld [vmem:[%s19910_s15 + $0x340] sm:$0xff]  ;;  %14276 = vmatprep.subr.bf16.mxu0 %v17373_v35  ;;  %v17500_v42 = vcombine.low %v2056_v31, %v2060_v32  ;;  %v20115_v35 = vcombine.low %v20057_v3, %v20057_v3 }
 0x1bb   : > { %v1924_v38 = vld [vmem:[%s19910_s15 + $0x360] sm:$0xff]  ;;  %14277 = vmatpush2.bf16.msra.mxu0 %v17372_v41  ;;  %v20125_v41 = vld [vmem:[#allocation2 + $0x18] sm:$0xff] }
 0x1bc   : > { %v2048_v39 = vld [vmem:[%s19910_s15 + $0x740] sm:$0xff]  ;;  %v17365_v43 = vcombine.high %v1920_v36, %v1924_v38  ;;  %14317 = vmatprep.subr.bf16.mxu1 %v17501_v37  ;;  %v17364_v47 = vcombine.low %v1920_v36, %v1924_v38  ;;  %v20119_v38 = vld [vmem:[#allocation2 + $0x58] sm:$0xff] }
 0x1bd   : > { %v2052_v40 = vld [vmem:[%s19910_s15 + $0x760] sm:$0xff]  ;;  %14318 = vmatpush2.bf16.msra.mxu1 %v17500_v42 }
 0x1be   : > { %v17493_v44 = vcombine.high %v2048_v39, %v2052_v40  ;;  %v1912_v45 = vld [vmem:[%s19910_s15 + $0x300] sm:$0xff]  ;;  %14278 = vmatprep.subr.bf16.mxu0 %v17365_v43  ;;  %v17492_v49 = vcombine.low %v2048_v39, %v2052_v40  ;;  %v20123_v39 = vcombine.low %v20059_v4, %v20059_v4 }
 0x1bf   : > { %v1916_v46 = vld [vmem:[%s19910_s15 + $0x320] sm:$0xff]  ;;  %14279 = vmatpush2.bf16.msra.mxu0 %v17364_v47 }
 0x1c0   : > { %v2040_v48 = vld [vmem:[%s19910_s15 + $0x700] sm:$0xff]  ;;  %v17357_v50 = vcombine.high %v1912_v45, %v1916_v46  ;;  %14319 = vmatprep.subr.bf16.mxu1 %v17493_v44  ;;  %v17356_v54 = vcombine.low %v1912_v45, %v1916_v46  ;;  %v20131_v46 = vcombine.high %v20119_v38, %v20119_v38 }
 0x1c1   : > { %v2044_v7 = vld [vmem:[%s19910_s15 + $0x720] sm:$0xff]  ;;  %14320 = vmatpush2.bf16.msra.mxu1 %v17492_v49 }
 0x1c2   : > { %v17485_v51 = vcombine.high %v2040_v48, %v2044_v7  ;;  %v1904_v10 = vld [vmem:[%s19910_s15 + $0x2c0] sm:$0xff]  ;;  %14280 = vmatprep.subr.bf16.mxu0 %v17357_v50  ;;  %v17484_v55 = vcombine.low %v2040_v48, %v2044_v7  ;;  %v20138_v7 = vcombine.high %v20125_v41, %v20125_v41 }
 0x1c3   : > { %v1908_v52 = vld [vmem:[%s19910_s15 + $0x2e0] sm:$0xff]  ;;  %14281 = vmatpush2.bf16.msra.mxu0 %v17356_v54 }
 0x1c4   : > { %v2032_v53 = vld [vmem:[%s19910_s15 + $0x6c0] sm:$0xff]  ;;  %v17349_v8 = vcombine.high %v1904_v10, %v1908_v52  ;;  %14321 = vmatprep.subr.bf16.mxu1 %v17485_v51  ;;  %v17348_v61 = vcombine.low %v1904_v10, %v1908_v52 }
 0x1c5   : > { %v2036_v11 = vld [vmem:[%s19910_s15 + $0x6e0] sm:$0xff]  ;;  %14322 = vmatpush2.bf16.msra.mxu1 %v17484_v55 }
 0x1c6   : > { %v17477_v56 = vcombine.high %v2032_v53, %v2036_v11  ;;  %v1896_v57 = vld [vmem:[%s19910_s15 + $0x280] sm:$0xff]  ;;  %14282 = vmatprep.subr.bf16.mxu0 %v17349_v8  ;;  %v17476_v62 = vcombine.low %v2032_v53, %v2036_v11 }
 0x1c7   : > { %v1900_v58 = vld [vmem:[%s19910_s15 + $0x2a0] sm:$0xff]  ;;  %14283 = vmatpush2.bf16.msra.mxu0 %v17348_v61 }
 0x1c8   : > { %v2024_v59 = vld [vmem:[%s19910_s15 + $0x680] sm:$0xff]  ;;  %v17341_v63 = vcombine.high %v1896_v57, %v1900_v58  ;;  %14323 = vmatprep.subr.bf16.mxu1 %v17477_v56  ;;  %v17340_v21 = vcombine.low %v1896_v57, %v1900_v58 }
 0x1c9   : > { %v2028_v60 = vld [vmem:[%s19910_s15 + $0x6a0] sm:$0xff]  ;;  %14324 = vmatpush2.bf16.msra.mxu1 %v17476_v62 }
 0x1ca   : > { %v17469_v0 = vcombine.high %v2024_v59, %v2028_v60  ;;  %v1888_v1 = vld [vmem:[%s19910_s15 + $0x240] sm:$0xff]  ;;  %14284 = vmatprep.subr.bf16.mxu0 %v17341_v63  ;;  %v17468_v6 = vcombine.low %v2024_v59, %v2028_v60 }
 0x1cb   : > { %v1892_v18 = vld [vmem:[%s19910_s15 + $0x260] sm:$0xff]  ;;  %14285 = vmatpush2.bf16.msra.mxu0 %v17340_v21 }
 0x1cc   : > { %v2016_v2 = vld [vmem:[%s19910_s15 + $0x640] sm:$0xff]  ;;  %v17333_v24 = vcombine.high %v1888_v1, %v1892_v18  ;;  %14325 = vmatprep.subr.bf16.mxu1 %v17469_v0  ;;  %v17332_v16 = vcombine.low %v1888_v1, %v1892_v18 }
 0x1cd   : > { %v2020_v5 = vld [vmem:[%s19910_s15 + $0x660] sm:$0xff]  ;;  %14326 = vmatpush2.bf16.msra.mxu1 %v17468_v6 }
 0x1ce   : > { %v17461_v13 = vcombine.high %v2016_v2, %v2020_v5  ;;  %v1880_v27 = vld [vmem:[%s19910_s15 + $0x200] sm:$0xff]  ;;  %14286 = vmatprep.subr.bf16.mxu0 %v17333_v24  ;;  %v17460_v17 = vcombine.low %v2016_v2, %v2020_v5 }
 0x1cf   : > { %v1884_v14 = vld [vmem:[%s19910_s15 + $0x220] sm:$0xff]  ;;  %14287 = vmatpush2.bf16.msra.mxu0 %v17332_v16 }
 0x1d0   : > { %v2008_v28 = vld [vmem:[%s19910_s15 + $0x600] sm:$0xff]  ;;  %v17325_v19 = vcombine.high %v1880_v27, %v1884_v14  ;;  %14327 = vmatprep.subr.bf16.mxu1 %v17461_v13  ;;  %v17324_v29 = vcombine.low %v1880_v27, %v1884_v14 }
 0x1d1   : > { %v2012_v15 = vld [vmem:[%s19910_s15 + $0x620] sm:$0xff]  ;;  %14328 = vmatpush2.bf16.msra.mxu1 %v17460_v17 }
 0x1d2   : > { %v17453_v20 = vcombine.high %v2008_v28, %v2012_v15  ;;  %v2128_v22 = vld [vmem:[%s19910_s15 + $0x9c0] sm:$0xff]  ;;  %14288 = vmatprep.subr.bf16.mxu0 %v17325_v19  ;;  %v17452_v30 = vcombine.low %v2008_v28, %v2012_v15 }
 0x1d3   : > { %v2132_v23 = vld [vmem:[%s19910_s15 + $0x9e0] sm:$0xff]  ;;  %14289 = vmatpush2.bf16.msra.mxu0 %v17324_v29 }
 0x1d4   : > { %v2256_v25 = vld [vmem:[%s19910_s15 + $0xdc0] sm:$0xff]  ;;  %v17573_v31 = vcombine.high %v2128_v22, %v2132_v23  ;;  %14329 = vmatprep.subr.bf16.mxu1 %v17453_v20  ;;  %v17572_v40 = vcombine.low %v2128_v22, %v2132_v23 }
 0x1d5   : > { %v2260_v26 = vld [vmem:[%s19910_s15 + $0xde0] sm:$0xff]  ;;  %14330 = vmatpush2.bf16.msra.mxu1 %v17452_v30 }
 0x1d6   : > { %v17701_v32 = vcombine.high %v2256_v25, %v2260_v26  ;;  %v2120_v33 = vld [vmem:[%s19910_s15 + $0x980] sm:$0xff]  ;;  %14340 = vmatprep.subr.bf16.mxu0 %v17573_v31  ;;  %v17700_v42 = vcombine.low %v2256_v25, %v2260_v26  ;;  %14291 = vmatmul.mubr.bf16.vlgmr.msra.gmra.mxu0 %v20115_v35 }
 0x1d7   : > { %v2124_v34 = vld [vmem:[%s19910_s15 + $0x9a0] sm:$0xff]  ;;  %14341 = vmatpush1.bf16.msra.mxu0 %v17572_v40  ;;  %14372 = vmatprep.mubr.bf16.mxu0 %v20131_v46 }
 0x1d8   : > { %v2248_v37 = vld [vmem:[%s19910_s15 + $0xd80] sm:$0xff]  ;;  %v17565_v43 = vcombine.high %v2120_v33, %v2124_v34  ;;  %14381 = vmatprep.subr.bf16.mxu1 %v17701_v32  ;;  %14332 = vmatmul.mubr.bf16.vlgmr.msra.gmra.mxu1 %v20123_v39  ;;  %v17564_v47 = vcombine.low %v2120_v33, %v2124_v34 }
 0x1d9   : > { %v2252_v36 = vld [vmem:[%s19910_s15 + $0xda0] sm:$0xff]  ;;  %14382 = vmatpush1.bf16.msra.mxu1 %v17700_v42  ;;  %14413 = vmatprep.mubr.bf16.mxu1 %v20138_v7 }
 0x1da   : > { %v17693_v3 = vcombine.high %v2248_v37, %v2252_v36  ;;  %v2112_v44 = vld [vmem:[%s19910_s15 + $0x940] sm:$0xff]  ;;  %14342 = vmatprep.subr.bf16.mxu0 %v17565_v43  ;;  %v17692_v49 = vcombine.low %v2248_v37, %v2252_v36 }
 0x1db   : > { %v2116_v45 = vld [vmem:[%s19910_s15 + $0x960] sm:$0xff]  ;;  %14343 = vmatpush1.bf16.msra.mxu0 %v17564_v47 }
 0x1dc   : > { %v2240_v4 = vld [vmem:[%s19910_s15 + $0xd40] sm:$0xff]  ;;  %v17557_v50 = vcombine.high %v2112_v44, %v2116_v45  ;;  %14383 = vmatprep.subr.bf16.mxu1 %v17693_v3  ;;  %v17556_v54 = vcombine.low %v2112_v44, %v2116_v45 }
 0x1dd   : > { %v2244_v48 = vld [vmem:[%s19910_s15 + $0xd60] sm:$0xff]  ;;  %14384 = vmatpush1.bf16.msra.mxu1 %v17692_v49 }
 0x1de   : > { %v17685_v51 = vcombine.high %v2240_v4, %v2244_v48  ;;  %v2104_v10 = vld [vmem:[%s19910_s15 + $0x900] sm:$0xff]  ;;  %14344 = vmatprep.subr.bf16.mxu0 %v17557_v50  ;;  %v17684_v55 = vcombine.low %v2240_v4, %v2244_v48 }
 0x1df   : > { %v2108_v52 = vld [vmem:[%s19910_s15 + $0x920] sm:$0xff]  ;;  %14345 = vmatpush1.bf16.msra.mxu0 %v17556_v54 }
 0x1e0   : > { %v2232_v53 = vld [vmem:[%s19910_s15 + $0xd00] sm:$0xff]  ;;  %v17549_v8 = vcombine.high %v2104_v10, %v2108_v52  ;;  %14385 = vmatprep.subr.bf16.mxu1 %v17685_v51  ;;  %v17548_v61 = vcombine.low %v2104_v10, %v2108_v52 }
 0x1e1   : > { %v2236_v11 = vld [vmem:[%s19910_s15 + $0xd20] sm:$0xff]  ;;  %14386 = vmatpush1.bf16.msra.mxu1 %v17684_v55 }
 0x1e2   : > { %v17677_v56 = vcombine.high %v2232_v53, %v2236_v11  ;;  %v2096_v57 = vld [vmem:[%s19910_s15 + $0x8c0] sm:$0xff]  ;;  %14346 = vmatprep.subr.bf16.mxu0 %v17549_v8  ;;  %v17676_v62 = vcombine.low %v2232_v53, %v2236_v11 }
 0x1e3   : > { %v2100_v58 = vld [vmem:[%s19910_s15 + $0x8e0] sm:$0xff]  ;;  %14347 = vmatpush1.bf16.msra.mxu0 %v17548_v61 }
 0x1e4   : > { %v2224_v59 = vld [vmem:[%s19910_s15 + $0xcc0] sm:$0xff]  ;;  %v17541_v63 = vcombine.high %v2096_v57, %v2100_v58  ;;  %14387 = vmatprep.subr.bf16.mxu1 %v17677_v56  ;;  %v17540_v21 = vcombine.low %v2096_v57, %v2100_v58 }
 0x1e5   : > { %v2228_v60 = vld [vmem:[%s19910_s15 + $0xce0] sm:$0xff]  ;;  %14388 = vmatpush1.bf16.msra.mxu1 %v17676_v62 }
 0x1e6   : > { %v17669_v0 = vcombine.high %v2224_v59, %v2228_v60  ;;  %v2088_v1 = vld [vmem:[%s19910_s15 + $0x880] sm:$0xff]  ;;  %14348 = vmatprep.subr.bf16.mxu0 %v17541_v63  ;;  %v17668_v6 = vcombine.low %v2224_v59, %v2228_v60 }
 0x1e7   : > { %v2092_v18 = vld [vmem:[%s19910_s15 + $0x8a0] sm:$0xff]  ;;  %14349 = vmatpush1.bf16.msra.mxu0 %v17540_v21 }
 0x1e8   : > { %v2216_v2 = vld [vmem:[%s19910_s15 + $0xc80] sm:$0xff]  ;;  %v17533_v24 = vcombine.high %v2088_v1, %v2092_v18  ;;  %14389 = vmatprep.subr.bf16.mxu1 %v17669_v0  ;;  %v17532_v16 = vcombine.low %v2088_v1, %v2092_v18 }
 0x1e9   : > { %v2220_v5 = vld [vmem:[%s19910_s15 + $0xca0] sm:$0xff]  ;;  %14390 = vmatpush1.bf16.msra.mxu1 %v17668_v6 }
 0x1ea   : > { %v17661_v13 = vcombine.high %v2216_v2, %v2220_v5  ;;  %v2080_v27 = vld [vmem:[%s19910_s15 + $0x840] sm:$0xff]  ;;  %14350 = vmatprep.subr.bf16.mxu0 %v17533_v24  ;;  %v17660_v17 = vcombine.low %v2216_v2, %v2220_v5 }
 0x1eb   : > { %v2084_v14 = vld [vmem:[%s19910_s15 + $0x860] sm:$0xff]  ;;  %14351 = vmatpush1.bf16.msra.mxu0 %v17532_v16 }
 0x1ec   : > { %v2208_v28 = vld [vmem:[%s19910_s15 + $0xc40] sm:$0xff]  ;;  %v17525_v19 = vcombine.high %v2080_v27, %v2084_v14  ;;  %14391 = vmatprep.subr.bf16.mxu1 %v17661_v13  ;;  %v17524_v29 = vcombine.low %v2080_v27, %v2084_v14 }
 0x1ed   : > { %v2212_v15 = vld [vmem:[%s19910_s15 + $0xc60] sm:$0xff]  ;;  %14392 = vmatpush1.bf16.msra.mxu1 %v17660_v17 }
 0x1ee   : > { %v17653_v20 = vcombine.high %v2208_v28, %v2212_v15  ;;  %v2072_v22 = vld [vmem:[%s19910_s15 + $0x800] sm:$0xff]  ;;  %14352 = vmatprep.subr.bf16.mxu0 %v17525_v19  ;;  %v17652_v30 = vcombine.low %v2208_v28, %v2212_v15 }
 0x1ef   : > { %v2076_v23 = vld [vmem:[%s19910_s15 + $0x820] sm:$0xff]  ;;  %14353 = vmatpush1.bf16.msra.mxu0 %v17524_v29 }
 0x1f0   : > { %v2200_v25 = vld [vmem:[%s19910_s15 + $0xc00] sm:$0xff]  ;;  %v17517_v31 = vcombine.high %v2072_v22, %v2076_v23  ;;  %14393 = vmatprep.subr.bf16.mxu1 %v17653_v20  ;;  %v17516_v40 = vcombine.low %v2072_v22, %v2076_v23 }
 0x1f1   : > { %v2204_v26 = vld [vmem:[%s19910_s15 + $0xc20] sm:$0xff]  ;;  %14394 = vmatpush1.bf16.msra.mxu1 %v17652_v30 }
 0x1f2   : > { %v17645_v32 = vcombine.high %v2200_v25, %v2204_v26  ;;  %v2192_v33 = vld [vmem:[%s19910_s15 + $0xbc0] sm:$0xff]  ;;  %14354 = vmatprep.subr.bf16.mxu0 %v17517_v31  ;;  %v17644_v42 = vcombine.low %v2200_v25, %v2204_v26 }
 0x1f3   : > { %v2196_v34 = vld [vmem:[%s19910_s15 + $0xbe0] sm:$0xff]  ;;  %14355 = vmatpush1.bf16.msra.mxu0 %v17516_v40 }
 0x1f4   : > { %v2320_v37 = vld [vmem:[%s19910_s15 + $0xfc0] sm:$0xff]  ;;  %v17637_v43 = vcombine.high %v2192_v33, %v2196_v34  ;;  %14395 = vmatprep.subr.bf16.mxu1 %v17645_v32  ;;  %v17636_v47 = vcombine.low %v2192_v33, %v2196_v34 }
 0x1f5   : > { %v2324_v36 = vld [vmem:[%s19910_s15 + $0xfe0] sm:$0xff]  ;;  %14396 = vmatpush1.bf16.msra.mxu1 %v17644_v42 }
 0x1f6   : > { %v17765_v3 = vcombine.high %v2320_v37, %v2324_v36  ;;  %v2184_v44 = vld [vmem:[%s19910_s15 + $0xb80] sm:$0xff]  ;;  %14356 = vmatprep.subr.bf16.mxu0 %v17637_v43  ;;  %v17764_v49 = vcombine.low %v2320_v37, %v2324_v36 }
 0x1f7   : > { %v2188_v45 = vld [vmem:[%s19910_s15 + $0xba0] sm:$0xff]  ;;  %14357 = vmatpush2.bf16.msra.mxu0 %v17636_v47 }
 0x1f8   : > { %v2312_v4 = vld [vmem:[%s19910_s15 + $0xf80] sm:$0xff]  ;;  %v17629_v50 = vcombine.high %v2184_v44, %v2188_v45  ;;  %14397 = vmatprep.subr.bf16.mxu1 %v17765_v3  ;;  %v17628_v54 = vcombine.low %v2184_v44, %v2188_v45 }
 0x1f9   : > { %v2316_v48 = vld [vmem:[%s19910_s15 + $0xfa0] sm:$0xff]  ;;  %14398 = vmatpush2.bf16.msra.mxu1 %v17764_v49 }
 0x1fa   : > { %v17757_v51 = vcombine.high %v2312_v4, %v2316_v48  ;;  %v2176_v10 = vld [vmem:[%s19910_s15 + $0xb40] sm:$0xff]  ;;  %14358 = vmatprep.subr.bf16.mxu0 %v17629_v50  ;;  %v17756_v55 = vcombine.low %v2312_v4, %v2316_v48 }
 0x1fb   : > { %v2180_v52 = vld [vmem:[%s19910_s15 + $0xb60] sm:$0xff]  ;;  %14359 = vmatpush2.bf16.msra.mxu0 %v17628_v54 }
 0x1fc   : > { %v2304_v53 = vld [vmem:[%s19910_s15 + $0xf40] sm:$0xff]  ;;  %v17621_v8 = vcombine.high %v2176_v10, %v2180_v52  ;;  %14399 = vmatprep.subr.bf16.mxu1 %v17757_v51  ;;  %v17620_v61 = vcombine.low %v2176_v10, %v2180_v52 }
 0x1fd   : > { %v2308_v11 = vld [vmem:[%s19910_s15 + $0xf60] sm:$0xff]  ;;  %14400 = vmatpush2.bf16.msra.mxu1 %v17756_v55  ;;  %v20207_v55 = vld [vmem:[#allocation2 + $0x50] sm:$0xff] }
 0x1fe   : > { %v17749_v56 = vcombine.high %v2304_v53, %v2308_v11  ;;  %v2168_v57 = vld [vmem:[%s19910_s15 + $0xb00] sm:$0xff]  ;;  %14360 = vmatprep.subr.bf16.mxu0 %v17621_v8  ;;  %v17748_v62 = vcombine.low %v2304_v53, %v2308_v11  ;;  %v20203_v53 = vcombine.low %v20119_v38, %v20119_v38  ;;  %v20211_v8 = vcombine.low %v20125_v41, %v20125_v41 }
 0x1ff   : > { %v2172_v58 = vld [vmem:[%s19910_s15 + $0xb20] sm:$0xff]  ;;  %14361 = vmatpush2.bf16.msra.mxu0 %v17620_v61 }
 0x200   : > { %v2296_v59 = vld [vmem:[%s19910_s15 + $0xf00] sm:$0xff]  ;;  %v17613_v63 = vcombine.high %v2168_v57, %v2172_v58  ;;  %14401 = vmatprep.subr.bf16.mxu1 %v17749_v56  ;;  %v17612_v21 = vcombine.low %v2168_v57, %v2172_v58 }
 0x201   : > { %v2300_v60 = vld [vmem:[%s19910_s15 + $0xf20] sm:$0xff]  ;;  %14402 = vmatpush2.bf16.msra.mxu1 %v17748_v62  ;;  %v20219_v62 = vcombine.high %v20207_v55, %v20207_v55 }
 0x202   : > { %v17741_v0 = vcombine.high %v2296_v59, %v2300_v60  ;;  %v2160_v1 = vld [vmem:[%s19910_s15 + $0xac0] sm:$0xff]  ;;  %14362 = vmatprep.subr.bf16.mxu0 %v17613_v63  ;;  %v17740_v6 = vcombine.low %v2296_v59, %v2300_v60 }
 0x203   : > { %v2164_v18 = vld [vmem:[%s19910_s15 + $0xae0] sm:$0xff]  ;;  %14363 = vmatpush2.bf16.msra.mxu0 %v17612_v21 }
 0x204   : > { %v2288_v2 = vld [vmem:[%s19910_s15 + $0xec0] sm:$0xff]  ;;  %v17605_v24 = vcombine.high %v2160_v1, %v2164_v18  ;;  %14403 = vmatprep.subr.bf16.mxu1 %v17741_v0  ;;  %v17604_v16 = vcombine.low %v2160_v1, %v2164_v18 }
 0x205   : > { %v2292_v5 = vld [vmem:[%s19910_s15 + $0xee0] sm:$0xff]  ;;  %14404 = vmatpush2.bf16.msra.mxu1 %v17740_v6 }
 0x206   : > { %v17733_v13 = vcombine.high %v2288_v2, %v2292_v5  ;;  %v2152_v27 = vld [vmem:[%s19910_s15 + $0xa80] sm:$0xff]  ;;  %14364 = vmatprep.subr.bf16.mxu0 %v17605_v24  ;;  %v17732_v17 = vcombine.low %v2288_v2, %v2292_v5 }
 0x207   : > { %v2156_v14 = vld [vmem:[%s19910_s15 + $0xaa0] sm:$0xff]  ;;  %14365 = vmatpush2.bf16.msra.mxu0 %v17604_v16 }
 0x208   : > { %v2280_v28 = vld [vmem:[%s19910_s15 + $0xe80] sm:$0xff]  ;;  %v17597_v19 = vcombine.high %v2152_v27, %v2156_v14  ;;  %14405 = vmatprep.subr.bf16.mxu1 %v17733_v13  ;;  %v17596_v29 = vcombine.low %v2152_v27, %v2156_v14 }
 0x209   : > { %v2284_v15 = vld [vmem:[%s19910_s15 + $0xea0] sm:$0xff]  ;;  %14406 = vmatpush2.bf16.msra.mxu1 %v17732_v17 }
 0x20a   : > { %v17725_v20 = vcombine.high %v2280_v28, %v2284_v15  ;;  %v2144_v22 = vld [vmem:[%s19910_s15 + $0xa40] sm:$0xff]  ;;  %14366 = vmatprep.subr.bf16.mxu0 %v17597_v19  ;;  %v17724_v30 = vcombine.low %v2280_v28, %v2284_v15 }
 0x20b   : > { %v2148_v23 = vld [vmem:[%s19910_s15 + $0xa60] sm:$0xff]  ;;  %14367 = vmatpush2.bf16.msra.mxu0 %v17596_v29 }
 0x20c   : > { %v2272_v25 = vld [vmem:[%s19910_s15 + $0xe40] sm:$0xff]  ;;  %v17589_v31 = vcombine.high %v2144_v22, %v2148_v23  ;;  %14407 = vmatprep.subr.bf16.mxu1 %v17725_v20  ;;  %v17588_v40 = vcombine.low %v2144_v22, %v2148_v23 }
 0x20d   : > { %v2276_v26 = vld [vmem:[%s19910_s15 + $0xe60] sm:$0xff]  ;;  %14408 = vmatpush2.bf16.msra.mxu1 %v17724_v30 }
 0x20e   : > { %v17717_v32 = vcombine.high %v2272_v25, %v2276_v26  ;;  %v2136_v33 = vld [vmem:[%s19910_s15 + $0xa00] sm:$0xff]  ;;  %14368 = vmatprep.subr.bf16.mxu0 %v17589_v31  ;;  %v17716_v42 = vcombine.low %v2272_v25, %v2276_v26 }
 0x20f   : > { %v2140_v34 = vld [vmem:[%s19910_s15 + $0xa20] sm:$0xff]  ;;  %14369 = vmatpush2.bf16.msra.mxu0 %v17588_v40 }
 0x210   : > { %v2264_v37 = vld [vmem:[%s19910_s15 + $0xe00] sm:$0xff]  ;;  %v17581_v43 = vcombine.high %v2136_v33, %v2140_v34  ;;  %14409 = vmatprep.subr.bf16.mxu1 %v17717_v32  ;;  %v17580_v47 = vcombine.low %v2136_v33, %v2140_v34 }
 0x211   : > { %v2268_v36 = vld [vmem:[%s19910_s15 + $0xe20] sm:$0xff]  ;;  %14410 = vmatpush2.bf16.msra.mxu1 %v17716_v42 }
 0x212   : > { %v17709_v3 = vcombine.high %v2264_v37, %v2268_v36  ;;  %v2384_v44 = vld [vmem:[%s19910_s15 + $0x11c0] sm:$0xff]  ;;  %14370 = vmatprep.subr.bf16.mxu0 %v17581_v43  ;;  %v17708_v49 = vcombine.low %v2264_v37, %v2268_v36 }
 0x213   : > { %v2388_v45 = vld [vmem:[%s19910_s15 + $0x11e0] sm:$0xff]  ;;  %14371 = vmatpush2.bf16.msra.mxu0 %v17580_v47 }
 0x214   : > { %v2512_v4 = vld [vmem:[%s19910_s15 + $0x15c0] sm:$0xff]  ;;  %v17829_v50 = vcombine.high %v2384_v44, %v2388_v45  ;;  %14411 = vmatprep.subr.bf16.mxu1 %v17709_v3  ;;  %v17828_v56 = vcombine.low %v2384_v44, %v2388_v45 }
 0x215   : > { %v2516_v48 = vld [vmem:[%s19910_s15 + $0x15e0] sm:$0xff]  ;;  %14412 = vmatpush2.bf16.msra.mxu1 %v17708_v49 }
 0x216   : > { %v17957_v51 = vcombine.high %v2512_v4, %v2516_v48  ;;  %v2376_v10 = vld [vmem:[%s19910_s15 + $0x1180] sm:$0xff]  ;;  %14422 = vmatprep.subr.bf16.mxu0 %v17829_v50  ;;  %v17956_v58 = vcombine.low %v2512_v4, %v2516_v48  ;;  %14373 = vmatmul.mubr.bf16.vlgmr.msra.gmra.mxu0 %v20203_v53 }
 0x217   : > { %v2380_v52 = vld [vmem:[%s19910_s15 + $0x11a0] sm:$0xff]  ;;  %14423 = vmatpush1.bf16.msra.mxu0 %v17828_v56  ;;  %14454 = vmatprep.mubr.bf16.mxu0 %v20219_v62 }
 0x218   : > { %v2504_v11 = vld [vmem:[%s19910_s15 + $0x1580] sm:$0xff]  ;;  %v17821_v59 = vcombine.high %v2376_v10, %v2380_v52  ;;  %14463 = vmatprep.subr.bf16.mxu1 %v17957_v51  ;;  %14414 = vmatmul.mubr.bf16.vlgmr.msra.gmra.mxu1 %v20211_v8  ;;  %v17820_v1 = vcombine.low %v2376_v10, %v2380_v52 }
 0x219   : > { %v2508_v54 = vld [vmem:[%s19910_s15 + $0x15a0] sm:$0xff]  ;;  %14464 = vmatpush1.bf16.msra.mxu1 %v17956_v58 }
 0x21a   : > { %v20213_v57 = vld [vmem:[#allocation2 + $0x68] sm:$0xff]  ;;  %v17949_v38 = vcombine.high %v2504_v11, %v2508_v54  ;;  %14424 = vmatprep.subr.bf16.mxu0 %v17821_v59  ;;  %v17948_v18 = vcombine.low %v2504_v11, %v2508_v54 }
 0x21b   : > { %v2368_v60 = vld [vmem:[%s19910_s15 + $0x1140] sm:$0xff]  ;;  %v20226_v0 = vcombine.high %v20213_v57, %v20213_v57  ;;  %14425 = vmatpush1.bf16.msra.mxu0 %v17820_v1 }
 0x21c   : > { %v2372_v61 = vld [vmem:[%s19910_s15 + $0x1160] sm:$0xff]  ;;  %14465 = vmatprep.subr.bf16.mxu1 %v17949_v38 }
 0x21d   : > { %v2496_v41 = vld [vmem:[%s19910_s15 + $0x1540] sm:$0xff]  ;;  %v17813_v2 = vcombine.high %v2368_v60, %v2372_v61  ;;  %14495 = vmatprep.mubr.bf16.mxu1 %v20226_v0  ;;  %v17812_v27 = vcombine.low %v2368_v60, %v2372_v61  ;;  %14466 = vmatpush1.bf16.msra.mxu1 %v17948_v18 }
 0x21e   : > { %v2500_v63 = vld [vmem:[%s19910_s15 + $0x1560] sm:$0xff] }
 0x21f   : > { %v17941_v5 = vcombine.high %v2496_v41, %v2500_v63  ;;  %v2360_v21 = vld [vmem:[%s19910_s15 + $0x1100] sm:$0xff]  ;;  %14426 = vmatprep.subr.bf16.mxu0 %v17813_v2  ;;  %v17940_v14 = vcombine.low %v2496_v41, %v2500_v63 }
 0x220   : > { %v2364_v6 = vld [vmem:[%s19910_s15 + $0x1120] sm:$0xff]  ;;  %14427 = vmatpush1.bf16.msra.mxu0 %v17812_v27 }
 0x221   : > { %v2488_v24 = vld [vmem:[%s19910_s15 + $0x1500] sm:$0xff]  ;;  %v17805_v28 = vcombine.high %v2360_v21, %v2364_v6  ;;  %14467 = vmatprep.subr.bf16.mxu1 %v17941_v5  ;;  %v17804_v22 = vcombine.low %v2360_v21, %v2364_v6 }
 0x222   : > { %v2492_v13 = vld [vmem:[%s19910_s15 + $0x1520] sm:$0xff]  ;;  %14468 = vmatpush1.bf16.msra.mxu1 %v17940_v14 }
 0x223   : > { %v17933_v15 = vcombine.high %v2488_v24, %v2492_v13  ;;  %v2352_v16 = vld [vmem:[%s19910_s15 + $0x10c0] sm:$0xff]  ;;  %14428 = vmatprep.subr.bf16.mxu0 %v17805_v28  ;;  %v17932_v23 = vcombine.low %v2488_v24, %v2492_v13 }
 0x224   : > { %v2356_v17 = vld [vmem:[%s19910_s15 + $0x10e0] sm:$0xff]  ;;  %14429 = vmatpush1.bf16.msra.mxu0 %v17804_v22 }
 0x225   : > { %v2480_v19 = vld [vmem:[%s19910_s15 + $0x14c0] sm:$0xff]  ;;  %v17797_v25 = vcombine.high %v2352_v16, %v2356_v17  ;;  %14469 = vmatprep.subr.bf16.mxu1 %v17933_v15  ;;  %v17796_v33 = vcombine.low %v2352_v16, %v2356_v17 }
 0x226   : > { %v2484_v20 = vld [vmem:[%s19910_s15 + $0x14e0] sm:$0xff]  ;;  %14470 = vmatpush1.bf16.msra.mxu1 %v17932_v23 }
 0x227   : > { %v17925_v26 = vcombine.high %v2480_v19, %v2484_v20  ;;  %v2344_v29 = vld [vmem:[%s19910_s15 + $0x1080] sm:$0xff]  ;;  %14430 = vmatprep.subr.bf16.mxu0 %v17797_v25  ;;  %v17924_v34 = vcombine.low %v2480_v19, %v2484_v20 }
 0x228   : > { %v2348_v30 = vld [vmem:[%s19910_s15 + $0x10a0] sm:$0xff]  ;;  %14431 = vmatpush1.bf16.msra.mxu0 %v17796_v33 }
 0x229   : > { %v2472_v31 = vld [vmem:[%s19910_s15 + $0x1480] sm:$0xff]  ;;  %v17789_v37 = vcombine.high %v2344_v29, %v2348_v30  ;;  %14471 = vmatprep.subr.bf16.mxu1 %v17925_v26  ;;  %v17788_v44 = vcombine.low %v2344_v29, %v2348_v30 }
 0x22a   : > { %v2476_v32 = vld [vmem:[%s19910_s15 + $0x14a0] sm:$0xff]  ;;  %14472 = vmatpush1.bf16.msra.mxu1 %v17924_v34 }
 0x22b   : > { %v17917_v36 = vcombine.high %v2472_v31, %v2476_v32  ;;  %v2336_v40 = vld [vmem:[%s19910_s15 + $0x1040] sm:$0xff]  ;;  %14432 = vmatprep.subr.bf16.mxu0 %v17789_v37  ;;  %v17916_v45 = vcombine.low %v2472_v31, %v2476_v32 }
 0x22c   : > { %v2340_v42 = vld [vmem:[%s19910_s15 + $0x1060] sm:$0xff]  ;;  %14433 = vmatpush1.bf16.msra.mxu0 %v17788_v44 }
 0x22d   : > { %v2464_v43 = vld [vmem:[%s19910_s15 + $0x1440] sm:$0xff]  ;;  %v17781_v4 = vcombine.high %v2336_v40, %v2340_v42  ;;  %14473 = vmatprep.subr.bf16.mxu1 %v17917_v36  ;;  %v17780_v10 = vcombine.low %v2336_v40, %v2340_v42 }
 0x22e   : > { %v2468_v3 = vld [vmem:[%s19910_s15 + $0x1460] sm:$0xff]  ;;  %14474 = vmatpush1.bf16.msra.mxu1 %v17916_v45 }
 0x22f   : > { %v17909_v48 = vcombine.high %v2464_v43, %v2468_v3  ;;  %v2328_v47 = vld [vmem:[%s19910_s15 + $0x1000] sm:$0xff]  ;;  %14434 = vmatprep.subr.bf16.mxu0 %v17781_v4  ;;  %v17908_v52 = vcombine.low %v2464_v43, %v2468_v3 }
 0x230   : > { %v2332_v49 = vld [vmem:[%s19910_s15 + $0x1020] sm:$0xff]  ;;  %14435 = vmatpush1.bf16.msra.mxu0 %v17780_v10 }
 0x231   : > { %v2456_v50 = vld [vmem:[%s19910_s15 + $0x1400] sm:$0xff]  ;;  %v17773_v11 = vcombine.high %v2328_v47, %v2332_v49  ;;  %14475 = vmatprep.subr.bf16.mxu1 %v17909_v48  ;;  %v17772_v60 = vcombine.low %v2328_v47, %v2332_v49 }
 0x232   : > { %v2460_v51 = vld [vmem:[%s19910_s15 + $0x1420] sm:$0xff]  ;;  %14476 = vmatpush1.bf16.msra.mxu1 %v17908_v52 }
 0x233   : > { %v17901_v54 = vcombine.high %v2456_v50, %v2460_v51  ;;  %v2448_v56 = vld [vmem:[%s19910_s15 + $0x13c0] sm:$0xff]  ;;  %14436 = vmatprep.subr.bf16.mxu0 %v17773_v11  ;;  %v17900_v61 = vcombine.low %v2456_v50, %v2460_v51 }
 0x234   : > { %v2452_v58 = vld [vmem:[%s19910_s15 + $0x13e0] sm:$0xff]  ;;  %14437 = vmatpush1.bf16.msra.mxu0 %v17772_v60 }
 0x235   : > { %v2576_v59 = vld [vmem:[%s19910_s15 + $0x17c0] sm:$0xff]  ;;  %v17893_v41 = vcombine.high %v2448_v56, %v2452_v58  ;;  %14477 = vmatprep.subr.bf16.mxu1 %v17901_v54  ;;  %v17892_v21 = vcombine.low %v2448_v56, %v2452_v58 }
 0x236   : > { %v2580_v38 = vld [vmem:[%s19910_s15 + $0x17e0] sm:$0xff]  ;;  %14478 = vmatpush1.bf16.msra.mxu1 %v17900_v61 }
 0x237   : > { %v18021_v63 = vcombine.high %v2576_v59, %v2580_v38  ;;  %v2440_v1 = vld [vmem:[%s19910_s15 + $0x1380] sm:$0xff]  ;;  %14438 = vmatprep.subr.bf16.mxu0 %v17893_v41  ;;  %v18020_v6 = vcombine.low %v2576_v59, %v2580_v38 }
 0x238   : > { %v2444_v18 = vld [vmem:[%s19910_s15 + $0x13a0] sm:$0xff]  ;;  %14439 = vmatpush2.bf16.msra.mxu0 %v17892_v21 }
 0x239   : > { %v2568_v2 = vld [vmem:[%s19910_s15 + $0x1780] sm:$0xff]  ;;  %v17885_v24 = vcombine.high %v2440_v1, %v2444_v18  ;;  %14479 = vmatprep.subr.bf16.mxu1 %v18021_v63  ;;  %v17884_v16 = vcombine.low %v2440_v1, %v2444_v18 }
 0x23a   : > { %v2572_v5 = vld [vmem:[%s19910_s15 + $0x17a0] sm:$0xff]  ;;  %14480 = vmatpush2.bf16.msra.mxu1 %v18020_v6 }
 0x23b   : > { %v18013_v13 = vcombine.high %v2568_v2, %v2572_v5  ;;  %v2432_v27 = vld [vmem:[%s19910_s15 + $0x1340] sm:$0xff]  ;;  %14440 = vmatprep.subr.bf16.mxu0 %v17885_v24  ;;  %v18012_v17 = vcombine.low %v2568_v2, %v2572_v5 }
 0x23c   : > { %v2436_v14 = vld [vmem:[%s19910_s15 + $0x1360] sm:$0xff]  ;;  %14441 = vmatpush2.bf16.msra.mxu0 %v17884_v16 }
 0x23d   : > { %v2560_v28 = vld [vmem:[%s19910_s15 + $0x1740] sm:$0xff]  ;;  %v17877_v19 = vcombine.high %v2432_v27, %v2436_v14  ;;  %14481 = vmatprep.subr.bf16.mxu1 %v18013_v13  ;;  %v17876_v29 = vcombine.low %v2432_v27, %v2436_v14 }
 0x23e   : > { %v2564_v15 = vld [vmem:[%s19910_s15 + $0x1760] sm:$0xff]  ;;  %14482 = vmatpush2.bf16.msra.mxu1 %v18012_v17 }
 0x23f   : > { %v18005_v20 = vcombine.high %v2560_v28, %v2564_v15  ;;  %v2424_v22 = vld [vmem:[%s19910_s15 + $0x1300] sm:$0xff]  ;;  %14442 = vmatprep.subr.bf16.mxu0 %v17877_v19  ;;  %v18004_v30 = vcombine.low %v2560_v28, %v2564_v15  ;;  %v20291_v19 = vcombine.low %v20207_v55, %v20207_v55 }
 0x240   : > { %v2428_v23 = vld [vmem:[%s19910_s15 + $0x1320] sm:$0xff]  ;;  %14443 = vmatpush2.bf16.msra.mxu0 %v17876_v29 }
 0x241   : > { %v2552_v25 = vld [vmem:[%s19910_s15 + $0x1700] sm:$0xff]  ;;  %v17869_v31 = vcombine.high %v2424_v22, %v2428_v23  ;;  %14483 = vmatprep.subr.bf16.mxu1 %v18005_v20  ;;  %v17868_v40 = vcombine.low %v2424_v22, %v2428_v23 }
 0x242   : > { %v2556_v26 = vld [vmem:[%s19910_s15 + $0x1720] sm:$0xff]  ;;  %14484 = vmatpush2.bf16.msra.mxu1 %v18004_v30 }
 0x243   : > { %v17997_v32 = vcombine.high %v2552_v25, %v2556_v26  ;;  %v2416_v33 = vld [vmem:[%s19910_s15 + $0x12c0] sm:$0xff]  ;;  %14444 = vmatprep.subr.bf16.mxu0 %v17869_v31  ;;  %v17996_v42 = vcombine.low %v2552_v25, %v2556_v26  ;;  %v20299_v25 = vcombine.low %v20213_v57, %v20213_v57 }
 0x244   : > { %v2420_v34 = vld [vmem:[%s19910_s15 + $0x12e0] sm:$0xff]  ;;  %14445 = vmatpush2.bf16.msra.mxu0 %v17868_v40 }
 0x245   : > { %v2544_v37 = vld [vmem:[%s19910_s15 + $0x16c0] sm:$0xff]  ;;  %v17861_v43 = vcombine.high %v2416_v33, %v2420_v34  ;;  %14485 = vmatprep.subr.bf16.mxu1 %v17997_v32  ;;  %v17860_v47 = vcombine.low %v2416_v33, %v2420_v34 }
 0x246   : > { %v2548_v36 = vld [vmem:[%s19910_s15 + $0x16e0] sm:$0xff]  ;;  %14486 = vmatpush2.bf16.msra.mxu1 %v17996_v42 }
 0x247   : > { %v17989_v3 = vcombine.high %v2544_v37, %v2548_v36  ;;  %v2408_v44 = vld [vmem:[%s19910_s15 + $0x1280] sm:$0xff]  ;;  %14446 = vmatprep.subr.bf16.mxu0 %v17861_v43  ;;  %v17988_v49 = vcombine.low %v2544_v37, %v2548_v36 }
 0x248   : > { %v2412_v45 = vld [vmem:[%s19910_s15 + $0x12a0] sm:$0xff]  ;;  %14447 = vmatpush2.bf16.msra.mxu0 %v17860_v47 }
 0x249   : > { %v2536_v4 = vld [vmem:[%s19910_s15 + $0x1680] sm:$0xff]  ;;  %v17853_v50 = vcombine.high %v2408_v44, %v2412_v45  ;;  %14487 = vmatprep.subr.bf16.mxu1 %v17989_v3  ;;  %v17852_v56 = vcombine.low %v2408_v44, %v2412_v45 }
 0x24a   : > { %v2540_v48 = vld [vmem:[%s19910_s15 + $0x16a0] sm:$0xff]  ;;  %14488 = vmatpush2.bf16.msra.mxu1 %v17988_v49 }
 0x24b   : > { %v17981_v51 = vcombine.high %v2536_v4, %v2540_v48  ;;  %v2400_v10 = vld [vmem:[%s19910_s15 + $0x1240] sm:$0xff]  ;;  %14448 = vmatprep.subr.bf16.mxu0 %v17853_v50  ;;  %v17980_v58 = vcombine.low %v2536_v4, %v2540_v48 }
 0x24c   : > { %v2404_v52 = vld [vmem:[%s19910_s15 + $0x1260] sm:$0xff]  ;;  %14449 = vmatpush2.bf16.msra.mxu0 %v17852_v56 }
 0x24d   : > { %v2528_v11 = vld [vmem:[%s19910_s15 + $0x1640] sm:$0xff]  ;;  %v17845_v59 = vcombine.high %v2400_v10, %v2404_v52  ;;  %14489 = vmatprep.subr.bf16.mxu1 %v17981_v51  ;;  %v17844_v1 = vcombine.low %v2400_v10, %v2404_v52 }
 0x24e   : > { %v2532_v54 = vld [vmem:[%s19910_s15 + $0x1660] sm:$0xff]  ;;  %14490 = vmatpush2.bf16.msra.mxu1 %v17980_v58 }
 0x24f   : > { %v17973_v38 = vcombine.high %v2528_v11, %v2532_v54  ;;  %v2392_v60 = vld [vmem:[%s19910_s15 + $0x1200] sm:$0xff]  ;;  %14450 = vmatprep.subr.bf16.mxu0 %v17845_v59  ;;  %v17972_v18 = vcombine.low %v2528_v11, %v2532_v54 }
 0x250   : > { %v2396_v61 = vld [vmem:[%s19910_s15 + $0x1220] sm:$0xff]  ;;  %14451 = vmatpush2.bf16.msra.mxu0 %v17844_v1 }
 0x251   : > { %v2520_v41 = vld [vmem:[%s19910_s15 + $0x1600] sm:$0xff]  ;;  %v17837_v2 = vcombine.high %v2392_v60, %v2396_v61  ;;  %14491 = vmatprep.subr.bf16.mxu1 %v17973_v38  ;;  %v17836_v27 = vcombine.low %v2392_v60, %v2396_v61 }
 0x252   : > { %v2524_v63 = vld [vmem:[%s19910_s15 + $0x1620] sm:$0xff]  ;;  %14492 = vmatpush2.bf16.msra.mxu1 %v17972_v18 }
 0x253   : > { %v17965_v5 = vcombine.high %v2520_v41, %v2524_v63  ;;  %v2640_v21 = vld [vmem:[%s19910_s15 + $0x19c0] sm:$0xff]  ;;  %14452 = vmatprep.subr.bf16.mxu0 %v17837_v2  ;;  %v17964_v14 = vcombine.low %v2520_v41, %v2524_v63 }
 0x254   : > { %v2644_v6 = vld [vmem:[%s19910_s15 + $0x19e0] sm:$0xff]  ;;  %14453 = vmatpush2.bf16.msra.mxu0 %v17836_v27 }
 0x255   : > { %v2768_v24 = vld [vmem:[%s19910_s15 + $0x1dc0] sm:$0xff]  ;;  %v18085_v28 = vcombine.high %v2640_v21, %v2644_v6  ;;  %14493 = vmatprep.subr.bf16.mxu1 %v17965_v5  ;;  %v18084_v26 = vcombine.low %v2640_v21, %v2644_v6 }
 0x256   : > { %v2772_v13 = vld [vmem:[%s19910_s15 + $0x1de0] sm:$0xff]  ;;  %14494 = vmatpush2.bf16.msra.mxu1 %v17964_v14 }
 0x257   : > { %v18213_v15 = vcombine.high %v2768_v24, %v2772_v13  ;;  %v2632_v16 = vld [vmem:[%s19910_s15 + $0x1980] sm:$0xff]  ;;  %14504 = vmatprep.subr.bf16.mxu0 %v18085_v28  ;;  %v18212_v30 = vcombine.low %v2768_v24, %v2772_v13  ;;  %14455 = vmatmul.mubr.bf16.vlgmr.msra.gmra.mxu0 %v20291_v19 }
 0x258   : > { %v2636_v17 = vld [vmem:[%s19910_s15 + $0x19a0] sm:$0xff]  ;;  %14505 = vmatpush1.bf16.msra.mxu0 %v18084_v26 }
 0x259   : > { %v2760_v20 = vld [vmem:[%s19910_s15 + $0x1d80] sm:$0xff]  ;;  %v18077_v31 = vcombine.high %v2632_v16, %v2636_v17  ;;  %14545 = vmatprep.subr.bf16.mxu1 %v18213_v15  ;;  %14496 = vmatmul.mubr.bf16.vlgmr.msra.gmra.mxu1 %v20299_v25  ;;  %v18076_v40 = vcombine.low %v2632_v16, %v2636_v17 }
 0x25a   : > { %v2764_v22 = vld [vmem:[%s19910_s15 + $0x1da0] sm:$0xff]  ;;  %14546 = vmatpush1.bf16.msra.mxu1 %v18212_v30 }
 0x25b   : > { %v20295_v23 = vld [vmem:[#allocation2 + $0x8] sm:$0xff]  ;;  %v18205_v55 = vcombine.high %v2760_v20, %v2764_v22  ;;  %14506 = vmatprep.subr.bf16.mxu0 %v18077_v31  ;;  %v18204_v42 = vcombine.low %v2760_v20, %v2764_v22 }
 0x25c   : > { %v20301_v29 = vld [vmem:[#allocation2 + $0x48] sm:$0xff]  ;;  %v20307_v34 = vcombine.high %v20295_v23, %v20295_v23  ;;  %14507 = vmatpush1.bf16.msra.mxu0 %v18076_v40 }
 0x25d   : > { %v2624_v32 = vld [vmem:[%s19910_s15 + $0x1940] sm:$0xff]  ;;  %v20314_v36 = vcombine.high %v20301_v29, %v20301_v29  ;;  %14547 = vmatprep.subr.bf16.mxu1 %v18205_v55 }
 0x25e   : > { %v2628_v33 = vld [vmem:[%s19910_s15 + $0x1960] sm:$0xff]  ;;  %14536 = vmatprep.mubr.bf16.mxu0 %v20307_v34  ;;  %14548 = vmatpush1.bf16.msra.mxu1 %v18204_v42 }
 0x25f   : > { %v2752_v57 = vld [vmem:[%s19910_s15 + $0x1d40] sm:$0xff]  ;;  %v18069_v43 = vcombine.high %v2624_v32, %v2628_v33  ;;  %14577 = vmatprep.mubr.bf16.mxu1 %v20314_v36  ;;  %v18068_v47 = vcombine.low %v2624_v32, %v2628_v33 }
 0x260   : > { %v2756_v37 = vld [vmem:[%s19910_s15 + $0x1d60] sm:$0xff] }
 0x261   : > { %v18197_v3 = vcombine.high %v2752_v57, %v2756_v37  ;;  %v2616_v44 = vld [vmem:[%s19910_s15 + $0x1900] sm:$0xff]  ;;  %14508 = vmatprep.subr.bf16.mxu0 %v18069_v43  ;;  %v18196_v49 = vcombine.low %v2752_v57, %v2756_v37 }
 0x262   : > { %v2620_v45 = vld [vmem:[%s19910_s15 + $0x1920] sm:$0xff]  ;;  %14509 = vmatpush1.bf16.msra.mxu0 %v18068_v47 }
 0x263   : > { %v2744_v4 = vld [vmem:[%s19910_s15 + $0x1d00] sm:$0xff]  ;;  %v18061_v50 = vcombine.high %v2616_v44, %v2620_v45  ;;  %14549 = vmatprep.subr.bf16.mxu1 %v18197_v3  ;;  %v18060_v56 = vcombine.low %v2616_v44, %v2620_v45 }
 0x264   : > { %v2748_v48 = vld [vmem:[%s19910_s15 + $0x1d20] sm:$0xff]  ;;  %14550 = vmatpush1.bf16.msra.mxu1 %v18196_v49 }
 0x265   : > { %v18189_v51 = vcombine.high %v2744_v4, %v2748_v48  ;;  %v2608_v10 = vld [vmem:[%s19910_s15 + $0x18c0] sm:$0xff]  ;;  %14510 = vmatprep.subr.bf16.mxu0 %v18061_v50  ;;  %v18188_v58 = vcombine.low %v2744_v4, %v2748_v48 }
 0x266   : > { %v2612_v52 = vld [vmem:[%s19910_s15 + $0x18e0] sm:$0xff]  ;;  %14511 = vmatpush1.bf16.msra.mxu0 %v18060_v56 }
 0x267   : > { %v2736_v11 = vld [vmem:[%s19910_s15 + $0x1cc0] sm:$0xff]  ;;  %v18053_v59 = vcombine.high %v2608_v10, %v2612_v52  ;;  %14551 = vmatprep.subr.bf16.mxu1 %v18189_v51  ;;  %v18052_v1 = vcombine.low %v2608_v10, %v2612_v52 }
 0x268   : > { %v2740_v54 = vld [vmem:[%s19910_s15 + $0x1ce0] sm:$0xff]  ;;  %14552 = vmatpush1.bf16.msra.mxu1 %v18188_v58 }
 0x269   : > { %v18181_v38 = vcombine.high %v2736_v11, %v2740_v54  ;;  %v2600_v60 = vld [vmem:[%s19910_s15 + $0x1880] sm:$0xff]  ;;  %14512 = vmatprep.subr.bf16.mxu0 %v18053_v59  ;;  %v18180_v18 = vcombine.low %v2736_v11, %v2740_v54 }
 0x26a   : > { %v2604_v61 = vld [vmem:[%s19910_s15 + $0x18a0] sm:$0xff]  ;;  %14513 = vmatpush1.bf16.msra.mxu0 %v18052_v1 }
 0x26b   : > { %v2728_v41 = vld [vmem:[%s19910_s15 + $0x1c80] sm:$0xff]  ;;  %v18045_v2 = vcombine.high %v2600_v60, %v2604_v61  ;;  %14553 = vmatprep.subr.bf16.mxu1 %v18181_v38  ;;  %v18044_v27 = vcombine.low %v2600_v60, %v2604_v61 }
 0x26c   : > { %v2732_v63 = vld [vmem:[%s19910_s15 + $0x1ca0] sm:$0xff]  ;;  %14554 = vmatpush1.bf16.msra.mxu1 %v18180_v18 }
 0x26d   : > { %v18173_v5 = vcombine.high %v2728_v41, %v2732_v63  ;;  %v2592_v21 = vld [vmem:[%s19910_s15 + $0x1840] sm:$0xff]  ;;  %14514 = vmatprep.subr.bf16.mxu0 %v18045_v2  ;;  %v18172_v14 = vcombine.low %v2728_v41, %v2732_v63 }
 0x26e   : > { %v2596_v6 = vld [vmem:[%s19910_s15 + $0x1860] sm:$0xff]  ;;  %14515 = vmatpush1.bf16.msra.mxu0 %v18044_v27 }
 0x26f   : > { %v2720_v24 = vld [vmem:[%s19910_s15 + $0x1c40] sm:$0xff]  ;;  %v18037_v28 = vcombine.high %v2592_v21, %v2596_v6  ;;  %14555 = vmatprep.subr.bf16.mxu1 %v18173_v5  ;;  %v18036_v26 = vcombine.low %v2592_v21, %v2596_v6 }
 0x270   : > { %v2724_v13 = vld [vmem:[%s19910_s15 + $0x1c60] sm:$0xff]  ;;  %14556 = vmatpush1.bf16.msra.mxu1 %v18172_v14 }
 0x271   : > { %v18165_v15 = vcombine.high %v2720_v24, %v2724_v13  ;;  %v2584_v16 = vld [vmem:[%s19910_s15 + $0x1800] sm:$0xff]  ;;  %14516 = vmatprep.subr.bf16.mxu0 %v18037_v28  ;;  %v18164_v30 = vcombine.low %v2720_v24, %v2724_v13 }
 0x272   : > { %v2588_v17 = vld [vmem:[%s19910_s15 + $0x1820] sm:$0xff]  ;;  %14517 = vmatpush1.bf16.msra.mxu0 %v18036_v26 }
 0x273   : > { %v2712_v20 = vld [vmem:[%s19910_s15 + $0x1c00] sm:$0xff]  ;;  %v18029_v31 = vcombine.high %v2584_v16, %v2588_v17  ;;  %14557 = vmatprep.subr.bf16.mxu1 %v18165_v15  ;;  %v18028_v40 = vcombine.low %v2584_v16, %v2588_v17 }
 0x274   : > { %v2716_v22 = vld [vmem:[%s19910_s15 + $0x1c20] sm:$0xff]  ;;  %14558 = vmatpush1.bf16.msra.mxu1 %v18164_v30 }
 0x275   : > { %v18157_v55 = vcombine.high %v2712_v20, %v2716_v22  ;;  %v2704_v32 = vld [vmem:[%s19910_s15 + $0x1bc0] sm:$0xff]  ;;  %14518 = vmatprep.subr.bf16.mxu0 %v18029_v31  ;;  %v18156_v42 = vcombine.low %v2712_v20, %v2716_v22 }
 0x276   : > { %v2708_v33 = vld [vmem:[%s19910_s15 + $0x1be0] sm:$0xff]  ;;  %14519 = vmatpush1.bf16.msra.mxu0 %v18028_v40 }
 0x277   : > { %v2832_v57 = vld [vmem:[%s19910_s15 + $0x1fc0] sm:$0xff]  ;;  %v18149_v43 = vcombine.high %v2704_v32, %v2708_v33  ;;  %14559 = vmatprep.subr.bf16.mxu1 %v18157_v55  ;;  %v18148_v47 = vcombine.low %v2704_v32, %v2708_v33 }
 0x278   : > { %v2836_v37 = vld [vmem:[%s19910_s15 + $0x1fe0] sm:$0xff]  ;;  %14560 = vmatpush1.bf16.msra.mxu1 %v18156_v42  ;;  %v3866_v42 = vlaneseq }
 0x279   : > { %v18277_v3 = vcombine.high %v2832_v57, %v2836_v37  ;;  %v2696_v44 = vld [vmem:[%s19910_s15 + $0x1b80] sm:$0xff]  ;;  %14520 = vmatprep.subr.bf16.mxu0 %v18149_v43  ;;  %v18276_v49 = vcombine.low %v2832_v57, %v2836_v37 }
 0x27a   : > { %v2700_v45 = vld [vmem:[%s19910_s15 + $0x1ba0] sm:$0xff]  ;;  %14521 = vmatpush2.bf16.msra.mxu0 %v18148_v47 }
 0x27b   : > { %v2824_v4 = vld [vmem:[%s19910_s15 + $0x1f80] sm:$0xff]  ;;  %v18141_v50 = vcombine.high %v2696_v44, %v2700_v45  ;;  %14561 = vmatprep.subr.bf16.mxu1 %v18277_v3  ;;  %v18140_v56 = vcombine.low %v2696_v44, %v2700_v45 }
 0x27c   : > { %v2828_v48 = vld [vmem:[%s19910_s15 + $0x1fa0] sm:$0xff]  ;;  %14562 = vmatpush2.bf16.msra.mxu1 %v18276_v49 }
 0x27d   : > { %v18269_v51 = vcombine.high %v2824_v4, %v2828_v48  ;;  %v2688_v10 = vld [vmem:[%s19910_s15 + $0x1b40] sm:$0xff]  ;;  %14522 = vmatprep.subr.bf16.mxu0 %v18141_v50  ;;  %v18268_v58 = vcombine.low %v2824_v4, %v2828_v48  ;;  %v20371_v50 = vshrl.u32 %v3866_v42, 7 }
 0x27e   : > { %v2692_v52 = vld [vmem:[%s19910_s15 + $0x1b60] sm:$0xff]  ;;  %14523 = vmatpush2.bf16.msra.mxu0 %v18140_v56 }
 0x27f   : > { %v2816_v11 = vld [vmem:[%s19910_s15 + $0x1f40] sm:$0xff]  ;;  %v18133_v59 = vcombine.high %v2688_v10, %v2692_v52  ;;  %14563 = vmatprep.subr.bf16.mxu1 %v18269_v51  ;;  %v18132_v1 = vcombine.low %v2688_v10, %v2692_v52 }
 0x280   : > { %v2820_v54 = vld [vmem:[%s19910_s15 + $0x1f60] sm:$0xff]  ;;  %14564 = vmatpush2.bf16.msra.mxu1 %v18268_v58 }
 0x281   : > { %v18261_v38 = vcombine.high %v2816_v11, %v2820_v54  ;;  %v2680_v60 = vld [vmem:[%s19910_s15 + $0x1b00] sm:$0xff]  ;;  %14524 = vmatprep.subr.bf16.mxu0 %v18133_v59  ;;  %v18260_v18 = vcombine.low %v2816_v11, %v2820_v54 }
 0x282   : > { %v2684_v61 = vld [vmem:[%s19910_s15 + $0x1b20] sm:$0xff]  ;;  %14525 = vmatpush2.bf16.msra.mxu0 %v18132_v1  ;;  %v3872_v1 = vsub.s32 1, %v20371_v50 }
 0x283   : > { %v2808_v41 = vld [vmem:[%s19910_s15 + $0x1f00] sm:$0xff]  ;;  %v18125_v2 = vcombine.high %v2680_v60, %v2684_v61  ;;  %14565 = vmatprep.subr.bf16.mxu1 %v18261_v38  ;;  %v18124_v27 = vcombine.low %v2680_v60, %v2684_v61  ;;  %v3868_v38 = vsub.s32 0, %v20371_v50 }
 0x284   : > { %v2812_v63 = vld [vmem:[%s19910_s15 + $0x1f20] sm:$0xff]  ;;  %14566 = vmatpush2.bf16.msra.mxu1 %v18260_v18 }
 0x285   : > { %v18253_v5 = vcombine.high %v2808_v41, %v2812_v63  ;;  %v2672_v21 = vld [vmem:[%s19910_s15 + $0x1ac0] sm:$0xff]  ;;  %14526 = vmatprep.subr.bf16.mxu0 %v18125_v2  ;;  %v18252_v14 = vcombine.low %v2808_v41, %v2812_v63 }
 0x286   : > { %v2676_v6 = vld [vmem:[%s19910_s15 + $0x1ae0] sm:$0xff]  ;;  %14527 = vmatpush2.bf16.msra.mxu0 %v18124_v27  ;;  %v20394_v27 = vcombine.low %v20301_v29, %v20301_v29 }
 0x287   : > { %v2800_v24 = vld [vmem:[%s19910_s15 + $0x1ec0] sm:$0xff]  ;;  %v18117_v28 = vcombine.high %v2672_v21, %v2676_v6  ;;  %14567 = vmatprep.subr.bf16.mxu1 %v18253_v5  ;;  %v18116_v26 = vcombine.low %v2672_v21, %v2676_v6  ;;  %v20384_v5 = vcombine.low %v20295_v23, %v20295_v23 }
 0x288   : > { %v2804_v13 = vld [vmem:[%s19910_s15 + $0x1ee0] sm:$0xff]  ;;  %14568 = vmatpush2.bf16.msra.mxu1 %v18252_v14 }
 0x289   : > { %v18245_v15 = vcombine.high %v2800_v24, %v2804_v13  ;;  %v2664_v16 = vld [vmem:[%s19910_s15 + $0x1a80] sm:$0xff]  ;;  %14528 = vmatprep.subr.bf16.mxu0 %v18117_v28  ;;  %v18244_v30 = vcombine.low %v2800_v24, %v2804_v13  ;;  %v20388_v24 = vld [vmem:[#allocation2 + $0x40] sm:$0xff] }
 0x28a   : > { %v2668_v17 = vld [vmem:[%s19910_s15 + $0x1aa0] sm:$0xff]  ;;  %14529 = vmatpush2.bf16.msra.mxu0 %v18116_v26  ;;  %v20396_v28 = vld [vmem:[#allocation2 + $0x20] sm:$0xff]  ;;  %v20404_v26 = vcombine.high %v20388_v24, %v20388_v24 }
 0x28b   : > { %v2792_v20 = vld [vmem:[%s19910_s15 + $0x1e80] sm:$0xff]  ;;  %v18109_v31 = vcombine.high %v2664_v16, %v2668_v17  ;;  %14569 = vmatprep.subr.bf16.mxu1 %v18245_v15  ;;  %v18108_v40 = vcombine.low %v2664_v16, %v2668_v17 }
 0x28c   : > { %v2796_v22 = vld [vmem:[%s19910_s15 + $0x1ea0] sm:$0xff]  ;;  %14570 = vmatpush2.bf16.msra.mxu1 %v18244_v30 }
 0x28d   : > { %v18237_v55 = vcombine.high %v2792_v20, %v2796_v22  ;;  %v2656_v32 = vld [vmem:[%s19910_s15 + $0x1a40] sm:$0xff]  ;;  %14530 = vmatprep.subr.bf16.mxu0 %v18109_v31  ;;  %v18236_v43 = vcombine.low %v2792_v20, %v2796_v22 }
 0x28e   : > { %v2660_v33 = vld [vmem:[%s19910_s15 + $0x1a60] sm:$0xff]  ;;  %14531 = vmatpush2.bf16.msra.mxu0 %v18108_v40 }
 0x28f   : > { %v2784_v57 = vld [vmem:[%s19910_s15 + $0x1e40] sm:$0xff]  ;;  %v18101_v3 = vcombine.high %v2656_v32, %v2660_v33  ;;  %14571 = vmatprep.subr.bf16.mxu1 %v18237_v55  ;;  %v18100_v49 = vcombine.low %v2656_v32, %v2660_v33  ;;  %v20411_v55 = vcombine.high %v20396_v28, %v20396_v28 }
 0x290   : > { %v2788_v37 = vld [vmem:[%s19910_s15 + $0x1e60] sm:$0xff]  ;;  %14572 = vmatpush2.bf16.msra.mxu1 %v18236_v43 }
 0x291   : > { %v18229_v44 = vcombine.high %v2784_v57, %v2788_v37  ;;  %v2648_v45 = vld [vmem:[%s19910_s15 + $0x1a00] sm:$0xff]  ;;  %14532 = vmatprep.subr.bf16.mxu0 %v18101_v3  ;;  %v18228_v51 = vcombine.low %v2784_v57, %v2788_v37 }
 0x292   : > { %v2652_v4 = vld [vmem:[%s19910_s15 + $0x1a20] sm:$0xff]  ;;  %14533 = vmatpush2.bf16.msra.mxu0 %v18100_v49 }
 0x293   : > { %v2776_v48 = vld [vmem:[%s19910_s15 + $0x1e00] sm:$0xff]  ;;  %v18093_v10 = vcombine.high %v2648_v45, %v2652_v4  ;;  %14573 = vmatprep.subr.bf16.mxu1 %v18229_v44  ;;  %v18092_v59 = vcombine.low %v2648_v45, %v2652_v4 }
 0x294   : > { %v2780_v47 = vld [vmem:[%s19910_s15 + $0x1e20] sm:$0xff]  ;;  %14574 = vmatpush2.bf16.msra.mxu1 %v18228_v51 }
 0x295   : > { %v18221_v52 = vcombine.high %v2776_v48, %v2780_v47  ;;  %v2896_v11 = vld [vmem:[%s19910_s15 + $0x21c0] sm:$0xff]  ;;  %14534 = vmatprep.subr.bf16.mxu0 %v18093_v10  ;;  %v18220_v60 = vcombine.low %v2776_v48, %v2780_v47 }
 0x296   : > { %v2900_v54 = vld [vmem:[%s19910_s15 + $0x21e0] sm:$0xff]  ;;  %14535 = vmatpush2.bf16.msra.mxu0 %v18092_v59  ;;  %v14292_v29 = vpop.f32.mrf.mxu0 }
 0x297   : > { %v3024_v56 = vld [vmem:[%s19910_s15 + $0x25c0] sm:$0xff]  ;;  %v18341_v41 = vcombine.high %v2896_v11, %v2900_v54  ;;  %14575 = vmatprep.subr.bf16.mxu1 %v18221_v52  ;;  %v18340_v14 = vcombine.low %v2896_v11, %v2900_v54 }
 0x298   : > { %v3028_v58 = vld [vmem:[%s19910_s15 + $0x25e0] sm:$0xff]  ;;  %14576 = vmatpush2.bf16.msra.mxu1 %v18220_v60  ;;  %v14333_v33 = vpop.f32.mrf.mxu1  ;;  %v14294_v37 = vpop.f32.mrf.mxu0 }
 0x299   : > { %v3864_v61 = vld [vmem:[%s19923_s29] sm:$0xff]  ;;  %v18469_v63 = vcombine.high %v3024_v56, %v3028_v58  ;;  %14586 = vmatprep.subr.bf16.mxu0 %v18341_v41  ;;  %v18468_v23 = vcombine.low %v3024_v56, %v3028_v58  ;;  %14537 = vmatmul.mubr.bf16.vlgmr.msra.gmra.mxu0 %v20384_v5 }
 0x29a   : > { %v2888_v18 = vld [vmem:[%s19910_s15 + $0x2180] sm:$0xff]  ;;  %v3869_v13 = vrot.slane %v3864_v61, %v3868_v38  ;;  %v3873_v16 = vrot.slane %v3864_v61, %v3872_v1  ;;  %14587 = vmatpush1.bf16.msra.mxu0 %v18340_v14  ;;  %v14335_v44 = vpop.f32.mrf.mxu1  ;;  %14618 = vmatprep.mubr.bf16.mxu0 %v20404_v26  ;;  %v14296_v47 = vpop.f32.mrf.mxu0 }
 0x29b   : > { %v2892_v2 = vld [vmem:[%s19910_s15 + $0x21a0] sm:$0xff]  ;;  %14627 = vmatprep.subr.bf16.mxu1 %v18469_v63  ;;  %14578 = vmatmul.mubr.bf16.vlgmr.msra.gmra.mxu1 %v20394_v27 }
 0x29c   : > { %v3016_v21 = vld [vmem:[%s19910_s15 + $0x2580] sm:$0xff]  ;;  %v18333_v15 = vcombine.high %v2888_v18, %v2892_v2  ;;  %v14293_v32 = vadd.f32 %v14292_v29, %v3869_v13  ;;  %v18332_v57 = vcombine.low %v2888_v18, %v2892_v2  ;;  %14628 = vmatpush1.bf16.msra.mxu1 %v18468_v23  ;;  %v14295_v3 = vadd.f32 %v14294_v37, %v3873_v16  ;;  %v14337_v52 = vpop.f32.mrf.mxu1  ;;  %v14297_v54 = vpop.f32.mrf.mxu0 }
 0x29d   : > { %v3020_v6 = vld [vmem:[%s19910_s15 + $0x25a0] sm:$0xff]  ;;  %14659 = vmatprep.mubr.bf16.mxu1 %v20411_v55 }
 0x29e   : > { %v18461_v17 = vcombine.high %v3016_v21, %v3020_v6  ;;  %v2880_v20 = vld [vmem:[%s19910_s15 + $0x2140] sm:$0xff]  ;;  %14588 = vmatprep.subr.bf16.mxu0 %v18333_v15  ;;  %v18460_v40 = vcombine.low %v3016_v21, %v3020_v6  ;;  %v20414_v43 = vadd.f32 %v14333_v33, %v14293_v32  ;;  %v20422_v10 = vadd.f32 %v14335_v44, %v14295_v3  ;;  %v14338_v59 = vpop.f32.mrf.mxu1 }
 0x29f   : > { %v2884_v22 = vld [vmem:[%s19910_s15 + $0x2160] sm:$0xff]  ;;  %14589 = vmatpush1.bf16.msra.mxu0 %v18332_v57 }
 0x2a0   : > { %v3008_v30 = vld [vmem:[%s19910_s15 + $0x2540] sm:$0xff]  ;;  %v18325_v42 = vcombine.high %v2880_v20, %v2884_v22  ;;  %14629 = vmatprep.subr.bf16.mxu1 %v18461_v17  ;;  %v18324_v11 = vcombine.low %v2880_v20, %v2884_v22 }
 0x2a1   : > { %v3012_v31 = vld [vmem:[%s19910_s15 + $0x2560] sm:$0xff]  ;;  %14630 = vmatpush1.bf16.msra.mxu1 %v18460_v40 }
 0x2a2   : > { %v18453_v45 = vcombine.high %v3008_v30, %v3012_v31  ;;  %v2872_v4 = vld [vmem:[%s19910_s15 + $0x2100] sm:$0xff]  ;;  %14590 = vmatprep.subr.bf16.mxu0 %v18325_v42  ;;  %v18452_v56 = vcombine.low %v3008_v30, %v3012_v31 }
 0x2a3   : > { %v2876_v48 = vld [vmem:[%s19910_s15 + $0x2120] sm:$0xff]  ;;  %14591 = vmatpush1.bf16.msra.mxu0 %v18324_v11 }
 0x2a4   : > { %v3000_v49 = vld [vmem:[%s19910_s15 + $0x2500] sm:$0xff]  ;;  %v18317_v58 = vcombine.high %v2872_v4, %v2876_v48  ;;  %14631 = vmatprep.subr.bf16.mxu1 %v18453_v45  ;;  %v18316_v2 = vcombine.low %v2872_v4, %v2876_v48 }
 0x2a5   : > { %v3004_v51 = vld [vmem:[%s19910_s15 + $0x2520] sm:$0xff]  ;;  %14632 = vmatpush1.bf16.msra.mxu1 %v18452_v56 }
 0x2a6   : > { %v18445_v60 = vcombine.high %v3000_v49, %v3004_v51  ;;  %v2864_v61 = vld [vmem:[%s19910_s15 + $0x20c0] sm:$0xff]  ;;  %14592 = vmatprep.subr.bf16.mxu0 %v18317_v58  ;;  %v18444_v21 = vcombine.low %v3000_v49, %v3004_v51 }
 0x2a7   : > { %v2868_v41 = vld [vmem:[%s19910_s15 + $0x20e0] sm:$0xff]  ;;  %14593 = vmatpush1.bf16.msra.mxu0 %v18316_v2 }
 0x2a8   : > { %v2992_v63 = vld [vmem:[%s19910_s15 + $0x24c0] sm:$0xff]  ;;  %v18309_v6 = vcombine.high %v2864_v61, %v2868_v41  ;;  %14633 = vmatprep.subr.bf16.mxu1 %v18445_v60  ;;  %v18308_v17 = vcombine.low %v2864_v61, %v2868_v41 }
 0x2a9   : > { %v2996_v18 = vld [vmem:[%s19910_s15 + $0x24e0] sm:$0xff]  ;;  %14634 = vmatpush1.bf16.msra.mxu1 %v18444_v21 }
 0x2aa   : > { %v18437_v13 = vcombine.high %v2992_v63, %v2996_v18  ;;  %v2856_v14 = vld [vmem:[%s19910_s15 + $0x2080] sm:$0xff]  ;;  %14594 = vmatprep.subr.bf16.mxu0 %v18309_v6  ;;  %v18436_v20 = vcombine.low %v2992_v63, %v2996_v18 }
 0x2ab   : > { %v2860_v23 = vld [vmem:[%s19910_s15 + $0x20a0] sm:$0xff]  ;;  %14595 = vmatpush1.bf16.msra.mxu0 %v18308_v17 }
 0x2ac   : > { %v2984_v15 = vld [vmem:[%s19910_s15 + $0x2480] sm:$0xff]  ;;  %v18301_v22 = vcombine.high %v2856_v14, %v2860_v23  ;;  %14635 = vmatprep.subr.bf16.mxu1 %v18437_v13  ;;  %v18300_v57 = vcombine.low %v2856_v14, %v2860_v23 }
 0x2ad   : > { %v2988_v16 = vld [vmem:[%s19910_s15 + $0x24a0] sm:$0xff]  ;;  %14636 = vmatpush1.bf16.msra.mxu1 %v18436_v20 }
 0x2ae   : > { %v18429_v29 = vcombine.high %v2984_v15, %v2988_v16  ;;  %v2848_v30 = vld [vmem:[%s19910_s15 + $0x2040] sm:$0xff]  ;;  %14596 = vmatprep.subr.bf16.mxu0 %v18301_v22  ;;  %v18428_v37 = vcombine.low %v2984_v15, %v2988_v16 }
 0x2af   : > { %v2852_v31 = vld [vmem:[%s19910_s15 + $0x2060] sm:$0xff]  ;;  %14597 = vmatpush1.bf16.msra.mxu0 %v18300_v57 }
 0x2b0   : > { %v2976_v32 = vld [vmem:[%s19910_s15 + $0x2440] sm:$0xff]  ;;  %v18293_v40 = vcombine.high %v2848_v30, %v2852_v31  ;;  %14637 = vmatprep.subr.bf16.mxu1 %v18429_v29  ;;  %v18292_v48 = vcombine.low %v2848_v30, %v2852_v31 }
 0x2b1   : > { %v2980_v33 = vld [vmem:[%s19910_s15 + $0x2460] sm:$0xff]  ;;  %14638 = vmatpush1.bf16.msra.mxu1 %v18428_v37 }
 0x2b2   : > { %v18421_v42 = vcombine.high %v2976_v32, %v2980_v33  ;;  %v2840_v3 = vld [vmem:[%s19910_s15 + $0x2000] sm:$0xff]  ;;  %14598 = vmatprep.subr.bf16.mxu0 %v18293_v40  ;;  %v18420_v47 = vcombine.low %v2976_v32, %v2980_v33 }
 0x2b3   : > { %v2844_v44 = vld [vmem:[%s19910_s15 + $0x2020] sm:$0xff]  ;;  %14599 = vmatpush1.bf16.msra.mxu0 %v18292_v48 }
 0x2b4   : > { %v2968_v45 = vld [vmem:[%s19910_s15 + $0x2400] sm:$0xff]  ;;  %v18285_v49 = vcombine.high %v2840_v3, %v2844_v44  ;;  %14639 = vmatprep.subr.bf16.mxu1 %v18421_v42  ;;  %v18284_v58 = vcombine.low %v2840_v3, %v2844_v44 }
 0x2b5   : > { %v2972_v4 = vld [vmem:[%s19910_s15 + $0x2420] sm:$0xff]  ;;  %14640 = vmatpush1.bf16.msra.mxu1 %v18420_v47 }
 0x2b6   : > { %v18413_v51 = vcombine.high %v2968_v45, %v2972_v4  ;;  %v2960_v52 = vld [vmem:[%s19910_s15 + $0x23c0] sm:$0xff]  ;;  %14600 = vmatprep.subr.bf16.mxu0 %v18285_v49  ;;  %v18412_v59 = vcombine.low %v2968_v45, %v2972_v4 }
 0x2b7   : > { %v2964_v11 = vld [vmem:[%s19910_s15 + $0x23e0] sm:$0xff]  ;;  %14601 = vmatpush1.bf16.msra.mxu0 %v18284_v58 }
 0x2b8   : > { %v3088_v54 = vld [vmem:[%s19910_s15 + $0x27c0] sm:$0xff]  ;;  %v18405_v60 = vcombine.high %v2960_v52, %v2964_v11  ;;  %14641 = vmatprep.subr.bf16.mxu1 %v18413_v51  ;;  %v18404_v21 = vcombine.low %v2960_v52, %v2964_v11 }
 0x2b9   : > { %v3092_v56 = vld [vmem:[%s19910_s15 + $0x27e0] sm:$0xff]  ;;  %14642 = vmatpush1.bf16.msra.mxu1 %v18412_v59 }
 0x2ba   : > { %v18533_v61 = vcombine.high %v3088_v54, %v3092_v56  ;;  %v2952_v41 = vld [vmem:[%s19910_s15 + $0x2380] sm:$0xff]  ;;  %14602 = vmatprep.subr.bf16.mxu0 %v18405_v60  ;;  %v18532_v6 = vcombine.low %v3088_v54, %v3092_v56 }
 0x2bb   : > { %v2956_v63 = vld [vmem:[%s19910_s15 + $0x23a0] sm:$0xff]  ;;  %14603 = vmatpush2.bf16.msra.mxu0 %v18404_v21 }
 0x2bc   : > { %v3080_v18 = vld [vmem:[%s19910_s15 + $0x2780] sm:$0xff]  ;;  %v18397_v13 = vcombine.high %v2952_v41, %v2956_v63  ;;  %14643 = vmatprep.subr.bf16.mxu1 %v18533_v61  ;;  %v18396_v20 = vcombine.low %v2952_v41, %v2956_v63 }
 0x2bd   : > { %v3084_v2 = vld [vmem:[%s19910_s15 + $0x27a0] sm:$0xff]  ;;  %14644 = vmatpush2.bf16.msra.mxu1 %v18532_v6 }
 0x2be   : > { %v18525_v14 = vcombine.high %v3080_v18, %v3084_v2  ;;  %v2944_v23 = vld [vmem:[%s19910_s15 + $0x2340] sm:$0xff]  ;;  %14604 = vmatprep.subr.bf16.mxu0 %v18397_v13  ;;  %v18524_v22 = vcombine.low %v3080_v18, %v3084_v2 }
 0x2bf   : > { %v2948_v15 = vld [vmem:[%s19910_s15 + $0x2360] sm:$0xff]  ;;  %14605 = vmatpush2.bf16.msra.mxu0 %v18396_v20 }
 0x2c0   : > { %v3072_v16 = vld [vmem:[%s19910_s15 + $0x2740] sm:$0xff]  ;;  %v18389_v29 = vcombine.high %v2944_v23, %v2948_v15  ;;  %14645 = vmatprep.subr.bf16.mxu1 %v18525_v14  ;;  %v18388_v37 = vcombine.low %v2944_v23, %v2948_v15 }
 0x2c1   : > { %v3076_v17 = vld [vmem:[%s19910_s15 + $0x2760] sm:$0xff]  ;;  %14646 = vmatpush2.bf16.msra.mxu1 %v18524_v22 }
 0x2c2   : > { %v18517_v30 = vcombine.high %v3072_v16, %v3076_v17  ;;  %v2936_v31 = vld [vmem:[%s19910_s15 + $0x2300] sm:$0xff]  ;;  %14606 = vmatprep.subr.bf16.mxu0 %v18389_v29  ;;  %v18516_v40 = vcombine.low %v3072_v16, %v3076_v17 }
 0x2c3   : > { %v2940_v32 = vld [vmem:[%s19910_s15 + $0x2320] sm:$0xff]  ;;  %14607 = vmatpush2.bf16.msra.mxu0 %v18388_v37 }
 0x2c4   : > { %v3064_v33 = vld [vmem:[%s19910_s15 + $0x2700] sm:$0xff]  ;;  %v18381_v42 = vcombine.high %v2936_v31, %v2940_v32  ;;  %14647 = vmatprep.subr.bf16.mxu1 %v18517_v30  ;;  %v18380_v47 = vcombine.low %v2936_v31, %v2940_v32 }
 0x2c5   : > { %v3068_v57 = vld [vmem:[%s19910_s15 + $0x2720] sm:$0xff]  ;;  %14648 = vmatpush2.bf16.msra.mxu1 %v18516_v40 }
 0x2c6   : > { %v18509_v3 = vcombine.high %v3064_v33, %v3068_v57  ;;  %v2928_v44 = vld [vmem:[%s19910_s15 + $0x22c0] sm:$0xff]  ;;  %14608 = vmatprep.subr.bf16.mxu0 %v18381_v42  ;;  %v18508_v49 = vcombine.low %v3064_v33, %v3068_v57 }
 0x2c7   : > { %v2932_v45 = vld [vmem:[%s19910_s15 + $0x22e0] sm:$0xff]  ;;  %14609 = vmatpush2.bf16.msra.mxu0 %v18380_v47 }
 0x2c8   : > { %v3056_v4 = vld [vmem:[%s19910_s15 + $0x26c0] sm:$0xff]  ;;  %v18373_v51 = vcombine.high %v2928_v44, %v2932_v45  ;;  %14649 = vmatprep.subr.bf16.mxu1 %v18509_v3  ;;  %v18372_v59 = vcombine.low %v2928_v44, %v2932_v45 }
 0x2c9   : > { %v3060_v48 = vld [vmem:[%s19910_s15 + $0x26e0] sm:$0xff]  ;;  %14650 = vmatpush2.bf16.msra.mxu1 %v18508_v49 }
 0x2ca   : > { %v18501_v52 = vcombine.high %v3056_v4, %v3060_v48  ;;  %v2920_v11 = vld [vmem:[%s19910_s15 + $0x2280] sm:$0xff]  ;;  %14610 = vmatprep.subr.bf16.mxu0 %v18373_v51  ;;  %v18500_v60 = vcombine.low %v3056_v4, %v3060_v48  ;;  %v20480_v48 = vcombine.low %v20388_v24, %v20388_v24  ;;  %v20484_v51 = vld [vmem:[#allocation2 + $0x10] sm:$0xff] }
 0x2cb   : > { %v2924_v54 = vld [vmem:[%s19910_s15 + $0x22a0] sm:$0xff]  ;;  %14611 = vmatpush2.bf16.msra.mxu0 %v18372_v59 }
 0x2cc   : > { %v3048_v56 = vld [vmem:[%s19910_s15 + $0x2680] sm:$0xff]  ;;  %v18365_v61 = vcombine.high %v2920_v11, %v2924_v54  ;;  %14651 = vmatprep.subr.bf16.mxu1 %v18501_v52  ;;  %v18364_v6 = vcombine.low %v2920_v11, %v2924_v54  ;;  %v20488_v52 = vcombine.low %v20396_v28, %v20396_v28  ;;  %v20490_v54 = vld [vmem:[#allocation2 + $0x38] sm:$0xff] }
 0x2cd   : > { %v3052_v58 = vld [vmem:[%s19910_s15 + $0x26a0] sm:$0xff]  ;;  %14652 = vmatpush2.bf16.msra.mxu1 %v18500_v60 }
 0x2ce   : > { %v18493_v41 = vcombine.high %v3048_v56, %v3052_v58  ;;  %v2912_v63 = vld [vmem:[%s19910_s15 + $0x2240] sm:$0xff]  ;;  %14612 = vmatprep.subr.bf16.mxu0 %v18365_v61  ;;  %v18492_v13 = vcombine.low %v3048_v56, %v3052_v58  ;;  %v20496_v61 = vcombine.high %v20484_v51, %v20484_v51 }
 0x2cf   : > { %v2916_v18 = vld [vmem:[%s19910_s15 + $0x2260] sm:$0xff]  ;;  %14613 = vmatpush2.bf16.msra.mxu0 %v18364_v6 }
 0x2d0   : > { %v3040_v2 = vld [vmem:[%s19910_s15 + $0x2640] sm:$0xff]  ;;  %v18357_v14 = vcombine.high %v2912_v63, %v2916_v18  ;;  %14653 = vmatprep.subr.bf16.mxu1 %v18493_v41  ;;  %v18356_v22 = vcombine.low %v2912_v63, %v2916_v18  ;;  %v20503_v18 = vcombine.high %v20490_v54, %v20490_v54 }
 0x2d1   : > { %v3044_v21 = vld [vmem:[%s19910_s15 + $0x2660] sm:$0xff]  ;;  %14654 = vmatpush2.bf16.msra.mxu1 %v18492_v13 }
 0x2d2   : > { %v18485_v23 = vcombine.high %v3040_v2, %v3044_v21  ;;  %v2904_v15 = vld [vmem:[%s19910_s15 + $0x2200] sm:$0xff]  ;;  %14614 = vmatprep.subr.bf16.mxu0 %v18357_v14  ;;  %v18484_v29 = vcombine.low %v3040_v2, %v3044_v21 }
 0x2d3   : > { %v2908_v16 = vld [vmem:[%s19910_s15 + $0x2220] sm:$0xff]  ;;  %14615 = vmatpush2.bf16.msra.mxu0 %v18356_v22 }
 0x2d4   : > { %v3032_v17 = vld [vmem:[%s19910_s15 + $0x2600] sm:$0xff]  ;;  %v18349_v30 = vcombine.high %v2904_v15, %v2908_v16  ;;  %14655 = vmatprep.subr.bf16.mxu1 %v18485_v23  ;;  %v18348_v40 = vcombine.low %v2904_v15, %v2908_v16 }
 0x2d5   : > { %v3036_v20 = vld [vmem:[%s19910_s15 + $0x2620] sm:$0xff]  ;;  %14656 = vmatpush2.bf16.msra.mxu1 %v18484_v29 }
 0x2d6   : > { %v18477_v31 = vcombine.high %v3032_v17, %v3036_v20  ;;  %v3152_v32 = vld [vmem:[%s19910_s15 + $0x29c0] sm:$0xff]  ;;  %14616 = vmatprep.subr.bf16.mxu0 %v18349_v30  ;;  %v18476_v42 = vcombine.low %v3032_v17, %v3036_v20  ;;  %v14374_v41 = vpop.f32.mrf.mxu0 }
 0x2d7   : > { %v3156_v33 = vld [vmem:[%s19910_s15 + $0x29e0] sm:$0xff]  ;;  %14617 = vmatpush2.bf16.msra.mxu0 %v18348_v40  ;;  %v14375_v2 = vadd.f32 %v14374_v41, %v20414_v43 }
 0x2d8   : > { %v3280_v57 = vld [vmem:[%s19910_s15 + $0x2dc0] sm:$0xff]  ;;  %v18597_v3 = vcombine.high %v3152_v32, %v3156_v33  ;;  %14657 = vmatprep.subr.bf16.mxu1 %v18477_v31  ;;  %v18596_v11 = vcombine.low %v3152_v32, %v3156_v33  ;;  %v14415_v21 = vpop.f32.mrf.mxu1  ;;  %v14376_v13 = vpop.f32.mrf.mxu0 }
 0x2d9   : > { %v3284_v37 = vld [vmem:[%s19910_s15 + $0x2de0] sm:$0xff]  ;;  %14658 = vmatpush2.bf16.msra.mxu1 %v18476_v42  ;;  %v20507_v15 = vadd.f32 %v14415_v21, %v14375_v2  ;;  %v14377_v16 = vadd.f32 %v14376_v13, %v20422_v10 }
 0x2da   : > { %v18725_v44 = vcombine.high %v3280_v57, %v3284_v37  ;;  %v3144_v45 = vld [vmem:[%s19910_s15 + $0x2980] sm:$0xff]  ;;  %14668 = vmatprep.subr.bf16.mxu0 %v18597_v3  ;;  %v18724_v56 = vcombine.low %v3280_v57, %v3284_v37  ;;  %14619 = vmatmul.mubr.bf16.vlgmr.msra.gmra.mxu0 %v20480_v48  ;;  %v14417_v17 = vpop.f32.mrf.mxu1  ;;  %v14378_v29 = vpop.f32.mrf.mxu0 }
 0x2db   : > { %v3148_v4 = vld [vmem:[%s19910_s15 + $0x29a0] sm:$0xff]  ;;  %14669 = vmatpush1.bf16.msra.mxu0 %v18596_v11  ;;  %14700 = vmatprep.mubr.bf16.mxu0 %v20496_v61  ;;  %v20516_v32 = vadd.f32 %v14417_v17, %v14377_v16 }
 0x2dc   : > { %v3272_v47 = vld [vmem:[%s19910_s15 + $0x2d80] sm:$0xff]  ;;  %v18589_v58 = vcombine.high %v3144_v45, %v3148_v4  ;;  %14709 = vmatprep.subr.bf16.mxu1 %v18725_v44  ;;  %14660 = vmatmul.mubr.bf16.vlgmr.msra.gmra.mxu1 %v20488_v52  ;;  %v18588_v6 = vcombine.low %v3144_v45, %v3148_v4  ;;  %v14419_v33 = vpop.f32.mrf.mxu1  ;;  %v14379_v57 = vpop.f32.mrf.mxu0 }
 0x2dd   : > { %v3276_v49 = vld [vmem:[%s19910_s15 + $0x2da0] sm:$0xff]  ;;  %14710 = vmatpush1.bf16.msra.mxu1 %v18724_v56  ;;  %14741 = vmatprep.mubr.bf16.mxu1 %v20503_v18 }
 0x2de   : > { %v18717_v24 = vcombine.high %v3272_v47, %v3276_v49  ;;  %v3136_v59 = vld [vmem:[%s19910_s15 + $0x2940] sm:$0xff]  ;;  %14670 = vmatprep.subr.bf16.mxu0 %v18589_v58  ;;  %v18716_v14 = vcombine.low %v3272_v47, %v3276_v49  ;;  %v14420_v42 = vpop.f32.mrf.mxu1 }
 0x2df   : > { %v3140_v60 = vld [vmem:[%s19910_s15 + $0x2960] sm:$0xff]  ;;  %14671 = vmatpush1.bf16.msra.mxu0 %v18588_v6 }
 0x2e0   : > { %v3264_v28 = vld [vmem:[%s19910_s15 + $0x2d40] sm:$0xff]  ;;  %v18581_v23 = vcombine.high %v3136_v59, %v3140_v60  ;;  %14711 = vmatprep.subr.bf16.mxu1 %v18717_v24  ;;  %v18580_v10 = vcombine.low %v3136_v59, %v3140_v60 }
 0x2e1   : > { %v3268_v63 = vld [vmem:[%s19910_s15 + $0x2d60] sm:$0xff]  ;;  %14712 = vmatpush1.bf16.msra.mxu1 %v18716_v14 }
 0x2e2   : > { %v18709_v43 = vcombine.high %v3264_v28, %v3268_v63  ;;  %v3128_v20 = vld [vmem:[%s19910_s15 + $0x2900] sm:$0xff]  ;;  %14672 = vmatprep.subr.bf16.mxu0 %v18581_v23  ;;  %v18708_v37 = vcombine.low %v3264_v28, %v3268_v63 }
 0x2e3   : > { %v3132_v22 = vld [vmem:[%s19910_s15 + $0x2920] sm:$0xff]  ;;  %14673 = vmatpush1.bf16.msra.mxu0 %v18580_v10 }
 0x2e4   : > { %v3256_v30 = vld [vmem:[%s19910_s15 + $0x2d00] sm:$0xff]  ;;  %v18573_v40 = vcombine.high %v3128_v20, %v3132_v22  ;;  %14713 = vmatprep.subr.bf16.mxu1 %v18709_v43  ;;  %v18572_v49 = vcombine.low %v3128_v20, %v3132_v22 }
 0x2e5   : > { %v3260_v31 = vld [vmem:[%s19910_s15 + $0x2d20] sm:$0xff]  ;;  %14714 = vmatpush1.bf16.msra.mxu1 %v18708_v37 }
 0x2e6   : > { %v18701_v3 = vcombine.high %v3256_v30, %v3260_v31  ;;  %v3120_v44 = vld [vmem:[%s19910_s15 + $0x28c0] sm:$0xff]  ;;  %14674 = vmatprep.subr.bf16.mxu0 %v18573_v40  ;;  %v18700_v11 = vcombine.low %v3256_v30, %v3260_v31 }
 0x2e7   : > { %v3124_v45 = vld [vmem:[%s19910_s15 + $0x28e0] sm:$0xff]  ;;  %14675 = vmatpush1.bf16.msra.mxu0 %v18572_v49 }
 0x2e8   : > { %v3248_v4 = vld [vmem:[%s19910_s15 + $0x2cc0] sm:$0xff]  ;;  %v18565_v56 = vcombine.high %v3120_v44, %v3124_v45  ;;  %14715 = vmatprep.subr.bf16.mxu1 %v18701_v3  ;;  %v18564_v28 = vcombine.low %v3120_v44, %v3124_v45 }
 0x2e9   : > { %v3252_v47 = vld [vmem:[%s19910_s15 + $0x2ce0] sm:$0xff]  ;;  %14716 = vmatpush1.bf16.msra.mxu1 %v18700_v11 }
 0x2ea   : > { %v18693_v58 = vcombine.high %v3248_v4, %v3252_v47  ;;  %v3112_v24 = vld [vmem:[%s19910_s15 + $0x2880] sm:$0xff]  ;;  %14676 = vmatprep.subr.bf16.mxu0 %v18565_v56  ;;  %v18692_v63 = vcombine.low %v3248_v4, %v3252_v47 }
 0x2eb   : > { %v3116_v59 = vld [vmem:[%s19910_s15 + $0x28a0] sm:$0xff]  ;;  %14677 = vmatpush1.bf16.msra.mxu0 %v18564_v28 }
 0x2ec   : > { %v3240_v60 = vld [vmem:[%s19910_s15 + $0x2c80] sm:$0xff]  ;;  %v18557_v2 = vcombine.high %v3112_v24, %v3116_v59  ;;  %14717 = vmatprep.subr.bf16.mxu1 %v18693_v58  ;;  %v18556_v16 = vcombine.low %v3112_v24, %v3116_v59 }
 0x2ed   : > { %v3244_v41 = vld [vmem:[%s19910_s15 + $0x2ca0] sm:$0xff]  ;;  %14718 = vmatpush1.bf16.msra.mxu1 %v18692_v63 }
 0x2ee   : > { %v18685_v21 = vcombine.high %v3240_v60, %v3244_v41  ;;  %v3104_v6 = vld [vmem:[%s19910_s15 + $0x2840] sm:$0xff]  ;;  %14678 = vmatprep.subr.bf16.mxu0 %v18557_v2  ;;  %v18684_v17 = vcombine.low %v3240_v60, %v3244_v41 }
 0x2ef   : > { %v3108_v13 = vld [vmem:[%s19910_s15 + $0x2860] sm:$0xff]  ;;  %14679 = vmatpush1.bf16.msra.mxu0 %v18556_v16 }
 0x2f0   : > { %v3232_v14 = vld [vmem:[%s19910_s15 + $0x2c40] sm:$0xff]  ;;  %v18549_v43 = vcombine.high %v3104_v6, %v3108_v13  ;;  %14719 = vmatprep.subr.bf16.mxu1 %v18685_v21  ;;  %v18548_v33 = vcombine.low %v3104_v6, %v3108_v13 }
 0x2f1   : > { %v3236_v23 = vld [vmem:[%s19910_s15 + $0x2c60] sm:$0xff]  ;;  %14720 = vmatpush1.bf16.msra.mxu1 %v18684_v17 }
 0x2f2   : > { %v18677_v20 = vcombine.high %v3232_v14, %v3236_v23  ;;  %v3096_v22 = vld [vmem:[%s19910_s15 + $0x2800] sm:$0xff]  ;;  %14680 = vmatprep.subr.bf16.mxu0 %v18549_v43  ;;  %v18676_v10 = vcombine.low %v3232_v14, %v3236_v23 }
 0x2f3   : > { %v3100_v29 = vld [vmem:[%s19910_s15 + $0x2820] sm:$0xff]  ;;  %14681 = vmatpush1.bf16.msra.mxu0 %v18548_v33 }
 0x2f4   : > { %v3224_v30 = vld [vmem:[%s19910_s15 + $0x2c00] sm:$0xff]  ;;  %v18541_v57 = vcombine.high %v3096_v22, %v3100_v29  ;;  %14721 = vmatprep.subr.bf16.mxu1 %v18677_v20  ;;  %v18540_v45 = vcombine.low %v3096_v22, %v3100_v29 }
 0x2f5   : > { %v3228_v31 = vld [vmem:[%s19910_s15 + $0x2c20] sm:$0xff]  ;;  %14722 = vmatpush1.bf16.msra.mxu1 %v18676_v10 }
 0x2f6   : > { %v18669_v37 = vcombine.high %v3224_v30, %v3228_v31  ;;  %v3216_v40 = vld [vmem:[%s19910_s15 + $0x2bc0] sm:$0xff]  ;;  %14682 = vmatprep.subr.bf16.mxu0 %v18541_v57  ;;  %v18668_v4 = vcombine.low %v3224_v30, %v3228_v31 }
 0x2f7   : > { %v3220_v42 = vld [vmem:[%s19910_s15 + $0x2be0] sm:$0xff]  ;;  %14683 = vmatpush1.bf16.msra.mxu0 %v18540_v45 }
 0x2f8   : > { %v3344_v3 = vld [vmem:[%s19910_s15 + $0x2fc0] sm:$0xff]  ;;  %v18661_v47 = vcombine.high %v3216_v40, %v3220_v42  ;;  %14723 = vmatprep.subr.bf16.mxu1 %v18669_v37  ;;  %v18660_v59 = vcombine.low %v3216_v40, %v3220_v42 }
 0x2f9   : > { %v3348_v44 = vld [vmem:[%s19910_s15 + $0x2fe0] sm:$0xff]  ;;  %14724 = vmatpush1.bf16.msra.mxu1 %v18668_v4 }
 0x2fa   : > { %v18789_v49 = vcombine.high %v3344_v3, %v3348_v44  ;;  %v3208_v11 = vld [vmem:[%s19910_s15 + $0x2b80] sm:$0xff]  ;;  %14684 = vmatprep.subr.bf16.mxu0 %v18661_v47  ;;  %v18788_v60 = vcombine.low %v3344_v3, %v3348_v44 }
 0x2fb   : > { %v3212_v56 = vld [vmem:[%s19910_s15 + $0x2ba0] sm:$0xff]  ;;  %14685 = vmatpush2.bf16.msra.mxu0 %v18660_v59 }
 0x2fc   : > { %v3336_v58 = vld [vmem:[%s19910_s15 + $0x2f80] sm:$0xff]  ;;  %v18653_v41 = vcombine.high %v3208_v11, %v3212_v56  ;;  %14725 = vmatprep.subr.bf16.mxu1 %v18789_v49  ;;  %v18652_v13 = vcombine.low %v3208_v11, %v3212_v56 }
 0x2fd   : > { %v3340_v24 = vld [vmem:[%s19910_s15 + $0x2fa0] sm:$0xff]  ;;  %14726 = vmatpush2.bf16.msra.mxu1 %v18788_v60 }
 0x2fe   : > { %v18781_v28 = vcombine.high %v3336_v58, %v3340_v24  ;;  %v3200_v63 = vld [vmem:[%s19910_s15 + $0x2b40] sm:$0xff]  ;;  %14686 = vmatprep.subr.bf16.mxu0 %v18653_v41  ;;  %v18780_v14 = vcombine.low %v3336_v58, %v3340_v24 }
 0x2ff   : > { %v3204_v2 = vld [vmem:[%s19910_s15 + $0x2b60] sm:$0xff]  ;;  %14687 = vmatpush2.bf16.msra.mxu0 %v18652_v13 }
 0x300   : > { %v3328_v21 = vld [vmem:[%s19910_s15 + $0x2f40] sm:$0xff]  ;;  %v18645_v23 = vcombine.high %v3200_v63, %v3204_v2  ;;  %14727 = vmatprep.subr.bf16.mxu1 %v18781_v28  ;;  %v18644_v29 = vcombine.low %v3200_v63, %v3204_v2 }
 0x301   : > { %v3332_v6 = vld [vmem:[%s19910_s15 + $0x2f60] sm:$0xff]  ;;  %14728 = vmatpush2.bf16.msra.mxu1 %v18780_v14 }
 0x302   : > { %v18773_v16 = vcombine.high %v3328_v21, %v3332_v6  ;;  %v3192_v17 = vld [vmem:[%s19910_s15 + $0x2b00] sm:$0xff]  ;;  %14688 = vmatprep.subr.bf16.mxu0 %v18645_v23  ;;  %v18772_v30 = vcombine.low %v3328_v21, %v3332_v6 }
 0x303   : > { %v3196_v43 = vld [vmem:[%s19910_s15 + $0x2b20] sm:$0xff]  ;;  %14689 = vmatpush2.bf16.msra.mxu0 %v18644_v29 }
 0x304   : > { %v3320_v20 = vld [vmem:[%s19910_s15 + $0x2f00] sm:$0xff]  ;;  %v18637_v31 = vcombine.high %v3192_v17, %v3196_v43  ;;  %14729 = vmatprep.subr.bf16.mxu1 %v18773_v16  ;;  %v18636_v42 = vcombine.low %v3192_v17, %v3196_v43 }
 0x305   : > { %v3324_v22 = vld [vmem:[%s19910_s15 + $0x2f20] sm:$0xff]  ;;  %14730 = vmatpush2.bf16.msra.mxu1 %v18772_v30 }
 0x306   : > { %v18765_v33 = vcombine.high %v3320_v20, %v3324_v22  ;;  %v3184_v10 = vld [vmem:[%s19910_s15 + $0x2ac0] sm:$0xff]  ;;  %14690 = vmatprep.subr.bf16.mxu0 %v18637_v31  ;;  %v18764_v3 = vcombine.low %v3320_v20, %v3324_v22 }
 0x307   : > { %v3188_v57 = vld [vmem:[%s19910_s15 + $0x2ae0] sm:$0xff]  ;;  %14691 = vmatpush2.bf16.msra.mxu0 %v18636_v42 }
 0x308   : > { %v3312_v37 = vld [vmem:[%s19910_s15 + $0x2ec0] sm:$0xff]  ;;  %v18629_v44 = vcombine.high %v3184_v10, %v3188_v57  ;;  %14731 = vmatprep.subr.bf16.mxu1 %v18765_v33  ;;  %v18628_v56 = vcombine.low %v3184_v10, %v3188_v57 }
 0x309   : > { %v3316_v40 = vld [vmem:[%s19910_s15 + $0x2ee0] sm:$0xff]  ;;  %14732 = vmatpush2.bf16.msra.mxu1 %v18764_v3 }
 0x30a   : > { %v18757_v45 = vcombine.high %v3312_v37, %v3316_v40  ;;  %v3176_v4 = vld [vmem:[%s19910_s15 + $0x2a80] sm:$0xff]  ;;  %14692 = vmatprep.subr.bf16.mxu0 %v18629_v44  ;;  %v18756_v58 = vcombine.low %v3312_v37, %v3316_v40 }
 0x30b   : > { %v3180_v47 = vld [vmem:[%s19910_s15 + $0x2aa0] sm:$0xff]  ;;  %14693 = vmatpush2.bf16.msra.mxu0 %v18628_v56 }
 0x30c   : > { %v3304_v49 = vld [vmem:[%s19910_s15 + $0x2e80] sm:$0xff]  ;;  %v18621_v24 = vcombine.high %v3176_v4, %v3180_v47  ;;  %14733 = vmatprep.subr.bf16.mxu1 %v18757_v45  ;;  %v18620_v2 = vcombine.low %v3176_v4, %v3180_v47  ;;  %v20574_v45 = vcombine.low %v20484_v51, %v20484_v51 }
 0x30d   : > { %v3308_v11 = vld [vmem:[%s19910_s15 + $0x2ea0] sm:$0xff]  ;;  %14734 = vmatpush2.bf16.msra.mxu1 %v18756_v58  ;;  %v20584_v58 = vld [vmem:[#allocation2 + $0x70] sm:$0xff] }
 0x30e   : > { %v18749_v59 = vcombine.high %v3304_v49, %v3308_v11  ;;  %v3168_v60 = vld [vmem:[%s19910_s15 + $0x2a40] sm:$0xff]  ;;  %14694 = vmatprep.subr.bf16.mxu0 %v18621_v24  ;;  %v18748_v21 = vcombine.low %v3304_v49, %v3308_v11  ;;  %v20578_v49 = vld [vmem:[#allocation2 + $0x60] sm:$0xff]  ;;  %v20582_v11 = vcombine.low %v20490_v54, %v20490_v54 }
 0x30f   : > { %v3172_v41 = vld [vmem:[%s19910_s15 + $0x2a60] sm:$0xff]  ;;  %14695 = vmatpush2.bf16.msra.mxu0 %v18620_v2 }
 0x310   : > { %v3296_v28 = vld [vmem:[%s19910_s15 + $0x2e40] sm:$0xff]  ;;  %v18613_v6 = vcombine.high %v3168_v60, %v3172_v41  ;;  %14735 = vmatprep.subr.bf16.mxu1 %v18749_v59  ;;  %v18612_v43 = vcombine.low %v3168_v60, %v3172_v41 }
 0x311   : > { %v3300_v63 = vld [vmem:[%s19910_s15 + $0x2e60] sm:$0xff]  ;;  %14736 = vmatpush2.bf16.msra.mxu1 %v18748_v21  ;;  %v20597_v21 = vcombine.high %v20584_v58, %v20584_v58 }
 0x312   : > { %v18741_v13 = vcombine.high %v3296_v28, %v3300_v63  ;;  %v3160_v14 = vld [vmem:[%s19910_s15 + $0x2a00] sm:$0xff]  ;;  %14696 = vmatprep.subr.bf16.mxu0 %v18613_v6  ;;  %v18740_v20 = vcombine.low %v3296_v28, %v3300_v63  ;;  %v20590_v28 = vcombine.high %v20578_v49, %v20578_v49 }
 0x313   : > { %v3164_v23 = vld [vmem:[%s19910_s15 + $0x2a20] sm:$0xff]  ;;  %14697 = vmatpush2.bf16.msra.mxu0 %v18612_v43 }
 0x314   : > { %v3288_v16 = vld [vmem:[%s19910_s15 + $0x2e00] sm:$0xff]  ;;  %v18605_v22 = vcombine.high %v3160_v14, %v3164_v23  ;;  %14737 = vmatprep.subr.bf16.mxu1 %v18741_v13  ;;  %v18604_v57 = vcombine.low %v3160_v14, %v3164_v23 }
 0x315   : > { %v3292_v17 = vld [vmem:[%s19910_s15 + $0x2e20] sm:$0xff]  ;;  %14738 = vmatpush2.bf16.msra.mxu1 %v18740_v20 }
 0x316   : > { %v18733_v29 = vcombine.high %v3288_v16, %v3292_v17  ;;  %v3408_v30 = vld [vmem:[%s19910_s15 + $0x31c0] sm:$0xff]  ;;  %14698 = vmatprep.subr.bf16.mxu0 %v18605_v22  ;;  %v18732_v37 = vcombine.low %v3288_v16, %v3292_v17 }
 0x317   : > { %v3412_v31 = vld [vmem:[%s19910_s15 + $0x31e0] sm:$0xff]  ;;  %14699 = vmatpush2.bf16.msra.mxu0 %v18604_v57  ;;  %v14456_v63 = vpop.f32.mrf.mxu0 }
 0x318   : > { %v3536_v33 = vld [vmem:[%s19910_s15 + $0x35c0] sm:$0xff]  ;;  %v18853_v40 = vcombine.high %v3408_v30, %v3412_v31  ;;  %14739 = vmatprep.subr.bf16.mxu1 %v18733_v29  ;;  %v18852_v56 = vcombine.low %v3408_v30, %v3412_v31  ;;  %v14457_v6 = vadd.f32 %v14456_v63, %v20507_v15 }
 0x319   : > { %v3540_v10 = vld [vmem:[%s19910_s15 + $0x35e0] sm:$0xff]  ;;  %14740 = vmatpush2.bf16.msra.mxu1 %v18732_v37  ;;  %v14497_v13 = vpop.f32.mrf.mxu1  ;;  %v14458_v23 = vpop.f32.mrf.mxu0 }
 0x31a   : > { %v18981_v42 = vcombine.high %v3536_v33, %v3540_v10  ;;  %v3400_v3 = vld [vmem:[%s19910_s15 + $0x3180] sm:$0xff]  ;;  %14750 = vmatprep.subr.bf16.mxu0 %v18853_v40  ;;  %v18980_v24 = vcombine.low %v3536_v33, %v3540_v10  ;;  %14701 = vmatmul.mubr.bf16.vlgmr.msra.gmra.mxu0 %v20574_v45  ;;  %v20601_v43 = vadd.f32 %v14497_v13, %v14457_v6 }
 0x31b   : > { %v3404_v44 = vld [vmem:[%s19910_s15 + $0x31a0] sm:$0xff]  ;;  %14751 = vmatpush1.bf16.msra.mxu0 %v18852_v56  ;;  %v14459_v20 = vadd.f32 %v14458_v23, %v20516_v32  ;;  %v14499_v22 = vpop.f32.mrf.mxu1  ;;  %14782 = vmatprep.mubr.bf16.mxu0 %v20590_v28  ;;  %v14460_v31 = vpop.f32.mrf.mxu0 }
 0x31c   : > { %v3528_v4 = vld [vmem:[%s19910_s15 + $0x3580] sm:$0xff]  ;;  %v18845_v59 = vcombine.high %v3400_v3, %v3404_v44  ;;  %14791 = vmatprep.subr.bf16.mxu1 %v18981_v42  ;;  %14742 = vmatmul.mubr.bf16.vlgmr.msra.gmra.mxu1 %v20582_v11  ;;  %v18844_v14 = vcombine.low %v3400_v3, %v3404_v44 }
 0x31d   : > { %v3532_v47 = vld [vmem:[%s19910_s15 + $0x35a0] sm:$0xff]  ;;  %14792 = vmatpush1.bf16.msra.mxu1 %v18980_v24  ;;  %14823 = vmatprep.mubr.bf16.mxu1 %v20597_v21  ;;  %v20610_v57 = vadd.f32 %v14499_v22, %v14459_v20  ;;  %v14501_v37 = vpop.f32.mrf.mxu1  ;;  %v14461_v40 = vpop.f32.mrf.mxu0 }
 0x31e   : > { %v18973_v51 = vcombine.high %v3528_v4, %v3532_v47  ;;  %v3392_v60 = vld [vmem:[%s19910_s15 + $0x3140] sm:$0xff]  ;;  %14752 = vmatprep.subr.bf16.mxu0 %v18845_v59  ;;  %v18972_v16 = vcombine.low %v3528_v4, %v3532_v47 }
 0x31f   : > { %v3396_v41 = vld [vmem:[%s19910_s15 + $0x3160] sm:$0xff]  ;;  %14753 = vmatpush1.bf16.msra.mxu0 %v18844_v14  ;;  %v14502_v44 = vpop.f32.mrf.mxu1 }
 0x320   : > { %v3520_v54 = vld [vmem:[%s19910_s15 + $0x3540] sm:$0xff]  ;;  %v18837_v17 = vcombine.high %v3392_v60, %v3396_v41  ;;  %14793 = vmatprep.subr.bf16.mxu1 %v18973_v51  ;;  %v18836_v32 = vcombine.low %v3392_v60, %v3396_v41 }
 0x321   : > { %v3524_v2 = vld [vmem:[%s19910_s15 + $0x3560] sm:$0xff]  ;;  %14794 = vmatpush1.bf16.msra.mxu1 %v18972_v16 }
 0x322   : > { %v18965_v15 = vcombine.high %v3520_v54, %v3524_v2  ;;  %v3384_v29 = vld [vmem:[%s19910_s15 + $0x3100] sm:$0xff]  ;;  %14754 = vmatprep.subr.bf16.mxu0 %v18837_v17  ;;  %v18964_v42 = vcombine.low %v3520_v54, %v3524_v2 }
 0x323   : > { %v3388_v30 = vld [vmem:[%s19910_s15 + $0x3120] sm:$0xff]  ;;  %14755 = vmatpush1.bf16.msra.mxu0 %v18836_v32 }
 0x324   : > { %v3512_v33 = vld [vmem:[%s19910_s15 + $0x3500] sm:$0xff]  ;;  %v18829_v3 = vcombine.high %v3384_v29, %v3388_v30  ;;  %14795 = vmatprep.subr.bf16.mxu1 %v18965_v15  ;;  %v18828_v51 = vcombine.low %v3384_v29, %v3388_v30 }
 0x325   : > { %v3516_v10 = vld [vmem:[%s19910_s15 + $0x3520] sm:$0xff]  ;;  %14796 = vmatpush1.bf16.msra.mxu1 %v18964_v42 }
 0x326   : > { %v18957_v4 = vcombine.high %v3512_v33, %v3516_v10  ;;  %v3376_v47 = vld [vmem:[%s19910_s15 + $0x30c0] sm:$0xff]  ;;  %14756 = vmatprep.subr.bf16.mxu0 %v18829_v3  ;;  %v18956_v60 = vcombine.low %v3512_v33, %v3516_v10 }
 0x327   : > { %v3380_v56 = vld [vmem:[%s19910_s15 + $0x30e0] sm:$0xff]  ;;  %14757 = vmatpush1.bf16.msra.mxu0 %v18828_v51 }
 0x328   : > { %v3504_v24 = vld [vmem:[%s19910_s15 + $0x34c0] sm:$0xff]  ;;  %v18821_v41 = vcombine.high %v3376_v47, %v3380_v56  ;;  %14797 = vmatprep.subr.bf16.mxu1 %v18957_v4  ;;  %v18820_v14 = vcombine.low %v3376_v47, %v3380_v56 }
 0x329   : > { %v3508_v59 = vld [vmem:[%s19910_s15 + $0x34e0] sm:$0xff]  ;;  %14798 = vmatpush1.bf16.msra.mxu1 %v18956_v60 }
 0x32a   : > { %v18949_v63 = vcombine.high %v3504_v24, %v3508_v59  ;;  %v3368_v54 = vld [vmem:[%s19910_s15 + $0x3080] sm:$0xff]  ;;  %14758 = vmatprep.subr.bf16.mxu0 %v18821_v41  ;;  %v18948_v23 = vcombine.low %v3504_v24, %v3508_v59 }
 0x32b   : > { %v3372_v2 = vld [vmem:[%s19910_s15 + $0x30a0] sm:$0xff]  ;;  %14759 = vmatpush1.bf16.msra.mxu0 %v18820_v14 }
 0x32c   : > { %v3496_v6 = vld [vmem:[%s19910_s15 + $0x3480] sm:$0xff]  ;;  %v18813_v16 = vcombine.high %v3368_v54, %v3372_v2  ;;  %14799 = vmatprep.subr.bf16.mxu1 %v18949_v63  ;;  %v18812_v30 = vcombine.low %v3368_v54, %v3372_v2 }
 0x32d   : > { %v3500_v13 = vld [vmem:[%s19910_s15 + $0x34a0] sm:$0xff]  ;;  %14800 = vmatpush1.bf16.msra.mxu1 %v18948_v23 }
 0x32e   : > { %v18941_v17 = vcombine.high %v3496_v6, %v3500_v13  ;;  %v3360_v20 = vld [vmem:[%s19910_s15 + $0x3040] sm:$0xff]  ;;  %14760 = vmatprep.subr.bf16.mxu0 %v18813_v16  ;;  %v18940_v31 = vcombine.low %v3496_v6, %v3500_v13 }
 0x32f   : > { %v3364_v22 = vld [vmem:[%s19910_s15 + $0x3060] sm:$0xff]  ;;  %14761 = vmatpush1.bf16.msra.mxu0 %v18812_v30 }
 0x330   : > { %v3488_v15 = vld [vmem:[%s19910_s15 + $0x3440] sm:$0xff]  ;;  %v18805_v33 = vcombine.high %v3360_v20, %v3364_v22  ;;  %14801 = vmatprep.subr.bf16.mxu1 %v18941_v17  ;;  %v18804_v3 = vcombine.low %v3360_v20, %v3364_v22 }
 0x331   : > { %v3492_v29 = vld [vmem:[%s19910_s15 + $0x3460] sm:$0xff]  ;;  %14802 = vmatpush1.bf16.msra.mxu1 %v18940_v31 }
 0x332   : > { %v18933_v10 = vcombine.high %v3488_v15, %v3492_v29  ;;  %v3352_v37 = vld [vmem:[%s19910_s15 + $0x3000] sm:$0xff]  ;;  %14762 = vmatprep.subr.bf16.mxu0 %v18805_v33  ;;  %v18932_v44 = vcombine.low %v3488_v15, %v3492_v29 }
 0x333   : > { %v3356_v32 = vld [vmem:[%s19910_s15 + $0x3020] sm:$0xff]  ;;  %14763 = vmatpush1.bf16.msra.mxu0 %v18804_v3 }
 0x334   : > { %v3480_v40 = vld [vmem:[%s19910_s15 + $0x3400] sm:$0xff]  ;;  %v18797_v4 = vcombine.high %v3352_v37, %v3356_v32  ;;  %14803 = vmatprep.subr.bf16.mxu1 %v18933_v10  ;;  %v18796_v60 = vcombine.low %v3352_v37, %v3356_v32 }
 0x335   : > { %v3484_v42 = vld [vmem:[%s19910_s15 + $0x3420] sm:$0xff]  ;;  %14804 = vmatpush1.bf16.msra.mxu1 %v18932_v44 }
 0x336   : > { %v18925_v47 = vcombine.high %v3480_v40, %v3484_v42  ;;  %v3472_v56 = vld [vmem:[%s19910_s15 + $0x33c0] sm:$0xff]  ;;  %14764 = vmatprep.subr.bf16.mxu0 %v18797_v4  ;;  %v18924_v41 = vcombine.low %v3480_v40, %v3484_v42 }
 0x337   : > { %v3476_v24 = vld [vmem:[%s19910_s15 + $0x33e0] sm:$0xff]  ;;  %14765 = vmatpush1.bf16.msra.mxu0 %v18796_v60 }
 0x338   : > { %v3600_v59 = vld [vmem:[%s19910_s15 + $0x37c0] sm:$0xff]  ;;  %v18917_v63 = vcombine.high %v3472_v56, %v3476_v24  ;;  %14805 = vmatprep.subr.bf16.mxu1 %v18925_v47  ;;  %v18916_v23 = vcombine.low %v3472_v56, %v3476_v24 }
 0x339   : > { %v3604_v51 = vld [vmem:[%s19910_s15 + $0x37e0] sm:$0xff]  ;;  %14806 = vmatpush1.bf16.msra.mxu1 %v18924_v41 }
 0x33a   : > { %v19045_v54 = vcombine.high %v3600_v59, %v3604_v51  ;;  %v3464_v2 = vld [vmem:[%s19910_s15 + $0x3380] sm:$0xff]  ;;  %14766 = vmatprep.subr.bf16.mxu0 %v18917_v63  ;;  %v19044_v16 = vcombine.low %v3600_v59, %v3604_v51 }
 0x33b   : > { %v3468_v6 = vld [vmem:[%s19910_s15 + $0x33a0] sm:$0xff]  ;;  %14767 = vmatpush2.bf16.msra.mxu0 %v18916_v23 }
 0x33c   : > { %v3592_v13 = vld [vmem:[%s19910_s15 + $0x3780] sm:$0xff]  ;;  %v18909_v17 = vcombine.high %v3464_v2, %v3468_v6  ;;  %14807 = vmatprep.subr.bf16.mxu1 %v19045_v54  ;;  %v18908_v31 = vcombine.low %v3464_v2, %v3468_v6 }
 0x33d   : > { %v3596_v14 = vld [vmem:[%s19910_s15 + $0x37a0] sm:$0xff]  ;;  %14808 = vmatpush2.bf16.msra.mxu1 %v19044_v16 }
 0x33e   : > { %v19037_v20 = vcombine.high %v3592_v13, %v3596_v14  ;;  %v3456_v22 = vld [vmem:[%s19910_s15 + $0x3340] sm:$0xff]  ;;  %14768 = vmatprep.subr.bf16.mxu0 %v18909_v17  ;;  %v19036_v33 = vcombine.low %v3592_v13, %v3596_v14 }
 0x33f   : > { %v3460_v15 = vld [vmem:[%s19910_s15 + $0x3360] sm:$0xff]  ;;  %14769 = vmatpush2.bf16.msra.mxu0 %v18908_v31 }
 0x340   : > { %v3584_v29 = vld [vmem:[%s19910_s15 + $0x3740] sm:$0xff]  ;;  %v18901_v10 = vcombine.high %v3456_v22, %v3460_v15  ;;  %14809 = vmatprep.subr.bf16.mxu1 %v19037_v20  ;;  %v18900_v44 = vcombine.low %v3456_v22, %v3460_v15 }
 0x341   : > { %v3588_v30 = vld [vmem:[%s19910_s15 + $0x3760] sm:$0xff]  ;;  %14810 = vmatpush2.bf16.msra.mxu1 %v19036_v33 }
 0x342   : > { %v19029_v37 = vcombine.high %v3584_v29, %v3588_v30  ;;  %v3448_v32 = vld [vmem:[%s19910_s15 + $0x3300] sm:$0xff]  ;;  %14770 = vmatprep.subr.bf16.mxu0 %v18901_v10  ;;  %v19028_v4 = vcombine.low %v3584_v29, %v3588_v30 }
 0x343   : > { %v3452_v40 = vld [vmem:[%s19910_s15 + $0x3320] sm:$0xff]  ;;  %14771 = vmatpush2.bf16.msra.mxu0 %v18900_v44 }
 0x344   : > { %v3576_v42 = vld [vmem:[%s19910_s15 + $0x3700] sm:$0xff]  ;;  %v18893_v47 = vcombine.high %v3448_v32, %v3452_v40  ;;  %14811 = vmatprep.subr.bf16.mxu1 %v19029_v37  ;;  %v18892_v41 = vcombine.low %v3448_v32, %v3452_v40 }
 0x345   : > { %v3580_v3 = vld [vmem:[%s19910_s15 + $0x3720] sm:$0xff]  ;;  %14812 = vmatpush2.bf16.msra.mxu1 %v19028_v4 }
 0x346   : > { %v19021_v56 = vcombine.high %v3576_v42, %v3580_v3  ;;  %v3440_v24 = vld [vmem:[%s19910_s15 + $0x32c0] sm:$0xff]  ;;  %14772 = vmatprep.subr.bf16.mxu0 %v18893_v47  ;;  %v19020_v63 = vcombine.low %v3576_v42, %v3580_v3 }
 0x347   : > { %v3444_v59 = vld [vmem:[%s19910_s15 + $0x32e0] sm:$0xff]  ;;  %14773 = vmatpush2.bf16.msra.mxu0 %v18892_v41 }
 0x348   : > { %v3568_v51 = vld [vmem:[%s19910_s15 + $0x36c0] sm:$0xff]  ;;  %v18885_v54 = vcombine.high %v3440_v24, %v3444_v59  ;;  %14813 = vmatprep.subr.bf16.mxu1 %v19021_v56  ;;  %v18884_v16 = vcombine.low %v3440_v24, %v3444_v59 }
 0x349   : > { %v3572_v60 = vld [vmem:[%s19910_s15 + $0x36e0] sm:$0xff]  ;;  %14814 = vmatpush2.bf16.msra.mxu1 %v19020_v63 }
 0x34a   : > { %v19013_v2 = vcombine.high %v3568_v51, %v3572_v60  ;;  %v3432_v6 = vld [vmem:[%s19910_s15 + $0x3280] sm:$0xff]  ;;  %14774 = vmatprep.subr.bf16.mxu0 %v18885_v54  ;;  %v19012_v17 = vcombine.low %v3568_v51, %v3572_v60 }
 0x34b   : > { %v3436_v13 = vld [vmem:[%s19910_s15 + $0x32a0] sm:$0xff]  ;;  %14775 = vmatpush2.bf16.msra.mxu0 %v18884_v16 }
 0x34c   : > { %v3560_v14 = vld [vmem:[%s19910_s15 + $0x3680] sm:$0xff]  ;;  %v18877_v20 = vcombine.high %v3432_v6, %v3436_v13  ;;  %14815 = vmatprep.subr.bf16.mxu1 %v19013_v2  ;;  %v18876_v33 = vcombine.low %v3432_v6, %v3436_v13 }
 0x34d   : > { %v3564_v23 = vld [vmem:[%s19910_s15 + $0x36a0] sm:$0xff]  ;;  %14816 = vmatpush2.bf16.msra.mxu1 %v19012_v17 }
 0x34e   : > { %v19005_v22 = vcombine.high %v3560_v14, %v3564_v23  ;;  %v3424_v15 = vld [vmem:[%s19910_s15 + $0x3240] sm:$0xff]  ;;  %14776 = vmatprep.subr.bf16.mxu0 %v18877_v20  ;;  %v19004_v10 = vcombine.low %v3560_v14, %v3564_v23  ;;  %v20668_v23 = vcombine.low %v20578_v49, %v20578_v49  ;;  %v20672_v20 = vld [vmem:[#allocation2 + $0x78] sm:$0xff] }
 0x34f   : > { %v3428_v29 = vld [vmem:[%s19910_s15 + $0x3260] sm:$0xff]  ;;  %14777 = vmatpush2.bf16.msra.mxu0 %v18876_v33 }
 0x350   : > { %v3552_v30 = vld [vmem:[%s19910_s15 + $0x3640] sm:$0xff]  ;;  %v18869_v37 = vcombine.high %v3424_v15, %v3428_v29  ;;  %14817 = vmatprep.subr.bf16.mxu1 %v19005_v22  ;;  %v18868_v4 = vcombine.low %v3424_v15, %v3428_v29  ;;  %v20676_v22 = vcombine.low %v20584_v58, %v20584_v58 }
 0x351   : > { %v3556_v31 = vld [vmem:[%s19910_s15 + $0x3660] sm:$0xff]  ;;  %14818 = vmatpush2.bf16.msra.mxu1 %v19004_v10 }
 0x352   : > { %v18997_v32 = vcombine.high %v3552_v30, %v3556_v31  ;;  %v3416_v40 = vld [vmem:[%s19910_s15 + $0x3200] sm:$0xff]  ;;  %14778 = vmatprep.subr.bf16.mxu0 %v18869_v37  ;;  %v18996_v47 = vcombine.low %v3552_v30, %v3556_v31  ;;  %v20684_v37 = vcombine.high %v20672_v20, %v20672_v20 }
 0x353   : > { %v3420_v42 = vld [vmem:[%s19910_s15 + $0x3220] sm:$0xff]  ;;  %14779 = vmatpush2.bf16.msra.mxu0 %v18868_v4 }
 0x354   : > { %v3544_v3 = vld [vmem:[%s19910_s15 + $0x3600] sm:$0xff]  ;;  %v18861_v56 = vcombine.high %v3416_v40, %v3420_v42  ;;  %14819 = vmatprep.subr.bf16.mxu1 %v18997_v32  ;;  %v18860_v63 = vcombine.low %v3416_v40, %v3420_v42 }
 0x355   : > { %v3548_v44 = vld [vmem:[%s19910_s15 + $0x3620] sm:$0xff]  ;;  %14820 = vmatpush2.bf16.msra.mxu1 %v18996_v47 }
 0x356   : > { %v18989_v24 = vcombine.high %v3544_v3, %v3548_v44  ;;  %v3664_v59 = vld [vmem:[%s19910_s15 + $0x39c0] sm:$0xff]  ;;  %14780 = vmatprep.subr.bf16.mxu0 %v18861_v56  ;;  %v18988_v54 = vcombine.low %v3544_v3, %v3548_v44 }
 0x357   : > { %v3668_v51 = vld [vmem:[%s19910_s15 + $0x39e0] sm:$0xff]  ;;  %14781 = vmatpush2.bf16.msra.mxu0 %v18860_v63 }
 0x358   : > { %v3792_v60 = vld [vmem:[%s19910_s15 + $0x3dc0] sm:$0xff]  ;;  %v19109_v2 = vcombine.high %v3664_v59, %v3668_v51  ;;  %14821 = vmatprep.subr.bf16.mxu1 %v18989_v24  ;;  %v19108_v15 = vcombine.low %v3664_v59, %v3668_v51 }
 0x359   : > { %v3796_v41 = vld [vmem:[%s19910_s15 + $0x3de0] sm:$0xff]  ;;  %14822 = vmatpush2.bf16.msra.mxu1 %v18988_v54  ;;  %v14538_v32 = vpop.f32.mrf.mxu0 }
 0x35a   : > { %v19237_v6 = vcombine.high %v3792_v60, %v3796_v41  ;;  %v3656_v13 = vld [vmem:[%s19910_s15 + $0x3980] sm:$0xff]  ;;  %14832 = vmatprep.subr.bf16.mxu0 %v19109_v2  ;;  %v19236_v30 = vcombine.low %v3792_v60, %v3796_v41  ;;  %14783 = vmatmul.mubr.bf16.vlgmr.msra.gmra.mxu0 %v20668_v23  ;;  %v14539_v3 = vadd.f32 %v14538_v32, %v20601_v43 }
 0x35b   : > { %v3660_v14 = vld [vmem:[%s19910_s15 + $0x39a0] sm:$0xff]  ;;  %v14579_v44 = vpop.f32.mrf.mxu1  ;;  %14833 = vmatpush1.bf16.msra.mxu0 %v19108_v15  ;;  %v14540_v47 = vpop.f32.mrf.mxu0  ;;  %14864 = vmatprep.mubr.bf16.mxu0 %v20684_v37 }
 0x35c   : > { %v3784_v16 = vld [vmem:[%s19910_s15 + $0x3d80] sm:$0xff]  ;;  %v19101_v31 = vcombine.high %v3656_v13, %v3660_v14  ;;  %14873 = vmatprep.subr.bf16.mxu1 %v19237_v6  ;;  %14824 = vmatmul.mubr.bf16.vlgmr.msra.gmra.mxu1 %v20676_v22  ;;  %v19100_v4 = vcombine.low %v3656_v13, %v3660_v14  ;;  %v20695_v59 = vadd.f32 %v14579_v44, %v14539_v3 }
 0x35d   : > { %v3788_v17 = vld [vmem:[%s19910_s15 + $0x3da0] sm:$0xff]  ;;  %14874 = vmatpush1.bf16.msra.mxu1 %v19236_v30  ;;  %v14541_v51 = vadd.f32 %v14540_v47, %v20610_v57  ;;  %v14581_v60 = vpop.f32.mrf.mxu1  ;;  %v14542_v54 = vpop.f32.mrf.mxu0 }
 0x35e   : > { %v20678_v29 = vld [vmem:[#allocation2 + $0x28] sm:$0xff]  ;;  %v19229_v49 = vcombine.high %v3784_v16, %v3788_v17  ;;  %14834 = vmatprep.subr.bf16.mxu0 %v19101_v31  ;;  %v19228_v56 = vcombine.low %v3784_v16, %v3788_v17 }
 0x35f   : > { %v3648_v33 = vld [vmem:[%s19910_s15 + $0x3940] sm:$0xff]  ;;  %v20691_v42 = vcombine.high %v20678_v29, %v20678_v29  ;;  %v20704_v13 = vadd.f32 %v14581_v60, %v14541_v51  ;;  %v14583_v14 = vpop.f32.mrf.mxu1  ;;  %14835 = vmatpush1.bf16.msra.mxu0 %v19100_v4  ;;  %v14543_v16 = vpop.f32.mrf.mxu0 }
 0x360   : > { %v3652_v10 = vld [vmem:[%s19910_s15 + $0x3960] sm:$0xff]  ;;  %14875 = vmatprep.subr.bf16.mxu1 %v19229_v49 }
 0x361   : > { %v3776_v58 = vld [vmem:[%s19910_s15 + $0x3d40] sm:$0xff]  ;;  %v19093_v24 = vcombine.high %v3648_v33, %v3652_v10  ;;  %14905 = vmatprep.mubr.bf16.mxu1 %v20691_v42  ;;  %v19092_v57 = vcombine.low %v3648_v33, %v3652_v10  ;;  %14876 = vmatpush1.bf16.msra.mxu1 %v19228_v56  ;;  %v14584_v30 = vpop.f32.mrf.mxu1 }
 0x362   : > { %v3780_v40 = vld [vmem:[%s19910_s15 + $0x3d60] sm:$0xff] }
 0x363   : > { %v19221_v43 = vcombine.high %v3776_v58, %v3780_v40  ;;  %v3640_v41 = vld [vmem:[%s19910_s15 + $0x3900] sm:$0xff]  ;;  %14836 = vmatprep.subr.bf16.mxu0 %v19093_v24  ;;  %v19220_v17 = vcombine.low %v3776_v58, %v3780_v40 }
 0x364   : > { %v3644_v63 = vld [vmem:[%s19910_s15 + $0x3920] sm:$0xff]  ;;  %14837 = vmatpush1.bf16.msra.mxu0 %v19092_v57 }
 0x365   : > { %v3768_v2 = vld [vmem:[%s19910_s15 + $0x3d00] sm:$0xff]  ;;  %v19085_v15 = vcombine.high %v3640_v41, %v3644_v63  ;;  %14877 = vmatprep.subr.bf16.mxu1 %v19221_v43  ;;  %v19084_v47 = vcombine.low %v3640_v41, %v3644_v63 }
 0x366   : > { %v3772_v6 = vld [vmem:[%s19910_s15 + $0x3d20] sm:$0xff]  ;;  %14878 = vmatpush1.bf16.msra.mxu1 %v19220_v17 }
 0x367   : > { %v19213_v31 = vcombine.high %v3768_v2, %v3772_v6  ;;  %v3632_v49 = vld [vmem:[%s19910_s15 + $0x38c0] sm:$0xff]  ;;  %14838 = vmatprep.subr.bf16.mxu0 %v19085_v15  ;;  %v19212_v33 = vcombine.low %v3768_v2, %v3772_v6 }
 0x368   : > { %v3636_v32 = vld [vmem:[%s19910_s15 + $0x38e0] sm:$0xff]  ;;  %14839 = vmatpush1.bf16.msra.mxu0 %v19084_v47 }
 0x369   : > { %v3760_v3 = vld [vmem:[%s19910_s15 + $0x3cc0] sm:$0xff]  ;;  %v19077_v10 = vcombine.high %v3632_v49, %v3636_v32  ;;  %14879 = vmatprep.subr.bf16.mxu1 %v19213_v31  ;;  %v19076_v51 = vcombine.low %v3632_v49, %v3636_v32 }
 0x36a   : > { %v3764_v44 = vld [vmem:[%s19910_s15 + $0x3ce0] sm:$0xff]  ;;  %14880 = vmatpush1.bf16.msra.mxu1 %v19212_v33 }
 0x36b   : > { %v19205_v58 = vcombine.high %v3760_v3, %v3764_v44  ;;  %v3624_v40 = vld [vmem:[%s19910_s15 + $0x3880] sm:$0xff]  ;;  %14840 = vmatprep.subr.bf16.mxu0 %v19077_v10  ;;  %v19204_v60 = vcombine.low %v3760_v3, %v3764_v44 }
 0x36c   : > { %v3628_v4 = vld [vmem:[%s19910_s15 + $0x38a0] sm:$0xff]  ;;  %14841 = vmatpush1.bf16.msra.mxu0 %v19076_v51 }
 0x36d   : > { %v3752_v56 = vld [vmem:[%s19910_s15 + $0x3c80] sm:$0xff]  ;;  %v19069_v43 = vcombine.high %v3624_v40, %v3628_v4  ;;  %14881 = vmatprep.subr.bf16.mxu1 %v19205_v58  ;;  %v19068_v14 = vcombine.low %v3624_v40, %v3628_v4 }
 0x36e   : > { %v3756_v24 = vld [vmem:[%s19910_s15 + $0x3ca0] sm:$0xff]  ;;  %14882 = vmatpush1.bf16.msra.mxu1 %v19204_v60 }
 0x36f   : > { %v19197_v41 = vcombine.high %v3752_v56, %v3756_v24  ;;  %v3616_v63 = vld [vmem:[%s19910_s15 + $0x3840] sm:$0xff]  ;;  %14842 = vmatprep.subr.bf16.mxu0 %v19069_v43  ;;  %v19196_v57 = vcombine.low %v3752_v56, %v3756_v24 }
 0x370   : > { %v3620_v54 = vld [vmem:[%s19910_s15 + $0x3860] sm:$0xff]  ;;  %14843 = vmatpush1.bf16.msra.mxu0 %v19068_v14 }
 0x371   : > { %v3744_v2 = vld [vmem:[%s19910_s15 + $0x3c40] sm:$0xff]  ;;  %v19061_v16 = vcombine.high %v3616_v63, %v3620_v54  ;;  %14883 = vmatprep.subr.bf16.mxu1 %v19197_v41  ;;  %v19060_v32 = vcombine.low %v3616_v63, %v3620_v54 }
 0x372   : > { %v3748_v6 = vld [vmem:[%s19910_s15 + $0x3c60] sm:$0xff]  ;;  %14884 = vmatpush1.bf16.msra.mxu1 %v19196_v57 }
 0x373   : > { %v19189_v17 = vcombine.high %v3744_v2, %v3748_v6  ;;  %v3608_v15 = vld [vmem:[%s19910_s15 + $0x3800] sm:$0xff]  ;;  %14844 = vmatprep.subr.bf16.mxu0 %v19061_v16  ;;  %v19188_v3 = vcombine.low %v3744_v2, %v3748_v6 }
 0x374   : > { %v3612_v30 = vld [vmem:[%s19910_s15 + $0x3820] sm:$0xff]  ;;  %14845 = vmatpush1.bf16.msra.mxu0 %v19060_v32 }
 0x375   : > { %v3736_v31 = vld [vmem:[%s19910_s15 + $0x3c00] sm:$0xff]  ;;  %v19053_v44 = vcombine.high %v3608_v15, %v3612_v30  ;;  %14885 = vmatprep.subr.bf16.mxu1 %v19189_v17  ;;  %v19052_v4 = vcombine.low %v3608_v15, %v3612_v30 }
 0x376   : > { %v3740_v49 = vld [vmem:[%s19910_s15 + $0x3c20] sm:$0xff]  ;;  %14886 = vmatpush1.bf16.msra.mxu1 %v19188_v3 }
 0x377   : > { %v19181_v47 = vcombine.high %v3736_v31, %v3740_v49  ;;  %v3728_v33 = vld [vmem:[%s19910_s15 + $0x3bc0] sm:$0xff]  ;;  %14846 = vmatprep.subr.bf16.mxu0 %v19053_v44  ;;  %v19180_v56 = vcombine.low %v3736_v31, %v3740_v49 }
 0x378   : > { %v3732_v10 = vld [vmem:[%s19910_s15 + $0x3be0] sm:$0xff]  ;;  %14847 = vmatpush1.bf16.msra.mxu0 %v19052_v4 }
 0x379   : > { %v3856_v58 = vld [vmem:[%s19910_s15 + $0x3fc0] sm:$0xff]  ;;  %v19173_v24 = vcombine.high %v3728_v33, %v3732_v10  ;;  %14887 = vmatprep.subr.bf16.mxu1 %v19181_v47  ;;  %v19172_v54 = vcombine.low %v3728_v33, %v3732_v10 }
 0x37a   : > { %v3860_v40 = vld [vmem:[%s19910_s15 + $0x3fe0] sm:$0xff]  ;;  %14888 = vmatpush1.bf16.msra.mxu1 %v19180_v56 }
 0x37b   : > { %v19301_v51 = vcombine.high %v3856_v58, %v3860_v40  ;;  %v3720_v60 = vld [vmem:[%s19910_s15 + $0x3b80] sm:$0xff]  ;;  %14848 = vmatprep.subr.bf16.mxu0 %v19173_v24  ;;  %v19300_v2 = vcombine.low %v3856_v58, %v3860_v40 }
 0x37c   : > { %v3724_v43 = vld [vmem:[%s19910_s15 + $0x3ba0] sm:$0xff]  ;;  %14849 = vmatpush2.bf16.msra.mxu0 %v19172_v54 }
 0x37d   : > { %v3848_v41 = vld [vmem:[%s19910_s15 + $0x3f80] sm:$0xff]  ;;  %v19165_v6 = vcombine.high %v3720_v60, %v3724_v43  ;;  %14889 = vmatprep.subr.bf16.mxu1 %v19301_v51  ;;  %v19164_v30 = vcombine.low %v3720_v60, %v3724_v43 }
 0x37e   : > { %v3852_v63 = vld [vmem:[%s19910_s15 + $0x3fa0] sm:$0xff]  ;;  %14890 = vmatpush2.bf16.msra.mxu1 %v19300_v2 }
 0x37f   : > { %v19293_v14 = vcombine.high %v3848_v41, %v3852_v63  ;;  %v3712_v57 = vld [vmem:[%s19910_s15 + $0x3b40] sm:$0xff]  ;;  %14850 = vmatprep.subr.bf16.mxu0 %v19165_v6  ;;  %v19292_v31 = vcombine.low %v3848_v41, %v3852_v63 }
 0x380   : > { %v3716_v16 = vld [vmem:[%s19910_s15 + $0x3b60] sm:$0xff]  ;;  %14851 = vmatpush2.bf16.msra.mxu0 %v19164_v30 }
 0x381   : > { %v3840_v17 = vld [vmem:[%s19910_s15 + $0x3f40] sm:$0xff]  ;;  %v19157_v49 = vcombine.high %v3712_v57, %v3716_v16  ;;  %14891 = vmatprep.subr.bf16.mxu1 %v19293_v14  ;;  %v19156_v10 = vcombine.low %v3712_v57, %v3716_v16 }
 0x382   : > { %v3844_v15 = vld [vmem:[%s19910_s15 + $0x3f60] sm:$0xff]  ;;  %14892 = vmatpush2.bf16.msra.mxu1 %v19292_v31 }
 0x383   : > { %v19285_v32 = vcombine.high %v3840_v17, %v3844_v15  ;;  %v3704_v3 = vld [vmem:[%s19910_s15 + $0x3b00] sm:$0xff]  ;;  %14852 = vmatprep.subr.bf16.mxu0 %v19157_v49  ;;  %v19284_v58 = vcombine.low %v3840_v17, %v3844_v15 }
 0x384   : > { %v3708_v44 = vld [vmem:[%s19910_s15 + $0x3b20] sm:$0xff]  ;;  %14853 = vmatpush2.bf16.msra.mxu0 %v19156_v10 }
 0x385   : > { %v3832_v47 = vld [vmem:[%s19910_s15 + $0x3f00] sm:$0xff]  ;;  %v19149_v40 = vcombine.high %v3704_v3, %v3708_v44  ;;  %14893 = vmatprep.subr.bf16.mxu1 %v19285_v32  ;;  %v19148_v43 = vcombine.low %v3704_v3, %v3708_v44 }
 0x386   : > { %v3836_v33 = vld [vmem:[%s19910_s15 + $0x3f20] sm:$0xff]  ;;  %14894 = vmatpush2.bf16.msra.mxu1 %v19284_v58 }
 0x387   : > { %v19277_v4 = vcombine.high %v3832_v47, %v3836_v33  ;;  %v3696_v56 = vld [vmem:[%s19910_s15 + $0x3ac0] sm:$0xff]  ;;  %14854 = vmatprep.subr.bf16.mxu0 %v19149_v40  ;;  %v19276_v41 = vcombine.low %v3832_v47, %v3836_v33 }
 0x388   : > { %v3700_v24 = vld [vmem:[%s19910_s15 + $0x3ae0] sm:$0xff]  ;;  %14855 = vmatpush2.bf16.msra.mxu0 %v19148_v43 }
 0x389   : > { %v3824_v51 = vld [vmem:[%s19910_s15 + $0x3ec0] sm:$0xff]  ;;  %v19141_v63 = vcombine.high %v3696_v56, %v3700_v24  ;;  %14895 = vmatprep.subr.bf16.mxu1 %v19277_v4  ;;  %v19140_v16 = vcombine.low %v3696_v56, %v3700_v24 }
 0x38a   : > { %v3828_v60 = vld [vmem:[%s19910_s15 + $0x3ee0] sm:$0xff]  ;;  %14896 = vmatpush2.bf16.msra.mxu1 %v19276_v41  ;;  %v1873_v41 = vld [vmem:[%s19910_s15 + $0x1c8] sm:$0xff] }
 0x38b   : > { %v19269_v54 = vcombine.high %v3824_v51, %v3828_v60  ;;  %v3688_v2 = vld [vmem:[%s19910_s15 + $0x3a80] sm:$0xff]  ;;  %14856 = vmatprep.subr.bf16.mxu0 %v19141_v63  ;;  %v19268_v17 = vcombine.low %v3824_v51, %v3828_v60  ;;  %v1877_v63 = vld [vmem:[%s19910_s15 + $0x1e8] sm:$0xff] }
 0x38c   : > { %v3692_v6 = vld [vmem:[%s19910_s15 + $0x3aa0] sm:$0xff]  ;;  %14857 = vmatpush2.bf16.msra.mxu0 %v19140_v16 }
 0x38d   : > { %v3816_v14 = vld [vmem:[%s19910_s15 + $0x3e80] sm:$0xff]  ;;  %v19133_v15 = vcombine.high %v3688_v2, %v3692_v6  ;;  %14897 = vmatprep.subr.bf16.mxu1 %v19269_v54  ;;  %v19132_v44 = vcombine.low %v3688_v2, %v3692_v6  ;;  %v2001_v54 = vld [vmem:[%s19910_s15 + $0x5c8] sm:$0xff] }
 0x38e   : > { %v3820_v57 = vld [vmem:[%s19910_s15 + $0x3ea0] sm:$0xff]  ;;  %14898 = vmatpush2.bf16.msra.mxu1 %v19268_v17  ;;  %v2005_v2 = vld [vmem:[%s19910_s15 + $0x5e8] sm:$0xff] }
 0x38f   : > { %v19261_v30 = vcombine.high %v3816_v14, %v3820_v57  ;;  %v3680_v31 = vld [vmem:[%s19910_s15 + $0x3a40] sm:$0xff]  ;;  %14858 = vmatprep.subr.bf16.mxu0 %v19133_v15  ;;  %v19260_v47 = vcombine.low %v3816_v14, %v3820_v57  ;;  %v17319_v57 = vcombine.high %v1873_v41, %v1877_v63  ;;  %v17447_v16 = vcombine.high %v2001_v54, %v2005_v2  ;;  %v1865_v17 = vld [vmem:[%s19910_s15 + $0x188] sm:$0xff] }
 0x390   : > { %v3684_v49 = vld [vmem:[%s19910_s15 + $0x3a60] sm:$0xff]  ;;  %14859 = vmatpush2.bf16.msra.mxu0 %v19132_v44  ;;  %v1869_v15 = vld [vmem:[%s19910_s15 + $0x1a8] sm:$0xff]  ;;  %v17446_v44 = vcombine.low %v2001_v54, %v2005_v2 }
 0x391   : > { %v3808_v32 = vld [vmem:[%s19910_s15 + $0x3e40] sm:$0xff]  ;;  %v19125_v33 = vcombine.high %v3680_v31, %v3684_v49  ;;  %14899 = vmatprep.subr.bf16.mxu1 %v19261_v30  ;;  %v19124_v24 = vcombine.low %v3680_v31, %v3684_v49  ;;  %v20762_v30 = vcombine.low %v20672_v20, %v20672_v20  ;;  %v1993_v31 = vld [vmem:[%s19910_s15 + $0x588] sm:$0xff] }
 0x392   : > { %v3812_v3 = vld [vmem:[%s19910_s15 + $0x3e60] sm:$0xff]  ;;  %14900 = vmatpush2.bf16.msra.mxu1 %v19260_v47  ;;  %v1997_v49 = vld [vmem:[%s19910_s15 + $0x5a8] sm:$0xff]  ;;  %v17311_v47 = vcombine.high %v1865_v17, %v1869_v15 }
 0x393   : > { %v19253_v10 = vcombine.high %v3808_v32, %v3812_v3  ;;  %v3672_v58 = vld [vmem:[%s19910_s15 + $0x3a00] sm:$0xff]  ;;  %14860 = vmatprep.subr.bf16.mxu0 %v19125_v33  ;;  %v19252_v51 = vcombine.low %v3808_v32, %v3812_v3  ;;  %v20768_v32 = vcombine.low %v20678_v29, %v20678_v29  ;;  %v17318_v3 = vcombine.low %v1873_v41, %v1877_v63  ;;  %v1849_v2 = vld [vmem:[%s19910_s15 + $0x108] sm:$0xff] }
 0x394   : > { %v3676_v40 = vld [vmem:[%s19910_s15 + $0x3a20] sm:$0xff]  ;;  %14861 = vmatpush2.bf16.msra.mxu0 %v19124_v24  ;;  %v17439_v33 = vcombine.high %v1993_v31, %v1997_v49  ;;  %v17310_v24 = vcombine.low %v1865_v17, %v1869_v15 }
 0x395   : > { %v3800_v4 = vld [vmem:[%s19910_s15 + $0x3e00] sm:$0xff]  ;;  %v19117_v60 = vcombine.high %v3672_v58, %v3676_v40  ;;  %14901 = vmatprep.subr.bf16.mxu1 %v19253_v10  ;;  %v19116_v6 = vcombine.low %v3672_v58, %v3676_v40  ;;  %v1857_v10 = vld [vmem:[%s19910_s15 + $0x148] sm:$0xff] }
 0x396   : > { %v3804_v56 = vld [vmem:[%s19910_s15 + $0x3e20] sm:$0xff]  ;;  %14902 = vmatpush2.bf16.msra.mxu1 %v19252_v51  ;;  %v1861_v58 = vld [vmem:[%s19910_s15 + $0x168] sm:$0xff] }
 0x397   : > { %v19245_v43 = vcombine.high %v3800_v4, %v3804_v56  ;;  %14862 = vmatprep.subr.bf16.mxu0 %v19117_v60  ;;  %v19244_v14 = vcombine.low %v3800_v4, %v3804_v56  ;;  %v1985_v40 = vld [vmem:[%s19910_s15 + $0x548] sm:$0xff]  ;;  %v17438_v60 = vcombine.low %v1993_v31, %v1997_v49 }
 0x398   : > { %14863 = vmatpush2.bf16.msra.mxu0 %v19116_v6  ;;  %v1989_v4 = vld [vmem:[%s19910_s15 + $0x568] sm:$0xff] }
 0x399   : > { %14903 = vmatprep.subr.bf16.mxu1 %v19245_v43  ;;  %14914 = vmatprep.subr.bf16.mxu0 %v17319_v57  ;;  %v17303_v43 = vcombine.high %v1857_v10, %v1861_v58  ;;  %v1853_v6 = vld [vmem:[%s19910_s15 + $0x128] sm:$0xff]  ;;  %v17430_v49 = vcombine.low %v1985_v40, %v1989_v4 }
 0x39a   : > { %14904 = vmatpush2.bf16.msra.mxu1 %v19244_v14  ;;  %v14620_v20 = vpop.f32.mrf.mxu0  ;;  %v1977_v57 = vld [vmem:[%s19910_s15 + $0x508] sm:$0xff] }
 0x39b   : > { %14955 = vmatprep.subr.bf16.mxu1 %v17447_v16  ;;  %14865 = vmatmul.mubr.bf16.vlgmr.msra.gmra.mxu0 %v20762_v30  ;;  %v14621_v56 = vadd.f32 %v14620_v20, %v20695_v59  ;;  %v17431_v59 = vcombine.high %v1985_v40, %v1989_v4  ;;  %v1981_v16 = vld [vmem:[%s19910_s15 + $0x528] sm:$0xff] }
 0x39c   : > { %v14661_v29 = vpop.f32.mrf.mxu1  ;;  %14915 = vmatpush1.bf16.msra.mxu0 %v17318_v3  ;;  %v14622_v51 = vpop.f32.mrf.mxu0  ;;  %14946 = vmatprep.mubr.bf16.mxu0 %v20065_v9  ;;  %v17295_v3 = vcombine.high %v1849_v2, %v1853_v6  ;;  %v1845_v20 = vld [vmem:[%s19910_s15 + $0xe8] sm:$0xff] }
 0x39d   : > { %14906 = vmatmul.mubr.bf16.vlgmr.msra.gmra.mxu1 %v20768_v32  ;;  %14916 = vmatprep.subr.bf16.mxu0 %v17311_v47  ;;  %v20777_v41 = vadd.f32 %v14661_v29, %v14621_v56  ;;  %v14623_v63 = vadd.f32 %v14622_v51, %v20704_v13  ;;  %v17302_v13 = vcombine.low %v1857_v10, %v1861_v58  ;;  %v1969_v56 = vld [vmem:[%s19910_s15 + $0x4c8] sm:$0xff] }
 0x39e   : > { %14956 = vmatpush1.bf16.msra.mxu1 %v17446_v44  ;;  %v14663_v54 = vpop.f32.mrf.mxu1  ;;  %v14624_v14 = vpop.f32.mrf.mxu0  ;;  %14987 = vmatprep.mubr.bf16.mxu1 %v20069_v12  ;;  %v17423_v47 = vcombine.high %v1977_v57, %v1981_v16  ;;  %v1973_v29 = vld [vmem:[%s19910_s15 + $0x4e8] sm:$0xff]  ;;  %v17294_v51 = vcombine.low %v1849_v2, %v1853_v6  ;;  %v17422_v10 = vcombine.low %v1977_v57, %v1981_v16 }
 0x39f   : > { %14957 = vmatprep.subr.bf16.mxu1 %v17439_v33  ;;  %v20786_v17 = vadd.f32 %v14663_v54, %v14623_v63  ;;  %v1841_v33 = vld [vmem:[%s19910_s15 + $0xc8] sm:$0xff]  ;;  %v17415_v40 = vcombine.high %v1969_v56, %v1973_v29  ;;  %v17414_v54 = vcombine.low %v1969_v56, %v1973_v29 }
 0x3a0   : > { %v14665_v15 = vpop.f32.mrf.mxu1  ;;  %14917 = vmatpush1.bf16.msra.mxu0 %v17310_v24  ;;  %v14625_v31 = vpop.f32.mrf.mxu0  ;;  %v17287_v58 = vcombine.high %v1841_v33, %v1845_v20  ;;  %v1833_v4 = vld [vmem:[%s19910_s15 + $0x88] sm:$0xff]  ;;  %v17286_v63 = vcombine.low %v1841_v33, %v1845_v20 }
 0x3a1   : > { %14918 = vmatprep.subr.bf16.mxu0 %v17303_v43  ;;  %v1837_v24 = vld [vmem:[%s19910_s15 + $0xa8] sm:$0xff] }
 0x3a2   : > { %14958 = vmatpush1.bf16.msra.mxu1 %v17438_v60  ;;  %v14666_v44 = vpop.f32.mrf.mxu1  ;;  %v1961_v60 = vld [vmem:[%s19910_s15 + $0x488] sm:$0xff]  ;;  %v17278_v15 = vcombine.low %v1833_v4, %v1837_v24 }
 0x3a3   : > { %14959 = vmatprep.subr.bf16.mxu1 %v17431_v59  ;;  %v1965_v43 = vld [vmem:[%s19910_s15 + $0x4a8] sm:$0xff]  ;;  %v17279_v59 = vcombine.high %v1833_v4, %v1837_v24 }
 0x3a4   : > { %14919 = vmatpush1.bf16.msra.mxu0 %v17302_v13  ;;  %v17407_v2 = vcombine.high %v1961_v60, %v1965_v43  ;;  %v1825_v6 = vld [vmem:[%s19910_s15 + $0x48] sm:$0xff]  ;;  %v17406_v13 = vcombine.low %v1961_v60, %v1965_v43 }
 0x3a5   : > { %14920 = vmatprep.subr.bf16.mxu0 %v17295_v3  ;;  %v1829_v14 = vld [vmem:[%s19910_s15 + $0x68] sm:$0xff] }
 0x3a6   : > { %14960 = vmatpush1.bf16.msra.mxu1 %v17430_v49  ;;  %v1953_v57 = vld [vmem:[%s19910_s15 + $0x448] sm:$0xff]  ;;  %v17271_v31 = vcombine.high %v1825_v6, %v1829_v14  ;;  %v17270_v20 = vcombine.low %v1825_v6, %v1829_v14 }
 0x3a7   : > { %14961 = vmatprep.subr.bf16.mxu1 %v17423_v47  ;;  %v1957_v16 = vld [vmem:[%s19910_s15 + $0x468] sm:$0xff] }
 0x3a8   : > { %14921 = vmatpush1.bf16.msra.mxu0 %v17294_v51  ;;  %v17399_v49 = vcombine.high %v1953_v57, %v1957_v16  ;;  %v1817_v3 = vld [vmem:[%s19910_s15 + $0x8] sm:$0xff]  ;;  %v17398_v56 = vcombine.low %v1953_v57, %v1957_v16 }
 0x3a9   : > { %14922 = vmatprep.subr.bf16.mxu0 %v17287_v58  ;;  %v1821_v44 = vld [vmem:[%s19910_s15 + $0x28] sm:$0xff] }
 0x3aa   : > { %14962 = vmatpush1.bf16.msra.mxu1 %v17422_v10  ;;  %v1945_v47 = vld [vmem:[%s19910_s15 + $0x408] sm:$0xff]  ;;  %v17263_v29 = vcombine.high %v1817_v3, %v1821_v44  ;;  %v17262_v24 = vcombine.low %v1817_v3, %v1821_v44 }
 0x3ab   : > { %14963 = vmatprep.subr.bf16.mxu1 %v17415_v40  ;;  %v1949_v33 = vld [vmem:[%s19910_s15 + $0x428] sm:$0xff] }
 0x3ac   : > { %14923 = vmatpush1.bf16.msra.mxu0 %v17286_v63  ;;  %v17391_v51 = vcombine.high %v1945_v47, %v1949_v33  ;;  %v1937_v10 = vld [vmem:[%s19910_s15 + $0x3c8] sm:$0xff]  ;;  %v17390_v60 = vcombine.low %v1945_v47, %v1949_v33 }
 0x3ad   : > { %14924 = vmatprep.subr.bf16.mxu0 %v17279_v59  ;;  %v1941_v58 = vld [vmem:[%s19910_s15 + $0x3e8] sm:$0xff] }
 0x3ae   : > { %14964 = vmatpush1.bf16.msra.mxu1 %v17414_v54  ;;  %v2065_v40 = vld [vmem:[%s19910_s15 + $0x7c8] sm:$0xff]  ;;  %v17383_v43 = vcombine.high %v1937_v10, %v1941_v58  ;;  %v17382_v14 = vcombine.low %v1937_v10, %v1941_v58 }
 0x3af   : > { %14965 = vmatprep.subr.bf16.mxu1 %v17407_v2  ;;  %v2069_v4 = vld [vmem:[%s19910_s15 + $0x7e8] sm:$0xff] }
 0x3b0   : > { %14925 = vmatpush1.bf16.msra.mxu0 %v17278_v15  ;;  %v17511_v63 = vcombine.high %v2065_v40, %v2069_v4  ;;  %v1929_v54 = vld [vmem:[%s19910_s15 + $0x388] sm:$0xff]  ;;  %v17510_v57 = vcombine.low %v2065_v40, %v2069_v4 }
 0x3b1   : > { %14926 = vmatprep.subr.bf16.mxu0 %v17271_v31  ;;  %v1933_v59 = vld [vmem:[%s19910_s15 + $0x3a8] sm:$0xff] }
 0x3b2   : > { %14966 = vmatpush1.bf16.msra.mxu1 %v17406_v13  ;;  %v2057_v2 = vld [vmem:[%s19910_s15 + $0x788] sm:$0xff]  ;;  %v17375_v16 = vcombine.high %v1929_v54, %v1933_v59  ;;  %v17374_v44 = vcombine.low %v1929_v54, %v1933_v59 }
 0x3b3   : > { %14967 = vmatprep.subr.bf16.mxu1 %v17399_v49  ;;  %v2061_v6 = vld [vmem:[%s19910_s15 + $0x7a8] sm:$0xff] }
 0x3b4   : > { %14927 = vmatpush1.bf16.msra.mxu0 %v17270_v20  ;;  %v17503_v15 = vcombine.high %v2057_v2, %v2061_v6  ;;  %v1921_v13 = vld [vmem:[%s19910_s15 + $0x348] sm:$0xff]  ;;  %v17502_v47 = vcombine.low %v2057_v2, %v2061_v6 }
 0x3b5   : > { %14928 = vmatprep.subr.bf16.mxu0 %v17263_v29  ;;  %v1925_v31 = vld [vmem:[%s19910_s15 + $0x368] sm:$0xff] }
 0x3b6   : > { %14968 = vmatpush1.bf16.msra.mxu1 %v17398_v56  ;;  %v2049_v49 = vld [vmem:[%s19910_s15 + $0x748] sm:$0xff]  ;;  %v17367_v33 = vcombine.high %v1921_v13, %v1925_v31  ;;  %v17366_v58 = vcombine.low %v1921_v13, %v1925_v31 }
 0x3b7   : > { %14969 = vmatprep.subr.bf16.mxu1 %v17391_v51  ;;  %v2053_v3 = vld [vmem:[%s19910_s15 + $0x768] sm:$0xff] }
 0x3b8   : > { %14929 = vmatpush1.bf16.msra.mxu0 %v17262_v24  ;;  %v17495_v20 = vcombine.high %v2049_v49, %v2053_v3  ;;  %v1913_v56 = vld [vmem:[%s19910_s15 + $0x308] sm:$0xff]  ;;  %v17494_v40 = vcombine.low %v2049_v49, %v2053_v3 }
 0x3b9   : > { %14930 = vmatprep.subr.bf16.mxu0 %v17383_v43  ;;  %v1917_v29 = vld [vmem:[%s19910_s15 + $0x328] sm:$0xff] }
 0x3ba   : > { %14970 = vmatpush1.bf16.msra.mxu1 %v17390_v60  ;;  %v2041_v51 = vld [vmem:[%s19910_s15 + $0x708] sm:$0xff]  ;;  %v17359_v4 = vcombine.high %v1913_v56, %v1917_v29  ;;  %v17358_v59 = vcombine.low %v1913_v56, %v1917_v29 }
 0x3bb   : > { %14971 = vmatprep.subr.bf16.mxu1 %v17511_v63  ;;  %v2045_v10 = vld [vmem:[%s19910_s15 + $0x728] sm:$0xff] }
 0x3bc   : > { %14931 = vmatpush2.bf16.msra.mxu0 %v17382_v14  ;;  %v17487_v24 = vcombine.high %v2041_v51, %v2045_v10  ;;  %v1905_v60 = vld [vmem:[%s19910_s15 + $0x2c8] sm:$0xff]  ;;  %v17486_v2 = vcombine.low %v2041_v51, %v2045_v10 }
 0x3bd   : > { %14932 = vmatprep.subr.bf16.mxu0 %v17375_v16  ;;  %v1909_v43 = vld [vmem:[%s19910_s15 + $0x2e8] sm:$0xff] }
 0x3be   : > { %14972 = vmatpush2.bf16.msra.mxu1 %v17510_v57  ;;  %v2033_v63 = vld [vmem:[%s19910_s15 + $0x6c8] sm:$0xff]  ;;  %v17351_v6 = vcombine.high %v1905_v60, %v1909_v43  ;;  %v17350_v31 = vcombine.low %v1905_v60, %v1909_v43 }
 0x3bf   : > { %14973 = vmatprep.subr.bf16.mxu1 %v17503_v15  ;;  %v2037_v54 = vld [vmem:[%s19910_s15 + $0x6e8] sm:$0xff] }
 0x3c0   : > { %14933 = vmatpush2.bf16.msra.mxu0 %v17374_v44  ;;  %v17479_v14 = vcombine.high %v2033_v63, %v2037_v54  ;;  %v1897_v57 = vld [vmem:[%s19910_s15 + $0x288] sm:$0xff]  ;;  %v17478_v49 = vcombine.low %v2033_v63, %v2037_v54 }
 0x3c1   : > { %14934 = vmatprep.subr.bf16.mxu0 %v17367_v33  ;;  %v1901_v16 = vld [vmem:[%s19910_s15 + $0x2a8] sm:$0xff] }
 0x3c2   : > { %14974 = vmatpush2.bf16.msra.mxu1 %v17502_v47  ;;  %v2025_v15 = vld [vmem:[%s19910_s15 + $0x688] sm:$0xff]  ;;  %v17343_v3 = vcombine.high %v1897_v57, %v1901_v16  ;;  %v17342_v29 = vcombine.low %v1897_v57, %v1901_v16 }
 0x3c3   : > { %14975 = vmatprep.subr.bf16.mxu1 %v17495_v20  ;;  %v2029_v13 = vld [vmem:[%s19910_s15 + $0x6a8] sm:$0xff] }
 0x3c4   : > { %14935 = vmatpush2.bf16.msra.mxu0 %v17366_v58  ;;  %v17471_v44 = vcombine.high %v2025_v15, %v2029_v13  ;;  %v1889_v47 = vld [vmem:[%s19910_s15 + $0x248] sm:$0xff]  ;;  %v17470_v51 = vcombine.low %v2025_v15, %v2029_v13 }
 0x3c5   : > { %14936 = vmatprep.subr.bf16.mxu0 %v17359_v4  ;;  %v1893_v33 = vld [vmem:[%s19910_s15 + $0x268] sm:$0xff] }
 0x3c6   : > { %14976 = vmatpush2.bf16.msra.mxu1 %v17494_v40  ;;  %v2017_v20 = vld [vmem:[%s19910_s15 + $0x648] sm:$0xff]  ;;  %v17335_v10 = vcombine.high %v1889_v47, %v1893_v33  ;;  %v17334_v43 = vcombine.low %v1889_v47, %v1893_v33 }
 0x3c7   : > { %14977 = vmatprep.subr.bf16.mxu1 %v17487_v24  ;;  %v2021_v56 = vld [vmem:[%s19910_s15 + $0x668] sm:$0xff] }
 0x3c8   : > { %14937 = vmatpush2.bf16.msra.mxu0 %v17358_v59  ;;  %v17463_v58 = vcombine.high %v2017_v20, %v2021_v56  ;;  %v1881_v40 = vld [vmem:[%s19910_s15 + $0x208] sm:$0xff]  ;;  %v17462_v63 = vcombine.low %v2017_v20, %v2021_v56 }
 0x3c9   : > { %14938 = vmatprep.subr.bf16.mxu0 %v17351_v6  ;;  %v1885_v4 = vld [vmem:[%s19910_s15 + $0x228] sm:$0xff] }
 0x3ca   : > { %14978 = vmatpush2.bf16.msra.mxu1 %v17486_v2  ;;  %v2009_v24 = vld [vmem:[%s19910_s15 + $0x608] sm:$0xff]  ;;  %v17327_v54 = vcombine.high %v1881_v40, %v1885_v4  ;;  %v17326_v16 = vcombine.low %v1881_v40, %v1885_v4 }
 0x3cb   : > { %14979 = vmatprep.subr.bf16.mxu1 %v17479_v14  ;;  %v2013_v60 = vld [vmem:[%s19910_s15 + $0x628] sm:$0xff] }
 0x3cc   : > { %14939 = vmatpush2.bf16.msra.mxu0 %v17350_v31  ;;  %v17455_v59 = vcombine.high %v2009_v24, %v2013_v60  ;;  %v2129_v2 = vld [vmem:[%s19910_s15 + $0x9c8] sm:$0xff]  ;;  %v17454_v15 = vcombine.low %v2009_v24, %v2013_v60 }
 0x3cd   : > { %14940 = vmatprep.subr.bf16.mxu0 %v17343_v3  ;;  %v2133_v6 = vld [vmem:[%s19910_s15 + $0x9e8] sm:$0xff] }
 0x3ce   : > { %14980 = vmatpush2.bf16.msra.mxu1 %v17478_v49  ;;  %v2257_v14 = vld [vmem:[%s19910_s15 + $0xdc8] sm:$0xff]  ;;  %v17575_v13 = vcombine.high %v2129_v2, %v2133_v6  ;;  %v17574_v33 = vcombine.low %v2129_v2, %v2133_v6 }
 0x3cf   : > { %14981 = vmatprep.subr.bf16.mxu1 %v17471_v44  ;;  %v2261_v57 = vld [vmem:[%s19910_s15 + $0xde8] sm:$0xff] }
 0x3d0   : > { %14941 = vmatpush2.bf16.msra.mxu0 %v17342_v29  ;;  %v17703_v31 = vcombine.high %v2257_v14, %v2261_v57  ;;  %v2121_v49 = vld [vmem:[%s19910_s15 + $0x988] sm:$0xff]  ;;  %v17702_v20 = vcombine.low %v2257_v14, %v2261_v57 }
 0x3d1   : > { %14942 = vmatprep.subr.bf16.mxu0 %v17335_v10  ;;  %v2125_v3 = vld [vmem:[%s19910_s15 + $0x9a8] sm:$0xff] }
 0x3d2   : > { %14982 = vmatpush2.bf16.msra.mxu1 %v17470_v51  ;;  %v2249_v44 = vld [vmem:[%s19910_s15 + $0xd88] sm:$0xff]  ;;  %v17567_v56 = vcombine.high %v2121_v49, %v2125_v3 }
 0x3d3   : > { %14983 = vmatprep.subr.bf16.mxu1 %v17463_v58  ;;  %v2253_v47 = vld [vmem:[%s19910_s15 + $0xda8] sm:$0xff] }
 0x3d4   : > { %14943 = vmatpush2.bf16.msra.mxu0 %v17334_v43  ;;  %v17695_v29 = vcombine.high %v2249_v44, %v2253_v47  ;;  %v2113_v51 = vld [vmem:[%s19910_s15 + $0x948] sm:$0xff]  ;;  %v17566_v43 = vcombine.low %v2121_v49, %v2125_v3 }
 0x3d5   : > { %14944 = vmatprep.subr.bf16.mxu0 %v17327_v54  ;;  %v2117_v10 = vld [vmem:[%s19910_s15 + $0x968] sm:$0xff]  ;;  %v17694_v54 = vcombine.low %v2249_v44, %v2253_v47 }
 0x3d6   : > { %14984 = vmatpush2.bf16.msra.mxu1 %v17462_v63  ;;  %v2241_v40 = vld [vmem:[%s19910_s15 + $0xd48] sm:$0xff] }
 0x3d7   : > { %14985 = vmatprep.subr.bf16.mxu1 %v17455_v59  ;;  %v2245_v4 = vld [vmem:[%s19910_s15 + $0xd68] sm:$0xff]  ;;  %v17559_v59 = vcombine.high %v2113_v51, %v2117_v10 }
 0x3d8   : > { %14945 = vmatpush2.bf16.msra.mxu0 %v17326_v16  ;;  %v2105_v57 = vld [vmem:[%s19910_s15 + $0x908] sm:$0xff]  ;;  %v17686_v47 = vcombine.low %v2241_v40, %v2245_v4 }
 0x3d9   : > { %14996 = vmatprep.subr.bf16.mxu0 %v17575_v13  ;;  %v2109_v16 = vld [vmem:[%s19910_s15 + $0x928] sm:$0xff] }
 0x3da   : > { %14986 = vmatpush2.bf16.msra.mxu1 %v17454_v15  ;;  %v14702_v58 = vpop.f32.mrf.mxu0  ;;  %v2233_v13 = vld [vmem:[%s19910_s15 + $0xd08] sm:$0xff] }
 0x3db   : > { %15037 = vmatprep.subr.bf16.mxu1 %v17703_v31  ;;  %14947 = vmatmul.mubr.bf16.vlgmr.msra.gmra.mxu0 %v20115_v35  ;;  %v14703_v24 = vadd.f32 %v14702_v58, %v20777_v41  ;;  %v17687_v41 = vcombine.high %v2241_v40, %v2245_v4  ;;  %v2237_v31 = vld [vmem:[%s19910_s15 + $0xd28] sm:$0xff] }
 0x3dc   : > { %v14743_v60 = vpop.f32.mrf.mxu1  ;;  %14997 = vmatpush1.bf16.msra.mxu0 %v17574_v33  ;;  %v14704_v63 = vpop.f32.mrf.mxu0  ;;  %15028 = vmatprep.mubr.bf16.mxu0 %v20131_v46  ;;  %v17551_v33 = vcombine.high %v2105_v57, %v2109_v16  ;;  %v2101_v58 = vld [vmem:[%s19910_s15 + $0x8e8] sm:$0xff] }
 0x3dd   : > { %14988 = vmatmul.mubr.bf16.vlgmr.msra.gmra.mxu1 %v20123_v39  ;;  %14998 = vmatprep.subr.bf16.mxu0 %v17567_v56  ;;  %v20851_v2 = vadd.f32 %v14743_v60, %v14703_v24  ;;  %v14705_v6 = vadd.f32 %v14704_v63, %v20786_v17  ;;  %v17558_v17 = vcombine.low %v2113_v51, %v2117_v10  ;;  %v2225_v24 = vld [vmem:[%s19910_s15 + $0xcc8] sm:$0xff] }
 0x3de   : > { %15038 = vmatpush1.bf16.msra.mxu1 %v17702_v20  ;;  %v14745_v14 = vpop.f32.mrf.mxu1  ;;  %v14706_v15 = vpop.f32.mrf.mxu0  ;;  %15069 = vmatprep.mubr.bf16.mxu1 %v20138_v7  ;;  %v17679_v56 = vcombine.high %v2233_v13, %v2237_v31  ;;  %v2229_v60 = vld [vmem:[%s19910_s15 + $0xce8] sm:$0xff]  ;;  %v17550_v63 = vcombine.low %v2105_v57, %v2109_v16  ;;  %v17678_v51 = vcombine.low %v2233_v13, %v2237_v31 }
 0x3df   : > { %15039 = vmatprep.subr.bf16.mxu1 %v17695_v29  ;;  %v20860_v49 = vadd.f32 %v14745_v14, %v14705_v6  ;;  %v2097_v29 = vld [vmem:[%s19910_s15 + $0x8c8] sm:$0xff]  ;;  %v17671_v40 = vcombine.high %v2225_v24, %v2229_v60  ;;  %v17670_v14 = vcombine.low %v2225_v24, %v2229_v60 }
 0x3e0   : > { %v14747_v3 = vpop.f32.mrf.mxu1  ;;  %14999 = vmatpush1.bf16.msra.mxu0 %v17566_v43  ;;  %v14707_v44 = vpop.f32.mrf.mxu0  ;;  %v17543_v10 = vcombine.high %v2097_v29, %v2101_v58  ;;  %v2089_v4 = vld [vmem:[%s19910_s15 + $0x888] sm:$0xff]  ;;  %v17542_v6 = vcombine.low %v2097_v29, %v2101_v58 }
 0x3e1   : > { %15000 = vmatprep.subr.bf16.mxu0 %v17559_v59  ;;  %v2093_v43 = vld [vmem:[%s19910_s15 + $0x8a8] sm:$0xff] }
 0x3e2   : > { %15040 = vmatpush1.bf16.msra.mxu1 %v17694_v54  ;;  %v14748_v20 = vpop.f32.mrf.mxu1  ;;  %v2217_v54 = vld [vmem:[%s19910_s15 + $0xc88] sm:$0xff]  ;;  %v17534_v3 = vcombine.low %v2089_v4, %v2093_v43 }
 0x3e3   : > { %15041 = vmatprep.subr.bf16.mxu1 %v17687_v41  ;;  %v2221_v59 = vld [vmem:[%s19910_s15 + $0xca8] sm:$0xff]  ;;  %v17535_v41 = vcombine.high %v2089_v4, %v2093_v43 }
 0x3e4   : > { %15001 = vmatpush1.bf16.msra.mxu0 %v17558_v17  ;;  %v17663_v57 = vcombine.high %v2217_v54, %v2221_v59  ;;  %v2081_v16 = vld [vmem:[%s19910_s15 + $0x848] sm:$0xff]  ;;  %v17662_v17 = vcombine.low %v2217_v54, %v2221_v59 }
 0x3e5   : > { %15002 = vmatprep.subr.bf16.mxu0 %v17551_v33  ;;  %v2085_v15 = vld [vmem:[%s19910_s15 + $0x868] sm:$0xff] }
 0x3e6   : > { %15042 = vmatpush1.bf16.msra.mxu1 %v17686_v47  ;;  %v2209_v13 = vld [vmem:[%s19910_s15 + $0xc48] sm:$0xff]  ;;  %v17527_v44 = vcombine.high %v2081_v16, %v2085_v15  ;;  %v17526_v58 = vcombine.low %v2081_v16, %v2085_v15 }
 0x3e7   : > { %15043 = vmatprep.subr.bf16.mxu1 %v17679_v56  ;;  %v2213_v31 = vld [vmem:[%s19910_s15 + $0xc68] sm:$0xff] }
 0x3e8   : > { %15003 = vmatpush1.bf16.msra.mxu0 %v17550_v63  ;;  %v17655_v47 = vcombine.high %v2209_v13, %v2213_v31  ;;  %v2073_v33 = vld [vmem:[%s19910_s15 + $0x808] sm:$0xff]  ;;  %v17654_v24 = vcombine.low %v2209_v13, %v2213_v31 }
 0x3e9   : > { %15004 = vmatprep.subr.bf16.mxu0 %v17543_v10  ;;  %v2077_v20 = vld [vmem:[%s19910_s15 + $0x828] sm:$0xff] }
 0x3ea   : > { %15044 = vmatpush1.bf16.msra.mxu1 %v17678_v51  ;;  %v2201_v56 = vld [vmem:[%s19910_s15 + $0xc08] sm:$0xff]  ;;  %v17519_v60 = vcombine.high %v2073_v33, %v2077_v20  ;;  %v17518_v43 = vcombine.low %v2073_v33, %v2077_v20 }
 0x3eb   : > { %15045 = vmatprep.subr.bf16.mxu1 %v17671_v40  ;;  %v2205_v29 = vld [vmem:[%s19910_s15 + $0xc28] sm:$0xff] }
 0x3ec   : > { %15005 = vmatpush1.bf16.msra.mxu0 %v17542_v6  ;;  %v17647_v63 = vcombine.high %v2201_v56, %v2205_v29  ;;  %v2193_v51 = vld [vmem:[%s19910_s15 + $0xbc8] sm:$0xff]  ;;  %v17646_v54 = vcombine.low %v2201_v56, %v2205_v29 }
 0x3ed   : > { %15006 = vmatprep.subr.bf16.mxu0 %v17535_v41  ;;  %v2197_v10 = vld [vmem:[%s19910_s15 + $0xbe8] sm:$0xff] }
 0x3ee   : > { %15046 = vmatpush1.bf16.msra.mxu1 %v17670_v14  ;;  %v2321_v40 = vld [vmem:[%s19910_s15 + $0xfc8] sm:$0xff]  ;;  %v17639_v59 = vcombine.high %v2193_v51, %v2197_v10  ;;  %v17638_v15 = vcombine.low %v2193_v51, %v2197_v10 }
 0x3ef   : > { %15047 = vmatprep.subr.bf16.mxu1 %v17663_v57  ;;  %v2325_v4 = vld [vmem:[%s19910_s15 + $0xfe8] sm:$0xff] }
 0x3f0   : > { %15007 = vmatpush1.bf16.msra.mxu0 %v17534_v3  ;;  %v17767_v6 = vcombine.high %v2321_v40, %v2325_v4  ;;  %v2185_v14 = vld [vmem:[%s19910_s15 + $0xb88] sm:$0xff]  ;;  %v17766_v13 = vcombine.low %v2321_v40, %v2325_v4 }
 0x3f1   : > { %15008 = vmatprep.subr.bf16.mxu0 %v17527_v44  ;;  %v2189_v41 = vld [vmem:[%s19910_s15 + $0xba8] sm:$0xff] }
 0x3f2   : > { %15048 = vmatpush1.bf16.msra.mxu1 %v17662_v17  ;;  %v2313_v57 = vld [vmem:[%s19910_s15 + $0xf88] sm:$0xff]  ;;  %v17631_v31 = vcombine.high %v2185_v14, %v2189_v41  ;;  %v17630_v20 = vcombine.low %v2185_v14, %v2189_v41 }
 0x3f3   : > { %15049 = vmatprep.subr.bf16.mxu1 %v17655_v47  ;;  %v2317_v16 = vld [vmem:[%s19910_s15 + $0xfa8] sm:$0xff] }
 0x3f4   : > { %15009 = vmatpush1.bf16.msra.mxu0 %v17526_v58  ;;  %v17759_v3 = vcombine.high %v2313_v57, %v2317_v16  ;;  %v2177_v17 = vld [vmem:[%s19910_s15 + $0xb48] sm:$0xff]  ;;  %v17758_v56 = vcombine.low %v2313_v57, %v2317_v16 }
 0x3f5   : > { %15010 = vmatprep.subr.bf16.mxu0 %v17519_v60  ;;  %v2181_v44 = vld [vmem:[%s19910_s15 + $0xb68] sm:$0xff] }
 0x3f6   : > { %15050 = vmatpush1.bf16.msra.mxu1 %v17654_v24  ;;  %v2305_v47 = vld [vmem:[%s19910_s15 + $0xf48] sm:$0xff]  ;;  %v17623_v29 = vcombine.high %v2177_v17, %v2181_v44  ;;  %v17622_v10 = vcombine.low %v2177_v17, %v2181_v44 }
 0x3f7   : > { %15051 = vmatprep.subr.bf16.mxu1 %v17647_v63  ;;  %v2309_v33 = vld [vmem:[%s19910_s15 + $0xf68] sm:$0xff] }
 0x3f8   : > { %15011 = vmatpush1.bf16.msra.mxu0 %v17518_v43  ;;  %v17751_v58 = vcombine.high %v2305_v47, %v2309_v33  ;;  %v2169_v24 = vld [vmem:[%s19910_s15 + $0xb08] sm:$0xff]  ;;  %v17750_v40 = vcombine.low %v2305_v47, %v2309_v33 }
 0x3f9   : > { %15012 = vmatprep.subr.bf16.mxu0 %v17639_v59  ;;  %v2173_v60 = vld [vmem:[%s19910_s15 + $0xb28] sm:$0xff] }
 0x3fa   : > { %15052 = vmatpush1.bf16.msra.mxu1 %v17646_v54  ;;  %v2297_v63 = vld [vmem:[%s19910_s15 + $0xf08] sm:$0xff]  ;;  %v17615_v4 = vcombine.high %v2169_v24, %v2173_v60  ;;  %v17614_v41 = vcombine.low %v2169_v24, %v2173_v60 }
 0x3fb   : > { %15053 = vmatprep.subr.bf16.mxu1 %v17767_v6  ;;  %v2301_v51 = vld [vmem:[%s19910_s15 + $0xf28] sm:$0xff] }
 0x3fc   : > { %15013 = vmatpush2.bf16.msra.mxu0 %v17638_v15  ;;  %v17743_v43 = vcombine.high %v2297_v63, %v2301_v51  ;;  %v2161_v54 = vld [vmem:[%s19910_s15 + $0xac8] sm:$0xff]  ;;  %v17742_v57 = vcombine.low %v2297_v63, %v2301_v51 }
 0x3fd   : > { %15014 = vmatprep.subr.bf16.mxu0 %v17631_v31  ;;  %v2165_v59 = vld [vmem:[%s19910_s15 + $0xae8] sm:$0xff] }
 0x3fe   : > { %15054 = vmatpush2.bf16.msra.mxu1 %v17766_v13  ;;  %v2289_v6 = vld [vmem:[%s19910_s15 + $0xec8] sm:$0xff]  ;;  %v17607_v16 = vcombine.high %v2161_v54, %v2165_v59  ;;  %v17606_v44 = vcombine.low %v2161_v54, %v2165_v59 }
 0x3ff   : > { %15055 = vmatprep.subr.bf16.mxu1 %v17759_v3  ;;  %v2293_v14 = vld [vmem:[%s19910_s15 + $0xee8] sm:$0xff] }
 0x400   : > { %15015 = vmatpush2.bf16.msra.mxu0 %v17630_v20  ;;  %v17735_v15 = vcombine.high %v2289_v6, %v2293_v14  ;;  %v2153_v13 = vld [vmem:[%s19910_s15 + $0xa88] sm:$0xff]  ;;  %v17734_v47 = vcombine.low %v2289_v6, %v2293_v14 }
 0x401   : > { %15016 = vmatprep.subr.bf16.mxu0 %v17623_v29  ;;  %v2157_v31 = vld [vmem:[%s19910_s15 + $0xaa8] sm:$0xff] }
 0x402   : > { %15056 = vmatpush2.bf16.msra.mxu1 %v17758_v56  ;;  %v2281_v3 = vld [vmem:[%s19910_s15 + $0xe88] sm:$0xff]  ;;  %v17599_v33 = vcombine.high %v2153_v13, %v2157_v31  ;;  %v17598_v60 = vcombine.low %v2153_v13, %v2157_v31 }
 0x403   : > { %15057 = vmatprep.subr.bf16.mxu1 %v17751_v58  ;;  %v2285_v17 = vld [vmem:[%s19910_s15 + $0xea8] sm:$0xff] }
 0x404   : > { %15017 = vmatpush2.bf16.msra.mxu0 %v17622_v10  ;;  %v17727_v20 = vcombine.high %v2281_v3, %v2285_v17  ;;  %v2145_v56 = vld [vmem:[%s19910_s15 + $0xa48] sm:$0xff]  ;;  %v17726_v63 = vcombine.low %v2281_v3, %v2285_v17 }
 0x405   : > { %15018 = vmatprep.subr.bf16.mxu0 %v17615_v4  ;;  %v2149_v29 = vld [vmem:[%s19910_s15 + $0xa68] sm:$0xff] }
 0x406   : > { %15058 = vmatpush2.bf16.msra.mxu1 %v17750_v40  ;;  %v2273_v58 = vld [vmem:[%s19910_s15 + $0xe48] sm:$0xff]  ;;  %v17591_v51 = vcombine.high %v2145_v56, %v2149_v29  ;;  %v17590_v59 = vcombine.low %v2145_v56, %v2149_v29 }
 0x407   : > { %15059 = vmatprep.subr.bf16.mxu1 %v17743_v43  ;;  %v2277_v24 = vld [vmem:[%s19910_s15 + $0xe68] sm:$0xff] }
 0x408   : > { %15019 = vmatpush2.bf16.msra.mxu0 %v17614_v41  ;;  %v17719_v10 = vcombine.high %v2273_v58, %v2277_v24  ;;  %v2137_v40 = vld [vmem:[%s19910_s15 + $0xa08] sm:$0xff]  ;;  %v17718_v6 = vcombine.low %v2273_v58, %v2277_v24 }
 0x409   : > { %15020 = vmatprep.subr.bf16.mxu0 %v17607_v16  ;;  %v2141_v4 = vld [vmem:[%s19910_s15 + $0xa28] sm:$0xff] }
 0x40a   : > { %15060 = vmatpush2.bf16.msra.mxu1 %v17742_v57  ;;  %v2265_v43 = vld [vmem:[%s19910_s15 + $0xe08] sm:$0xff]  ;;  %v17583_v14 = vcombine.high %v2137_v40, %v2141_v4  ;;  %v17582_v31 = vcombine.low %v2137_v40, %v2141_v4 }
 0x40b   : > { %15061 = vmatprep.subr.bf16.mxu1 %v17735_v15  ;;  %v2269_v54 = vld [vmem:[%s19910_s15 + $0xe28] sm:$0xff] }
 0x40c   : > { %15021 = vmatpush2.bf16.msra.mxu0 %v17606_v44  ;;  %v17711_v41 = vcombine.high %v2265_v43, %v2269_v54  ;;  %v2385_v57 = vld [vmem:[%s19910_s15 + $0x11c8] sm:$0xff]  ;;  %v17710_v3 = vcombine.low %v2265_v43, %v2269_v54 }
 0x40d   : > { %15022 = vmatprep.subr.bf16.mxu0 %v17599_v33  ;;  %v2389_v16 = vld [vmem:[%s19910_s15 + $0x11e8] sm:$0xff] }
 0x40e   : > { %15062 = vmatpush2.bf16.msra.mxu1 %v17734_v47  ;;  %v2513_v15 = vld [vmem:[%s19910_s15 + $0x15c8] sm:$0xff]  ;;  %v17831_v17 = vcombine.high %v2385_v57, %v2389_v16  ;;  %v17830_v29 = vcombine.low %v2385_v57, %v2389_v16 }
 0x40f   : > { %15063 = vmatprep.subr.bf16.mxu1 %v17727_v20  ;;  %v2517_v13 = vld [vmem:[%s19910_s15 + $0x15e8] sm:$0xff] }
 0x410   : > { %15023 = vmatpush2.bf16.msra.mxu0 %v17598_v60  ;;  %v17959_v44 = vcombine.high %v2513_v15, %v2517_v13  ;;  %v2377_v47 = vld [vmem:[%s19910_s15 + $0x1188] sm:$0xff]  ;;  %v17958_v58 = vcombine.low %v2513_v15, %v2517_v13 }
 0x411   : > { %15024 = vmatprep.subr.bf16.mxu0 %v17591_v51  ;;  %v2381_v33 = vld [vmem:[%s19910_s15 + $0x11a8] sm:$0xff] }
 0x412   : > { %15064 = vmatpush2.bf16.msra.mxu1 %v17726_v63  ;;  %v2505_v20 = vld [vmem:[%s19910_s15 + $0x1588] sm:$0xff]  ;;  %v17823_v24 = vcombine.high %v2377_v47, %v2381_v33 }
 0x413   : > { %15065 = vmatprep.subr.bf16.mxu1 %v17719_v10  ;;  %v2509_v56 = vld [vmem:[%s19910_s15 + $0x15a8] sm:$0xff] }
 0x414   : > { %15025 = vmatpush2.bf16.msra.mxu0 %v17590_v59  ;;  %v17951_v60 = vcombine.high %v2505_v20, %v2509_v56  ;;  %v2369_v63 = vld [vmem:[%s19910_s15 + $0x1148] sm:$0xff]  ;;  %v17822_v59 = vcombine.low %v2377_v47, %v2381_v33 }
 0x415   : > { %15026 = vmatprep.subr.bf16.mxu0 %v17583_v14  ;;  %v2373_v51 = vld [vmem:[%s19910_s15 + $0x1168] sm:$0xff]  ;;  %v17950_v14 = vcombine.low %v2505_v20, %v2509_v56 }
 0x416   : > { %15066 = vmatpush2.bf16.msra.mxu1 %v17718_v6  ;;  %v2497_v40 = vld [vmem:[%s19910_s15 + $0x1548] sm:$0xff] }
 0x417   : > { %15067 = vmatprep.subr.bf16.mxu1 %v17711_v41  ;;  %v2501_v4 = vld [vmem:[%s19910_s15 + $0x1568] sm:$0xff]  ;;  %v17815_v41 = vcombine.high %v2369_v63, %v2373_v51 }
 0x418   : > { %15027 = vmatpush2.bf16.msra.mxu0 %v17582_v31  ;;  %v2361_v13 = vld [vmem:[%s19910_s15 + $0x1108] sm:$0xff]  ;;  %v17942_v56 = vcombine.low %v2497_v40, %v2501_v4 }
 0x419   : > { %15078 = vmatprep.subr.bf16.mxu0 %v17831_v17  ;;  %v2365_v31 = vld [vmem:[%s19910_s15 + $0x1128] sm:$0xff] }
 0x41a   : > { %15068 = vmatpush2.bf16.msra.mxu1 %v17710_v3  ;;  %v14784_v10 = vpop.f32.mrf.mxu0  ;;  %v2489_v17 = vld [vmem:[%s19910_s15 + $0x1508] sm:$0xff] }
 0x41b   : > { %15119 = vmatprep.subr.bf16.mxu1 %v17959_v44  ;;  %15029 = vmatmul.mubr.bf16.vlgmr.msra.gmra.mxu0 %v20203_v53  ;;  %v14785_v43 = vadd.f32 %v14784_v10, %v20851_v2  ;;  %v17943_v2 = vcombine.high %v2497_v40, %v2501_v4  ;;  %v2493_v44 = vld [vmem:[%s19910_s15 + $0x1528] sm:$0xff] }
 0x41c   : > { %v14825_v54 = vpop.f32.mrf.mxu1  ;;  %15079 = vmatpush1.bf16.msra.mxu0 %v17830_v29  ;;  %v14786_v6 = vpop.f32.mrf.mxu0  ;;  %15110 = vmatprep.mubr.bf16.mxu0 %v20219_v62  ;;  %v17807_v29 = vcombine.high %v2361_v13, %v2365_v31  ;;  %v2357_v10 = vld [vmem:[%s19910_s15 + $0x10e8] sm:$0xff] }
 0x41d   : > { %15070 = vmatmul.mubr.bf16.vlgmr.msra.gmra.mxu1 %v20211_v8  ;;  %15080 = vmatprep.subr.bf16.mxu0 %v17823_v24  ;;  %v20925_v57 = vadd.f32 %v14825_v54, %v14785_v43  ;;  %v14787_v16 = vadd.f32 %v14786_v6, %v20860_v49  ;;  %v17814_v49 = vcombine.low %v2369_v63, %v2373_v51  ;;  %v2481_v43 = vld [vmem:[%s19910_s15 + $0x14c8] sm:$0xff] }
 0x41e   : > { %15120 = vmatpush1.bf16.msra.mxu1 %v17958_v58  ;;  %v14827_v15 = vpop.f32.mrf.mxu1  ;;  %v14788_v3 = vpop.f32.mrf.mxu0  ;;  %15151 = vmatprep.mubr.bf16.mxu1 %v20226_v0  ;;  %v17935_v24 = vcombine.high %v2489_v17, %v2493_v44  ;;  %v2485_v54 = vld [vmem:[%s19910_s15 + $0x14e8] sm:$0xff]  ;;  %v17806_v6 = vcombine.low %v2361_v13, %v2365_v31  ;;  %v17934_v63 = vcombine.low %v2489_v17, %v2493_v44 }
 0x41f   : > { %15121 = vmatprep.subr.bf16.mxu1 %v17951_v60  ;;  %v20934_v47 = vadd.f32 %v14827_v15, %v14787_v16  ;;  %v2353_v60 = vld [vmem:[%s19910_s15 + $0x10c8] sm:$0xff]  ;;  %v17927_v40 = vcombine.high %v2481_v43, %v2485_v54  ;;  %v17926_v15 = vcombine.low %v2481_v43, %v2485_v54 }
 0x420   : > { %v14829_v33 = vpop.f32.mrf.mxu1  ;;  %15081 = vmatpush1.bf16.msra.mxu0 %v17822_v59  ;;  %v14789_v20 = vpop.f32.mrf.mxu0  ;;  %v17799_v51 = vcombine.high %v2353_v60, %v2357_v10  ;;  %v2345_v4 = vld [vmem:[%s19910_s15 + $0x1088] sm:$0xff]  ;;  %v17798_v16 = vcombine.low %v2353_v60, %v2357_v10 }
 0x421   : > { %15082 = vmatprep.subr.bf16.mxu0 %v17815_v41  ;;  %v2349_v59 = vld [vmem:[%s19910_s15 + $0x10a8] sm:$0xff] }
 0x422   : > { %15122 = vmatpush1.bf16.msra.mxu1 %v17950_v14  ;;  %v14830_v58 = vpop.f32.mrf.mxu1  ;;  %v2473_v14 = vld [vmem:[%s19910_s15 + $0x1488] sm:$0xff]  ;;  %v17790_v33 = vcombine.low %v2345_v4, %v2349_v59 }
 0x423   : > { %15123 = vmatprep.subr.bf16.mxu1 %v17943_v2  ;;  %v2477_v41 = vld [vmem:[%s19910_s15 + $0x14a8] sm:$0xff]  ;;  %v17791_v2 = vcombine.high %v2345_v4, %v2349_v59 }
 0x424   : > { %15083 = vmatpush1.bf16.msra.mxu0 %v17814_v49  ;;  %v17919_v13 = vcombine.high %v2473_v14, %v2477_v41  ;;  %v2337_v31 = vld [vmem:[%s19910_s15 + $0x1048] sm:$0xff]  ;;  %v17918_v49 = vcombine.low %v2473_v14, %v2477_v41 }
 0x425   : > { %15084 = vmatprep.subr.bf16.mxu0 %v17807_v29  ;;  %v2341_v3 = vld [vmem:[%s19910_s15 + $0x1068] sm:$0xff] }
 0x426   : > { %15124 = vmatpush1.bf16.msra.mxu1 %v17942_v56  ;;  %v2465_v17 = vld [vmem:[%s19910_s15 + $0x1448] sm:$0xff]  ;;  %v17783_v20 = vcombine.high %v2337_v31, %v2341_v3  ;;  %v17782_v10 = vcombine.low %v2337_v31, %v2341_v3 }
 0x427   : > { %15125 = vmatprep.subr.bf16.mxu1 %v17935_v24  ;;  %v2469_v44 = vld [vmem:[%s19910_s15 + $0x1468] sm:$0xff] }
 0x428   : > { %15085 = vmatpush1.bf16.msra.mxu0 %v17806_v6  ;;  %v17911_v56 = vcombine.high %v2465_v17, %v2469_v44  ;;  %v2329_v29 = vld [vmem:[%s19910_s15 + $0x1008] sm:$0xff]  ;;  %v17910_v43 = vcombine.low %v2465_v17, %v2469_v44 }
 0x429   : > { %15086 = vmatprep.subr.bf16.mxu0 %v17799_v51  ;;  %v2333_v58 = vld [vmem:[%s19910_s15 + $0x1028] sm:$0xff] }
 0x42a   : > { %15126 = vmatpush1.bf16.msra.mxu1 %v17934_v63  ;;  %v2457_v24 = vld [vmem:[%s19910_s15 + $0x1408] sm:$0xff]  ;;  %v17775_v54 = vcombine.high %v2329_v29, %v2333_v58  ;;  %v17774_v59 = vcombine.low %v2329_v29, %v2333_v58 }
 0x42b   : > { %15127 = vmatprep.subr.bf16.mxu1 %v17927_v40  ;;  %v2461_v60 = vld [vmem:[%s19910_s15 + $0x1428] sm:$0xff] }
 0x42c   : > { %15087 = vmatpush1.bf16.msra.mxu0 %v17798_v16  ;;  %v17903_v6 = vcombine.high %v2457_v24, %v2461_v60  ;;  %v2449_v63 = vld [vmem:[%s19910_s15 + $0x13c8] sm:$0xff]  ;;  %v17902_v14 = vcombine.low %v2457_v24, %v2461_v60 }
 0x42d   : > { %15088 = vmatprep.subr.bf16.mxu0 %v17791_v2  ;;  %v2453_v51 = vld [vmem:[%s19910_s15 + $0x13e8] sm:$0xff] }
 0x42e   : > { %15128 = vmatpush1.bf16.msra.mxu1 %v17926_v15  ;;  %v2577_v40 = vld [vmem:[%s19910_s15 + $0x17c8] sm:$0xff]  ;;  %v17895_v41 = vcombine.high %v2449_v63, %v2453_v51  ;;  %v17894_v3 = vcombine.low %v2449_v63, %v2453_v51 }
 0x42f   : > { %15129 = vmatprep.subr.bf16.mxu1 %v17919_v13  ;;  %v2581_v4 = vld [vmem:[%s19910_s15 + $0x17e8] sm:$0xff] }
 0x430   : > { %15089 = vmatpush1.bf16.msra.mxu0 %v17790_v33  ;;  %v18023_v16 = vcombine.high %v2577_v40, %v2581_v4  ;;  %v2441_v15 = vld [vmem:[%s19910_s15 + $0x1388] sm:$0xff]  ;;  %v18022_v17 = vcombine.low %v2577_v40, %v2581_v4 }
 0x431   : > { %15090 = vmatprep.subr.bf16.mxu0 %v17783_v20  ;;  %v2445_v2 = vld [vmem:[%s19910_s15 + $0x13a8] sm:$0xff] }
 0x432   : > { %15130 = vmatpush1.bf16.msra.mxu1 %v17918_v49  ;;  %v2569_v13 = vld [vmem:[%s19910_s15 + $0x1788] sm:$0xff]  ;;  %v17887_v44 = vcombine.high %v2441_v15, %v2445_v2  ;;  %v17886_v58 = vcombine.low %v2441_v15, %v2445_v2 }
 0x433   : > { %15131 = vmatprep.subr.bf16.mxu1 %v17911_v56  ;;  %v2573_v31 = vld [vmem:[%s19910_s15 + $0x17a8] sm:$0xff] }
 0x434   : > { %15091 = vmatpush1.bf16.msra.mxu0 %v17782_v10  ;;  %v18015_v33 = vcombine.high %v2569_v13, %v2573_v31  ;;  %v2433_v49 = vld [vmem:[%s19910_s15 + $0x1348] sm:$0xff]  ;;  %v18014_v24 = vcombine.low %v2569_v13, %v2573_v31 }
 0x435   : > { %15092 = vmatprep.subr.bf16.mxu0 %v17775_v54  ;;  %v2437_v20 = vld [vmem:[%s19910_s15 + $0x1368] sm:$0xff] }
 0x436   : > { %15132 = vmatpush1.bf16.msra.mxu1 %v17910_v43  ;;  %v2561_v56 = vld [vmem:[%s19910_s15 + $0x1748] sm:$0xff]  ;;  %v17879_v60 = vcombine.high %v2433_v49, %v2437_v20  ;;  %v17878_v51 = vcombine.low %v2433_v49, %v2437_v20 }
 0x437   : > { %15133 = vmatprep.subr.bf16.mxu1 %v17903_v6  ;;  %v2565_v29 = vld [vmem:[%s19910_s15 + $0x1768] sm:$0xff] }
 0x438   : > { %15093 = vmatpush1.bf16.msra.mxu0 %v17774_v59  ;;  %v18007_v10 = vcombine.high %v2561_v56, %v2565_v29  ;;  %v2425_v43 = vld [vmem:[%s19910_s15 + $0x1308] sm:$0xff]  ;;  %v18006_v40 = vcombine.low %v2561_v56, %v2565_v29 }
 0x439   : > { %15094 = vmatprep.subr.bf16.mxu0 %v17895_v41  ;;  %v2429_v54 = vld [vmem:[%s19910_s15 + $0x1328] sm:$0xff] }
 0x43a   : > { %15134 = vmatpush1.bf16.msra.mxu1 %v17902_v14  ;;  %v2553_v6 = vld [vmem:[%s19910_s15 + $0x1708] sm:$0xff]  ;;  %v17871_v4 = vcombine.high %v2425_v43, %v2429_v54  ;;  %v17870_v2 = vcombine.low %v2425_v43, %v2429_v54 }
 0x43b   : > { %15135 = vmatprep.subr.bf16.mxu1 %v18023_v16  ;;  %v2557_v63 = vld [vmem:[%s19910_s15 + $0x1728] sm:$0xff] }
 0x43c   : > { %15095 = vmatpush2.bf16.msra.mxu0 %v17894_v3  ;;  %v17999_v59 = vcombine.high %v2553_v6, %v2557_v63  ;;  %v2417_v14 = vld [vmem:[%s19910_s15 + $0x12c8] sm:$0xff]  ;;  %v17998_v13 = vcombine.low %v2553_v6, %v2557_v63 }
 0x43d   : > { %15096 = vmatprep.subr.bf16.mxu0 %v17887_v44  ;;  %v2421_v41 = vld [vmem:[%s19910_s15 + $0x12e8] sm:$0xff] }
 0x43e   : > { %15136 = vmatpush2.bf16.msra.mxu1 %v18022_v17  ;;  %v2545_v16 = vld [vmem:[%s19910_s15 + $0x16c8] sm:$0xff]  ;;  %v17863_v31 = vcombine.high %v2417_v14, %v2421_v41  ;;  %v17862_v20 = vcombine.low %v2417_v14, %v2421_v41 }
 0x43f   : > { %15137 = vmatprep.subr.bf16.mxu1 %v18015_v33  ;;  %v2549_v15 = vld [vmem:[%s19910_s15 + $0x16e8] sm:$0xff] }
 0x440   : > { %15097 = vmatpush2.bf16.msra.mxu0 %v17886_v58  ;;  %v17991_v3 = vcombine.high %v2545_v16, %v2549_v15  ;;  %v2409_v17 = vld [vmem:[%s19910_s15 + $0x1288] sm:$0xff]  ;;  %v17990_v56 = vcombine.low %v2545_v16, %v2549_v15 }
 0x441   : > { %15098 = vmatprep.subr.bf16.mxu0 %v17879_v60  ;;  %v2413_v44 = vld [vmem:[%s19910_s15 + $0x12a8] sm:$0xff] }
 0x442   : > { %15138 = vmatpush2.bf16.msra.mxu1 %v18014_v24  ;;  %v2537_v33 = vld [vmem:[%s19910_s15 + $0x1688] sm:$0xff]  ;;  %v17855_v29 = vcombine.high %v2409_v17, %v2413_v44  ;;  %v17854_v54 = vcombine.low %v2409_v17, %v2413_v44 }
 0x443   : > { %15139 = vmatprep.subr.bf16.mxu1 %v18007_v10  ;;  %v2541_v49 = vld [vmem:[%s19910_s15 + $0x16a8] sm:$0xff] }
 0x444   : > { %15099 = vmatpush2.bf16.msra.mxu0 %v17878_v51  ;;  %v17983_v58 = vcombine.high %v2537_v33, %v2541_v49  ;;  %v2401_v24 = vld [vmem:[%s19910_s15 + $0x1248] sm:$0xff]  ;;  %v17982_v6 = vcombine.low %v2537_v33, %v2541_v49 }
 0x445   : > { %15100 = vmatprep.subr.bf16.mxu0 %v17871_v4  ;;  %v2405_v60 = vld [vmem:[%s19910_s15 + $0x1268] sm:$0xff] }
 0x446   : > { %15140 = vmatpush2.bf16.msra.mxu1 %v18006_v40  ;;  %v2529_v10 = vld [vmem:[%s19910_s15 + $0x1648] sm:$0xff]  ;;  %v17847_v63 = vcombine.high %v2401_v24, %v2405_v60  ;;  %v17846_v41 = vcombine.low %v2401_v24, %v2405_v60 }
 0x447   : > { %15141 = vmatprep.subr.bf16.mxu1 %v17999_v59  ;;  %v2533_v43 = vld [vmem:[%s19910_s15 + $0x1668] sm:$0xff] }
 0x448   : > { %15101 = vmatpush2.bf16.msra.mxu0 %v17870_v2  ;;  %v17975_v51 = vcombine.high %v2529_v10, %v2533_v43  ;;  %v2393_v40 = vld [vmem:[%s19910_s15 + $0x1208] sm:$0xff]  ;;  %v17974_v16 = vcombine.low %v2529_v10, %v2533_v43 }
 0x449   : > { %15102 = vmatprep.subr.bf16.mxu0 %v17863_v31  ;;  %v2397_v4 = vld [vmem:[%s19910_s15 + $0x1228] sm:$0xff] }
 0x44a   : > { %15142 = vmatpush2.bf16.msra.mxu1 %v17998_v13  ;;  %v2521_v59 = vld [vmem:[%s19910_s15 + $0x1608] sm:$0xff]  ;;  %v17839_v15 = vcombine.high %v2393_v40, %v2397_v4  ;;  %v17838_v44 = vcombine.low %v2393_v40, %v2397_v4 }
 0x44b   : > { %15143 = vmatprep.subr.bf16.mxu1 %v17991_v3  ;;  %v2525_v14 = vld [vmem:[%s19910_s15 + $0x1628] sm:$0xff] }
 0x44c   : > { %15103 = vmatpush2.bf16.msra.mxu0 %v17862_v20  ;;  %v17967_v2 = vcombine.high %v2521_v59, %v2525_v14  ;;  %v2641_v13 = vld [vmem:[%s19910_s15 + $0x19c8] sm:$0xff]  ;;  %v17966_v33 = vcombine.low %v2521_v59, %v2525_v14 }
 0x44d   : > { %15104 = vmatprep.subr.bf16.mxu0 %v17855_v29  ;;  %v2645_v31 = vld [vmem:[%s19910_s15 + $0x19e8] sm:$0xff] }
 0x44e   : > { %15144 = vmatpush2.bf16.msra.mxu1 %v17990_v56  ;;  %v2769_v3 = vld [vmem:[%s19910_s15 + $0x1dc8] sm:$0xff]  ;;  %v18087_v49 = vcombine.high %v2641_v13, %v2645_v31  ;;  %v18086_v60 = vcombine.low %v2641_v13, %v2645_v31 }
 0x44f   : > { %15145 = vmatprep.subr.bf16.mxu1 %v17983_v58  ;;  %v2773_v17 = vld [vmem:[%s19910_s15 + $0x1de8] sm:$0xff] }
 0x450   : > { %15105 = vmatpush2.bf16.msra.mxu0 %v17854_v54  ;;  %v18215_v20 = vcombine.high %v2769_v3, %v2773_v17  ;;  %v2633_v56 = vld [vmem:[%s19910_s15 + $0x1988] sm:$0xff]  ;;  %v18214_v10 = vcombine.low %v2769_v3, %v2773_v17 }
 0x451   : > { %15106 = vmatprep.subr.bf16.mxu0 %v17847_v63  ;;  %v2637_v29 = vld [vmem:[%s19910_s15 + $0x19a8] sm:$0xff] }
 0x452   : > { %15146 = vmatpush2.bf16.msra.mxu1 %v17982_v6  ;;  %v2761_v58 = vld [vmem:[%s19910_s15 + $0x1d88] sm:$0xff]  ;;  %v18079_v43 = vcombine.high %v2633_v56, %v2637_v29 }
 0x453   : > { %15147 = vmatprep.subr.bf16.mxu1 %v17975_v51  ;;  %v2765_v24 = vld [vmem:[%s19910_s15 + $0x1da8] sm:$0xff] }
 0x454   : > { %15107 = vmatpush2.bf16.msra.mxu0 %v17846_v41  ;;  %v18207_v54 = vcombine.high %v2761_v58, %v2765_v24  ;;  %v2625_v6 = vld [vmem:[%s19910_s15 + $0x1948] sm:$0xff]  ;;  %v16891_v41 = vld [vmem:[%s19925_s19] sm:$0xff] }
 0x455   : > { %15108 = vmatprep.subr.bf16.mxu0 %v17839_v15  ;;  %v2629_v63 = vld [vmem:[%s19910_s15 + $0x1968] sm:$0xff] }
 0x456   : > { %15148 = vmatpush2.bf16.msra.mxu1 %v17974_v16  ;;  %v2753_v40 = vld [vmem:[%s19910_s15 + $0x1d48] sm:$0xff]  ;;  %v18078_v16 = vcombine.low %v2633_v56, %v2637_v29  ;;  %v18071_v13 = vcombine.high %v2625_v6, %v2629_v63 }
 0x457   : > { %15149 = vmatprep.subr.bf16.mxu1 %v17967_v2  ;;  %v2757_v4 = vld [vmem:[%s19910_s15 + $0x1d68] sm:$0xff]  ;;  %v18206_v2 = vcombine.low %v2761_v58, %v2765_v24 }
 0x458   : > { %15109 = vmatpush2.bf16.msra.mxu0 %v17838_v44  ;;  %v2617_v44 = vld [vmem:[%s19910_s15 + $0x1908] sm:$0xff] }
 0x459   : > { %15160 = vmatprep.subr.bf16.mxu0 %v18087_v49  ;;  %v16896_v49 = vrot.slane %v16891_v41, %v3868_v38  ;;  %v2745_v56 = vld [vmem:[%s19910_s15 + $0x1d08] sm:$0xff]  ;;  %v18198_v38 = vcombine.low %v2753_v40, %v2757_v4 }
 0x45a   : > { %15150 = vmatpush2.bf16.msra.mxu1 %v17966_v33  ;;  %v2621_v33 = vld [vmem:[%s19910_s15 + $0x1928] sm:$0xff] }
 0x45b   : > { %15201 = vmatprep.subr.bf16.mxu1 %v18215_v20  ;;  %v14866_v51 = vpop.f32.mrf.mxu0  ;;  %15111 = vmatmul.mubr.bf16.vlgmr.msra.gmra.mxu0 %v20291_v19  ;;  %v2749_v29 = vld [vmem:[%s19910_s15 + $0x1d28] sm:$0xff] }
 0x45c   : > { %v14867_v59 = vadd.f32 %v14866_v51, %v20925_v57  ;;  %15161 = vmatpush1.bf16.msra.mxu0 %v18086_v60  ;;  %v18199_v57 = vcombine.high %v2753_v40, %v2757_v4  ;;  %15192 = vmatprep.mubr.bf16.mxu0 %v20307_v34 }
 0x45d   : > { %v14907_v14 = vpop.f32.mrf.mxu1  ;;  %15152 = vmatmul.mubr.bf16.vlgmr.msra.gmra.mxu1 %v20299_v25  ;;  %v14868_v15 = vpop.f32.mrf.mxu0  ;;  %15162 = vmatprep.subr.bf16.mxu0 %v18079_v43 }
 0x45e   : > { %15202 = vmatpush1.bf16.msra.mxu1 %v18214_v10  ;;  %v14908_v31 = vadd.f32 %v14907_v14, %v14867_v59  ;;  %v14869_v3 = vadd.f32 %v14868_v15, %v20934_v47  ;;  %15233 = vmatprep.mubr.bf16.mxu1 %v20314_v36  ;;  %v16900_v47 = vrot.slane %v16891_v41, %v3872_v1  ;;  %v2609_v15 = vld [vmem:[%s19910_s15 + $0x18c8] sm:$0xff] }
 0x45f   : > { %v14909_v17 = vpop.f32.mrf.mxu1  ;;  %15203 = vmatprep.subr.bf16.mxu1 %v18207_v54  ;;  %v14870_v20 = vpop.f32.mrf.mxu0  ;;  %v18070_v10 = vcombine.low %v2625_v6, %v2629_v63  ;;  %v18063_v54 = vcombine.high %v2617_v44, %v2621_v33  ;;  %v18191_v14 = vcombine.high %v2745_v56, %v2749_v29  ;;  %v2741_v1 = vld [vmem:[%s19910_s15 + $0x1ce8] sm:$0xff]  ;;  %v18062_v6 = vcombine.low %v2617_v44, %v2621_v33 }
 0x460   : > { %v16882_v58 = vmax.f32 %v14908_v31, 0.0  ;;  %v14910_v24 = vadd.f32 %v14909_v17, %v14869_v3  ;;  %15163 = vmatpush1.bf16.msra.mxu0 %v18078_v16  ;;  %v2613_v31 = vld [vmem:[%s19910_s15 + $0x18e8] sm:$0xff]  ;;  %v18190_v63 = vcombine.low %v2745_v56, %v2749_v29 }
 0x461   : > { %v14911_v60 = vpop.f32.mrf.mxu1  ;;  %v14871_v43 = vpop.f32.mrf.mxu0  ;;  %15164 = vmatprep.subr.bf16.mxu0 %v18071_v13  ;;  %v2737_v3 = vld [vmem:[%s19910_s15 + $0x1cc8] sm:$0xff]  ;;  %v18055_v40 = vcombine.high %v2609_v15, %v2613_v31 }
 0x462   : > { %15204 = vmatpush1.bf16.msra.mxu1 %v18206_v2  ;;  %v16883_v51 = vmax.f32 %v14910_v24, 0.0  ;;  %v16933_v41 = vmul.f32 %v16896_v49, %v16882_v58  ;;  %v18183_v2 = vcombine.high %v2737_v3, %v2741_v1  ;;  %v2601_v13 = vld [vmem:[%s19910_s15 + $0x1888] sm:$0xff]  ;;  %v18054_v49 = vcombine.low %v2609_v15, %v2613_v31 }
 0x463   : > { %v14912_v59 = vpop.f32.mrf.mxu1  ;;  %15205 = vmatprep.subr.bf16.mxu1 %v18199_v57  ;;  %v2605_v17 = vld [vmem:[%s19910_s15 + $0x18a8] sm:$0xff]  ;;  %v18182_v44 = vcombine.low %v2737_v3, %v2741_v1 }
 0x464   : > { %v16934_v16 = vmul.f32 %v16900_v47, %v16883_v51  ;;  %15165 = vmatpush1.bf16.msra.mxu0 %v18070_v10  ;;  %v2729_v57 = vld [vmem:[%s19910_s15 + $0x1c88] sm:$0xff]  ;;  %v18047_v33 = vcombine.high %v2601_v13, %v2605_v17  ;;  %v18046_v60 = vcombine.low %v2601_v13, %v2605_v17 }
 0x465   : > { %15166 = vmatprep.subr.bf16.mxu0 %v18063_v54  ;;  %v2733_v20 = vld [vmem:[%s19910_s15 + $0x1ca8] sm:$0xff] }
 0x466   : > { %15206 = vmatpush1.bf16.msra.mxu1 %v18198_v38  ;;  %v21015_v4 = vadd.f32 %v16934_v16, %v16933_v41  ;;  %v18175_v56 = vcombine.high %v2729_v57, %v2733_v20  ;;  %v2593_v29 = vld [vmem:[%s19910_s15 + $0x1848] sm:$0xff]  ;;  %v18174_v10 = vcombine.low %v2729_v57, %v2733_v20 }
 0x467   : > { %15207 = vmatprep.subr.bf16.mxu1 %v18191_v14  ;;  %v2597_v58 = vld [vmem:[%s19910_s15 + $0x1868] sm:$0xff] }
 0x468   : > { %15167 = vmatpush1.bf16.msra.mxu0 %v18062_v6  ;;  %v2721_v24 = vld [vmem:[%s19910_s15 + $0x1c48] sm:$0xff]  ;;  %v18039_v43 = vcombine.high %v2593_v29, %v2597_v58  ;;  %v18038_v15 = vcombine.low %v2593_v29, %v2597_v58 }
 0x469   : > { %15168 = vmatprep.subr.bf16.mxu0 %v18055_v40  ;;  %v2725_v47 = vld [vmem:[%s19910_s15 + $0x1c68] sm:$0xff] }
 0x46a   : > { %15208 = vmatpush1.bf16.msra.mxu1 %v18190_v63  ;;  %v18167_v38 = vcombine.high %v2721_v24, %v2725_v47  ;;  %v2585_v54 = vld [vmem:[%s19910_s15 + $0x1808] sm:$0xff]  ;;  %v18166_v31 = vcombine.low %v2721_v24, %v2725_v47 }
 0x46b   : > { %15209 = vmatprep.subr.bf16.mxu1 %v18183_v2  ;;  %v2589_v51 = vld [vmem:[%s19910_s15 + $0x1828] sm:$0xff] }
 0x46c   : > { %15169 = vmatpush1.bf16.msra.mxu0 %v18054_v49  ;;  %v2713_v59 = vld [vmem:[%s19910_s15 + $0x1c08] sm:$0xff]  ;;  %v18031_v3 = vcombine.high %v2585_v54, %v2589_v51  ;;  %v18030_v40 = vcombine.low %v2585_v54, %v2589_v51 }
 0x46d   : > { %15170 = vmatprep.subr.bf16.mxu0 %v18047_v33  ;;  %v2717_v14 = vld [vmem:[%s19910_s15 + $0x1c28] sm:$0xff] }
 0x46e   : > { %15210 = vmatpush1.bf16.msra.mxu1 %v18182_v44  ;;  %v18159_v1 = vcombine.high %v2713_v59, %v2717_v14  ;;  %v2705_v41 = vld [vmem:[%s19910_s15 + $0x1bc8] sm:$0xff]  ;;  %v18158_v2 = vcombine.low %v2713_v59, %v2717_v14 }
 0x46f   : > { %15211 = vmatprep.subr.bf16.mxu1 %v18175_v56  ;;  %v2709_v16 = vld [vmem:[%s19910_s15 + $0x1be8] sm:$0xff] }
 0x470   : > { %15171 = vmatpush1.bf16.msra.mxu0 %v18046_v60  ;;  %v2833_v6 = vld [vmem:[%s19910_s15 + $0x1fc8] sm:$0xff]  ;;  %v18151_v13 = vcombine.high %v2705_v41, %v2709_v16  ;;  %v18150_v33 = vcombine.low %v2705_v41, %v2709_v16 }
 0x471   : > { %15172 = vmatprep.subr.bf16.mxu0 %v18039_v43  ;;  %v2837_v63 = vld [vmem:[%s19910_s15 + $0x1fe8] sm:$0xff] }
 0x472   : > { %15212 = vmatpush1.bf16.msra.mxu1 %v18174_v10  ;;  %v18279_v17 = vcombine.high %v2833_v6, %v2837_v63  ;;  %v2697_v57 = vld [vmem:[%s19910_s15 + $0x1b88] sm:$0xff]  ;;  %v18278_v56 = vcombine.low %v2833_v6, %v2837_v63 }
 0x473   : > { %15213 = vmatprep.subr.bf16.mxu1 %v18167_v38  ;;  %v2701_v20 = vld [vmem:[%s19910_s15 + $0x1ba8] sm:$0xff] }
 0x474   : > { %15173 = vmatpush1.bf16.msra.mxu0 %v18038_v15  ;;  %v2825_v49 = vld [vmem:[%s19910_s15 + $0x1f88] sm:$0xff]  ;;  %v18143_v29 = vcombine.high %v2697_v57, %v2701_v20  ;;  %v18142_v43 = vcombine.low %v2697_v57, %v2701_v20 }
 0x475   : > { %15174 = vmatprep.subr.bf16.mxu0 %v18031_v3  ;;  %v2829_v44 = vld [vmem:[%s19910_s15 + $0x1fa8] sm:$0xff] }
 0x476   : > { %15214 = vmatpush1.bf16.msra.mxu1 %v18166_v31  ;;  %v18271_v58 = vcombine.high %v2825_v49, %v2829_v44  ;;  %v2689_v24 = vld [vmem:[%s19910_s15 + $0x1b48] sm:$0xff]  ;;  %v18270_v38 = vcombine.low %v2825_v49, %v2829_v44 }
 0x477   : > { %15215 = vmatprep.subr.bf16.mxu1 %v18159_v1  ;;  %v2693_v47 = vld [vmem:[%s19910_s15 + $0x1b68] sm:$0xff] }
 0x478   : > { %15175 = vmatpush1.bf16.msra.mxu0 %v18030_v40  ;;  %v2817_v60 = vld [vmem:[%s19910_s15 + $0x1f48] sm:$0xff]  ;;  %v18135_v54 = vcombine.high %v2689_v24, %v2693_v47  ;;  %v18134_v3 = vcombine.low %v2689_v24, %v2693_v47 }
 0x479   : > { %15176 = vmatprep.subr.bf16.mxu0 %v18151_v13  ;;  %v2821_v10 = vld [vmem:[%s19910_s15 + $0x1f68] sm:$0xff] }
 0x47a   : > { %15216 = vmatpush1.bf16.msra.mxu1 %v18158_v2  ;;  %v18263_v51 = vcombine.high %v2817_v60, %v2821_v10  ;;  %v2681_v59 = vld [vmem:[%s19910_s15 + $0x1b08] sm:$0xff]  ;;  %v18262_v1 = vcombine.low %v2817_v60, %v2821_v10 }
 0x47b   : > { %15217 = vmatprep.subr.bf16.mxu1 %v18279_v17  ;;  %v2685_v14 = vld [vmem:[%s19910_s15 + $0x1b28] sm:$0xff] }
 0x47c   : > { %15177 = vmatpush2.bf16.msra.mxu0 %v18150_v33  ;;  %v2809_v15 = vld [vmem:[%s19910_s15 + $0x1f08] sm:$0xff]  ;;  %v18127_v41 = vcombine.high %v2681_v59, %v2685_v14  ;;  %v18126_v13 = vcombine.low %v2681_v59, %v2685_v14 }
 0x47d   : > { %15178 = vmatprep.subr.bf16.mxu0 %v18143_v29  ;;  %v2813_v31 = vld [vmem:[%s19910_s15 + $0x1f28] sm:$0xff] }
 0x47e   : > { %15218 = vmatpush2.bf16.msra.mxu1 %v18278_v56  ;;  %v18255_v16 = vcombine.high %v2809_v15, %v2813_v31  ;;  %v2673_v6 = vld [vmem:[%s19910_s15 + $0x1ac8] sm:$0xff]  ;;  %v18254_v17 = vcombine.low %v2809_v15, %v2813_v31 }
 0x47f   : > { %15219 = vmatprep.subr.bf16.mxu1 %v18271_v58  ;;  %v2677_v63 = vld [vmem:[%s19910_s15 + $0x1ae8] sm:$0xff] }
 0x480   : > { %15179 = vmatpush2.bf16.msra.mxu0 %v18142_v43  ;;  %v2801_v40 = vld [vmem:[%s19910_s15 + $0x1ec8] sm:$0xff]  ;;  %v18119_v57 = vcombine.high %v2673_v6, %v2677_v63  ;;  %v18118_v29 = vcombine.low %v2673_v6, %v2677_v63 }
 0x481   : > { %15180 = vmatprep.subr.bf16.mxu0 %v18135_v54  ;;  %v2805_v2 = vld [vmem:[%s19910_s15 + $0x1ee8] sm:$0xff] }
 0x482   : > { %15220 = vmatpush2.bf16.msra.mxu1 %v18270_v38  ;;  %v18247_v20 = vcombine.high %v2801_v40, %v2805_v2  ;;  %v2665_v49 = vld [vmem:[%s19910_s15 + $0x1a88] sm:$0xff]  ;;  %v18246_v58 = vcombine.low %v2801_v40, %v2805_v2 }
 0x483   : > { %15221 = vmatprep.subr.bf16.mxu1 %v18263_v51  ;;  %v2669_v44 = vld [vmem:[%s19910_s15 + $0x1aa8] sm:$0xff] }
 0x484   : > { %15181 = vmatpush2.bf16.msra.mxu0 %v18134_v3  ;;  %v2793_v33 = vld [vmem:[%s19910_s15 + $0x1e88] sm:$0xff]  ;;  %v18111_v24 = vcombine.high %v2665_v49, %v2669_v44  ;;  %v18110_v54 = vcombine.low %v2665_v49, %v2669_v44 }
 0x485   : > { %15182 = vmatprep.subr.bf16.mxu0 %v18127_v41  ;;  %v2797_v56 = vld [vmem:[%s19910_s15 + $0x1ea8] sm:$0xff] }
 0x486   : > { %15222 = vmatpush2.bf16.msra.mxu1 %v18262_v1  ;;  %v18239_v47 = vcombine.high %v2793_v33, %v2797_v56  ;;  %v2657_v60 = vld [vmem:[%s19910_s15 + $0x1a48] sm:$0xff]  ;;  %v18238_v51 = vcombine.low %v2793_v33, %v2797_v56  ;;  %v3880_v56 = vsub.s32 3, %v20371_v50 }
 0x487   : > { %15223 = vmatprep.subr.bf16.mxu1 %v18255_v16  ;;  %v2661_v10 = vld [vmem:[%s19910_s15 + $0x1a68] sm:$0xff] }
 0x488   : > { %15183 = vmatpush2.bf16.msra.mxu0 %v18126_v13  ;;  %v2785_v43 = vld [vmem:[%s19910_s15 + $0x1e48] sm:$0xff]  ;;  %v18103_v59 = vcombine.high %v2657_v60, %v2661_v10  ;;  %v18102_v41 = vcombine.low %v2657_v60, %v2661_v10 }
 0x489   : > { %15184 = vmatprep.subr.bf16.mxu0 %v18119_v57  ;;  %v2789_v38 = vld [vmem:[%s19910_s15 + $0x1e68] sm:$0xff] }
 0x48a   : > { %15224 = vmatpush2.bf16.msra.mxu1 %v18254_v17  ;;  %v18231_v14 = vcombine.high %v2785_v43, %v2789_v38  ;;  %v2649_v15 = vld [vmem:[%s19910_s15 + $0x1a08] sm:$0xff]  ;;  %v18230_v16 = vcombine.low %v2785_v43, %v2789_v38 }
 0x48b   : > { %15225 = vmatprep.subr.bf16.mxu1 %v18247_v20  ;;  %v2653_v31 = vld [vmem:[%s19910_s15 + $0x1a28] sm:$0xff]  ;;  %v3876_v20 = vsub.s32 2, %v20371_v50 }
 0x48c   : > { %15185 = vmatpush2.bf16.msra.mxu0 %v18118_v29  ;;  %v2777_v3 = vld [vmem:[%s19910_s15 + $0x1e08] sm:$0xff]  ;;  %v18095_v6 = vcombine.high %v2649_v15, %v2653_v31  ;;  %v18094_v57 = vcombine.low %v2649_v15, %v2653_v31 }
 0x48d   : > { %15186 = vmatprep.subr.bf16.mxu0 %v18111_v24  ;;  %v2781_v1 = vld [vmem:[%s19910_s15 + $0x1e28] sm:$0xff] }
 0x48e   : > { %15226 = vmatpush2.bf16.msra.mxu1 %v18246_v58  ;;  %v18223_v63 = vcombine.high %v2777_v3, %v2781_v1  ;;  %v2897_v40 = vld [vmem:[%s19910_s15 + $0x21c8] sm:$0xff]  ;;  %v18222_v49 = vcombine.low %v2777_v3, %v2781_v1 }
 0x48f   : > { %15227 = vmatprep.subr.bf16.mxu1 %v18239_v47  ;;  %v2901_v2 = vld [vmem:[%s19910_s15 + $0x21e8] sm:$0xff] }
 0x490   : > { %15187 = vmatpush2.bf16.msra.mxu0 %v18110_v54  ;;  %v3025_v13 = vld [vmem:[%s19910_s15 + $0x25c8] sm:$0xff]  ;;  %v18343_v44 = vcombine.high %v2897_v40, %v2901_v2  ;;  %v18342_v43 = vcombine.low %v2897_v40, %v2901_v2 }
 0x491   : > { %15188 = vmatprep.subr.bf16.mxu0 %v18103_v59  ;;  %v3029_v17 = vld [vmem:[%s19910_s15 + $0x25e8] sm:$0xff] }
 0x492   : > { %15228 = vmatpush2.bf16.msra.mxu1 %v18238_v51  ;;  %v18471_v33 = vcombine.high %v3025_v13, %v3029_v17  ;;  %v2889_v29 = vld [vmem:[%s19910_s15 + $0x2188] sm:$0xff]  ;;  %v18470_v38 = vcombine.low %v3025_v13, %v3029_v17 }
 0x493   : > { %15229 = vmatprep.subr.bf16.mxu1 %v18231_v14  ;;  %v2893_v58 = vld [vmem:[%s19910_s15 + $0x21a8] sm:$0xff] }
 0x494   : > { %15189 = vmatpush2.bf16.msra.mxu0 %v18102_v41  ;;  %v3017_v24 = vld [vmem:[%s19910_s15 + $0x2588] sm:$0xff]  ;;  %v18335_v54 = vcombine.high %v2889_v29, %v2893_v58 }
 0x495   : > { %15190 = vmatprep.subr.bf16.mxu0 %v18095_v6  ;;  %v3021_v47 = vld [vmem:[%s19910_s15 + $0x25a8] sm:$0xff]  ;;  %v18334_v6 = vcombine.low %v2889_v29, %v2893_v58 }
 0x496   : > { %15230 = vmatpush2.bf16.msra.mxu1 %v18230_v16  ;;  %v19470_v60 = vld [vmem:[%s19923_s29] sm:$0xff]  ;;  %v18463_v59 = vcombine.high %v3017_v24, %v3021_v47  ;;  %v18462_v40 = vcombine.low %v3017_v24, %v3021_v47 }
 0x497   : > { %15231 = vmatprep.subr.bf16.mxu1 %v18223_v63  ;;  %v3877_v10 = vrot.slane %v19470_v60, %v3876_v20  ;;  %v3881_v51 = vrot.slane %v19470_v60, %v3880_v56  ;;  %v2881_v14 = vld [vmem:[%s19910_s15 + $0x2148] sm:$0xff] }
 0x498   : > { %15191 = vmatpush2.bf16.msra.mxu0 %v18094_v57  ;;  %v2885_v15 = vld [vmem:[%s19910_s15 + $0x2168] sm:$0xff] }
 0x499   : > { %15242 = vmatprep.subr.bf16.mxu0 %v18343_v44  ;;  %v3009_v3 = vld [vmem:[%s19910_s15 + $0x2548] sm:$0xff]  ;;  %v18327_v2 = vcombine.high %v2881_v14, %v2885_v15  ;;  %v18326_v47 = vcombine.low %v2881_v14, %v2885_v15 }
 0x49a   : > { %15232 = vmatpush2.bf16.msra.mxu1 %v18222_v49  ;;  %v3013_v1 = vld [vmem:[%s19910_s15 + $0x2568] sm:$0xff] }
 0x49b   : > { %15283 = vmatprep.subr.bf16.mxu1 %v18471_v33  ;;  %v14948_v31 = vpop.f32.mrf.mxu0  ;;  %15193 = vmatmul.mubr.bf16.vlgmr.msra.gmra.mxu0 %v20384_v5  ;;  %v18455_v49 = vcombine.high %v3009_v3, %v3013_v1  ;;  %v2873_v44 = vld [vmem:[%s19910_s15 + $0x2108] sm:$0xff] }
 0x49c   : > { %v14949_v41 = vadd.f32 %v14948_v31, %v3877_v10  ;;  %15243 = vmatpush1.bf16.msra.mxu0 %v18342_v43  ;;  %v2877_v33 = vld [vmem:[%s19910_s15 + $0x2128] sm:$0xff]  ;;  %15274 = vmatprep.mubr.bf16.mxu0 %v20404_v26 }
 0x49d   : > { %v14989_v16 = vpop.f32.mrf.mxu1  ;;  %15234 = vmatmul.mubr.bf16.vlgmr.msra.gmra.mxu1 %v20394_v27  ;;  %v14950_v63 = vpop.f32.mrf.mxu0  ;;  %15244 = vmatprep.subr.bf16.mxu0 %v18335_v54  ;;  %v3001_v10 = vld [vmem:[%s19910_s15 + $0x2508] sm:$0xff]  ;;  %v18319_v54 = vcombine.high %v2873_v44, %v2877_v33 }
 0x49e   : > { %15284 = vmatpush1.bf16.msra.mxu1 %v18470_v38  ;;  %v21082_v13 = vadd.f32 %v14989_v16, %v14949_v41  ;;  %v14951_v17 = vadd.f32 %v14950_v63, %v3881_v51  ;;  %v3005_v29 = vld [vmem:[%s19910_s15 + $0x2528] sm:$0xff]  ;;  %15315 = vmatprep.mubr.bf16.mxu1 %v20411_v55  ;;  %v18454_v38 = vcombine.low %v3009_v3, %v3013_v1 }
 0x49f   : > { %v14991_v57 = vpop.f32.mrf.mxu1  ;;  %15285 = vmatprep.subr.bf16.mxu1 %v18463_v59  ;;  %v14952_v60 = vpop.f32.mrf.mxu0  ;;  %v18447_v59 = vcombine.high %v3001_v10, %v3005_v29  ;;  %v2865_v31 = vld [vmem:[%s19910_s15 + $0x20c8] sm:$0xff]  ;;  %v18446_v14 = vcombine.low %v3001_v10, %v3005_v29 }
 0x4a0   : > { %v21090_v58 = vadd.f32 %v14991_v57, %v14951_v17  ;;  %15245 = vmatpush1.bf16.msra.mxu0 %v18334_v6  ;;  %v2869_v41 = vld [vmem:[%s19910_s15 + $0x20e8] sm:$0xff]  ;;  %v18318_v17 = vcombine.low %v2873_v44, %v2877_v33 }
 0x4a1   : > { %v14993_v24 = vpop.f32.mrf.mxu1  ;;  %v14953_v43 = vpop.f32.mrf.mxu0  ;;  %15246 = vmatprep.subr.bf16.mxu0 %v18327_v2  ;;  %v2993_v16 = vld [vmem:[%s19910_s15 + $0x24c8] sm:$0xff]  ;;  %v18311_v15 = vcombine.high %v2865_v31, %v2869_v41  ;;  %v18310_v57 = vcombine.low %v2865_v31, %v2869_v41 }
 0x4a2   : > { %15286 = vmatpush1.bf16.msra.mxu1 %v18462_v40  ;;  %v2997_v63 = vld [vmem:[%s19910_s15 + $0x24e8] sm:$0xff] }
 0x4a3   : > { %v14994_v51 = vpop.f32.mrf.mxu1  ;;  %15287 = vmatprep.subr.bf16.mxu1 %v18455_v49  ;;  %v18439_v3 = vcombine.high %v2993_v16, %v2997_v63  ;;  %v2857_v1 = vld [vmem:[%s19910_s15 + $0x2088] sm:$0xff]  ;;  %v18438_v49 = vcombine.low %v2993_v16, %v2997_v63 }
 0x4a4   : > { %15247 = vmatpush1.bf16.msra.mxu0 %v18326_v47  ;;  %v2861_v6 = vld [vmem:[%s19910_s15 + $0x20a8] sm:$0xff] }
 0x4a5   : > { %15248 = vmatprep.subr.bf16.mxu0 %v18319_v54  ;;  %v2985_v40 = vld [vmem:[%s19910_s15 + $0x2488] sm:$0xff]  ;;  %v18303_v44 = vcombine.high %v2857_v1, %v2861_v6  ;;  %v18302_v47 = vcombine.low %v2857_v1, %v2861_v6 }
 0x4a6   : > { %15288 = vmatpush1.bf16.msra.mxu1 %v18454_v38  ;;  %v2989_v2 = vld [vmem:[%s19910_s15 + $0x24a8] sm:$0xff] }
 0x4a7   : > { %15289 = vmatprep.subr.bf16.mxu1 %v18447_v59  ;;  %v18431_v33 = vcombine.high %v2985_v40, %v2989_v2  ;;  %v2849_v60 = vld [vmem:[%s19910_s15 + $0x2048] sm:$0xff]  ;;  %v18430_v43 = vcombine.low %v2985_v40, %v2989_v2 }
 0x4a8   : > { %15249 = vmatpush1.bf16.msra.mxu0 %v18318_v17  ;;  %v2853_v10 = vld [vmem:[%s19910_s15 + $0x2068] sm:$0xff] }
 0x4a9   : > { %15250 = vmatprep.subr.bf16.mxu0 %v18311_v15  ;;  %v2977_v29 = vld [vmem:[%s19910_s15 + $0x2448] sm:$0xff]  ;;  %v18295_v38 = vcombine.high %v2849_v60, %v2853_v10  ;;  %v18294_v16 = vcombine.low %v2849_v60, %v2853_v10 }
 0x4aa   : > { %15290 = vmatpush1.bf16.msra.mxu1 %v18446_v14  ;;  %v2981_v24 = vld [vmem:[%s19910_s15 + $0x2468] sm:$0xff] }
 0x4ab   : > { %15291 = vmatprep.subr.bf16.mxu1 %v18439_v3  ;;  %v18423_v54 = vcombine.high %v2977_v29, %v2981_v24  ;;  %v2841_v51 = vld [vmem:[%s19910_s15 + $0x2008] sm:$0xff]  ;;  %v18422_v63 = vcombine.low %v2977_v29, %v2981_v24 }
 0x4ac   : > { %15251 = vmatpush1.bf16.msra.mxu0 %v18310_v57  ;;  %v2845_v59 = vld [vmem:[%s19910_s15 + $0x2028] sm:$0xff] }
 0x4ad   : > { %15252 = vmatprep.subr.bf16.mxu0 %v18303_v44  ;;  %v2969_v31 = vld [vmem:[%s19910_s15 + $0x2408] sm:$0xff]  ;;  %v18287_v17 = vcombine.high %v2841_v51, %v2845_v59  ;;  %v18286_v40 = vcombine.low %v2841_v51, %v2845_v59 }
 0x4ae   : > { %15292 = vmatpush1.bf16.msra.mxu1 %v18438_v49  ;;  %v2973_v41 = vld [vmem:[%s19910_s15 + $0x2428] sm:$0xff] }
 0x4af   : > { %15293 = vmatprep.subr.bf16.mxu1 %v18431_v33  ;;  %v18415_v14 = vcombine.high %v2969_v31, %v2973_v41  ;;  %v2961_v15 = vld [vmem:[%s19910_s15 + $0x23c8] sm:$0xff]  ;;  %v18414_v2 = vcombine.low %v2969_v31, %v2973_v41 }
 0x4b0   : > { %15253 = vmatpush1.bf16.msra.mxu0 %v18302_v47  ;;  %v2965_v3 = vld [vmem:[%s19910_s15 + $0x23e8] sm:$0xff] }
 0x4b1   : > { %15254 = vmatprep.subr.bf16.mxu0 %v18295_v38  ;;  %v3089_v1 = vld [vmem:[%s19910_s15 + $0x27c8] sm:$0xff]  ;;  %v18407_v57 = vcombine.high %v2961_v15, %v2965_v3  ;;  %v18406_v29 = vcombine.low %v2961_v15, %v2965_v3 }
 0x4b2   : > { %15294 = vmatpush1.bf16.msra.mxu1 %v18430_v43  ;;  %v3093_v6 = vld [vmem:[%s19910_s15 + $0x27e8] sm:$0xff] }
 0x4b3   : > { %15295 = vmatprep.subr.bf16.mxu1 %v18423_v54  ;;  %v18535_v49 = vcombine.high %v3089_v1, %v3093_v6  ;;  %v2953_v44 = vld [vmem:[%s19910_s15 + $0x2388] sm:$0xff]  ;;  %v18534_v24 = vcombine.low %v3089_v1, %v3093_v6 }
 0x4b4   : > { %15255 = vmatpush1.bf16.msra.mxu0 %v18294_v16  ;;  %v2957_v33 = vld [vmem:[%s19910_s15 + $0x23a8] sm:$0xff] }
 0x4b5   : > { %15256 = vmatprep.subr.bf16.mxu0 %v18287_v17  ;;  %v3081_v60 = vld [vmem:[%s19910_s15 + $0x2788] sm:$0xff]  ;;  %v18399_v47 = vcombine.high %v2953_v44, %v2957_v33  ;;  %v18398_v31 = vcombine.low %v2953_v44, %v2957_v33 }
 0x4b6   : > { %15296 = vmatpush1.bf16.msra.mxu1 %v18422_v63  ;;  %v3085_v10 = vld [vmem:[%s19910_s15 + $0x27a8] sm:$0xff] }
 0x4b7   : > { %15297 = vmatprep.subr.bf16.mxu1 %v18415_v14  ;;  %v18527_v43 = vcombine.high %v3081_v60, %v3085_v10  ;;  %v2945_v38 = vld [vmem:[%s19910_s15 + $0x2348] sm:$0xff]  ;;  %v18526_v41 = vcombine.low %v3081_v60, %v3085_v10 }
 0x4b8   : > { %15257 = vmatpush1.bf16.msra.mxu0 %v18286_v40  ;;  %v2949_v54 = vld [vmem:[%s19910_s15 + $0x2368] sm:$0xff] }
 0x4b9   : > { %15258 = vmatprep.subr.bf16.mxu0 %v18407_v57  ;;  %v3073_v51 = vld [vmem:[%s19910_s15 + $0x2748] sm:$0xff]  ;;  %v18391_v16 = vcombine.high %v2945_v38, %v2949_v54  ;;  %v18390_v1 = vcombine.low %v2945_v38, %v2949_v54 }
 0x4ba   : > { %15298 = vmatpush1.bf16.msra.mxu1 %v18414_v2  ;;  %v3077_v59 = vld [vmem:[%s19910_s15 + $0x2768] sm:$0xff] }
 0x4bb   : > { %15299 = vmatprep.subr.bf16.mxu1 %v18535_v49  ;;  %v18519_v63 = vcombine.high %v3073_v51, %v3077_v59  ;;  %v2937_v17 = vld [vmem:[%s19910_s15 + $0x2308] sm:$0xff]  ;;  %v18518_v6 = vcombine.low %v3073_v51, %v3077_v59 }
 0x4bc   : > { %15259 = vmatpush2.bf16.msra.mxu0 %v18406_v29  ;;  %v2941_v14 = vld [vmem:[%s19910_s15 + $0x2328] sm:$0xff] }
 0x4bd   : > { %15260 = vmatprep.subr.bf16.mxu0 %v18399_v47  ;;  %v3065_v15 = vld [vmem:[%s19910_s15 + $0x2708] sm:$0xff]  ;;  %v18383_v40 = vcombine.high %v2937_v17, %v2941_v14  ;;  %v18382_v60 = vcombine.low %v2937_v17, %v2941_v14 }
 0x4be   : > { %15300 = vmatpush2.bf16.msra.mxu1 %v18534_v24  ;;  %v3069_v3 = vld [vmem:[%s19910_s15 + $0x2728] sm:$0xff] }
 0x4bf   : > { %15301 = vmatprep.subr.bf16.mxu1 %v18527_v43  ;;  %v18511_v2 = vcombine.high %v3065_v15, %v3069_v3  ;;  %v2929_v57 = vld [vmem:[%s19910_s15 + $0x22c8] sm:$0xff]  ;;  %v18510_v10 = vcombine.low %v3065_v15, %v3069_v3 }
 0x4c0   : > { %15261 = vmatpush2.bf16.msra.mxu0 %v18398_v31  ;;  %v2933_v49 = vld [vmem:[%s19910_s15 + $0x22e8] sm:$0xff] }
 0x4c1   : > { %15262 = vmatprep.subr.bf16.mxu0 %v18391_v16  ;;  %v3057_v44 = vld [vmem:[%s19910_s15 + $0x26c8] sm:$0xff]  ;;  %v18375_v29 = vcombine.high %v2929_v57, %v2933_v49  ;;  %v18374_v51 = vcombine.low %v2929_v57, %v2933_v49 }
 0x4c2   : > { %15302 = vmatpush2.bf16.msra.mxu1 %v18526_v41  ;;  %v3061_v33 = vld [vmem:[%s19910_s15 + $0x26e8] sm:$0xff] }
 0x4c3   : > { %15303 = vmatprep.subr.bf16.mxu1 %v18519_v63  ;;  %v18503_v24 = vcombine.high %v3057_v44, %v3061_v33  ;;  %v2921_v47 = vld [vmem:[%s19910_s15 + $0x2288] sm:$0xff]  ;;  %v18502_v59 = vcombine.low %v3057_v44, %v3061_v33 }
 0x4c4   : > { %15263 = vmatpush2.bf16.msra.mxu0 %v18390_v1  ;;  %v2925_v43 = vld [vmem:[%s19910_s15 + $0x22a8] sm:$0xff] }
 0x4c5   : > { %15264 = vmatprep.subr.bf16.mxu0 %v18383_v40  ;;  %v3049_v38 = vld [vmem:[%s19910_s15 + $0x2688] sm:$0xff]  ;;  %v18367_v31 = vcombine.high %v2921_v47, %v2925_v43  ;;  %v18366_v15 = vcombine.low %v2921_v47, %v2925_v43 }
 0x4c6   : > { %15304 = vmatpush2.bf16.msra.mxu1 %v18518_v6  ;;  %v3053_v54 = vld [vmem:[%s19910_s15 + $0x26a8] sm:$0xff] }
 0x4c7   : > { %15305 = vmatprep.subr.bf16.mxu1 %v18511_v2  ;;  %v18495_v41 = vcombine.high %v3049_v38, %v3053_v54  ;;  %v2913_v16 = vld [vmem:[%s19910_s15 + $0x2248] sm:$0xff]  ;;  %v18494_v3 = vcombine.low %v3049_v38, %v3053_v54 }
 0x4c8   : > { %15265 = vmatpush2.bf16.msra.mxu0 %v18382_v60  ;;  %v2917_v63 = vld [vmem:[%s19910_s15 + $0x2268] sm:$0xff] }
 0x4c9   : > { %15266 = vmatprep.subr.bf16.mxu0 %v18375_v29  ;;  %v3041_v17 = vld [vmem:[%s19910_s15 + $0x2648] sm:$0xff]  ;;  %v18359_v1 = vcombine.high %v2913_v16, %v2917_v63  ;;  %v18358_v44 = vcombine.low %v2913_v16, %v2917_v63 }
 0x4ca   : > { %15306 = vmatpush2.bf16.msra.mxu1 %v18510_v10  ;;  %v3045_v14 = vld [vmem:[%s19910_s15 + $0x2668] sm:$0xff] }
 0x4cb   : > { %15307 = vmatprep.subr.bf16.mxu1 %v18503_v24  ;;  %v18487_v6 = vcombine.high %v3041_v17, %v3045_v14  ;;  %v2905_v40 = vld [vmem:[%s19910_s15 + $0x2208] sm:$0xff]  ;;  %v18486_v33 = vcombine.low %v3041_v17, %v3045_v14 }
 0x4cc   : > { %15267 = vmatpush2.bf16.msra.mxu0 %v18374_v51  ;;  %v2909_v2 = vld [vmem:[%s19910_s15 + $0x2228] sm:$0xff] }
 0x4cd   : > { %15268 = vmatprep.subr.bf16.mxu0 %v18367_v31  ;;  %v3033_v57 = vld [vmem:[%s19910_s15 + $0x2608] sm:$0xff]  ;;  %v18351_v60 = vcombine.high %v2905_v40, %v2909_v2  ;;  %v18350_v38 = vcombine.low %v2905_v40, %v2909_v2 }
 0x4ce   : > { %15308 = vmatpush2.bf16.msra.mxu1 %v18502_v59  ;;  %v3037_v49 = vld [vmem:[%s19910_s15 + $0x2628] sm:$0xff] }
 0x4cf   : > { %15309 = vmatprep.subr.bf16.mxu1 %v18495_v41  ;;  %v18479_v10 = vcombine.high %v3033_v57, %v3037_v49  ;;  %v3153_v29 = vld [vmem:[%s19910_s15 + $0x29c8] sm:$0xff]  ;;  %v18478_v54 = vcombine.low %v3033_v57, %v3037_v49 }
 0x4d0   : > { %15269 = vmatpush2.bf16.msra.mxu0 %v18366_v15  ;;  %v3157_v24 = vld [vmem:[%s19910_s15 + $0x29e8] sm:$0xff] }
 0x4d1   : > { %15270 = vmatprep.subr.bf16.mxu0 %v18359_v1  ;;  %v3281_v47 = vld [vmem:[%s19910_s15 + $0x2dc8] sm:$0xff]  ;;  %v18599_v51 = vcombine.high %v3153_v29, %v3157_v24  ;;  %v18598_v17 = vcombine.low %v3153_v29, %v3157_v24 }
 0x4d2   : > { %15310 = vmatpush2.bf16.msra.mxu1 %v18494_v3  ;;  %v3285_v43 = vld [vmem:[%s19910_s15 + $0x2de8] sm:$0xff] }
 0x4d3   : > { %15311 = vmatprep.subr.bf16.mxu1 %v18487_v6  ;;  %v18727_v59 = vcombine.high %v3281_v47, %v3285_v43  ;;  %v3145_v31 = vld [vmem:[%s19910_s15 + $0x2988] sm:$0xff]  ;;  %v18726_v14 = vcombine.low %v3281_v47, %v3285_v43 }
 0x4d4   : > { %15271 = vmatpush2.bf16.msra.mxu0 %v18358_v44  ;;  %v3149_v41 = vld [vmem:[%s19910_s15 + $0x29a8] sm:$0xff] }
 0x4d5   : > { %15272 = vmatprep.subr.bf16.mxu0 %v18351_v60  ;;  %v3273_v16 = vld [vmem:[%s19910_s15 + $0x2d88] sm:$0xff]  ;;  %v18591_v15 = vcombine.high %v3145_v31, %v3149_v41 }
 0x4d6   : > { %15312 = vmatpush2.bf16.msra.mxu1 %v18486_v33  ;;  %v3277_v63 = vld [vmem:[%s19910_s15 + $0x2da8] sm:$0xff]  ;;  %v18590_v33 = vcombine.low %v3145_v31, %v3149_v41 }
 0x4d7   : > { %15313 = vmatprep.subr.bf16.mxu1 %v18479_v10  ;;  %v18719_v3 = vcombine.high %v3273_v16, %v3277_v63  ;;  %v3137_v1 = vld [vmem:[%s19910_s15 + $0x2948] sm:$0xff]  ;;  %v18718_v10 = vcombine.low %v3273_v16, %v3277_v63 }
 0x4d8   : > { %15273 = vmatpush2.bf16.msra.mxu0 %v18350_v38  ;;  %v3141_v6 = vld [vmem:[%s19910_s15 + $0x2968] sm:$0xff] }
 0x4d9   : > { %15324 = vmatprep.subr.bf16.mxu0 %v18599_v51  ;;  %v3265_v2 = vld [vmem:[%s19910_s15 + $0x2d48] sm:$0xff]  ;;  %v18583_v29 = vcombine.high %v3137_v1, %v3141_v6 }
 0x4da   : > { %15314 = vmatpush2.bf16.msra.mxu1 %v18478_v54  ;;  %v3269_v57 = vld [vmem:[%s19910_s15 + $0x2d68] sm:$0xff] }
 0x4db   : > { %15365 = vmatprep.subr.bf16.mxu1 %v18727_v59  ;;  %v15030_v40 = vpop.f32.mrf.mxu0  ;;  %15275 = vmatmul.mubr.bf16.vlgmr.msra.gmra.mxu0 %v20480_v48  ;;  %v3129_v38 = vld [vmem:[%s19910_s15 + $0x2908] sm:$0xff] }
 0x4dc   : > { %v15031_v49 = vadd.f32 %v15030_v40, %v21082_v13  ;;  %15325 = vmatpush1.bf16.msra.mxu0 %v18598_v17  ;;  %v18711_v13 = vcombine.high %v3265_v2, %v3269_v57  ;;  %v3133_v54 = vld [vmem:[%s19910_s15 + $0x2928] sm:$0xff]  ;;  %15356 = vmatprep.mubr.bf16.mxu0 %v20496_v61  ;;  %v18710_v17 = vcombine.low %v3265_v2, %v3269_v57 }
 0x4dd   : > { %v15071_v44 = vpop.f32.mrf.mxu1  ;;  %15316 = vmatmul.mubr.bf16.vlgmr.msra.gmra.mxu1 %v20488_v52  ;;  %v15032_v60 = vpop.f32.mrf.mxu0  ;;  %15326 = vmatprep.subr.bf16.mxu0 %v18591_v15  ;;  %v3257_v59 = vld [vmem:[%s19910_s15 + $0x2d08] sm:$0xff] }
 0x4de   : > { %15366 = vmatpush1.bf16.msra.mxu1 %v18726_v14  ;;  %v21155_v24 = vadd.f32 %v15071_v44, %v15031_v49  ;;  %v15033_v47 = vadd.f32 %v15032_v60, %v21090_v58  ;;  %v3261_v31 = vld [vmem:[%s19910_s15 + $0x2d28] sm:$0xff]  ;;  %15397 = vmatprep.mubr.bf16.mxu1 %v20503_v18  ;;  %v18582_v58 = vcombine.low %v3137_v1, %v3141_v6 }
 0x4df   : > { %v15073_v43 = vpop.f32.mrf.mxu1  ;;  %15367 = vmatprep.subr.bf16.mxu1 %v18719_v3  ;;  %v15034_v51 = vpop.f32.mrf.mxu0  ;;  %v18575_v14 = vcombine.high %v3129_v38, %v3133_v54  ;;  %v18703_v3 = vcombine.high %v3257_v59, %v3261_v31  ;;  %v3121_v40 = vld [vmem:[%s19910_s15 + $0x28c8] sm:$0xff]  ;;  %v18702_v1 = vcombine.low %v3257_v59, %v3261_v31 }
 0x4e0   : > { %v21164_v41 = vadd.f32 %v15073_v43, %v15033_v47  ;;  %15327 = vmatpush1.bf16.msra.mxu0 %v18590_v33  ;;  %v3125_v49 = vld [vmem:[%s19910_s15 + $0x28e8] sm:$0xff]  ;;  %v18574_v47 = vcombine.low %v3129_v38, %v3133_v54 }
 0x4e1   : > { %v15075_v16 = vpop.f32.mrf.mxu1  ;;  %v15035_v63 = vpop.f32.mrf.mxu0  ;;  %15328 = vmatprep.subr.bf16.mxu0 %v18583_v29  ;;  %v3249_v44 = vld [vmem:[%s19910_s15 + $0x2cc8] sm:$0xff]  ;;  %v18567_v6 = vcombine.high %v3121_v40, %v3125_v49  ;;  %v18566_v43 = vcombine.low %v3121_v40, %v3125_v49 }
 0x4e2   : > { %15368 = vmatpush1.bf16.msra.mxu1 %v18718_v10  ;;  %v3253_v60 = vld [vmem:[%s19910_s15 + $0x2ce8] sm:$0xff] }
 0x4e3   : > { %v15076_v15 = vpop.f32.mrf.mxu1  ;;  %15369 = vmatprep.subr.bf16.mxu1 %v18711_v13  ;;  %v18695_v2 = vcombine.high %v3249_v44, %v3253_v60  ;;  %v3113_v57 = vld [vmem:[%s19910_s15 + $0x2888] sm:$0xff]  ;;  %v18694_v13 = vcombine.low %v3249_v44, %v3253_v60 }
 0x4e4   : > { %15329 = vmatpush1.bf16.msra.mxu0 %v18582_v58  ;;  %v3117_v33 = vld [vmem:[%s19910_s15 + $0x28a8] sm:$0xff] }
 0x4e5   : > { %15330 = vmatprep.subr.bf16.mxu0 %v18575_v14  ;;  %v3241_v10 = vld [vmem:[%s19910_s15 + $0x2c88] sm:$0xff]  ;;  %v18559_v38 = vcombine.high %v3113_v57, %v3117_v33  ;;  %v18558_v58 = vcombine.low %v3113_v57, %v3117_v33 }
 0x4e6   : > { %15370 = vmatpush1.bf16.msra.mxu1 %v18710_v17  ;;  %v3245_v29 = vld [vmem:[%s19910_s15 + $0x2ca8] sm:$0xff] }
 0x4e7   : > { %15371 = vmatprep.subr.bf16.mxu1 %v18703_v3  ;;  %v18687_v54 = vcombine.high %v3241_v10, %v3245_v29  ;;  %v3105_v51 = vld [vmem:[%s19910_s15 + $0x2848] sm:$0xff]  ;;  %v18686_v63 = vcombine.low %v3241_v10, %v3245_v29 }
 0x4e8   : > { %15331 = vmatpush1.bf16.msra.mxu0 %v18574_v47  ;;  %v3109_v59 = vld [vmem:[%s19910_s15 + $0x2868] sm:$0xff] }
 0x4e9   : > { %15332 = vmatprep.subr.bf16.mxu0 %v18567_v6  ;;  %v3233_v31 = vld [vmem:[%s19910_s15 + $0x2c48] sm:$0xff]  ;;  %v18551_v17 = vcombine.high %v3105_v51, %v3109_v59  ;;  %v18550_v44 = vcombine.low %v3105_v51, %v3109_v59 }
 0x4ea   : > { %15372 = vmatpush1.bf16.msra.mxu1 %v18702_v1  ;;  %v3237_v16 = vld [vmem:[%s19910_s15 + $0x2c68] sm:$0xff] }
 0x4eb   : > { %15373 = vmatprep.subr.bf16.mxu1 %v18695_v2  ;;  %v18679_v14 = vcombine.high %v3233_v31, %v3237_v16  ;;  %v3097_v15 = vld [vmem:[%s19910_s15 + $0x2808] sm:$0xff]  ;;  %v18678_v60 = vcombine.low %v3233_v31, %v3237_v16 }
 0x4ec   : > { %15333 = vmatpush1.bf16.msra.mxu0 %v18566_v43  ;;  %v3101_v3 = vld [vmem:[%s19910_s15 + $0x2828] sm:$0xff] }
 0x4ed   : > { %15334 = vmatprep.subr.bf16.mxu0 %v18559_v38  ;;  %v3225_v40 = vld [vmem:[%s19910_s15 + $0x2c08] sm:$0xff]  ;;  %v18543_v47 = vcombine.high %v3097_v15, %v3101_v3  ;;  %v18542_v10 = vcombine.low %v3097_v15, %v3101_v3 }
 0x4ee   : > { %15374 = vmatpush1.bf16.msra.mxu1 %v18694_v13  ;;  %v3229_v49 = vld [vmem:[%s19910_s15 + $0x2c28] sm:$0xff] }
 0x4ef   : > { %15375 = vmatprep.subr.bf16.mxu1 %v18687_v54  ;;  %v18671_v1 = vcombine.high %v3225_v40, %v3229_v49  ;;  %v3217_v6 = vld [vmem:[%s19910_s15 + $0x2bc8] sm:$0xff]  ;;  %v18670_v29 = vcombine.low %v3225_v40, %v3229_v49 }
 0x4f0   : > { %15335 = vmatpush1.bf16.msra.mxu0 %v18558_v58  ;;  %v3221_v2 = vld [vmem:[%s19910_s15 + $0x2be8] sm:$0xff] }
 0x4f1   : > { %15336 = vmatprep.subr.bf16.mxu0 %v18551_v17  ;;  %v3345_v57 = vld [vmem:[%s19910_s15 + $0x2fc8] sm:$0xff]  ;;  %v18663_v43 = vcombine.high %v3217_v6, %v3221_v2  ;;  %v18662_v31 = vcombine.low %v3217_v6, %v3221_v2 }
 0x4f2   : > { %15376 = vmatpush1.bf16.msra.mxu1 %v18686_v63  ;;  %v3349_v33 = vld [vmem:[%s19910_s15 + $0x2fe8] sm:$0xff] }
 0x4f3   : > { %15377 = vmatprep.subr.bf16.mxu1 %v18679_v14  ;;  %v18791_v13 = vcombine.high %v3345_v57, %v3349_v33  ;;  %v3209_v38 = vld [vmem:[%s19910_s15 + $0x2b88] sm:$0xff]  ;;  %v18790_v16 = vcombine.low %v3345_v57, %v3349_v33 }
 0x4f4   : > { %15337 = vmatpush1.bf16.msra.mxu0 %v18550_v44  ;;  %v3213_v54 = vld [vmem:[%s19910_s15 + $0x2ba8] sm:$0xff] }
 0x4f5   : > { %15338 = vmatprep.subr.bf16.mxu0 %v18543_v47  ;;  %v3337_v51 = vld [vmem:[%s19910_s15 + $0x2f88] sm:$0xff]  ;;  %v18655_v58 = vcombine.high %v3209_v38, %v3213_v54  ;;  %v18654_v40 = vcombine.low %v3209_v38, %v3213_v54 }
 0x4f6   : > { %15378 = vmatpush1.bf16.msra.mxu1 %v18678_v60  ;;  %v3341_v59 = vld [vmem:[%s19910_s15 + $0x2fa8] sm:$0xff] }
 0x4f7   : > { %15379 = vmatprep.subr.bf16.mxu1 %v18671_v1  ;;  %v18783_v63 = vcombine.high %v3337_v51, %v3341_v59  ;;  %v3201_v17 = vld [vmem:[%s19910_s15 + $0x2b48] sm:$0xff]  ;;  %v18782_v49 = vcombine.low %v3337_v51, %v3341_v59 }
 0x4f8   : > { %15339 = vmatpush1.bf16.msra.mxu0 %v18542_v10  ;;  %v3205_v14 = vld [vmem:[%s19910_s15 + $0x2b68] sm:$0xff] }
 0x4f9   : > { %15340 = vmatprep.subr.bf16.mxu0 %v18663_v43  ;;  %v3329_v15 = vld [vmem:[%s19910_s15 + $0x2f48] sm:$0xff]  ;;  %v18647_v44 = vcombine.high %v3201_v17, %v3205_v14  ;;  %v18646_v57 = vcombine.low %v3201_v17, %v3205_v14 }
 0x4fa   : > { %15380 = vmatpush1.bf16.msra.mxu1 %v18670_v29  ;;  %v3333_v3 = vld [vmem:[%s19910_s15 + $0x2f68] sm:$0xff] }
 0x4fb   : > { %15381 = vmatprep.subr.bf16.mxu1 %v18791_v13  ;;  %v18775_v60 = vcombine.high %v3329_v15, %v3333_v3  ;;  %v3193_v47 = vld [vmem:[%s19910_s15 + $0x2b08] sm:$0xff]  ;;  %v18774_v33 = vcombine.low %v3329_v15, %v3333_v3 }
 0x4fc   : > { %15341 = vmatpush2.bf16.msra.mxu0 %v18662_v31  ;;  %v3197_v1 = vld [vmem:[%s19910_s15 + $0x2b28] sm:$0xff] }
 0x4fd   : > { %15342 = vmatprep.subr.bf16.mxu0 %v18655_v58  ;;  %v3321_v6 = vld [vmem:[%s19910_s15 + $0x2f08] sm:$0xff]  ;;  %v18639_v10 = vcombine.high %v3193_v47, %v3197_v1  ;;  %v18638_v51 = vcombine.low %v3193_v47, %v3197_v1 }
 0x4fe   : > { %15382 = vmatpush2.bf16.msra.mxu1 %v18790_v16  ;;  %v3325_v2 = vld [vmem:[%s19910_s15 + $0x2f28] sm:$0xff] }
 0x4ff   : > { %15383 = vmatprep.subr.bf16.mxu1 %v18783_v63  ;;  %v18767_v29 = vcombine.high %v3321_v6, %v3325_v2  ;;  %v3185_v43 = vld [vmem:[%s19910_s15 + $0x2ac8] sm:$0xff]  ;;  %v18766_v59 = vcombine.low %v3321_v6, %v3325_v2 }
 0x500   : > { %15343 = vmatpush2.bf16.msra.mxu0 %v18654_v40  ;;  %v3189_v13 = vld [vmem:[%s19910_s15 + $0x2ae8] sm:$0xff] }
 0x501   : > { %15344 = vmatprep.subr.bf16.mxu0 %v18647_v44  ;;  %v3313_v38 = vld [vmem:[%s19910_s15 + $0x2ec8] sm:$0xff]  ;;  %v18631_v31 = vcombine.high %v3185_v43, %v3189_v13  ;;  %v18630_v15 = vcombine.low %v3185_v43, %v3189_v13 }
 0x502   : > { %15384 = vmatpush2.bf16.msra.mxu1 %v18782_v49  ;;  %v3317_v54 = vld [vmem:[%s19910_s15 + $0x2ee8] sm:$0xff] }
 0x503   : > { %15385 = vmatprep.subr.bf16.mxu1 %v18775_v60  ;;  %v18759_v16 = vcombine.high %v3313_v38, %v3317_v54  ;;  %v3177_v58 = vld [vmem:[%s19910_s15 + $0x2a88] sm:$0xff]  ;;  %v18758_v3 = vcombine.low %v3313_v38, %v3317_v54 }
 0x504   : > { %15345 = vmatpush2.bf16.msra.mxu0 %v18646_v57  ;;  %v3181_v63 = vld [vmem:[%s19910_s15 + $0x2aa8] sm:$0xff] }
 0x505   : > { %15346 = vmatprep.subr.bf16.mxu0 %v18639_v10  ;;  %v3305_v17 = vld [vmem:[%s19910_s15 + $0x2e88] sm:$0xff]  ;;  %v18623_v40 = vcombine.high %v3177_v58, %v3181_v63  ;;  %v18622_v6 = vcombine.low %v3177_v58, %v3181_v63 }
 0x506   : > { %15386 = vmatpush2.bf16.msra.mxu1 %v18774_v33  ;;  %v3309_v14 = vld [vmem:[%s19910_s15 + $0x2ea8] sm:$0xff] }
 0x507   : > { %15387 = vmatprep.subr.bf16.mxu1 %v18767_v29  ;;  %v18751_v49 = vcombine.high %v3305_v17, %v3309_v14  ;;  %v3169_v44 = vld [vmem:[%s19910_s15 + $0x2a48] sm:$0xff]  ;;  %v18750_v2 = vcombine.low %v3305_v17, %v3309_v14 }
 0x508   : > { %15347 = vmatpush2.bf16.msra.mxu0 %v18638_v51  ;;  %v3173_v60 = vld [vmem:[%s19910_s15 + $0x2a68] sm:$0xff] }
 0x509   : > { %15348 = vmatprep.subr.bf16.mxu0 %v18631_v31  ;;  %v3297_v47 = vld [vmem:[%s19910_s15 + $0x2e48] sm:$0xff]  ;;  %v18615_v57 = vcombine.high %v3169_v44, %v3173_v60  ;;  %v18614_v38 = vcombine.low %v3169_v44, %v3173_v60 }
 0x50a   : > { %15388 = vmatpush2.bf16.msra.mxu1 %v18766_v59  ;;  %v3301_v1 = vld [vmem:[%s19910_s15 + $0x2e68] sm:$0xff] }
 0x50b   : > { %15389 = vmatprep.subr.bf16.mxu1 %v18759_v16  ;;  %v18743_v33 = vcombine.high %v3297_v47, %v3301_v1  ;;  %v3161_v10 = vld [vmem:[%s19910_s15 + $0x2a08] sm:$0xff]  ;;  %v18742_v54 = vcombine.low %v3297_v47, %v3301_v1 }
 0x50c   : > { %15349 = vmatpush2.bf16.msra.mxu0 %v18630_v15  ;;  %v3165_v29 = vld [vmem:[%s19910_s15 + $0x2a28] sm:$0xff] }
 0x50d   : > { %15350 = vmatprep.subr.bf16.mxu0 %v18623_v40  ;;  %v3289_v43 = vld [vmem:[%s19910_s15 + $0x2e08] sm:$0xff]  ;;  %v18607_v51 = vcombine.high %v3161_v10, %v3165_v29  ;;  %v18606_v17 = vcombine.low %v3161_v10, %v3165_v29 }
 0x50e   : > { %15390 = vmatpush2.bf16.msra.mxu1 %v18758_v3  ;;  %v3293_v13 = vld [vmem:[%s19910_s15 + $0x2e28] sm:$0xff] }
 0x50f   : > { %15391 = vmatprep.subr.bf16.mxu1 %v18751_v49  ;;  %v18735_v59 = vcombine.high %v3289_v43, %v3293_v13  ;;  %v3409_v31 = vld [vmem:[%s19910_s15 + $0x31c8] sm:$0xff]  ;;  %v18734_v14 = vcombine.low %v3289_v43, %v3293_v13 }
 0x510   : > { %15351 = vmatpush2.bf16.msra.mxu0 %v18622_v6  ;;  %v3413_v16 = vld [vmem:[%s19910_s15 + $0x31e8] sm:$0xff] }
 0x511   : > { %15352 = vmatprep.subr.bf16.mxu0 %v18615_v57  ;;  %v3537_v58 = vld [vmem:[%s19910_s15 + $0x35c8] sm:$0xff]  ;;  %v18855_v15 = vcombine.high %v3409_v31, %v3413_v16  ;;  %v18854_v47 = vcombine.low %v3409_v31, %v3413_v16 }
 0x512   : > { %15392 = vmatpush2.bf16.msra.mxu1 %v18750_v2  ;;  %v3541_v63 = vld [vmem:[%s19910_s15 + $0x35e8] sm:$0xff] }
 0x513   : > { %15393 = vmatprep.subr.bf16.mxu1 %v18743_v33  ;;  %v18983_v3 = vcombine.high %v3537_v58, %v3541_v63  ;;  %v3401_v40 = vld [vmem:[%s19910_s15 + $0x3188] sm:$0xff]  ;;  %v18982_v1 = vcombine.low %v3537_v58, %v3541_v63 }
 0x514   : > { %15353 = vmatpush2.bf16.msra.mxu0 %v18614_v38  ;;  %v3405_v49 = vld [vmem:[%s19910_s15 + $0x31a8] sm:$0xff] }
 0x515   : > { %15354 = vmatprep.subr.bf16.mxu0 %v18607_v51  ;;  %v3529_v44 = vld [vmem:[%s19910_s15 + $0x3588] sm:$0xff]  ;;  %v18847_v6 = vcombine.high %v3401_v40, %v3405_v49 }
 0x516   : > { %15394 = vmatpush2.bf16.msra.mxu1 %v18742_v54  ;;  %v3533_v60 = vld [vmem:[%s19910_s15 + $0x35a8] sm:$0xff]  ;;  %v18846_v54 = vcombine.low %v3401_v40, %v3405_v49 }
 0x517   : > { %15395 = vmatprep.subr.bf16.mxu1 %v18735_v59  ;;  %v18975_v2 = vcombine.high %v3529_v44, %v3533_v60  ;;  %v3393_v57 = vld [vmem:[%s19910_s15 + $0x3148] sm:$0xff]  ;;  %v18974_v59 = vcombine.low %v3529_v44, %v3533_v60 }
 0x518   : > { %15355 = vmatpush2.bf16.msra.mxu0 %v18606_v17  ;;  %v3397_v33 = vld [vmem:[%s19910_s15 + $0x3168] sm:$0xff] }
 0x519   : > { %15406 = vmatprep.subr.bf16.mxu0 %v18855_v15  ;;  %v3521_v29 = vld [vmem:[%s19910_s15 + $0x3548] sm:$0xff]  ;;  %v18839_v31 = vcombine.high %v3393_v57, %v3397_v33 }
 0x51a   : > { %15396 = vmatpush2.bf16.msra.mxu1 %v18734_v14  ;;  %v3525_v43 = vld [vmem:[%s19910_s15 + $0x3568] sm:$0xff] }
 0x51b   : > { %15447 = vmatprep.subr.bf16.mxu1 %v18983_v3  ;;  %v15112_v10 = vpop.f32.mrf.mxu0  ;;  %15357 = vmatmul.mubr.bf16.vlgmr.msra.gmra.mxu0 %v20574_v45  ;;  %v3385_v17 = vld [vmem:[%s19910_s15 + $0x3108] sm:$0xff] }
 0x51c   : > { %v15113_v13 = vadd.f32 %v15112_v10, %v21155_v24  ;;  %15407 = vmatpush1.bf16.msra.mxu0 %v18854_v47  ;;  %v18967_v24 = vcombine.high %v3521_v29, %v3525_v43  ;;  %v3389_v14 = vld [vmem:[%s19910_s15 + $0x3128] sm:$0xff]  ;;  %15438 = vmatprep.mubr.bf16.mxu0 %v20590_v28  ;;  %v18966_v47 = vcombine.low %v3521_v29, %v3525_v43 }
 0x51d   : > { %v15153_v38 = vpop.f32.mrf.mxu1  ;;  %15398 = vmatmul.mubr.bf16.vlgmr.msra.gmra.mxu1 %v20582_v11  ;;  %v15114_v51 = vpop.f32.mrf.mxu0  ;;  %15408 = vmatprep.subr.bf16.mxu0 %v18847_v6  ;;  %v3513_v3 = vld [vmem:[%s19910_s15 + $0x3508] sm:$0xff] }
 0x51e   : > { %15448 = vmatpush1.bf16.msra.mxu1 %v18982_v1  ;;  %v21229_v16 = vadd.f32 %v15153_v38, %v15113_v13  ;;  %v15115_v58 = vadd.f32 %v15114_v51, %v21164_v41  ;;  %v3517_v40 = vld [vmem:[%s19910_s15 + $0x3528] sm:$0xff]  ;;  %15479 = vmatprep.mubr.bf16.mxu1 %v20597_v21  ;;  %v18838_v41 = vcombine.low %v3393_v57, %v3397_v33 }
 0x51f   : > { %v15155_v63 = vpop.f32.mrf.mxu1  ;;  %15449 = vmatprep.subr.bf16.mxu1 %v18975_v2  ;;  %v15116_v15 = vpop.f32.mrf.mxu0  ;;  %v18831_v1 = vcombine.high %v3385_v17, %v3389_v14  ;;  %v18959_v2 = vcombine.high %v3513_v3, %v3517_v40  ;;  %v3377_v10 = vld [vmem:[%s19910_s15 + $0x30c8] sm:$0xff]  ;;  %v18958_v57 = vcombine.low %v3513_v3, %v3517_v40 }
 0x520   : > { %v21238_v49 = vadd.f32 %v15155_v63, %v15115_v58  ;;  %15409 = vmatpush1.bf16.msra.mxu0 %v18846_v54  ;;  %v3381_v13 = vld [vmem:[%s19910_s15 + $0x30e8] sm:$0xff]  ;;  %v18830_v58 = vcombine.low %v3385_v17, %v3389_v14 }
 0x521   : > { %v15157_v44 = vpop.f32.mrf.mxu1  ;;  %v15117_v60 = vpop.f32.mrf.mxu0  ;;  %15410 = vmatprep.subr.bf16.mxu0 %v18839_v31  ;;  %v3505_v38 = vld [vmem:[%s19910_s15 + $0x34c8] sm:$0xff]  ;;  %v18823_v33 = vcombine.high %v3377_v10, %v3381_v13  ;;  %v18822_v63 = vcombine.low %v3377_v10, %v3381_v13 }
 0x522   : > { %15450 = vmatpush1.bf16.msra.mxu1 %v18974_v59  ;;  %v3509_v51 = vld [vmem:[%s19910_s15 + $0x34e8] sm:$0xff] }
 0x523   : > { %v15158_v6 = vpop.f32.mrf.mxu1  ;;  %15451 = vmatprep.subr.bf16.mxu1 %v18967_v24  ;;  %v18951_v29 = vcombine.high %v3505_v38, %v3509_v51  ;;  %v3369_v43 = vld [vmem:[%s19910_s15 + $0x3088] sm:$0xff]  ;;  %v18950_v24 = vcombine.low %v3505_v38, %v3509_v51 }
 0x524   : > { %15411 = vmatpush1.bf16.msra.mxu0 %v18838_v41  ;;  %v3373_v54 = vld [vmem:[%s19910_s15 + $0x30a8] sm:$0xff] }
 0x525   : > { %15412 = vmatprep.subr.bf16.mxu0 %v18831_v1  ;;  %v3497_v59 = vld [vmem:[%s19910_s15 + $0x3488] sm:$0xff]  ;;  %v18815_v17 = vcombine.high %v3369_v43, %v3373_v54  ;;  %v18814_v41 = vcombine.low %v3369_v43, %v3373_v54 }
 0x526   : > { %15452 = vmatpush1.bf16.msra.mxu1 %v18966_v47  ;;  %v3501_v31 = vld [vmem:[%s19910_s15 + $0x34a8] sm:$0xff] }
 0x527   : > { %15453 = vmatprep.subr.bf16.mxu1 %v18959_v2  ;;  %v18943_v14 = vcombine.high %v3497_v59, %v3501_v31  ;;  %v3361_v15 = vld [vmem:[%s19910_s15 + $0x3048] sm:$0xff]  ;;  %v18942_v60 = vcombine.low %v3497_v59, %v3501_v31 }
 0x528   : > { %15413 = vmatpush1.bf16.msra.mxu0 %v18830_v58  ;;  %v3365_v3 = vld [vmem:[%s19910_s15 + $0x3068] sm:$0xff] }
 0x529   : > { %15414 = vmatprep.subr.bf16.mxu0 %v18823_v33  ;;  %v3489_v40 = vld [vmem:[%s19910_s15 + $0x3448] sm:$0xff]  ;;  %v18807_v47 = vcombine.high %v3361_v15, %v3365_v3  ;;  %v18806_v38 = vcombine.low %v3361_v15, %v3365_v3 }
 0x52a   : > { %15454 = vmatpush1.bf16.msra.mxu1 %v18958_v57  ;;  %v3493_v44 = vld [vmem:[%s19910_s15 + $0x3468] sm:$0xff] }
 0x52b   : > { %15455 = vmatprep.subr.bf16.mxu1 %v18951_v29  ;;  %v18935_v1 = vcombine.high %v3489_v40, %v3493_v44  ;;  %v3353_v6 = vld [vmem:[%s19910_s15 + $0x3008] sm:$0xff]  ;;  %v18934_v51 = vcombine.low %v3489_v40, %v3493_v44 }
 0x52c   : > { %15415 = vmatpush1.bf16.msra.mxu0 %v18822_v63  ;;  %v3357_v2 = vld [vmem:[%s19910_s15 + $0x3028] sm:$0xff] }
 0x52d   : > { %15416 = vmatprep.subr.bf16.mxu0 %v18815_v17  ;;  %v3481_v10 = vld [vmem:[%s19910_s15 + $0x3408] sm:$0xff]  ;;  %v18799_v58 = vcombine.high %v3353_v6, %v3357_v2  ;;  %v18798_v59 = vcombine.low %v3353_v6, %v3357_v2 }
 0x52e   : > { %15456 = vmatpush1.bf16.msra.mxu1 %v18950_v24  ;;  %v3485_v13 = vld [vmem:[%s19910_s15 + $0x3428] sm:$0xff] }
 0x52f   : > { %15457 = vmatprep.subr.bf16.mxu1 %v18943_v14  ;;  %v18927_v57 = vcombine.high %v3481_v10, %v3485_v13  ;;  %v3473_v33 = vld [vmem:[%s19910_s15 + $0x33c8] sm:$0xff]  ;;  %v18926_v31 = vcombine.low %v3481_v10, %v3485_v13 }
 0x530   : > { %15417 = vmatpush1.bf16.msra.mxu0 %v18814_v41  ;;  %v3477_v29 = vld [vmem:[%s19910_s15 + $0x33e8] sm:$0xff] }
 0x531   : > { %15418 = vmatprep.subr.bf16.mxu0 %v18807_v47  ;;  %v3601_v43 = vld [vmem:[%s19910_s15 + $0x37c8] sm:$0xff]  ;;  %v18919_v63 = vcombine.high %v3473_v33, %v3477_v29  ;;  %v18918_v40 = vcombine.low %v3473_v33, %v3477_v29 }
 0x532   : > { %15458 = vmatpush1.bf16.msra.mxu1 %v18942_v60  ;;  %v3605_v54 = vld [vmem:[%s19910_s15 + $0x37e8] sm:$0xff] }
 0x533   : > { %15459 = vmatprep.subr.bf16.mxu1 %v18935_v1  ;;  %v19047_v24 = vcombine.high %v3601_v43, %v3605_v54  ;;  %v3465_v17 = vld [vmem:[%s19910_s15 + $0x3388] sm:$0xff]  ;;  %v19046_v44 = vcombine.low %v3601_v43, %v3605_v54 }
 0x534   : > { %15419 = vmatpush1.bf16.msra.mxu0 %v18806_v38  ;;  %v3469_v14 = vld [vmem:[%s19910_s15 + $0x33a8] sm:$0xff] }
 0x535   : > { %15420 = vmatprep.subr.bf16.mxu0 %v18799_v58  ;;  %v3593_v15 = vld [vmem:[%s19910_s15 + $0x3788] sm:$0xff]  ;;  %v18911_v41 = vcombine.high %v3465_v17, %v3469_v14  ;;  %v18910_v10 = vcombine.low %v3465_v17, %v3469_v14 }
 0x536   : > { %15460 = vmatpush1.bf16.msra.mxu1 %v18934_v51  ;;  %v3597_v3 = vld [vmem:[%s19910_s15 + $0x37a8] sm:$0xff] }
 0x537   : > { %15461 = vmatprep.subr.bf16.mxu1 %v18927_v57  ;;  %v19039_v60 = vcombine.high %v3593_v15, %v3597_v3  ;;  %v3457_v47 = vld [vmem:[%s19910_s15 + $0x3348] sm:$0xff]  ;;  %v19038_v13 = vcombine.low %v3593_v15, %v3597_v3 }
 0x538   : > { %15421 = vmatpush1.bf16.msra.mxu0 %v18798_v59  ;;  %v3461_v1 = vld [vmem:[%s19910_s15 + $0x3368] sm:$0xff] }
 0x539   : > { %15422 = vmatprep.subr.bf16.mxu0 %v18919_v63  ;;  %v3585_v6 = vld [vmem:[%s19910_s15 + $0x3748] sm:$0xff]  ;;  %v18903_v38 = vcombine.high %v3457_v47, %v3461_v1  ;;  %v18902_v43 = vcombine.low %v3457_v47, %v3461_v1 }
 0x53a   : > { %15462 = vmatpush1.bf16.msra.mxu1 %v18926_v31  ;;  %v3589_v2 = vld [vmem:[%s19910_s15 + $0x3768] sm:$0xff] }
 0x53b   : > { %15463 = vmatprep.subr.bf16.mxu1 %v19047_v24  ;;  %v19031_v51 = vcombine.high %v3585_v6, %v3589_v2  ;;  %v3449_v58 = vld [vmem:[%s19910_s15 + $0x3308] sm:$0xff]  ;;  %v19030_v54 = vcombine.low %v3585_v6, %v3589_v2 }
 0x53c   : > { %15423 = vmatpush2.bf16.msra.mxu0 %v18918_v40  ;;  %v3453_v57 = vld [vmem:[%s19910_s15 + $0x3328] sm:$0xff] }
 0x53d   : > { %15424 = vmatprep.subr.bf16.mxu0 %v18911_v41  ;;  %v3577_v33 = vld [vmem:[%s19910_s15 + $0x3708] sm:$0xff]  ;;  %v18895_v59 = vcombine.high %v3449_v58, %v3453_v57  ;;  %v18894_v15 = vcombine.low %v3449_v58, %v3453_v57 }
 0x53e   : > { %15464 = vmatpush2.bf16.msra.mxu1 %v19046_v44  ;;  %v3581_v29 = vld [vmem:[%s19910_s15 + $0x3728] sm:$0xff] }
 0x53f   : > { %15465 = vmatprep.subr.bf16.mxu1 %v19039_v60  ;;  %v19023_v31 = vcombine.high %v3577_v33, %v3581_v29  ;;  %v3441_v63 = vld [vmem:[%s19910_s15 + $0x32c8] sm:$0xff]  ;;  %v19022_v3 = vcombine.low %v3577_v33, %v3581_v29 }
 0x540   : > { %15425 = vmatpush2.bf16.msra.mxu0 %v18910_v10  ;;  %v3445_v24 = vld [vmem:[%s19910_s15 + $0x32e8] sm:$0xff] }
 0x541   : > { %15426 = vmatprep.subr.bf16.mxu0 %v18903_v38  ;;  %v3569_v17 = vld [vmem:[%s19910_s15 + $0x36c8] sm:$0xff]  ;;  %v18887_v40 = vcombine.high %v3441_v63, %v3445_v24  ;;  %v18886_v6 = vcombine.low %v3441_v63, %v3445_v24 }
 0x542   : > { %15466 = vmatpush2.bf16.msra.mxu1 %v19038_v13  ;;  %v3573_v14 = vld [vmem:[%s19910_s15 + $0x36e8] sm:$0xff] }
 0x543   : > { %15467 = vmatprep.subr.bf16.mxu1 %v19031_v51  ;;  %v19015_v44 = vcombine.high %v3569_v17, %v3573_v14  ;;  %v3433_v41 = vld [vmem:[%s19910_s15 + $0x3288] sm:$0xff]  ;;  %v19014_v2 = vcombine.low %v3569_v17, %v3573_v14 }
 0x544   : > { %15427 = vmatpush2.bf16.msra.mxu0 %v18902_v43  ;;  %v3437_v60 = vld [vmem:[%s19910_s15 + $0x32a8] sm:$0xff] }
 0x545   : > { %15428 = vmatprep.subr.bf16.mxu0 %v18895_v59  ;;  %v3561_v47 = vld [vmem:[%s19910_s15 + $0x3688] sm:$0xff]  ;;  %v18879_v10 = vcombine.high %v3433_v41, %v3437_v60  ;;  %v18878_v33 = vcombine.low %v3433_v41, %v3437_v60 }
 0x546   : > { %15468 = vmatpush2.bf16.msra.mxu1 %v19030_v54  ;;  %v3565_v1 = vld [vmem:[%s19910_s15 + $0x36a8] sm:$0xff] }
 0x547   : > { %15469 = vmatprep.subr.bf16.mxu1 %v19023_v31  ;;  %v19007_v13 = vcombine.high %v3561_v47, %v3565_v1  ;;  %v3425_v38 = vld [vmem:[%s19910_s15 + $0x3248] sm:$0xff]  ;;  %v19006_v29 = vcombine.low %v3561_v47, %v3565_v1 }
 0x548   : > { %15429 = vmatpush2.bf16.msra.mxu0 %v18894_v15  ;;  %v3429_v51 = vld [vmem:[%s19910_s15 + $0x3268] sm:$0xff] }
 0x549   : > { %15430 = vmatprep.subr.bf16.mxu0 %v18887_v40  ;;  %v3553_v58 = vld [vmem:[%s19910_s15 + $0x3648] sm:$0xff]  ;;  %v18871_v43 = vcombine.high %v3425_v38, %v3429_v51  ;;  %v18870_v17 = vcombine.low %v3425_v38, %v3429_v51 }
 0x54a   : > { %15470 = vmatpush2.bf16.msra.mxu1 %v19022_v3  ;;  %v3557_v57 = vld [vmem:[%s19910_s15 + $0x3668] sm:$0xff] }
 0x54b   : > { %15471 = vmatprep.subr.bf16.mxu1 %v19015_v44  ;;  %v18999_v54 = vcombine.high %v3553_v58, %v3557_v57  ;;  %v3417_v59 = vld [vmem:[%s19910_s15 + $0x3208] sm:$0xff]  ;;  %v18998_v14 = vcombine.low %v3553_v58, %v3557_v57 }
 0x54c   : > { %15431 = vmatpush2.bf16.msra.mxu0 %v18886_v6  ;;  %v3421_v31 = vld [vmem:[%s19910_s15 + $0x3228] sm:$0xff] }
 0x54d   : > { %15432 = vmatprep.subr.bf16.mxu0 %v18879_v10  ;;  %v3545_v63 = vld [vmem:[%s19910_s15 + $0x3608] sm:$0xff]  ;;  %v18863_v15 = vcombine.high %v3417_v59, %v3421_v31  ;;  %v18862_v47 = vcombine.low %v3417_v59, %v3421_v31 }
 0x54e   : > { %15472 = vmatpush2.bf16.msra.mxu1 %v19014_v2  ;;  %v3549_v24 = vld [vmem:[%s19910_s15 + $0x3628] sm:$0xff] }
 0x54f   : > { %15473 = vmatprep.subr.bf16.mxu1 %v19007_v13  ;;  %v18991_v3 = vcombine.high %v3545_v63, %v3549_v24  ;;  %v3665_v40 = vld [vmem:[%s19910_s15 + $0x39c8] sm:$0xff]  ;;  %v18990_v1 = vcombine.low %v3545_v63, %v3549_v24 }
 0x550   : > { %15433 = vmatpush2.bf16.msra.mxu0 %v18878_v33  ;;  %v3669_v44 = vld [vmem:[%s19910_s15 + $0x39e8] sm:$0xff] }
 0x551   : > { %15434 = vmatprep.subr.bf16.mxu0 %v18871_v43  ;;  %v3793_v41 = vld [vmem:[%s19910_s15 + $0x3dc8] sm:$0xff]  ;;  %v19111_v6 = vcombine.high %v3665_v40, %v3669_v44  ;;  %v19110_v58 = vcombine.low %v3665_v40, %v3669_v44 }
 0x552   : > { %15474 = vmatpush2.bf16.msra.mxu1 %v19006_v29  ;;  %v3797_v60 = vld [vmem:[%s19910_s15 + $0x3de8] sm:$0xff] }
 0x553   : > { %15475 = vmatprep.subr.bf16.mxu1 %v18999_v54  ;;  %v19239_v2 = vcombine.high %v3793_v41, %v3797_v60  ;;  %v3657_v10 = vld [vmem:[%s19910_s15 + $0x3988] sm:$0xff]  ;;  %v19238_v57 = vcombine.low %v3793_v41, %v3797_v60 }
 0x554   : > { %15435 = vmatpush2.bf16.msra.mxu0 %v18870_v17  ;;  %v3661_v13 = vld [vmem:[%s19910_s15 + $0x39a8] sm:$0xff] }
 0x555   : > { %15436 = vmatprep.subr.bf16.mxu0 %v18863_v15  ;;  %v3785_v38 = vld [vmem:[%s19910_s15 + $0x3d88] sm:$0xff]  ;;  %v19103_v33 = vcombine.high %v3657_v10, %v3661_v13 }
 0x556   : > { %15476 = vmatpush2.bf16.msra.mxu1 %v18998_v14  ;;  %v3789_v51 = vld [vmem:[%s19910_s15 + $0x3da8] sm:$0xff]  ;;  %v19102_v14 = vcombine.low %v3657_v10, %v3661_v13 }
 0x557   : > { %15477 = vmatprep.subr.bf16.mxu1 %v18991_v3  ;;  %v19231_v29 = vcombine.high %v3785_v38, %v3789_v51  ;;  %v3649_v43 = vld [vmem:[%s19910_s15 + $0x3948] sm:$0xff]  ;;  %v19230_v3 = vcombine.low %v3785_v38, %v3789_v51 }
 0x558   : > { %15437 = vmatpush2.bf16.msra.mxu0 %v18862_v47  ;;  %v3653_v54 = vld [vmem:[%s19910_s15 + $0x3968] sm:$0xff] }
 0x559   : > { %15488 = vmatprep.subr.bf16.mxu0 %v19111_v6  ;;  %v3777_v31 = vld [vmem:[%s19910_s15 + $0x3d48] sm:$0xff]  ;;  %v19095_v40 = vcombine.high %v3649_v43, %v3653_v54 }
 0x55a   : > { %15478 = vmatpush2.bf16.msra.mxu1 %v18990_v1  ;;  %v3781_v63 = vld [vmem:[%s19910_s15 + $0x3d68] sm:$0xff] }
 0x55b   : > { %15529 = vmatprep.subr.bf16.mxu1 %v19239_v2  ;;  %v15194_v59 = vpop.f32.mrf.mxu0  ;;  %15439 = vmatmul.mubr.bf16.vlgmr.msra.gmra.mxu0 %v20668_v23  ;;  %v3641_v47 = vld [vmem:[%s19910_s15 + $0x3908] sm:$0xff] }
 0x55c   : > { %v15195_v24 = vadd.f32 %v15194_v59, %v21229_v16  ;;  %15489 = vmatpush1.bf16.msra.mxu0 %v19110_v58  ;;  %v19223_v16 = vcombine.high %v3777_v31, %v3781_v63  ;;  %v3645_v1 = vld [vmem:[%s19910_s15 + $0x3928] sm:$0xff]  ;;  %15520 = vmatprep.mubr.bf16.mxu0 %v20684_v37  ;;  %v19222_v58 = vcombine.low %v3777_v31, %v3781_v63 }
 0x55d   : > { %v15235_v17 = vpop.f32.mrf.mxu1  ;;  %15480 = vmatmul.mubr.bf16.vlgmr.msra.gmra.mxu1 %v20676_v22  ;;  %v15196_v15 = vpop.f32.mrf.mxu0  ;;  %15490 = vmatprep.subr.bf16.mxu0 %v19103_v33  ;;  %v3769_v2 = vld [vmem:[%s19910_s15 + $0x3d08] sm:$0xff] }
 0x55e   : > { %15530 = vmatpush1.bf16.msra.mxu1 %v19238_v57  ;;  %v21303_v44 = vadd.f32 %v15235_v17, %v15195_v24  ;;  %v15197_v41 = vadd.f32 %v15196_v15, %v21238_v49  ;;  %v3773_v10 = vld [vmem:[%s19910_s15 + $0x3d28] sm:$0xff]  ;;  %15561 = vmatprep.mubr.bf16.mxu1 %v20691_v42  ;;  %v19094_v49 = vcombine.low %v3649_v43, %v3653_v54 }
 0x55f   : > { %v15237_v60 = vpop.f32.mrf.mxu1  ;;  %15531 = vmatprep.subr.bf16.mxu1 %v19231_v29  ;;  %v15198_v6 = vpop.f32.mrf.mxu0  ;;  %v19087_v57 = vcombine.high %v3641_v47, %v3645_v1  ;;  %v19215_v29 = vcombine.high %v3769_v2, %v3773_v10  ;;  %v3633_v59 = vld [vmem:[%s19910_s15 + $0x38c8] sm:$0xff]  ;;  %v19214_v43 = vcombine.low %v3769_v2, %v3773_v10 }
 0x560   : > { %v21312_v13 = vadd.f32 %v15237_v60, %v15197_v41  ;;  %15491 = vmatpush1.bf16.msra.mxu0 %v19102_v14  ;;  %v3637_v24 = vld [vmem:[%s19910_s15 + $0x38e8] sm:$0xff]  ;;  %v19086_v41 = vcombine.low %v3641_v47, %v3645_v1 }
 0x561   : > { %v15239_v38 = vpop.f32.mrf.mxu1  ;;  %v15199_v51 = vpop.f32.mrf.mxu0  ;;  %15492 = vmatprep.subr.bf16.mxu0 %v19095_v40  ;;  %v3761_v17 = vld [vmem:[%s19910_s15 + $0x3cc8] sm:$0xff]  ;;  %v19079_v54 = vcombine.high %v3633_v59, %v3637_v24  ;;  %v19078_v60 = vcombine.low %v3633_v59, %v3637_v24 }
 0x562   : > { %15532 = vmatpush1.bf16.msra.mxu1 %v19230_v3  ;;  %v3765_v15 = vld [vmem:[%s19910_s15 + $0x3ce8] sm:$0xff] }
 0x563   : > { %v15240_v33 = vpop.f32.mrf.mxu1  ;;  %15533 = vmatprep.subr.bf16.mxu1 %v19223_v16  ;;  %v19207_v31 = vcombine.high %v3761_v17, %v3765_v15  ;;  %v3625_v63 = vld [vmem:[%s19910_s15 + $0x3888] sm:$0xff]  ;;  %v19206_v16 = vcombine.low %v3761_v17, %v3765_v15 }
 0x564   : > { %15493 = vmatpush1.bf16.msra.mxu0 %v19094_v49  ;;  %v3629_v14 = vld [vmem:[%s19910_s15 + $0x38a8] sm:$0xff] }
 0x565   : > { %15494 = vmatprep.subr.bf16.mxu0 %v19087_v57  ;;  %v3753_v3 = vld [vmem:[%s19910_s15 + $0x3c88] sm:$0xff]  ;;  %v19071_v47 = vcombine.high %v3625_v63, %v3629_v14  ;;  %v19070_v49 = vcombine.low %v3625_v63, %v3629_v14 }
 0x566   : > { %15534 = vmatpush1.bf16.msra.mxu1 %v19222_v58  ;;  %v3757_v40 = vld [vmem:[%s19910_s15 + $0x3ca8] sm:$0xff] }
 0x567   : > { %15535 = vmatprep.subr.bf16.mxu1 %v19215_v29  ;;  %v19199_v1 = vcombine.high %v3753_v3, %v3757_v40  ;;  %v3617_v6 = vld [vmem:[%s19910_s15 + $0x3848] sm:$0xff]  ;;  %v19198_v51 = vcombine.low %v3753_v3, %v3757_v40 }
 0x568   : > { %15495 = vmatpush1.bf16.msra.mxu0 %v19086_v41  ;;  %v3621_v2 = vld [vmem:[%s19910_s15 + $0x3868] sm:$0xff] }
 0x569   : > { %15496 = vmatprep.subr.bf16.mxu0 %v19079_v54  ;;  %v3745_v10 = vld [vmem:[%s19910_s15 + $0x3c48] sm:$0xff]  ;;  %v19063_v58 = vcombine.high %v3617_v6, %v3621_v2  ;;  %v19062_v17 = vcombine.low %v3617_v6, %v3621_v2 }
 0x56a   : > { %15536 = vmatpush1.bf16.msra.mxu1 %v19214_v43  ;;  %v3749_v38 = vld [vmem:[%s19910_s15 + $0x3c68] sm:$0xff] }
 0x56b   : > { %15537 = vmatprep.subr.bf16.mxu1 %v19207_v31  ;;  %v19191_v57 = vcombine.high %v3745_v10, %v3749_v38  ;;  %v3609_v33 = vld [vmem:[%s19910_s15 + $0x3808] sm:$0xff]  ;;  %v19190_v15 = vcombine.low %v3745_v10, %v3749_v38 }
 0x56c   : > { %15497 = vmatpush1.bf16.msra.mxu0 %v19078_v60  ;;  %v3613_v29 = vld [vmem:[%s19910_s15 + $0x3828] sm:$0xff] }
 0x56d   : > { %15498 = vmatprep.subr.bf16.mxu0 %v19071_v47  ;;  %v3737_v59 = vld [vmem:[%s19910_s15 + $0x3c08] sm:$0xff]  ;;  %v19055_v41 = vcombine.high %v3609_v33, %v3613_v29  ;;  %v19054_v3 = vcombine.low %v3609_v33, %v3613_v29 }
 0x56e   : > { %15538 = vmatpush1.bf16.msra.mxu1 %v19206_v16  ;;  %v3741_v24 = vld [vmem:[%s19910_s15 + $0x3c28] sm:$0xff] }
 0x56f   : > { %15539 = vmatprep.subr.bf16.mxu1 %v19199_v1  ;;  %v19183_v43 = vcombine.high %v3737_v59, %v3741_v24  ;;  %v3729_v54 = vld [vmem:[%s19910_s15 + $0x3bc8] sm:$0xff]  ;;  %v19182_v40 = vcombine.low %v3737_v59, %v3741_v24 }
 0x570   : > { %15499 = vmatpush1.bf16.msra.mxu0 %v19070_v49  ;;  %v3733_v31 = vld [vmem:[%s19910_s15 + $0x3be8] sm:$0xff] }
 0x571   : > { %15500 = vmatprep.subr.bf16.mxu0 %v19063_v58  ;;  %v3857_v63 = vld [vmem:[%s19910_s15 + $0x3fc8] sm:$0xff]  ;;  %v19175_v60 = vcombine.high %v3729_v54, %v3733_v31  ;;  %v19174_v10 = vcombine.low %v3729_v54, %v3733_v31 }
 0x572   : > { %15540 = vmatpush1.bf16.msra.mxu1 %v19198_v51  ;;  %v3861_v14 = vld [vmem:[%s19910_s15 + $0x3fe8] sm:$0xff] }
 0x573   : > { %15541 = vmatprep.subr.bf16.mxu1 %v19191_v57  ;;  %v19303_v16 = vcombine.high %v3857_v63, %v3861_v14  ;;  %v3721_v47 = vld [vmem:[%s19910_s15 + $0x3b88] sm:$0xff]  ;;  %v19302_v38 = vcombine.low %v3857_v63, %v3861_v14 }
 0x574   : > { %15501 = vmatpush1.bf16.msra.mxu0 %v19062_v17  ;;  %v3725_v1 = vld [vmem:[%s19910_s15 + $0x3ba8] sm:$0xff] }
 0x575   : > { %15502 = vmatprep.subr.bf16.mxu0 %v19055_v41  ;;  %v3849_v6 = vld [vmem:[%s19910_s15 + $0x3f88] sm:$0xff]  ;;  %v19167_v49 = vcombine.high %v3721_v47, %v3725_v1  ;;  %v19166_v59 = vcombine.low %v3721_v47, %v3725_v1 }
 0x576   : > { %15542 = vmatpush1.bf16.msra.mxu1 %v19190_v15  ;;  %v3853_v2 = vld [vmem:[%s19910_s15 + $0x3fa8] sm:$0xff] }
 0x577   : > { %15543 = vmatprep.subr.bf16.mxu1 %v19183_v43  ;;  %v19295_v51 = vcombine.high %v3849_v6, %v3853_v2  ;;  %v3713_v58 = vld [vmem:[%s19910_s15 + $0x3b48] sm:$0xff]  ;;  %v19294_v24 = vcombine.low %v3849_v6, %v3853_v2 }
 0x578   : > { %15503 = vmatpush1.bf16.msra.mxu0 %v19054_v3  ;;  %v3717_v57 = vld [vmem:[%s19910_s15 + $0x3b68] sm:$0xff] }
 0x579   : > { %15504 = vmatprep.subr.bf16.mxu0 %v19175_v60  ;;  %v3841_v33 = vld [vmem:[%s19910_s15 + $0x3f48] sm:$0xff]  ;;  %v19159_v17 = vcombine.high %v3713_v58, %v3717_v57  ;;  %v19158_v63 = vcombine.low %v3713_v58, %v3717_v57 }
 0x57a   : > { %15544 = vmatpush1.bf16.msra.mxu1 %v19182_v40  ;;  %v3845_v29 = vld [vmem:[%s19910_s15 + $0x3f68] sm:$0xff] }
 0x57b   : > { %15545 = vmatprep.subr.bf16.mxu1 %v19303_v16  ;;  %v19287_v15 = vcombine.high %v3841_v33, %v3845_v29  ;;  %v3705_v41 = vld [vmem:[%s19910_s15 + $0x3b08] sm:$0xff]  ;;  %v19286_v14 = vcombine.low %v3841_v33, %v3845_v29 }
 0x57c   : > { %15505 = vmatpush2.bf16.msra.mxu0 %v19174_v10  ;;  %v3709_v43 = vld [vmem:[%s19910_s15 + $0x3b28] sm:$0xff] }
 0x57d   : > { %15506 = vmatprep.subr.bf16.mxu0 %v19167_v49  ;;  %v3833_v54 = vld [vmem:[%s19910_s15 + $0x3f08] sm:$0xff]  ;;  %v19151_v3 = vcombine.high %v3705_v41, %v3709_v43  ;;  %v19150_v6 = vcombine.low %v3705_v41, %v3709_v43 }
 0x57e   : > { %15546 = vmatpush2.bf16.msra.mxu1 %v19302_v38  ;;  %v3837_v31 = vld [vmem:[%s19910_s15 + $0x3f28] sm:$0xff] }
 0x57f   : > { %15547 = vmatprep.subr.bf16.mxu1 %v19295_v51  ;;  %v19279_v40 = vcombine.high %v3833_v54, %v3837_v31  ;;  %v3697_v60 = vld [vmem:[%s19910_s15 + $0x3ac8] sm:$0xff]  ;;  %v19278_v2 = vcombine.low %v3833_v54, %v3837_v31 }
 0x580   : > { %15507 = vmatpush2.bf16.msra.mxu0 %v19166_v59  ;;  %v3701_v16 = vld [vmem:[%s19910_s15 + $0x3ae8] sm:$0xff] }
 0x581   : > { %15508 = vmatprep.subr.bf16.mxu0 %v19159_v17  ;;  %v3825_v47 = vld [vmem:[%s19910_s15 + $0x3ec8] sm:$0xff]  ;;  %v19143_v10 = vcombine.high %v3697_v60, %v3701_v16  ;;  %v19142_v33 = vcombine.low %v3697_v60, %v3701_v16 }
 0x582   : > { %15548 = vmatpush2.bf16.msra.mxu1 %v19294_v24  ;;  %v3829_v1 = vld [vmem:[%s19910_s15 + $0x3ee8] sm:$0xff] }
 0x583   : > { %15549 = vmatprep.subr.bf16.mxu1 %v19287_v15  ;;  %v19271_v38 = vcombine.high %v3825_v47, %v3829_v1  ;;  %v3689_v49 = vld [vmem:[%s19910_s15 + $0x3a88] sm:$0xff]  ;;  %v19270_v29 = vcombine.low %v3825_v47, %v3829_v1 }
 0x584   : > { %15509 = vmatpush2.bf16.msra.mxu0 %v19158_v63  ;;  %v3693_v51 = vld [vmem:[%s19910_s15 + $0x3aa8] sm:$0xff] }
 0x585   : > { %15510 = vmatprep.subr.bf16.mxu0 %v19151_v3  ;;  %v3817_v58 = vld [vmem:[%s19910_s15 + $0x3e88] sm:$0xff]  ;;  %v19135_v59 = vcombine.high %v3689_v49, %v3693_v51  ;;  %v19134_v54 = vcombine.low %v3689_v49, %v3693_v51  ;;  %v2002_v49 = vld [vmem:[%s19910_s15 + $0x5d0] sm:$0xff] }
 0x586   : > { %15550 = vmatpush2.bf16.msra.mxu1 %v19286_v14  ;;  %v3821_v57 = vld [vmem:[%s19910_s15 + $0x3ea8] sm:$0xff]  ;;  %v2006_v51 = vld [vmem:[%s19910_s15 + $0x5f0] sm:$0xff] }
 0x587   : > { %15551 = vmatprep.subr.bf16.mxu1 %v19279_v40  ;;  %v19263_v24 = vcombine.high %v3817_v58, %v3821_v57  ;;  %v3681_v17 = vld [vmem:[%s19910_s15 + $0x3a48] sm:$0xff]  ;;  %v19262_v31 = vcombine.low %v3817_v58, %v3821_v57 }
 0x588   : > { %15511 = vmatpush2.bf16.msra.mxu0 %v19150_v6  ;;  %v3685_v15 = vld [vmem:[%s19910_s15 + $0x3a68] sm:$0xff] }
 0x589   : > { %15512 = vmatprep.subr.bf16.mxu0 %v19143_v10  ;;  %v3809_v41 = vld [vmem:[%s19910_s15 + $0x3e48] sm:$0xff]  ;;  %v19127_v63 = vcombine.high %v3681_v17, %v3685_v15  ;;  %v19126_v47 = vcombine.low %v3681_v17, %v3685_v15  ;;  %v1874_v10 = vld [vmem:[%s19910_s15 + $0x1d0] sm:$0xff] }
 0x58a   : > { %15552 = vmatpush2.bf16.msra.mxu1 %v19278_v2  ;;  %v3813_v43 = vld [vmem:[%s19910_s15 + $0x3e68] sm:$0xff]  ;;  %v1994_v17 = vld [vmem:[%s19910_s15 + $0x590] sm:$0xff] }
 0x58b   : > { %15553 = vmatprep.subr.bf16.mxu1 %v19271_v38  ;;  %v19255_v14 = vcombine.high %v3809_v41, %v3813_v43  ;;  %v3673_v3 = vld [vmem:[%s19910_s15 + $0x3a08] sm:$0xff]  ;;  %v19254_v1 = vcombine.low %v3809_v41, %v3813_v43  ;;  %v1878_v38 = vld [vmem:[%s19910_s15 + $0x1f0] sm:$0xff]  ;;  %v17448_v43 = vcombine.low %v2002_v49, %v2006_v51 }
 0x58c   : > { %15513 = vmatpush2.bf16.msra.mxu0 %v19142_v33  ;;  %v3677_v40 = vld [vmem:[%s19910_s15 + $0x3a28] sm:$0xff]  ;;  %v17321_v33 = vcombine.high %v1874_v10, %v1878_v38  ;;  %v1998_v15 = vld [vmem:[%s19910_s15 + $0x5b0] sm:$0xff]  ;;  %v17320_v41 = vcombine.low %v1874_v10, %v1878_v38 }
 0x58d   : > { %15514 = vmatprep.subr.bf16.mxu0 %v19135_v59  ;;  %v3801_v60 = vld [vmem:[%s19910_s15 + $0x3e08] sm:$0xff]  ;;  %v19119_v6 = vcombine.high %v3673_v3, %v3677_v40  ;;  %v19118_v58 = vcombine.low %v3673_v3, %v3677_v40  ;;  %v1866_v59 = vld [vmem:[%s19910_s15 + $0x190] sm:$0xff] }
 0x58e   : > { %15554 = vmatpush2.bf16.msra.mxu1 %v19270_v29  ;;  %v3805_v16 = vld [vmem:[%s19910_s15 + $0x3e28] sm:$0xff]  ;;  %v17449_v29 = vcombine.high %v2002_v49, %v2006_v51  ;;  %v1986_v40 = vld [vmem:[%s19910_s15 + $0x550] sm:$0xff] }
 0x58f   : > { %15555 = vmatprep.subr.bf16.mxu1 %v19263_v24  ;;  %v19247_v2 = vcombine.high %v3801_v60, %v3805_v16  ;;  %v19246_v57 = vcombine.low %v3801_v60, %v3805_v16  ;;  %v1870_v24 = vld [vmem:[%s19910_s15 + $0x1b0] sm:$0xff] }
 0x590   : > { %15515 = vmatpush2.bf16.msra.mxu0 %v19134_v54  ;;  %v17313_v54 = vcombine.high %v1866_v59, %v1870_v24  ;;  %v1990_v60 = vld [vmem:[%s19910_s15 + $0x570] sm:$0xff] }
 0x591   : > { %15516 = vmatprep.subr.bf16.mxu0 %v19127_v63  ;;  %v1858_v63 = vld [vmem:[%s19910_s15 + $0x150] sm:$0xff] }
 0x592   : > { %15556 = vmatpush2.bf16.msra.mxu1 %v19262_v31  ;;  %v17441_v31 = vcombine.high %v1994_v17, %v1998_v15 }
 0x593   : > { %15557 = vmatprep.subr.bf16.mxu1 %v19255_v14  ;;  %v1862_v14 = vld [vmem:[%s19910_s15 + $0x170] sm:$0xff] }
 0x594   : > { %15517 = vmatpush2.bf16.msra.mxu0 %v19126_v47  ;;  %v17305_v10 = vcombine.high %v1858_v63, %v1862_v14 }
 0x595   : > { %15518 = vmatprep.subr.bf16.mxu0 %v19119_v6 }
 0x596   : > { %15558 = vmatpush2.bf16.msra.mxu1 %v19254_v1  ;;  %v17312_v1 = vcombine.low %v1866_v59, %v1870_v24  ;;  %v1982_v59 = vld [vmem:[%s19910_s15 + $0x530] sm:$0xff] }
 0x597   : > { %15559 = vmatprep.subr.bf16.mxu1 %v19247_v2  ;;  %v17440_v2 = vcombine.low %v1994_v17, %v1998_v15 }
 0x598   : > { %15519 = vmatpush2.bf16.msra.mxu0 %v19118_v58  ;;  %v1850_v58 = vld [vmem:[%s19910_s15 + $0x110] sm:$0xff] }
 0x599   : > { %15570 = vmatprep.subr.bf16.mxu0 %v17321_v33 }
 0x59a   : > { %15560 = vmatpush2.bf16.msra.mxu1 %v19246_v57  ;;  %v1854_v57 = vld [vmem:[%s19910_s15 + $0x130] sm:$0xff] }
 0x59b   : > { %15611 = vmatprep.subr.bf16.mxu1 %v17449_v29  ;;  %v15276_v3 = vpop.f32.mrf.mxu0  ;;  %15521 = vmatmul.mubr.bf16.vlgmr.msra.gmra.mxu0 %v20762_v30  ;;  %v1978_v29 = vld [vmem:[%s19910_s15 + $0x510] sm:$0xff] }
 0x59c   : > { %v15277_v16 = vadd.f32 %v15276_v3, %v21303_v44  ;;  %15571 = vmatpush1.bf16.msra.mxu0 %v17320_v41  ;;  %v17433_v44 = vcombine.high %v1986_v40, %v1990_v60  ;;  %15602 = vmatprep.mubr.bf16.mxu0 %v20065_v9  ;;  %v17432_v41 = vcombine.low %v1986_v40, %v1990_v60  ;;  %v1842_v3 = vld [vmem:[%s19910_s15 + $0xd0] sm:$0xff] }
 0x59d   : > { %v15317_v47 = vpop.f32.mrf.mxu1  ;;  %15562 = vmatmul.mubr.bf16.vlgmr.msra.gmra.mxu1 %v20768_v32  ;;  %v15278_v6 = vpop.f32.mrf.mxu0  ;;  %15572 = vmatprep.subr.bf16.mxu0 %v17313_v54  ;;  %v1834_v60 = vld [vmem:[%s19910_s15 + $0x90] sm:$0xff] }
 0x59e   : > { %15612 = vmatpush1.bf16.msra.mxu1 %v17448_v43  ;;  %v21377_v38 = vadd.f32 %v15317_v47, %v15277_v16  ;;  %v15279_v49 = vadd.f32 %v15278_v6, %v21312_v13  ;;  %15643 = vmatprep.mubr.bf16.mxu1 %v20069_v12  ;;  %v17304_v13 = vcombine.low %v1858_v63, %v1862_v14  ;;  %v1846_v16 = vld [vmem:[%s19910_s15 + $0xf0] sm:$0xff] }
 0x59f   : > { %v15319_v51 = vpop.f32.mrf.mxu1  ;;  %15613 = vmatprep.subr.bf16.mxu1 %v17441_v31  ;;  %v15280_v33 = vpop.f32.mrf.mxu0  ;;  %v17297_v43 = vcombine.high %v1850_v58, %v1854_v57  ;;  %v17425_v31 = vcombine.high %v1978_v29, %v1982_v59  ;;  %v1970_v47 = vld [vmem:[%s19910_s15 + $0x4d0] sm:$0xff]  ;;  %v17424_v63 = vcombine.low %v1978_v29, %v1982_v59  ;;  %v17289_v14 = vcombine.high %v1842_v3, %v1846_v16 }
 0x5a0   : > { %v21386_v24 = vadd.f32 %v15319_v51, %v15279_v49  ;;  %15573 = vmatpush1.bf16.msra.mxu0 %v17312_v1  ;;  %v1974_v6 = vld [vmem:[%s19910_s15 + $0x4f0] sm:$0xff]  ;;  %v17296_v49 = vcombine.low %v1850_v58, %v1854_v57  ;;  %v17288_v51 = vcombine.low %v1842_v3, %v1846_v16 }
 0x5a1   : > { %v15321_v17 = vpop.f32.mrf.mxu1  ;;  %v15281_v15 = vpop.f32.mrf.mxu0  ;;  %15574 = vmatprep.subr.bf16.mxu0 %v17305_v10  ;;  %v17417_v40 = vcombine.high %v1970_v47, %v1974_v6  ;;  %v1838_v1 = vld [vmem:[%s19910_s15 + $0xb0] sm:$0xff] }
 0x5a2   : > { %15614 = vmatpush1.bf16.msra.mxu1 %v17440_v2  ;;  %v1962_v2 = vld [vmem:[%s19910_s15 + $0x490] sm:$0xff]  ;;  %v17281_v58 = vcombine.high %v1834_v60, %v1838_v1 }
 0x5a3   : > { %v15322_v54 = vpop.f32.mrf.mxu1  ;;  %15615 = vmatprep.subr.bf16.mxu1 %v17433_v44  ;;  %v1966_v10 = vld [vmem:[%s19910_s15 + $0x4b0] sm:$0xff]  ;;  %v17416_v44 = vcombine.low %v1970_v47, %v1974_v6 }
 0x5a4   : > { %15575 = vmatpush1.bf16.msra.mxu0 %v17304_v13  ;;  %v17409_v57 = vcombine.high %v1962_v2, %v1966_v10  ;;  %v1826_v33 = vld [vmem:[%s19910_s15 + $0x50] sm:$0xff]  ;;  %v17280_v13 = vcombine.low %v1834_v60, %v1838_v1  ;;  %v17408_v15 = vcombine.low %v1962_v2, %v1966_v10 }
 0x5a5   : > { %15576 = vmatprep.subr.bf16.mxu0 %v17297_v43  ;;  %v1830_v29 = vld [vmem:[%s19910_s15 + $0x70] sm:$0xff] }
 0x5a6   : > { %15616 = vmatpush1.bf16.msra.mxu1 %v17432_v41  ;;  %v1954_v59 = vld [vmem:[%s19910_s15 + $0x450] sm:$0xff]  ;;  %v17273_v41 = vcombine.high %v1826_v33, %v1830_v29  ;;  %v17272_v47 = vcombine.low %v1826_v33, %v1830_v29 }
 0x5a7   : > { %15617 = vmatprep.subr.bf16.mxu1 %v17425_v31  ;;  %v1958_v17 = vld [vmem:[%s19910_s15 + $0x470] sm:$0xff] }
 0x5a8   : > { %15577 = vmatpush1.bf16.msra.mxu0 %v17296_v49  ;;  %v17401_v43 = vcombine.high %v1954_v59, %v1958_v17  ;;  %v1818_v54 = vld [vmem:[%s19910_s15 + $0x10] sm:$0xff]  ;;  %v17400_v6 = vcombine.low %v1954_v59, %v1958_v17 }
 0x5a9   : > { %15578 = vmatprep.subr.bf16.mxu0 %v17289_v14  ;;  %v1822_v31 = vld [vmem:[%s19910_s15 + $0x30] sm:$0xff] }
 0x5aa   : > { %15618 = vmatpush1.bf16.msra.mxu1 %v17424_v63  ;;  %v1946_v3 = vld [vmem:[%s19910_s15 + $0x410] sm:$0xff]  ;;  %v17265_v49 = vcombine.high %v1818_v54, %v1822_v31  ;;  %v17264_v2 = vcombine.low %v1818_v54, %v1822_v31 }
 0x5ab   : > { %15619 = vmatprep.subr.bf16.mxu1 %v17417_v40  ;;  %v1950_v16 = vld [vmem:[%s19910_s15 + $0x430] sm:$0xff] }
 0x5ac   : > { %15579 = vmatpush1.bf16.msra.mxu0 %v17288_v51  ;;  %v17393_v63 = vcombine.high %v1946_v3, %v1950_v16  ;;  %v1938_v14 = vld [vmem:[%s19910_s15 + $0x3d0] sm:$0xff]  ;;  %v17392_v10 = vcombine.low %v1946_v3, %v1950_v16 }
 0x5ad   : > { %15580 = vmatprep.subr.bf16.mxu0 %v17281_v58  ;;  %v1942_v40 = vld [vmem:[%s19910_s15 + $0x3f0] sm:$0xff] }
 0x5ae   : > { %15620 = vmatpush1.bf16.msra.mxu1 %v17416_v44  ;;  %v2066_v60 = vld [vmem:[%s19910_s15 + $0x7d0] sm:$0xff]  ;;  %v17385_v51 = vcombine.high %v1938_v14, %v1942_v40  ;;  %v17384_v59 = vcombine.low %v1938_v14, %v1942_v40 }
 0x5af   : > { %15621 = vmatprep.subr.bf16.mxu1 %v17409_v57  ;;  %v2070_v1 = vld [vmem:[%s19910_s15 + $0x7f0] sm:$0xff] }
 0x5b0   : > { %15581 = vmatpush1.bf16.msra.mxu0 %v17280_v13  ;;  %v17513_v44 = vcombine.high %v2066_v60, %v2070_v1  ;;  %v1930_v58 = vld [vmem:[%s19910_s15 + $0x390] sm:$0xff]  ;;  %v17512_v17 = vcombine.low %v2066_v60, %v2070_v1 }
 0x5b1   : > { %15582 = vmatprep.subr.bf16.mxu0 %v17273_v41  ;;  %v1934_v57 = vld [vmem:[%s19910_s15 + $0x3b0] sm:$0xff] }
 0x5b2   : > { %15622 = vmatpush1.bf16.msra.mxu1 %v17408_v15  ;;  %v2058_v33 = vld [vmem:[%s19910_s15 + $0x790] sm:$0xff]  ;;  %v17377_v13 = vcombine.high %v1930_v58, %v1934_v57  ;;  %v17376_v3 = vcombine.low %v1930_v58, %v1934_v57 }
 0x5b3   : > { %15623 = vmatprep.subr.bf16.mxu1 %v17401_v43  ;;  %v2062_v29 = vld [vmem:[%s19910_s15 + $0x7b0] sm:$0xff] }
 0x5b4   : > { %15583 = vmatpush1.bf16.msra.mxu0 %v17272_v47  ;;  %v17505_v15 = vcombine.high %v2058_v33, %v2062_v29  ;;  %v1922_v41 = vld [vmem:[%s19910_s15 + $0x350] sm:$0xff]  ;;  %v17504_v16 = vcombine.low %v2058_v33, %v2062_v29 }
 0x5b5   : > { %15584 = vmatprep.subr.bf16.mxu0 %v17265_v49  ;;  %v1926_v43 = vld [vmem:[%s19910_s15 + $0x370] sm:$0xff] }
 0x5b6   : > { %15624 = vmatpush1.bf16.msra.mxu1 %v17400_v6  ;;  %v2050_v54 = vld [vmem:[%s19910_s15 + $0x750] sm:$0xff]  ;;  %v17369_v47 = vcombine.high %v1922_v41, %v1926_v43  ;;  %v17368_v60 = vcombine.low %v1922_v41, %v1926_v43 }
 0x5b7   : > { %15625 = vmatprep.subr.bf16.mxu1 %v17393_v63  ;;  %v2054_v31 = vld [vmem:[%s19910_s15 + $0x770] sm:$0xff] }
 0x5b8   : > { %15585 = vmatpush1.bf16.msra.mxu0 %v17264_v2  ;;  %v17497_v6 = vcombine.high %v2050_v54, %v2054_v31  ;;  %v1914_v49 = vld [vmem:[%s19910_s15 + $0x310] sm:$0xff]  ;;  %v17496_v1 = vcombine.low %v2050_v54, %v2054_v31 }
 0x5b9   : > { %15586 = vmatprep.subr.bf16.mxu0 %v17385_v51  ;;  %v1918_v63 = vld [vmem:[%s19910_s15 + $0x330] sm:$0xff] }
 0x5ba   : > { %15626 = vmatpush1.bf16.msra.mxu1 %v17392_v10  ;;  %v2042_v14 = vld [vmem:[%s19910_s15 + $0x710] sm:$0xff]  ;;  %v17361_v2 = vcombine.high %v1914_v49, %v1918_v63  ;;  %v17360_v33 = vcombine.low %v1914_v49, %v1918_v63 }
 0x5bb   : > { %15627 = vmatprep.subr.bf16.mxu1 %v17513_v44  ;;  %v2046_v40 = vld [vmem:[%s19910_s15 + $0x730] sm:$0xff] }
 0x5bc   : > { %15587 = vmatpush2.bf16.msra.mxu0 %v17384_v59  ;;  %v17489_v10 = vcombine.high %v2042_v14, %v2046_v40  ;;  %v1906_v51 = vld [vmem:[%s19910_s15 + $0x2d0] sm:$0xff]  ;;  %v17488_v29 = vcombine.low %v2042_v14, %v2046_v40 }
 0x5bd   : > { %15588 = vmatprep.subr.bf16.mxu0 %v17377_v13  ;;  %v1910_v44 = vld [vmem:[%s19910_s15 + $0x2f0] sm:$0xff] }
 0x5be   : > { %15628 = vmatpush2.bf16.msra.mxu1 %v17512_v17  ;;  %v2034_v58 = vld [vmem:[%s19910_s15 + $0x6d0] sm:$0xff]  ;;  %v17353_v59 = vcombine.high %v1906_v51, %v1910_v44  ;;  %v17352_v54 = vcombine.low %v1906_v51, %v1910_v44 }
 0x5bf   : > { %15629 = vmatprep.subr.bf16.mxu1 %v17505_v15  ;;  %v2038_v57 = vld [vmem:[%s19910_s15 + $0x6f0] sm:$0xff] }
 0x5c0   : > { %15589 = vmatpush2.bf16.msra.mxu0 %v17376_v3  ;;  %v17481_v17 = vcombine.high %v2034_v58, %v2038_v57  ;;  %v1898_v13 = vld [vmem:[%s19910_s15 + $0x290] sm:$0xff]  ;;  %v17480_v31 = vcombine.low %v2034_v58, %v2038_v57 }
 0x5c1   : > { %15590 = vmatprep.subr.bf16.mxu0 %v17369_v47  ;;  %v1902_v15 = vld [vmem:[%s19910_s15 + $0x2b0] sm:$0xff] }
 0x5c2   : > { %15630 = vmatpush2.bf16.msra.mxu1 %v17504_v16  ;;  %v2026_v41 = vld [vmem:[%s19910_s15 + $0x690] sm:$0xff]  ;;  %v17345_v3 = vcombine.high %v1898_v13, %v1902_v15  ;;  %v17344_v14 = vcombine.low %v1898_v13, %v1902_v15 }
 0x5c3   : > { %15631 = vmatprep.subr.bf16.mxu1 %v17497_v6  ;;  %v2030_v43 = vld [vmem:[%s19910_s15 + $0x6b0] sm:$0xff] }
 0x5c4   : > { %15591 = vmatpush2.bf16.msra.mxu0 %v17368_v60  ;;  %v17473_v16 = vcombine.high %v2026_v41, %v2030_v43  ;;  %v1890_v47 = vld [vmem:[%s19910_s15 + $0x250] sm:$0xff]  ;;  %v17472_v40 = vcombine.low %v2026_v41, %v2030_v43 }
 0x5c5   : > { %15592 = vmatprep.subr.bf16.mxu0 %v17361_v2  ;;  %v1894_v6 = vld [vmem:[%s19910_s15 + $0x270] sm:$0xff] }
 0x5c6   : > { %15632 = vmatpush2.bf16.msra.mxu1 %v17496_v1  ;;  %v2018_v49 = vld [vmem:[%s19910_s15 + $0x650] sm:$0xff]  ;;  %v17337_v60 = vcombine.high %v1890_v47, %v1894_v6  ;;  %v17336_v58 = vcombine.low %v1890_v47, %v1894_v6 }
 0x5c7   : > { %15633 = vmatprep.subr.bf16.mxu1 %v17489_v10  ;;  %v2022_v63 = vld [vmem:[%s19910_s15 + $0x670] sm:$0xff] }
 0x5c8   : > { %15593 = vmatpush2.bf16.msra.mxu0 %v17360_v33  ;;  %v17465_v1 = vcombine.high %v2018_v49, %v2022_v63  ;;  %v1882_v2 = vld [vmem:[%s19910_s15 + $0x210] sm:$0xff]  ;;  %v17464_v57 = vcombine.low %v2018_v49, %v2022_v63 }
 0x5c9   : > { %15594 = vmatprep.subr.bf16.mxu0 %v17353_v59  ;;  %v1886_v10 = vld [vmem:[%s19910_s15 + $0x230] sm:$0xff] }
 0x5ca   : > { %15634 = vmatpush2.bf16.msra.mxu1 %v17488_v29  ;;  %v2010_v51 = vld [vmem:[%s19910_s15 + $0x610] sm:$0xff]  ;;  %v17329_v33 = vcombine.high %v1882_v2, %v1886_v10  ;;  %v17328_v41 = vcombine.low %v1882_v2, %v1886_v10 }
 0x5cb   : > { %15635 = vmatprep.subr.bf16.mxu1 %v17481_v17  ;;  %v2014_v44 = vld [vmem:[%s19910_s15 + $0x630] sm:$0xff] }
 0x5cc   : > { %15595 = vmatpush2.bf16.msra.mxu0 %v17352_v54  ;;  %v17457_v29 = vcombine.high %v2010_v51, %v2014_v44  ;;  %v2130_v59 = vld [vmem:[%s19910_s15 + $0x9d0] sm:$0xff]  ;;  %v17456_v43 = vcombine.low %v2010_v51, %v2014_v44 }
 0x5cd   : > { %15596 = vmatprep.subr.bf16.mxu0 %v17345_v3  ;;  %v2134_v17 = vld [vmem:[%s19910_s15 + $0x9f0] sm:$0xff] }
 0x5ce   : > { %15636 = vmatpush2.bf16.msra.mxu1 %v17480_v31  ;;  %v2258_v13 = vld [vmem:[%s19910_s15 + $0xdd0] sm:$0xff]  ;;  %v17577_v54 = vcombine.high %v2130_v59, %v2134_v17  ;;  %v17576_v49 = vcombine.low %v2130_v59, %v2134_v17 }
 0x5cf   : > { %15637 = vmatprep.subr.bf16.mxu1 %v17473_v16  ;;  %v2262_v15 = vld [vmem:[%s19910_s15 + $0xdf0] sm:$0xff] }
 0x5d0   : > { %15597 = vmatpush2.bf16.msra.mxu0 %v17344_v14  ;;  %v17705_v31 = vcombine.high %v2258_v13, %v2262_v15  ;;  %v2122_v3 = vld [vmem:[%s19910_s15 + $0x990] sm:$0xff]  ;;  %v17704_v63 = vcombine.low %v2258_v13, %v2262_v15 }
 0x5d1   : > { %15598 = vmatprep.subr.bf16.mxu0 %v17337_v60  ;;  %v2126_v16 = vld [vmem:[%s19910_s15 + $0x9b0] sm:$0xff] }
 0x5d2   : > { %15638 = vmatpush2.bf16.msra.mxu1 %v17472_v40  ;;  %v2250_v47 = vld [vmem:[%s19910_s15 + $0xd90] sm:$0xff]  ;;  %v17569_v14 = vcombine.high %v2122_v3, %v2126_v16 }
 0x5d3   : > { %15639 = vmatprep.subr.bf16.mxu1 %v17465_v1  ;;  %v2254_v6 = vld [vmem:[%s19910_s15 + $0xdb0] sm:$0xff] }
 0x5d4   : > { %15599 = vmatpush2.bf16.msra.mxu0 %v17336_v58  ;;  %v17697_v40 = vcombine.high %v2250_v47, %v2254_v6  ;;  %v2114_v60 = vld [vmem:[%s19910_s15 + $0x950] sm:$0xff] }
 0x5d5   : > { %15600 = vmatprep.subr.bf16.mxu0 %v17329_v33  ;;  %v2118_v1 = vld [vmem:[%s19910_s15 + $0x970] sm:$0xff] }
 0x5d6   : > { %15640 = vmatpush2.bf16.msra.mxu1 %v17464_v57  ;;  %v2242_v10 = vld [vmem:[%s19910_s15 + $0xd50] sm:$0xff]  ;;  %v17568_v57 = vcombine.low %v2122_v3, %v2126_v16  ;;  %v17561_v59 = vcombine.high %v2114_v60, %v2118_v1 }
 0x5d7   : > { %15641 = vmatprep.subr.bf16.mxu1 %v17457_v29  ;;  %v2246_v51 = vld [vmem:[%s19910_s15 + $0xd70] sm:$0xff]  ;;  %v17696_v29 = vcombine.low %v2250_v47, %v2254_v6 }
 0x5d8   : > { %15601 = vmatpush2.bf16.msra.mxu0 %v17328_v41  ;;  %v2106_v41 = vld [vmem:[%s19910_s15 + $0x910] sm:$0xff] }
 0x5d9   : > { %15652 = vmatprep.subr.bf16.mxu0 %v17577_v54  ;;  %v2238_v3 = vld [vmem:[%s19910_s15 + $0xd30] sm:$0xff] }
 0x5da   : > { %15642 = vmatpush2.bf16.msra.mxu1 %v17456_v43  ;;  %v2110_v43 = vld [vmem:[%s19910_s15 + $0x930] sm:$0xff] }
 0x5db   : > { %15693 = vmatprep.subr.bf16.mxu1 %v17705_v31  ;;  %v15358_v2 = vpop.f32.mrf.mxu0  ;;  %15603 = vmatmul.mubr.bf16.vlgmr.msra.gmra.mxu0 %v20115_v35  ;;  %v2234_v31 = vld [vmem:[%s19910_s15 + $0xd10] sm:$0xff] }
 0x5dc   : > { %v15359_v44 = vadd.f32 %v15358_v2, %v21377_v38  ;;  %15653 = vmatpush1.bf16.msra.mxu0 %v17576_v49  ;;  %v17689_v38 = vcombine.high %v2242_v10, %v2246_v51  ;;  %15684 = vmatprep.mubr.bf16.mxu0 %v20131_v46  ;;  %v17688_v49 = vcombine.low %v2242_v10, %v2246_v51  ;;  %v2098_v2 = vld [vmem:[%s19910_s15 + $0x8d0] sm:$0xff] }
 0x5dd   : > { %v15399_v58 = vpop.f32.mrf.mxu1  ;;  %15644 = vmatmul.mubr.bf16.vlgmr.msra.gmra.mxu1 %v20123_v39  ;;  %v15360_v33 = vpop.f32.mrf.mxu0  ;;  %15654 = vmatprep.subr.bf16.mxu0 %v17569_v14  ;;  %v2090_v51 = vld [vmem:[%s19910_s15 + $0x890] sm:$0xff] }
 0x5de   : > { %15694 = vmatpush1.bf16.msra.mxu1 %v17704_v63  ;;  %v21451_v17 = vadd.f32 %v15399_v58, %v15359_v44  ;;  %v15361_v13 = vadd.f32 %v15360_v33, %v21386_v24  ;;  %15725 = vmatprep.mubr.bf16.mxu1 %v20138_v7  ;;  %v17560_v24 = vcombine.low %v2114_v60, %v2118_v1  ;;  %v2102_v44 = vld [vmem:[%s19910_s15 + $0x8f0] sm:$0xff] }
 0x5df   : > { %v15401_v15 = vpop.f32.mrf.mxu1  ;;  %15695 = vmatprep.subr.bf16.mxu1 %v17697_v40  ;;  %v15362_v54 = vpop.f32.mrf.mxu0  ;;  %v17553_v63 = vcombine.high %v2106_v41, %v2110_v43  ;;  %v17681_v40 = vcombine.high %v2234_v31, %v2238_v3  ;;  %v2226_v58 = vld [vmem:[%s19910_s15 + $0xcd0] sm:$0xff]  ;;  %v17680_v60 = vcombine.low %v2234_v31, %v2238_v3  ;;  %v17545_v1 = vcombine.high %v2098_v2, %v2102_v44 }
 0x5e0   : > { %v21460_v16 = vadd.f32 %v15401_v15, %v15361_v13  ;;  %15655 = vmatpush1.bf16.msra.mxu0 %v17568_v57  ;;  %v2230_v33 = vld [vmem:[%s19910_s15 + $0xcf0] sm:$0xff]  ;;  %v17552_v13 = vcombine.low %v2106_v41, %v2110_v43  ;;  %v17544_v15 = vcombine.low %v2098_v2, %v2102_v44 }
 0x5e1   : > { %v15403_v47 = vpop.f32.mrf.mxu1  ;;  %v15363_v6 = vpop.f32.mrf.mxu0  ;;  %15656 = vmatprep.subr.bf16.mxu0 %v17561_v59  ;;  %v17673_v10 = vcombine.high %v2226_v58, %v2230_v33  ;;  %v2094_v57 = vld [vmem:[%s19910_s15 + $0x8b0] sm:$0xff] }
 0x5e2   : > { %15696 = vmatpush1.bf16.msra.mxu1 %v17696_v29  ;;  %v2218_v29 = vld [vmem:[%s19910_s15 + $0xc90] sm:$0xff]  ;;  %v17537_v41 = vcombine.high %v2090_v51, %v2094_v57 }
 0x5e3   : > { %v15404_v14 = vpop.f32.mrf.mxu1  ;;  %15697 = vmatprep.subr.bf16.mxu1 %v17689_v38  ;;  %v2222_v59 = vld [vmem:[%s19910_s15 + $0xcb0] sm:$0xff]  ;;  %v17672_v38 = vcombine.low %v2226_v58, %v2230_v33 }
 0x5e4   : > { %15657 = vmatpush1.bf16.msra.mxu0 %v17560_v24  ;;  %v17665_v43 = vcombine.high %v2218_v29, %v2222_v59  ;;  %v2082_v54 = vld [vmem:[%s19910_s15 + $0x850] sm:$0xff]  ;;  %v17536_v24 = vcombine.low %v2090_v51, %v2094_v57  ;;  %v17664_v6 = vcombine.low %v2218_v29, %v2222_v59 }
 0x5e5   : > { %15658 = vmatprep.subr.bf16.mxu0 %v17553_v63  ;;  %v2086_v31 = vld [vmem:[%s19910_s15 + $0x870] sm:$0xff] }
 0x5e6   : > { %15698 = vmatpush1.bf16.msra.mxu1 %v17688_v49  ;;  %v2210_v3 = vld [vmem:[%s19910_s15 + $0xc50] sm:$0xff]  ;;  %v17529_v49 = vcombine.high %v2082_v54, %v2086_v31  ;;  %v17528_v58 = vcombine.low %v2082_v54, %v2086_v31 }
 0x5e7   : > { %15699 = vmatprep.subr.bf16.mxu1 %v17681_v40  ;;  %v2214_v47 = vld [vmem:[%s19910_s15 + $0xc70] sm:$0xff] }
 0x5e8   : > { %15659 = vmatpush1.bf16.msra.mxu0 %v17552_v13  ;;  %v17657_v63 = vcombine.high %v2210_v3, %v2214_v47  ;;  %v2074_v14 = vld [vmem:[%s19910_s15 + $0x810] sm:$0xff]  ;;  %v17656_v33 = vcombine.low %v2210_v3, %v2214_v47 }
 0x5e9   : > { %15660 = vmatprep.subr.bf16.mxu0 %v17545_v1  ;;  %v2078_v40 = vld [vmem:[%s19910_s15 + $0x830] sm:$0xff] }
 0x5ea   : > { %15700 = vmatpush1.bf16.msra.mxu1 %v17680_v60  ;;  %v2202_v2 = vld [vmem:[%s19910_s15 + $0xc10] sm:$0xff]  ;;  %v17521_v13 = vcombine.high %v2074_v14, %v2078_v40  ;;  %v17520_v29 = vcombine.low %v2074_v14, %v2078_v40 }
 0x5eb   : > { %15701 = vmatprep.subr.bf16.mxu1 %v17673_v10  ;;  %v2206_v44 = vld [vmem:[%s19910_s15 + $0xc30] sm:$0xff] }
 0x5ec   : > { %15661 = vmatpush1.bf16.msra.mxu0 %v17544_v15  ;;  %v17649_v60 = vcombine.high %v2202_v2, %v2206_v44  ;;  %v2194_v1 = vld [vmem:[%s19910_s15 + $0xbd0] sm:$0xff]  ;;  %v17648_v59 = vcombine.low %v2202_v2, %v2206_v44 }
 0x5ed   : > { %15662 = vmatprep.subr.bf16.mxu0 %v17537_v41  ;;  %v2198_v10 = vld [vmem:[%s19910_s15 + $0xbf0] sm:$0xff] }
 0x5ee   : > { %15702 = vmatpush1.bf16.msra.mxu1 %v17672_v38  ;;  %v2322_v51 = vld [vmem:[%s19910_s15 + $0xfd0] sm:$0xff]  ;;  %v17641_v15 = vcombine.high %v2194_v1, %v2198_v10  ;;  %v17640_v3 = vcombine.low %v2194_v1, %v2198_v10 }
 0x5ef   : > { %15703 = vmatprep.subr.bf16.mxu1 %v17665_v43  ;;  %v2326_v57 = vld [vmem:[%s19910_s15 + $0xff0] sm:$0xff] }
 0x5f0   : > { %15663 = vmatpush1.bf16.msra.mxu0 %v17536_v24  ;;  %v17769_v38 = vcombine.high %v2322_v51, %v2326_v57  ;;  %v2186_v41 = vld [vmem:[%s19910_s15 + $0xb90] sm:$0xff]  ;;  %v17768_v47 = vcombine.low %v2322_v51, %v2326_v57 }
 0x5f1   : > { %15664 = vmatprep.subr.bf16.mxu0 %v17529_v49  ;;  %v2190_v43 = vld [vmem:[%s19910_s15 + $0xbb0] sm:$0xff] }
 0x5f2   : > { %15704 = vmatpush1.bf16.msra.mxu1 %v17664_v6  ;;  %v2314_v54 = vld [vmem:[%s19910_s15 + $0xf90] sm:$0xff]  ;;  %v17633_v24 = vcombine.high %v2186_v41, %v2190_v43  ;;  %v17632_v2 = vcombine.low %v2186_v41, %v2190_v43 }
 0x5f3   : > { %15705 = vmatprep.subr.bf16.mxu1 %v17657_v63  ;;  %v2318_v31 = vld [vmem:[%s19910_s15 + $0xfb0] sm:$0xff] }
 0x5f4   : > { %15665 = vmatpush1.bf16.msra.mxu0 %v17528_v58  ;;  %v17761_v6 = vcombine.high %v2314_v54, %v2318_v31  ;;  %v2178_v49 = vld [vmem:[%s19910_s15 + $0xb50] sm:$0xff]  ;;  %v17760_v44 = vcombine.low %v2314_v54, %v2318_v31 }
 0x5f5   : > { %15666 = vmatprep.subr.bf16.mxu0 %v17521_v13  ;;  %v2182_v63 = vld [vmem:[%s19910_s15 + $0xb70] sm:$0xff] }
 0x5f6   : > { %15706 = vmatpush1.bf16.msra.mxu1 %v17656_v33  ;;  %v2306_v14 = vld [vmem:[%s19910_s15 + $0xf50] sm:$0xff]  ;;  %v17625_v58 = vcombine.high %v2178_v49, %v2182_v63  ;;  %v17624_v51 = vcombine.low %v2178_v49, %v2182_v63 }
 0x5f7   : > { %15707 = vmatprep.subr.bf16.mxu1 %v17649_v60  ;;  %v2310_v40 = vld [vmem:[%s19910_s15 + $0xf70] sm:$0xff] }
 0x5f8   : > { %15667 = vmatpush1.bf16.msra.mxu0 %v17520_v29  ;;  %v17753_v33 = vcombine.high %v2306_v14, %v2310_v40  ;;  %v2170_v13 = vld [vmem:[%s19910_s15 + $0xb10] sm:$0xff]  ;;  %v17752_v57 = vcombine.low %v2306_v14, %v2310_v40 }
 0x5f9   : > { %15668 = vmatprep.subr.bf16.mxu0 %v17641_v15  ;;  %v2174_v60 = vld [vmem:[%s19910_s15 + $0xb30] sm:$0xff] }
 0x5fa   : > { %15708 = vmatpush1.bf16.msra.mxu1 %v17648_v59  ;;  %v2298_v1 = vld [vmem:[%s19910_s15 + $0xf10] sm:$0xff]  ;;  %v17617_v29 = vcombine.high %v2170_v13, %v2174_v60  ;;  %v17616_v54 = vcombine.low %v2170_v13, %v2174_v60 }
 0x5fb   : > { %15709 = vmatprep.subr.bf16.mxu1 %v17769_v38  ;;  %v2302_v10 = vld [vmem:[%s19910_s15 + $0xf30] sm:$0xff] }
 0x5fc   : > { %15669 = vmatpush2.bf16.msra.mxu0 %v17640_v3  ;;  %v17745_v59 = vcombine.high %v2298_v1, %v2302_v10  ;;  %v2162_v15 = vld [vmem:[%s19910_s15 + $0xad0] sm:$0xff]  ;;  %v17744_v31 = vcombine.low %v2298_v1, %v2302_v10 }
 0x5fd   : > { %15670 = vmatprep.subr.bf16.mxu0 %v17633_v24  ;;  %v2166_v38 = vld [vmem:[%s19910_s15 + $0xaf0] sm:$0xff] }
 0x5fe   : > { %15710 = vmatpush2.bf16.msra.mxu1 %v17768_v47  ;;  %v2290_v41 = vld [vmem:[%s19910_s15 + $0xed0] sm:$0xff]  ;;  %v17609_v3 = vcombine.high %v2162_v15, %v2166_v38  ;;  %v17608_v14 = vcombine.low %v2162_v15, %v2166_v38 }
 0x5ff   : > { %15711 = vmatprep.subr.bf16.mxu1 %v17761_v6  ;;  %v2294_v43 = vld [vmem:[%s19910_s15 + $0xef0] sm:$0xff] }
 0x600   : > { %15671 = vmatpush2.bf16.msra.mxu0 %v17632_v2  ;;  %v17737_v47 = vcombine.high %v2290_v41, %v2294_v43  ;;  %v2154_v24 = vld [vmem:[%s19910_s15 + $0xa90] sm:$0xff]  ;;  %v17736_v40 = vcombine.low %v2290_v41, %v2294_v43 }
 0x601   : > { %15672 = vmatprep.subr.bf16.mxu0 %v17625_v58  ;;  %v2158_v6 = vld [vmem:[%s19910_s15 + $0xab0] sm:$0xff] }
 0x602   : > { %15712 = vmatpush2.bf16.msra.mxu1 %v17760_v44  ;;  %v2282_v49 = vld [vmem:[%s19910_s15 + $0xe90] sm:$0xff]  ;;  %v17601_v2 = vcombine.high %v2154_v24, %v2158_v6  ;;  %v17600_v1 = vcombine.low %v2154_v24, %v2158_v6 }
 0x603   : > { %15713 = vmatprep.subr.bf16.mxu1 %v17753_v33  ;;  %v2286_v63 = vld [vmem:[%s19910_s15 + $0xeb0] sm:$0xff] }
 0x604   : > { %15673 = vmatpush2.bf16.msra.mxu0 %v17624_v51  ;;  %v17729_v44 = vcombine.high %v2282_v49, %v2286_v63  ;;  %v2146_v58 = vld [vmem:[%s19910_s15 + $0xa50] sm:$0xff]  ;;  %v17728_v10 = vcombine.low %v2282_v49, %v2286_v63 }
 0x605   : > { %15674 = vmatprep.subr.bf16.mxu0 %v17617_v29  ;;  %v2150_v33 = vld [vmem:[%s19910_s15 + $0xa70] sm:$0xff] }
 0x606   : > { %15714 = vmatpush2.bf16.msra.mxu1 %v17752_v57  ;;  %v2274_v13 = vld [vmem:[%s19910_s15 + $0xe50] sm:$0xff]  ;;  %v17593_v51 = vcombine.high %v2146_v58, %v2150_v33  ;;  %v17592_v41 = vcombine.low %v2146_v58, %v2150_v33 }
 0x607   : > { %15715 = vmatprep.subr.bf16.mxu1 %v17745_v59  ;;  %v2278_v60 = vld [vmem:[%s19910_s15 + $0xe70] sm:$0xff] }
 0x608   : > { %15675 = vmatpush2.bf16.msra.mxu0 %v17616_v54  ;;  %v17721_v57 = vcombine.high %v2274_v13, %v2278_v60  ;;  %v2138_v29 = vld [vmem:[%s19910_s15 + $0xa10] sm:$0xff]  ;;  %v17720_v43 = vcombine.low %v2274_v13, %v2278_v60 }
 0x609   : > { %15676 = vmatprep.subr.bf16.mxu0 %v17609_v3  ;;  %v2142_v59 = vld [vmem:[%s19910_s15 + $0xa30] sm:$0xff] }
 0x60a   : > { %15716 = vmatpush2.bf16.msra.mxu1 %v17744_v31  ;;  %v2266_v15 = vld [vmem:[%s19910_s15 + $0xe10] sm:$0xff]  ;;  %v17585_v54 = vcombine.high %v2138_v29, %v2142_v59  ;;  %v17584_v49 = vcombine.low %v2138_v29, %v2142_v59 }
 0x60b   : > { %15717 = vmatprep.subr.bf16.mxu1 %v17737_v47  ;;  %v2270_v38 = vld [vmem:[%s19910_s15 + $0xe30] sm:$0xff] }
 0x60c   : > { %15677 = vmatpush2.bf16.msra.mxu0 %v17608_v14  ;;  %v17713_v31 = vcombine.high %v2266_v15, %v2270_v38  ;;  %v2386_v3 = vld [vmem:[%s19910_s15 + $0x11d0] sm:$0xff]  ;;  %v17712_v63 = vcombine.low %v2266_v15, %v2270_v38 }
 0x60d   : > { %15678 = vmatprep.subr.bf16.mxu0 %v17601_v2  ;;  %v2390_v47 = vld [vmem:[%s19910_s15 + $0x11f0] sm:$0xff] }
 0x60e   : > { %15718 = vmatpush2.bf16.msra.mxu1 %v17736_v40  ;;  %v2514_v24 = vld [vmem:[%s19910_s15 + $0x15d0] sm:$0xff]  ;;  %v17833_v14 = vcombine.high %v2386_v3, %v2390_v47  ;;  %v17832_v13 = vcombine.low %v2386_v3, %v2390_v47 }
 0x60f   : > { %15719 = vmatprep.subr.bf16.mxu1 %v17729_v44  ;;  %v2518_v6 = vld [vmem:[%s19910_s15 + $0x15f0] sm:$0xff] }
 0x610   : > { %15679 = vmatpush2.bf16.msra.mxu0 %v17600_v1  ;;  %v17961_v40 = vcombine.high %v2514_v24, %v2518_v6  ;;  %v2378_v2 = vld [vmem:[%s19910_s15 + $0x1190] sm:$0xff]  ;;  %v17960_v60 = vcombine.low %v2514_v24, %v2518_v6 }
 0x611   : > { %15680 = vmatprep.subr.bf16.mxu0 %v17593_v51  ;;  %v2382_v44 = vld [vmem:[%s19910_s15 + $0x11b0] sm:$0xff] }
 0x612   : > { %15720 = vmatpush2.bf16.msra.mxu1 %v17728_v10  ;;  %v2506_v58 = vld [vmem:[%s19910_s15 + $0x1590] sm:$0xff]  ;;  %v17825_v1 = vcombine.high %v2378_v2, %v2382_v44 }
 0x613   : > { %15721 = vmatprep.subr.bf16.mxu1 %v17721_v57  ;;  %v2510_v33 = vld [vmem:[%s19910_s15 + $0x15b0] sm:$0xff] }
 0x614   : > { %15681 = vmatpush2.bf16.msra.mxu0 %v17592_v41  ;;  %v17953_v10 = vcombine.high %v2506_v58, %v2510_v33  ;;  %v2370_v51 = vld [vmem:[%s19910_s15 + $0x1150] sm:$0xff] }
 0x615   : > { %15682 = vmatprep.subr.bf16.mxu0 %v17585_v54  ;;  %v2374_v57 = vld [vmem:[%s19910_s15 + $0x1170] sm:$0xff] }
 0x616   : > { %15722 = vmatpush2.bf16.msra.mxu1 %v17720_v43  ;;  %v2498_v59 = vld [vmem:[%s19910_s15 + $0x1550] sm:$0xff]  ;;  %v17824_v43 = vcombine.low %v2378_v2, %v2382_v44  ;;  %v17817_v3 = vcombine.high %v2370_v51, %v2374_v57 }
 0x617   : > { %15723 = vmatprep.subr.bf16.mxu1 %v17713_v31  ;;  %v2502_v15 = vld [vmem:[%s19910_s15 + $0x1570] sm:$0xff]  ;;  %v17952_v31 = vcombine.low %v2506_v58, %v2510_v33 }
 0x618   : > { %15683 = vmatpush2.bf16.msra.mxu0 %v17584_v49  ;;  %v2362_v49 = vld [vmem:[%s19910_s15 + $0x1110] sm:$0xff] }
 0x619   : > { %15734 = vmatprep.subr.bf16.mxu0 %v17833_v14  ;;  %v2494_v2 = vld [vmem:[%s19910_s15 + $0x1530] sm:$0xff] }
 0x61a   : > { %15724 = vmatpush2.bf16.msra.mxu1 %v17712_v63  ;;  %v2366_v63 = vld [vmem:[%s19910_s15 + $0x1130] sm:$0xff] }
 0x61b   : > { %15775 = vmatprep.subr.bf16.mxu1 %v17961_v40  ;;  %v15440_v29 = vpop.f32.mrf.mxu0  ;;  %15685 = vmatmul.mubr.bf16.vlgmr.msra.gmra.mxu0 %v20203_v53  ;;  %v2490_v40 = vld [vmem:[%s19910_s15 + $0x1510] sm:$0xff] }
 0x61c   : > { %v15441_v38 = vadd.f32 %v15440_v29, %v21451_v17  ;;  %15735 = vmatpush1.bf16.msra.mxu0 %v17832_v13  ;;  %v17945_v17 = vcombine.high %v2498_v59, %v2502_v15  ;;  %15766 = vmatprep.mubr.bf16.mxu0 %v20219_v62  ;;  %v17944_v13 = vcombine.low %v2498_v59, %v2502_v15  ;;  %v2354_v29 = vld [vmem:[%s19910_s15 + $0x10d0] sm:$0xff] }
 0x61d   : > { %v15481_v41 = vpop.f32.mrf.mxu1  ;;  %15726 = vmatmul.mubr.bf16.vlgmr.msra.gmra.mxu1 %v20211_v8  ;;  %v15442_v54 = vpop.f32.mrf.mxu0  ;;  %15736 = vmatprep.subr.bf16.mxu0 %v17825_v1  ;;  %v2346_v15 = vld [vmem:[%s19910_s15 + $0x1090] sm:$0xff] }
 0x61e   : > { %15776 = vmatpush1.bf16.msra.mxu1 %v17960_v60  ;;  %v21525_v47 = vadd.f32 %v15481_v41, %v15441_v38  ;;  %v15443_v24 = vadd.f32 %v15442_v54, %v21460_v16  ;;  %15807 = vmatprep.mubr.bf16.mxu1 %v20226_v0  ;;  %v17816_v16 = vcombine.low %v2370_v51, %v2374_v57  ;;  %v2358_v38 = vld [vmem:[%s19910_s15 + $0x10f0] sm:$0xff] }
 0x61f   : > { %v15483_v6 = vpop.f32.mrf.mxu1  ;;  %15777 = vmatprep.subr.bf16.mxu1 %v17953_v10  ;;  %v15444_v14 = vpop.f32.mrf.mxu0  ;;  %v17809_v60 = vcombine.high %v2362_v49, %v2366_v63  ;;  %v17937_v10 = vcombine.high %v2490_v40, %v2494_v2  ;;  %v2482_v41 = vld [vmem:[%s19910_s15 + $0x14d0] sm:$0xff]  ;;  %v17936_v51 = vcombine.low %v2490_v40, %v2494_v2  ;;  %v17801_v57 = vcombine.high %v2354_v29, %v2358_v38 }
 0x620   : > { %v21534_v44 = vadd.f32 %v15483_v6, %v15443_v24  ;;  %15737 = vmatpush1.bf16.msra.mxu0 %v17824_v43  ;;  %v2486_v54 = vld [vmem:[%s19910_s15 + $0x14f0] sm:$0xff]  ;;  %v17808_v24 = vcombine.low %v2362_v49, %v2366_v63  ;;  %v17800_v6 = vcombine.low %v2354_v29, %v2358_v38 }
 0x621   : > { %v15485_v58 = vpop.f32.mrf.mxu1  ;;  %v15445_v33 = vpop.f32.mrf.mxu0  ;;  %15738 = vmatprep.subr.bf16.mxu0 %v17817_v3  ;;  %v17929_v59 = vcombine.high %v2482_v41, %v2486_v54  ;;  %v2350_v43 = vld [vmem:[%s19910_s15 + $0x10b0] sm:$0xff] }
 0x622   : > { %15778 = vmatpush1.bf16.msra.mxu1 %v17952_v31  ;;  %v2474_v31 = vld [vmem:[%s19910_s15 + $0x1490] sm:$0xff]  ;;  %v17793_v49 = vcombine.high %v2346_v15, %v2350_v43 }
 0x623   : > { %v15486_v1 = vpop.f32.mrf.mxu1  ;;  %15779 = vmatprep.subr.bf16.mxu1 %v17945_v17  ;;  %v2478_v3 = vld [vmem:[%s19910_s15 + $0x14b0] sm:$0xff]  ;;  %v17928_v17 = vcombine.low %v2482_v41, %v2486_v54 }
 0x624   : > { %15739 = vmatpush1.bf16.msra.mxu0 %v17816_v16  ;;  %v17921_v63 = vcombine.high %v2474_v31, %v2478_v3  ;;  %v2338_v14 = vld [vmem:[%s19910_s15 + $0x1050] sm:$0xff]  ;;  %v17792_v16 = vcombine.low %v2346_v15, %v2350_v43  ;;  %v17920_v33 = vcombine.low %v2474_v31, %v2478_v3 }
 0x625   : > { %15740 = vmatprep.subr.bf16.mxu0 %v17809_v60  ;;  %v2342_v40 = vld [vmem:[%s19910_s15 + $0x1070] sm:$0xff] }
 0x626   : > { %15780 = vmatpush1.bf16.msra.mxu1 %v17944_v13  ;;  %v2466_v2 = vld [vmem:[%s19910_s15 + $0x1450] sm:$0xff]  ;;  %v17785_v13 = vcombine.high %v2338_v14, %v2342_v40  ;;  %v17784_v41 = vcombine.low %v2338_v14, %v2342_v40 }
 0x627   : > { %15781 = vmatprep.subr.bf16.mxu1 %v17937_v10  ;;  %v2470_v58 = vld [vmem:[%s19910_s15 + $0x1470] sm:$0xff] }
 0x628   : > { %15741 = vmatpush1.bf16.msra.mxu0 %v17808_v24  ;;  %v17913_v60 = vcombine.high %v2466_v2, %v2470_v58  ;;  %v2330_v1 = vld [vmem:[%s19910_s15 + $0x1010] sm:$0xff]  ;;  %v17912_v54 = vcombine.low %v2466_v2, %v2470_v58 }
 0x629   : > { %15742 = vmatprep.subr.bf16.mxu0 %v17801_v57  ;;  %v2334_v10 = vld [vmem:[%s19910_s15 + $0x1030] sm:$0xff] }
 0x62a   : > { %15782 = vmatpush1.bf16.msra.mxu1 %v17936_v51  ;;  %v2458_v29 = vld [vmem:[%s19910_s15 + $0x1410] sm:$0xff]  ;;  %v17777_v24 = vcombine.high %v2330_v1, %v2334_v10  ;;  %v17776_v31 = vcombine.low %v2330_v1, %v2334_v10 }
 0x62b   : > { %15783 = vmatprep.subr.bf16.mxu1 %v17929_v59  ;;  %v2462_v38 = vld [vmem:[%s19910_s15 + $0x1430] sm:$0xff] }
 0x62c   : > { %15743 = vmatpush1.bf16.msra.mxu0 %v17800_v6  ;;  %v17905_v51 = vcombine.high %v2458_v29, %v2462_v38  ;;  %v2450_v57 = vld [vmem:[%s19910_s15 + $0x13d0] sm:$0xff]  ;;  %v17904_v3 = vcombine.low %v2458_v29, %v2462_v38 }
 0x62d   : > { %15744 = vmatprep.subr.bf16.mxu0 %v17793_v49  ;;  %v2454_v59 = vld [vmem:[%s19910_s15 + $0x13f0] sm:$0xff] }
 0x62e   : > { %15784 = vmatpush1.bf16.msra.mxu1 %v17928_v17  ;;  %v2578_v15 = vld [vmem:[%s19910_s15 + $0x17d0] sm:$0xff]  ;;  %v17897_v6 = vcombine.high %v2450_v57, %v2454_v59  ;;  %v17896_v2 = vcombine.low %v2450_v57, %v2454_v59 }
 0x62f   : > { %15785 = vmatprep.subr.bf16.mxu1 %v17921_v63  ;;  %v2582_v43 = vld [vmem:[%s19910_s15 + $0x17f0] sm:$0xff] }
 0x630   : > { %15745 = vmatpush1.bf16.msra.mxu0 %v17792_v16  ;;  %v18025_v17 = vcombine.high %v2578_v15, %v2582_v43  ;;  %v2442_v49 = vld [vmem:[%s19910_s15 + $0x1390] sm:$0xff]  ;;  %v18024_v58 = vcombine.low %v2578_v15, %v2582_v43 }
 0x631   : > { %15746 = vmatprep.subr.bf16.mxu0 %v17785_v13  ;;  %v2446_v63 = vld [vmem:[%s19910_s15 + $0x13b0] sm:$0xff] }
 0x632   : > { %15786 = vmatpush1.bf16.msra.mxu1 %v17920_v33  ;;  %v2570_v14 = vld [vmem:[%s19910_s15 + $0x1790] sm:$0xff]  ;;  %v17889_v16 = vcombine.high %v2442_v49, %v2446_v63  ;;  %v17888_v29 = vcombine.low %v2442_v49, %v2446_v63 }
 0x633   : > { %15787 = vmatprep.subr.bf16.mxu1 %v17913_v60  ;;  %v2574_v40 = vld [vmem:[%s19910_s15 + $0x17b0] sm:$0xff] }
 0x634   : > { %15747 = vmatpush1.bf16.msra.mxu0 %v17784_v41  ;;  %v18017_v33 = vcombine.high %v2570_v14, %v2574_v40  ;;  %v2434_v13 = vld [vmem:[%s19910_s15 + $0x1350] sm:$0xff]  ;;  %v18016_v38 = vcombine.low %v2570_v14, %v2574_v40 }
 0x635   : > { %15748 = vmatprep.subr.bf16.mxu0 %v17777_v24  ;;  %v2438_v60 = vld [vmem:[%s19910_s15 + $0x1370] sm:$0xff] }
 0x636   : > { %15788 = vmatpush1.bf16.msra.mxu1 %v17912_v54  ;;  %v2562_v1 = vld [vmem:[%s19910_s15 + $0x1750] sm:$0xff]  ;;  %v17881_v41 = vcombine.high %v2434_v13, %v2438_v60  ;;  %v17880_v15 = vcombine.low %v2434_v13, %v2438_v60 }
 0x637   : > { %15789 = vmatprep.subr.bf16.mxu1 %v17905_v51  ;;  %v2566_v10 = vld [vmem:[%s19910_s15 + $0x1770] sm:$0xff] }
 0x638   : > { %15749 = vmatpush1.bf16.msra.mxu0 %v17776_v31  ;;  %v18009_v54 = vcombine.high %v2562_v1, %v2566_v10  ;;  %v2426_v24 = vld [vmem:[%s19910_s15 + $0x1310] sm:$0xff]  ;;  %v18008_v43 = vcombine.low %v2562_v1, %v2566_v10 }
 0x639   : > { %15750 = vmatprep.subr.bf16.mxu0 %v17897_v6  ;;  %v2430_v51 = vld [vmem:[%s19910_s15 + $0x1330] sm:$0xff] }
 0x63a   : > { %15790 = vmatpush1.bf16.msra.mxu1 %v17904_v3  ;;  %v2554_v57 = vld [vmem:[%s19910_s15 + $0x1710] sm:$0xff]  ;;  %v17873_v31 = vcombine.high %v2426_v24, %v2430_v51  ;;  %v17872_v14 = vcombine.low %v2426_v24, %v2430_v51 }
 0x63b   : > { %15791 = vmatprep.subr.bf16.mxu1 %v18025_v17  ;;  %v2558_v59 = vld [vmem:[%s19910_s15 + $0x1730] sm:$0xff] }
 0x63c   : > { %15751 = vmatpush2.bf16.msra.mxu0 %v17896_v2  ;;  %v18001_v3 = vcombine.high %v2554_v57, %v2558_v59  ;;  %v2418_v6 = vld [vmem:[%s19910_s15 + $0x12d0] sm:$0xff]  ;;  %v18000_v40 = vcombine.low %v2554_v57, %v2558_v59 }
 0x63d   : > { %15752 = vmatprep.subr.bf16.mxu0 %v17889_v16  ;;  %v2422_v17 = vld [vmem:[%s19910_s15 + $0x12f0] sm:$0xff] }
 0x63e   : > { %15792 = vmatpush2.bf16.msra.mxu1 %v18024_v58  ;;  %v2546_v49 = vld [vmem:[%s19910_s15 + $0x16d0] sm:$0xff]  ;;  %v17865_v2 = vcombine.high %v2418_v6, %v2422_v17  ;;  %v17864_v1 = vcombine.low %v2418_v6, %v2422_v17 }
 0x63f   : > { %15793 = vmatprep.subr.bf16.mxu1 %v18017_v33  ;;  %v2550_v63 = vld [vmem:[%s19910_s15 + $0x16f0] sm:$0xff] }
 0x640   : > { %15753 = vmatpush2.bf16.msra.mxu0 %v17888_v29  ;;  %v17993_v58 = vcombine.high %v2546_v49, %v2550_v63  ;;  %v2410_v16 = vld [vmem:[%s19910_s15 + $0x1290] sm:$0xff]  ;;  %v17992_v10 = vcombine.low %v2546_v49, %v2550_v63 }
 0x641   : > { %15754 = vmatprep.subr.bf16.mxu0 %v17881_v41  ;;  %v2414_v33 = vld [vmem:[%s19910_s15 + $0x12b0] sm:$0xff] }
 0x642   : > { %15794 = vmatpush2.bf16.msra.mxu1 %v18016_v38  ;;  %v2538_v13 = vld [vmem:[%s19910_s15 + $0x1690] sm:$0xff]  ;;  %v17857_v29 = vcombine.high %v2410_v16, %v2414_v33  ;;  %v17856_v57 = vcombine.low %v2410_v16, %v2414_v33 }
 0x643   : > { %15795 = vmatprep.subr.bf16.mxu1 %v18009_v54  ;;  %v2542_v60 = vld [vmem:[%s19910_s15 + $0x16b0] sm:$0xff] }
 0x644   : > { %15755 = vmatpush2.bf16.msra.mxu0 %v17880_v15  ;;  %v17985_v38 = vcombine.high %v2538_v13, %v2542_v60  ;;  %v2402_v41 = vld [vmem:[%s19910_s15 + $0x1250] sm:$0xff]  ;;  %v17984_v59 = vcombine.low %v2538_v13, %v2542_v60 }
 0x645   : > { %15756 = vmatprep.subr.bf16.mxu0 %v17873_v31  ;;  %v2406_v54 = vld [vmem:[%s19910_s15 + $0x1270] sm:$0xff] }
 0x646   : > { %15796 = vmatpush2.bf16.msra.mxu1 %v18008_v43  ;;  %v2530_v24 = vld [vmem:[%s19910_s15 + $0x1650] sm:$0xff]  ;;  %v17849_v15 = vcombine.high %v2402_v41, %v2406_v54  ;;  %v17848_v49 = vcombine.low %v2402_v41, %v2406_v54 }
 0x647   : > { %15797 = vmatprep.subr.bf16.mxu1 %v18001_v3  ;;  %v2534_v51 = vld [vmem:[%s19910_s15 + $0x1670] sm:$0xff] }
 0x648   : > { %15757 = vmatpush2.bf16.msra.mxu0 %v17872_v14  ;;  %v17977_v43 = vcombine.high %v2530_v24, %v2534_v51  ;;  %v2394_v31 = vld [vmem:[%s19910_s15 + $0x1210] sm:$0xff]  ;;  %v17976_v63 = vcombine.low %v2530_v24, %v2534_v51 }
 0x649   : > { %15758 = vmatprep.subr.bf16.mxu0 %v17865_v2  ;;  %v2398_v3 = vld [vmem:[%s19910_s15 + $0x1230] sm:$0xff] }
 0x64a   : > { %15798 = vmatpush2.bf16.msra.mxu1 %v18000_v40  ;;  %v2522_v6 = vld [vmem:[%s19910_s15 + $0x1610] sm:$0xff]  ;;  %v17841_v14 = vcombine.high %v2394_v31, %v2398_v3  ;;  %v17840_v13 = vcombine.low %v2394_v31, %v2398_v3 }
 0x64b   : > { %15799 = vmatprep.subr.bf16.mxu1 %v17993_v58  ;;  %v2526_v17 = vld [vmem:[%s19910_s15 + $0x1630] sm:$0xff] }
 0x64c   : > { %15759 = vmatpush2.bf16.msra.mxu0 %v17864_v1  ;;  %v17969_v40 = vcombine.high %v2522_v6, %v2526_v17  ;;  %v2642_v2 = vld [vmem:[%s19910_s15 + $0x19d0] sm:$0xff]  ;;  %v17968_v60 = vcombine.low %v2522_v6, %v2526_v17 }
 0x64d   : > { %15760 = vmatprep.subr.bf16.mxu0 %v17857_v29  ;;  %v2646_v58 = vld [vmem:[%s19910_s15 + $0x19f0] sm:$0xff] }
 0x64e   : > { %15800 = vmatpush2.bf16.msra.mxu1 %v17992_v10  ;;  %v2770_v16 = vld [vmem:[%s19910_s15 + $0x1dd0] sm:$0xff]  ;;  %v18089_v1 = vcombine.high %v2642_v2, %v2646_v58  ;;  %v18088_v24 = vcombine.low %v2642_v2, %v2646_v58 }
 0x64f   : > { %15801 = vmatprep.subr.bf16.mxu1 %v17985_v38  ;;  %v2774_v33 = vld [vmem:[%s19910_s15 + $0x1df0] sm:$0xff] }
 0x650   : > { %15761 = vmatpush2.bf16.msra.mxu0 %v17856_v57  ;;  %v18217_v10 = vcombine.high %v2770_v16, %v2774_v33  ;;  %v2634_v29 = vld [vmem:[%s19910_s15 + $0x1990] sm:$0xff]  ;;  %v18216_v51 = vcombine.low %v2770_v16, %v2774_v33 }
 0x651   : > { %15762 = vmatprep.subr.bf16.mxu0 %v17849_v15  ;;  %v2638_v38 = vld [vmem:[%s19910_s15 + $0x19b0] sm:$0xff] }
 0x652   : > { %15802 = vmatpush2.bf16.msra.mxu1 %v17984_v59  ;;  %v2762_v41 = vld [vmem:[%s19910_s15 + $0x1d90] sm:$0xff]  ;;  %v18081_v57 = vcombine.high %v2634_v29, %v2638_v38 }
 0x653   : > { %15803 = vmatprep.subr.bf16.mxu1 %v17977_v43  ;;  %v2766_v54 = vld [vmem:[%s19910_s15 + $0x1db0] sm:$0xff] }
 0x654   : > { %15763 = vmatpush2.bf16.msra.mxu0 %v17848_v49  ;;  %v18209_v59 = vcombine.high %v2762_v41, %v2766_v54  ;;  %v2626_v15 = vld [vmem:[%s19910_s15 + $0x1950] sm:$0xff]  ;;  %v18208_v58 = vcombine.low %v2762_v41, %v2766_v54 }
 0x655   : > { %15764 = vmatprep.subr.bf16.mxu0 %v17841_v14  ;;  %v2630_v43 = vld [vmem:[%s19910_s15 + $0x1970] sm:$0xff] }
 0x656   : > { %15804 = vmatpush2.bf16.msra.mxu1 %v17976_v63  ;;  %v2754_v3 = vld [vmem:[%s19910_s15 + $0x1d50] sm:$0xff]  ;;  %v18080_v63 = vcombine.low %v2634_v29, %v2638_v38  ;;  %v18073_v16 = vcombine.high %v2626_v15, %v2630_v43  ;;  %v18072_v54 = vcombine.low %v2626_v15, %v2630_v43 }
 0x657   : > { %15805 = vmatprep.subr.bf16.mxu1 %v17969_v40  ;;  %v2758_v6 = vld [vmem:[%s19910_s15 + $0x1d70] sm:$0xff] }
 0x658   : > { %15765 = vmatpush2.bf16.msra.mxu0 %v17840_v13  ;;  %v19471_v14 = vld [vmem:[%s19925_s19] sm:$0xff] }
 0x659   : > { %15816 = vmatprep.subr.bf16.mxu0 %v18089_v1  ;;  %v16904_v40 = vrot.slane %v19471_v14, %v3876_v20  ;;  %v2618_v1 = vld [vmem:[%s19910_s15 + $0x1910] sm:$0xff]  ;;  %v16908_v41 = vrot.slane %v19471_v14, %v3880_v56 }
 0x65a   : > { %15806 = vmatpush2.bf16.msra.mxu1 %v17968_v60  ;;  %v18201_v60 = vcombine.high %v2754_v3, %v2758_v6  ;;  %v2746_v38 = vld [vmem:[%s19910_s15 + $0x1d10] sm:$0xff] }
 0x65b   : > { %15857 = vmatprep.subr.bf16.mxu1 %v18217_v10  ;;  %v15522_v31 = vpop.f32.mrf.mxu0  ;;  %15767 = vmatmul.mubr.bf16.vlgmr.msra.gmra.mxu0 %v20291_v19  ;;  %v2622_v10 = vld [vmem:[%s19910_s15 + $0x1930] sm:$0xff] }
 0x65c   : > { %v15523_v17 = vadd.f32 %v15522_v31, %v21525_v47  ;;  %15817 = vmatpush1.bf16.msra.mxu0 %v18088_v24  ;;  %15848 = vmatprep.mubr.bf16.mxu0 %v20307_v34  ;;  %v2750_v24 = vld [vmem:[%s19910_s15 + $0x1d30] sm:$0xff]  ;;  %v18065_v31 = vcombine.high %v2618_v1, %v2622_v10 }
 0x65d   : > { %v15563_v49 = vpop.f32.mrf.mxu1  ;;  %15808 = vmatmul.mubr.bf16.vlgmr.msra.gmra.mxu1 %v20299_v25  ;;  %v15524_v2 = vpop.f32.mrf.mxu0  ;;  %15818 = vmatprep.subr.bf16.mxu0 %v18081_v57  ;;  %v2738_v56 = vld [vmem:[%s19910_s15 + $0x1cd0] sm:$0xff] }
 0x65e   : > { %15858 = vmatpush1.bf16.msra.mxu1 %v18216_v51  ;;  %v15564_v33 = vadd.f32 %v15563_v49, %v15523_v17  ;;  %v15525_v47 = vadd.f32 %v15524_v2, %v21534_v44  ;;  %15889 = vmatprep.mubr.bf16.mxu1 %v20314_v36  ;;  %v2742_v14 = vld [vmem:[%s19910_s15 + $0x1cf0] sm:$0xff] }
 0x65f   : > { %v15565_v13 = vpop.f32.mrf.mxu1  ;;  %15859 = vmatprep.subr.bf16.mxu1 %v18209_v59  ;;  %v15526_v29 = vpop.f32.mrf.mxu0  ;;  %v18200_v59 = vcombine.low %v2754_v3, %v2758_v6  ;;  %v18192_v3 = vcombine.low %v2746_v38, %v2750_v24 }
 0x660   : > { %v16884_v20 = vmax.f32 %v15564_v33, 0.0  ;;  %v15566_v51 = vadd.f32 %v15565_v13, %v15525_v47  ;;  %15819 = vmatpush1.bf16.msra.mxu0 %v18080_v63  ;;  %v18193_v33 = vcombine.high %v2746_v38, %v2750_v24  ;;  %v2610_v47 = vld [vmem:[%s19910_s15 + $0x18d0] sm:$0xff]  ;;  %v18064_v63 = vcombine.low %v2618_v1, %v2622_v10 }
 0x661   : > { %v15567_v44 = vpop.f32.mrf.mxu1  ;;  %v15527_v57 = vpop.f32.mrf.mxu0  ;;  %15820 = vmatprep.subr.bf16.mxu0 %v18073_v16  ;;  %v2614_v13 = vld [vmem:[%s19910_s15 + $0x18f0] sm:$0xff]  ;;  %v18184_v1 = vcombine.low %v2738_v56, %v2742_v14 }
 0x662   : > { %15860 = vmatpush1.bf16.msra.mxu1 %v18208_v58  ;;  %v16935_v17 = vmul.f32 %v16904_v40, %v16884_v20  ;;  %v16885_v49 = vmax.f32 %v15566_v51, 0.0  ;;  %v18057_v6 = vcombine.high %v2610_v47, %v2614_v13  ;;  %v18185_v58 = vcombine.high %v2738_v56, %v2742_v14  ;;  %v2602_v16 = vld [vmem:[%s19910_s15 + $0x1890] sm:$0xff] }
 0x663   : > { %v15568_v2 = vpop.f32.mrf.mxu1  ;;  %15861 = vmatprep.subr.bf16.mxu1 %v18201_v60  ;;  %v2606_v60 = vld [vmem:[%s19910_s15 + $0x18b0] sm:$0xff] }
 0x664   : > { %v16942_v15 = vadd.f32 %v21015_v4, %v16935_v17  ;;  %v16936_v43 = vmul.f32 %v16908_v41, %v16885_v49  ;;  %15821 = vmatpush1.bf16.msra.mxu0 %v18072_v54  ;;  %v2730_v29 = vld [vmem:[%s19910_s15 + $0x1c90] sm:$0xff]  ;;  %v18056_v4 = vcombine.low %v2610_v47, %v2614_v13  ;;  %v18049_v10 = vcombine.high %v2602_v16, %v2606_v60 }
 0x665   : > { %15822 = vmatprep.subr.bf16.mxu0 %v18065_v31  ;;  %v2734_v20 = vld [vmem:[%s19910_s15 + $0x1cb0] sm:$0xff]  ;;  %v18048_v54 = vcombine.low %v2602_v16, %v2606_v60 }
 0x666   : > { %15862 = vmatpush1.bf16.msra.mxu1 %v18200_v59  ;;  %v21616_v40 = vadd.f32 %v16942_v15, %v16936_v43  ;;  %v18177_v38 = vcombine.high %v2730_v29, %v2734_v20  ;;  %v2594_v24 = vld [vmem:[%s19910_s15 + $0x1850] sm:$0xff]  ;;  %v18176_v57 = vcombine.low %v2730_v29, %v2734_v20 }
 0x667   : > { %15863 = vmatprep.subr.bf16.mxu1 %v18193_v33  ;;  %v2598_v51 = vld [vmem:[%s19910_s15 + $0x1870] sm:$0xff] }
 0x668   : > { %15823 = vmatpush1.bf16.msra.mxu0 %v18064_v63  ;;  %v2722_v41 = vld [vmem:[%s19910_s15 + $0x1c50] sm:$0xff]  ;;  %v18041_v59 = vcombine.high %v2594_v24, %v2598_v51  ;;  %v18040_v47 = vcombine.low %v2594_v24, %v2598_v51 }
 0x669   : > { %15824 = vmatprep.subr.bf16.mxu0 %v18057_v6  ;;  %v2726_v44 = vld [vmem:[%s19910_s15 + $0x1c70] sm:$0xff] }
 0x66a   : > { %15864 = vmatpush1.bf16.msra.mxu1 %v18192_v3  ;;  %v18169_v31 = vcombine.high %v2722_v41, %v2726_v44  ;;  %v2586_v17 = vld [vmem:[%s19910_s15 + $0x1810] sm:$0xff]  ;;  %v18168_v13 = vcombine.low %v2722_v41, %v2726_v44 }
 0x66b   : > { %15865 = vmatprep.subr.bf16.mxu1 %v18185_v58  ;;  %v2590_v49 = vld [vmem:[%s19910_s15 + $0x1830] sm:$0xff] }
 0x66c   : > { %15825 = vmatpush1.bf16.msra.mxu0 %v18056_v4  ;;  %v2714_v2 = vld [vmem:[%s19910_s15 + $0x1c10] sm:$0xff]  ;;  %v18033_v56 = vcombine.high %v2586_v17, %v2590_v49  ;;  %v18032_v6 = vcombine.low %v2586_v17, %v2590_v49 }
 0x66d   : > { %15826 = vmatprep.subr.bf16.mxu0 %v18049_v10  ;;  %v2718_v33 = vld [vmem:[%s19910_s15 + $0x1c30] sm:$0xff] }
 0x66e   : > { %15866 = vmatpush1.bf16.msra.mxu1 %v18184_v1  ;;  %v18161_v14 = vcombine.high %v2714_v2, %v2718_v33  ;;  %v2706_v15 = vld [vmem:[%s19910_s15 + $0x1bd0] sm:$0xff]  ;;  %v18160_v58 = vcombine.low %v2714_v2, %v2718_v33 }
 0x66f   : > { %15867 = vmatprep.subr.bf16.mxu1 %v18177_v38  ;;  %v2710_v43 = vld [vmem:[%s19910_s15 + $0x1bf0] sm:$0xff] }
 0x670   : > { %15827 = vmatpush1.bf16.msra.mxu0 %v18048_v54  ;;  %v2834_v63 = vld [vmem:[%s19910_s15 + $0x1fd0] sm:$0xff]  ;;  %v18153_v16 = vcombine.high %v2706_v15, %v2710_v43  ;;  %v18152_v10 = vcombine.low %v2706_v15, %v2710_v43 }
 0x671   : > { %15828 = vmatprep.subr.bf16.mxu0 %v18041_v59  ;;  %v2838_v3 = vld [vmem:[%s19910_s15 + $0x1ff0] sm:$0xff] }
 0x672   : > { %15868 = vmatpush1.bf16.msra.mxu1 %v18176_v57  ;;  %v18281_v60 = vcombine.high %v2834_v63, %v2838_v3  ;;  %v2698_v29 = vld [vmem:[%s19910_s15 + $0x1b90] sm:$0xff]  ;;  %v18280_v38 = vcombine.low %v2834_v63, %v2838_v3 }
 0x673   : > { %15869 = vmatprep.subr.bf16.mxu1 %v18169_v31  ;;  %v2702_v20 = vld [vmem:[%s19910_s15 + $0x1bb0] sm:$0xff] }
 0x674   : > { %15829 = vmatpush1.bf16.msra.mxu0 %v18040_v47  ;;  %v2826_v4 = vld [vmem:[%s19910_s15 + $0x1f90] sm:$0xff]  ;;  %v18145_v24 = vcombine.high %v2698_v29, %v2702_v20  ;;  %v18144_v59 = vcombine.low %v2698_v29, %v2702_v20 }
 0x675   : > { %15830 = vmatprep.subr.bf16.mxu0 %v18033_v56  ;;  %v2830_v1 = vld [vmem:[%s19910_s15 + $0x1fb0] sm:$0xff] }
 0x676   : > { %15870 = vmatpush1.bf16.msra.mxu1 %v18168_v13  ;;  %v18273_v51 = vcombine.high %v2826_v4, %v2830_v1  ;;  %v2690_v41 = vld [vmem:[%s19910_s15 + $0x1b50] sm:$0xff]  ;;  %v18272_v31 = vcombine.low %v2826_v4, %v2830_v1 }
 0x677   : > { %15871 = vmatprep.subr.bf16.mxu1 %v18161_v14  ;;  %v2694_v44 = vld [vmem:[%s19910_s15 + $0x1b70] sm:$0xff] }
 0x678   : > { %15831 = vmatpush1.bf16.msra.mxu0 %v18032_v6  ;;  %v2818_v54 = vld [vmem:[%s19910_s15 + $0x1f50] sm:$0xff]  ;;  %v18137_v17 = vcombine.high %v2690_v41, %v2694_v44  ;;  %v18136_v56 = vcombine.low %v2690_v41, %v2694_v44 }
 0x679   : > { %15832 = vmatprep.subr.bf16.mxu0 %v18153_v16  ;;  %v2822_v57 = vld [vmem:[%s19910_s15 + $0x1f70] sm:$0xff] }
 0x67a   : > { %15872 = vmatpush1.bf16.msra.mxu1 %v18160_v58  ;;  %v18265_v49 = vcombine.high %v2818_v54, %v2822_v57  ;;  %v2682_v2 = vld [vmem:[%s19910_s15 + $0x1b10] sm:$0xff]  ;;  %v18264_v14 = vcombine.low %v2818_v54, %v2822_v57 }
 0x67b   : > { %15873 = vmatprep.subr.bf16.mxu1 %v18281_v60  ;;  %v2686_v33 = vld [vmem:[%s19910_s15 + $0x1b30] sm:$0xff] }
 0x67c   : > { %15833 = vmatpush2.bf16.msra.mxu0 %v18152_v10  ;;  %v2810_v47 = vld [vmem:[%s19910_s15 + $0x1f10] sm:$0xff]  ;;  %v18129_v15 = vcombine.high %v2682_v2, %v2686_v33  ;;  %v18128_v16 = vcombine.low %v2682_v2, %v2686_v33 }
 0x67d   : > { %15834 = vmatprep.subr.bf16.mxu0 %v18145_v24  ;;  %v2814_v13 = vld [vmem:[%s19910_s15 + $0x1f30] sm:$0xff] }
 0x67e   : > { %15874 = vmatpush2.bf16.msra.mxu1 %v18280_v38  ;;  %v18257_v43 = vcombine.high %v2810_v47, %v2814_v13  ;;  %v2674_v63 = vld [vmem:[%s19910_s15 + $0x1ad0] sm:$0xff]  ;;  %v18256_v60 = vcombine.low %v2810_v47, %v2814_v13 }
 0x67f   : > { %15875 = vmatprep.subr.bf16.mxu1 %v18273_v51  ;;  %v2678_v3 = vld [vmem:[%s19910_s15 + $0x1af0] sm:$0xff] }
 0x680   : > { %15835 = vmatpush2.bf16.msra.mxu0 %v18144_v59  ;;  %v2802_v6 = vld [vmem:[%s19910_s15 + $0x1ed0] sm:$0xff]  ;;  %v18121_v29 = vcombine.high %v2674_v63, %v2678_v3  ;;  %v18120_v24 = vcombine.low %v2674_v63, %v2678_v3 }
 0x681   : > { %15836 = vmatprep.subr.bf16.mxu0 %v18137_v17  ;;  %v2806_v58 = vld [vmem:[%s19910_s15 + $0x1ef0] sm:$0xff] }
 0x682   : > { %15876 = vmatpush2.bf16.msra.mxu1 %v18272_v31  ;;  %v18249_v20 = vcombine.high %v2802_v6, %v2806_v58  ;;  %v2666_v4 = vld [vmem:[%s19910_s15 + $0x1a90] sm:$0xff]  ;;  %v18248_v51 = vcombine.low %v2802_v6, %v2806_v58 }
 0x683   : > { %15877 = vmatprep.subr.bf16.mxu1 %v18265_v49  ;;  %v2670_v1 = vld [vmem:[%s19910_s15 + $0x1ab0] sm:$0xff] }
 0x684   : > { %15837 = vmatpush2.bf16.msra.mxu0 %v18136_v56  ;;  %v2794_v10 = vld [vmem:[%s19910_s15 + $0x1e90] sm:$0xff]  ;;  %v18113_v41 = vcombine.high %v2666_v4, %v2670_v1  ;;  %v18112_v17 = vcombine.low %v2666_v4, %v2670_v1 }
 0x685   : > { %15838 = vmatprep.subr.bf16.mxu0 %v18129_v15  ;;  %v2798_v38 = vld [vmem:[%s19910_s15 + $0x1eb0] sm:$0xff] }
 0x686   : > { %15878 = vmatpush2.bf16.msra.mxu1 %v18264_v14  ;;  %v18241_v44 = vcombine.high %v2794_v10, %v2798_v38  ;;  %v2658_v54 = vld [vmem:[%s19910_s15 + $0x1a50] sm:$0xff]  ;;  %v18240_v49 = vcombine.low %v2794_v10, %v2798_v38  ;;  %v3888_v38 = vsub.s32 5, %v20371_v50 }
 0x687   : > { %15879 = vmatprep.subr.bf16.mxu1 %v18257_v43  ;;  %v2662_v57 = vld [vmem:[%s19910_s15 + $0x1a70] sm:$0xff] }
 0x688   : > { %15839 = vmatpush2.bf16.msra.mxu0 %v18128_v16  ;;  %v2786_v59 = vld [vmem:[%s19910_s15 + $0x1e50] sm:$0xff]  ;;  %v18105_v2 = vcombine.high %v2658_v54, %v2662_v57  ;;  %v18104_v15 = vcombine.low %v2658_v54, %v2662_v57  ;;  %v19472_v54 = vld [vmem:[%s19923_s29] sm:$0xff] }
 0x689   : > { %15840 = vmatprep.subr.bf16.mxu0 %v18121_v29  ;;  %v2790_v31 = vld [vmem:[%s19910_s15 + $0x1e70] sm:$0xff] }
 0x68a   : > { %15880 = vmatpush2.bf16.msra.mxu1 %v18256_v60  ;;  %v18233_v33 = vcombine.high %v2786_v59, %v2790_v31  ;;  %v2650_v47 = vld [vmem:[%s19910_s15 + $0x1a10] sm:$0xff]  ;;  %v18232_v43 = vcombine.low %v2786_v59, %v2790_v31 }
 0x68b   : > { %15881 = vmatprep.subr.bf16.mxu1 %v18249_v20  ;;  %v2654_v13 = vld [vmem:[%s19910_s15 + $0x1a30] sm:$0xff]  ;;  %v3884_v20 = vsub.s32 4, %v20371_v50 }
 0x68c   : > { %15841 = vmatpush2.bf16.msra.mxu0 %v18120_v24  ;;  %v2778_v56 = vld [vmem:[%s19910_s15 + $0x1e10] sm:$0xff]  ;;  %v18097_v63 = vcombine.high %v2650_v47, %v2654_v13  ;;  %v18096_v29 = vcombine.low %v2650_v47, %v2654_v13 }
 0x68d   : > { %15842 = vmatprep.subr.bf16.mxu0 %v18113_v41  ;;  %v2782_v14 = vld [vmem:[%s19910_s15 + $0x1e30] sm:$0xff]  ;;  %v3885_v57 = vrot.slane %v19472_v54, %v3884_v20 }
 0x68e   : > { %15882 = vmatpush2.bf16.msra.mxu1 %v18248_v51  ;;  %v18225_v3 = vcombine.high %v2778_v56, %v2782_v14  ;;  %v2898_v6 = vld [vmem:[%s19910_s15 + $0x21d0] sm:$0xff]  ;;  %v18224_v4 = vcombine.low %v2778_v56, %v2782_v14 }
 0x68f   : > { %15883 = vmatprep.subr.bf16.mxu1 %v18241_v44  ;;  %v2902_v58 = vld [vmem:[%s19910_s15 + $0x21f0] sm:$0xff] }
 0x690   : > { %15843 = vmatpush2.bf16.msra.mxu0 %v18112_v17  ;;  %v3026_v16 = vld [vmem:[%s19910_s15 + $0x25d0] sm:$0xff]  ;;  %v18345_v1 = vcombine.high %v2898_v6, %v2902_v58  ;;  %v18344_v59 = vcombine.low %v2898_v6, %v2902_v58 }
 0x691   : > { %15844 = vmatprep.subr.bf16.mxu0 %v18105_v2  ;;  %v3030_v60 = vld [vmem:[%s19910_s15 + $0x25f0] sm:$0xff] }
 0x692   : > { %15884 = vmatpush2.bf16.msra.mxu1 %v18240_v49  ;;  %v18473_v10 = vcombine.high %v3026_v16, %v3030_v60  ;;  %v2890_v24 = vld [vmem:[%s19910_s15 + $0x2190] sm:$0xff]  ;;  %v18472_v31 = vcombine.low %v3026_v16, %v3030_v60  ;;  %v3889_v49 = vrot.slane %v19472_v54, %v3888_v38 }
 0x693   : > { %15885 = vmatprep.subr.bf16.mxu1 %v18233_v33  ;;  %v2894_v51 = vld [vmem:[%s19910_s15 + $0x21b0] sm:$0xff] }
 0x694   : > { %15845 = vmatpush2.bf16.msra.mxu0 %v18104_v15  ;;  %v3018_v41 = vld [vmem:[%s19910_s15 + $0x2590] sm:$0xff]  ;;  %v18337_v17 = vcombine.high %v2890_v24, %v2894_v51 }
 0x695   : > { %15846 = vmatprep.subr.bf16.mxu0 %v18097_v63  ;;  %v3022_v44 = vld [vmem:[%s19910_s15 + $0x25b0] sm:$0xff]  ;;  %v18336_v63 = vcombine.low %v2890_v24, %v2894_v51 }
 0x696   : > { %15886 = vmatpush2.bf16.msra.mxu1 %v18232_v43  ;;  %v18465_v2 = vcombine.high %v3018_v41, %v3022_v44  ;;  %v2882_v33 = vld [vmem:[%s19910_s15 + $0x2150] sm:$0xff]  ;;  %v18464_v6 = vcombine.low %v3018_v41, %v3022_v44 }
 0x697   : > { %15887 = vmatprep.subr.bf16.mxu1 %v18225_v3  ;;  %v2886_v47 = vld [vmem:[%s19910_s15 + $0x2170] sm:$0xff] }
 0x698   : > { %15847 = vmatpush2.bf16.msra.mxu0 %v18096_v29  ;;  %v3010_v56 = vld [vmem:[%s19910_s15 + $0x2550] sm:$0xff]  ;;  %v18329_v58 = vcombine.high %v2882_v33, %v2886_v47  ;;  %v18328_v44 = vcombine.low %v2882_v33, %v2886_v47 }
 0x699   : > { %15898 = vmatprep.subr.bf16.mxu0 %v18345_v1  ;;  %v3014_v14 = vld [vmem:[%s19910_s15 + $0x2570] sm:$0xff] }
 0x69a   : > { %15888 = vmatpush2.bf16.msra.mxu1 %v18224_v4  ;;  %v18457_v4 = vcombine.high %v3010_v56, %v3014_v14  ;;  %v2874_v1 = vld [vmem:[%s19910_s15 + $0x2110] sm:$0xff] }
 0x69b   : > { %15939 = vmatprep.subr.bf16.mxu1 %v18473_v10  ;;  %v15604_v13 = vpop.f32.mrf.mxu0  ;;  %15849 = vmatmul.mubr.bf16.vlgmr.msra.gmra.mxu0 %v20384_v5  ;;  %v2878_v10 = vld [vmem:[%s19910_s15 + $0x2130] sm:$0xff] }
 0x69c   : > { %v15605_v15 = vadd.f32 %v15604_v13, %v3885_v57  ;;  %15899 = vmatpush1.bf16.msra.mxu0 %v18344_v59  ;;  %15930 = vmatprep.mubr.bf16.mxu0 %v20404_v26  ;;  %v3002_v57 = vld [vmem:[%s19910_s15 + $0x2510] sm:$0xff] }
 0x69d   : > { %v15645_v43 = vpop.f32.mrf.mxu1  ;;  %15890 = vmatmul.mubr.bf16.vlgmr.msra.gmra.mxu1 %v20394_v27  ;;  %v15606_v3 = vpop.f32.mrf.mxu0  ;;  %15900 = vmatprep.subr.bf16.mxu0 %v18337_v17  ;;  %v3006_v24 = vld [vmem:[%s19910_s15 + $0x2530] sm:$0xff]  ;;  %v18321_v17 = vcombine.high %v2874_v1, %v2878_v10 }
 0x69e   : > { %15940 = vmatpush1.bf16.msra.mxu1 %v18472_v31  ;;  %v21683_v16 = vadd.f32 %v15645_v43, %v15605_v15  ;;  %v15607_v60 = vadd.f32 %v15606_v3, %v3889_v49  ;;  %15971 = vmatprep.mubr.bf16.mxu1 %v20411_v55  ;;  %v18456_v31 = vcombine.low %v3010_v56, %v3014_v14  ;;  %v2866_v13 = vld [vmem:[%s19910_s15 + $0x20d0] sm:$0xff] }
 0x69f   : > { %v15647_v29 = vpop.f32.mrf.mxu1  ;;  %15941 = vmatprep.subr.bf16.mxu1 %v18465_v2  ;;  %v15608_v54 = vpop.f32.mrf.mxu0  ;;  %v18449_v2 = vcombine.high %v3002_v57, %v3006_v24  ;;  %v2870_v15 = vld [vmem:[%s19910_s15 + $0x20f0] sm:$0xff]  ;;  %v18448_v33 = vcombine.low %v3002_v57, %v3006_v24 }
 0x6a0   : > { %v21691_v51 = vadd.f32 %v15647_v29, %v15607_v60  ;;  %15901 = vmatpush1.bf16.msra.mxu0 %v18336_v63  ;;  %v2994_v43 = vld [vmem:[%s19910_s15 + $0x24d0] sm:$0xff]  ;;  %v18320_v60 = vcombine.low %v2874_v1, %v2878_v10  ;;  %v18313_v47 = vcombine.high %v2866_v13, %v2870_v15  ;;  %v18312_v29 = vcombine.low %v2866_v13, %v2870_v15 }
 0x6a1   : > { %v15649_v41 = vpop.f32.mrf.mxu1  ;;  %v15609_v59 = vpop.f32.mrf.mxu0  ;;  %15902 = vmatprep.subr.bf16.mxu0 %v18329_v58  ;;  %v2998_v3 = vld [vmem:[%s19910_s15 + $0x24f0] sm:$0xff] }
 0x6a2   : > { %15942 = vmatpush1.bf16.msra.mxu1 %v18464_v6  ;;  %v18441_v56 = vcombine.high %v2994_v43, %v2998_v3  ;;  %v2858_v14 = vld [vmem:[%s19910_s15 + $0x2090] sm:$0xff] }
 0x6a3   : > { %v15650_v49 = vpop.f32.mrf.mxu1  ;;  %15943 = vmatprep.subr.bf16.mxu1 %v18457_v4  ;;  %v2862_v63 = vld [vmem:[%s19910_s15 + $0x20b0] sm:$0xff]  ;;  %v18440_v4 = vcombine.low %v2994_v43, %v2998_v3 }
 0x6a4   : > { %15903 = vmatpush1.bf16.msra.mxu0 %v18328_v44  ;;  %v2986_v6 = vld [vmem:[%s19910_s15 + $0x2490] sm:$0xff]  ;;  %v18305_v1 = vcombine.high %v2858_v14, %v2862_v63  ;;  %v18304_v44 = vcombine.low %v2858_v14, %v2862_v63 }
 0x6a5   : > { %15904 = vmatprep.subr.bf16.mxu0 %v18321_v17  ;;  %v2990_v58 = vld [vmem:[%s19910_s15 + $0x24b0] sm:$0xff] }
 0x6a6   : > { %15944 = vmatpush1.bf16.msra.mxu1 %v18456_v31  ;;  %v18433_v10 = vcombine.high %v2986_v6, %v2990_v58  ;;  %v2850_v54 = vld [vmem:[%s19910_s15 + $0x2050] sm:$0xff]  ;;  %v18432_v59 = vcombine.low %v2986_v6, %v2990_v58 }
 0x6a7   : > { %15945 = vmatprep.subr.bf16.mxu1 %v18449_v2  ;;  %v2854_v57 = vld [vmem:[%s19910_s15 + $0x2070] sm:$0xff] }
 0x6a8   : > { %15905 = vmatpush1.bf16.msra.mxu0 %v18320_v60  ;;  %v2978_v24 = vld [vmem:[%s19910_s15 + $0x2450] sm:$0xff]  ;;  %v18297_v31 = vcombine.high %v2850_v54, %v2854_v57  ;;  %v18296_v43 = vcombine.low %v2850_v54, %v2854_v57 }
 0x6a9   : > { %15906 = vmatprep.subr.bf16.mxu0 %v18313_v47  ;;  %v2982_v41 = vld [vmem:[%s19910_s15 + $0x2470] sm:$0xff] }
 0x6aa   : > { %15946 = vmatpush1.bf16.msra.mxu1 %v18448_v33  ;;  %v18425_v17 = vcombine.high %v2978_v24, %v2982_v41  ;;  %v2842_v49 = vld [vmem:[%s19910_s15 + $0x2010] sm:$0xff]  ;;  %v18424_v3 = vcombine.low %v2978_v24, %v2982_v41 }
 0x6ab   : > { %15947 = vmatprep.subr.bf16.mxu1 %v18441_v56  ;;  %v2846_v2 = vld [vmem:[%s19910_s15 + $0x2030] sm:$0xff] }
 0x6ac   : > { %15907 = vmatpush1.bf16.msra.mxu0 %v18312_v29  ;;  %v2970_v13 = vld [vmem:[%s19910_s15 + $0x2410] sm:$0xff]  ;;  %v18289_v60 = vcombine.high %v2842_v49, %v2846_v2  ;;  %v18288_v6 = vcombine.low %v2842_v49, %v2846_v2 }
 0x6ad   : > { %15908 = vmatprep.subr.bf16.mxu0 %v18305_v1  ;;  %v2974_v15 = vld [vmem:[%s19910_s15 + $0x2430] sm:$0xff] }
 0x6ae   : > { %15948 = vmatpush1.bf16.msra.mxu1 %v18440_v4  ;;  %v18417_v33 = vcombine.high %v2970_v13, %v2974_v15  ;;  %v2962_v47 = vld [vmem:[%s19910_s15 + $0x23d0] sm:$0xff]  ;;  %v18416_v58 = vcombine.low %v2970_v13, %v2974_v15 }
 0x6af   : > { %15949 = vmatprep.subr.bf16.mxu1 %v18433_v10  ;;  %v2966_v56 = vld [vmem:[%s19910_s15 + $0x23f0] sm:$0xff] }
 0x6b0   : > { %15909 = vmatpush1.bf16.msra.mxu0 %v18304_v44  ;;  %v3090_v14 = vld [vmem:[%s19910_s15 + $0x27d0] sm:$0xff]  ;;  %v18409_v29 = vcombine.high %v2962_v47, %v2966_v56  ;;  %v18408_v24 = vcombine.low %v2962_v47, %v2966_v56 }
 0x6b1   : > { %15910 = vmatprep.subr.bf16.mxu0 %v18297_v31  ;;  %v3094_v63 = vld [vmem:[%s19910_s15 + $0x27f0] sm:$0xff] }
 0x6b2   : > { %15950 = vmatpush1.bf16.msra.mxu1 %v18432_v59  ;;  %v18537_v4 = vcombine.high %v3090_v14, %v3094_v63  ;;  %v2954_v1 = vld [vmem:[%s19910_s15 + $0x2390] sm:$0xff]  ;;  %v18536_v41 = vcombine.low %v3090_v14, %v3094_v63 }
 0x6b3   : > { %15951 = vmatprep.subr.bf16.mxu1 %v18425_v17  ;;  %v2958_v10 = vld [vmem:[%s19910_s15 + $0x23b0] sm:$0xff] }
 0x6b4   : > { %15911 = vmatpush1.bf16.msra.mxu0 %v18296_v43  ;;  %v3082_v54 = vld [vmem:[%s19910_s15 + $0x2790] sm:$0xff]  ;;  %v18401_v44 = vcombine.high %v2954_v1, %v2958_v10  ;;  %v18400_v13 = vcombine.low %v2954_v1, %v2958_v10 }
 0x6b5   : > { %15912 = vmatprep.subr.bf16.mxu0 %v18289_v60  ;;  %v3086_v57 = vld [vmem:[%s19910_s15 + $0x27b0] sm:$0xff] }
 0x6b6   : > { %15952 = vmatpush1.bf16.msra.mxu1 %v18424_v3  ;;  %v18529_v59 = vcombine.high %v3082_v54, %v3086_v57  ;;  %v2946_v31 = vld [vmem:[%s19910_s15 + $0x2350] sm:$0xff]  ;;  %v18528_v15 = vcombine.low %v3082_v54, %v3086_v57 }
 0x6b7   : > { %15953 = vmatprep.subr.bf16.mxu1 %v18417_v33  ;;  %v2950_v17 = vld [vmem:[%s19910_s15 + $0x2370] sm:$0xff] }
 0x6b8   : > { %15913 = vmatpush1.bf16.msra.mxu0 %v18288_v6  ;;  %v3074_v49 = vld [vmem:[%s19910_s15 + $0x2750] sm:$0xff]  ;;  %v18393_v43 = vcombine.high %v2946_v31, %v2950_v17  ;;  %v18392_v14 = vcombine.low %v2946_v31, %v2950_v17 }
 0x6b9   : > { %15914 = vmatprep.subr.bf16.mxu0 %v18409_v29  ;;  %v3078_v2 = vld [vmem:[%s19910_s15 + $0x2770] sm:$0xff] }
 0x6ba   : > { %15954 = vmatpush1.bf16.msra.mxu1 %v18416_v58  ;;  %v18521_v3 = vcombine.high %v3074_v49, %v3078_v2  ;;  %v2938_v60 = vld [vmem:[%s19910_s15 + $0x2310] sm:$0xff]  ;;  %v18520_v63 = vcombine.low %v3074_v49, %v3078_v2 }
 0x6bb   : > { %15955 = vmatprep.subr.bf16.mxu1 %v18537_v4  ;;  %v2942_v33 = vld [vmem:[%s19910_s15 + $0x2330] sm:$0xff] }
 0x6bc   : > { %15915 = vmatpush2.bf16.msra.mxu0 %v18408_v24  ;;  %v3066_v47 = vld [vmem:[%s19910_s15 + $0x2710] sm:$0xff]  ;;  %v18385_v6 = vcombine.high %v2938_v60, %v2942_v33  ;;  %v18384_v54 = vcombine.low %v2938_v60, %v2942_v33 }
 0x6bd   : > { %15916 = vmatprep.subr.bf16.mxu0 %v18401_v44  ;;  %v3070_v56 = vld [vmem:[%s19910_s15 + $0x2730] sm:$0xff] }
 0x6be   : > { %15956 = vmatpush2.bf16.msra.mxu1 %v18536_v41  ;;  %v18513_v58 = vcombine.high %v3066_v47, %v3070_v56  ;;  %v2930_v29 = vld [vmem:[%s19910_s15 + $0x22d0] sm:$0xff]  ;;  %v18512_v57 = vcombine.low %v3066_v47, %v3070_v56 }
 0x6bf   : > { %15957 = vmatprep.subr.bf16.mxu1 %v18529_v59  ;;  %v2934_v4 = vld [vmem:[%s19910_s15 + $0x22f0] sm:$0xff] }
 0x6c0   : > { %15917 = vmatpush2.bf16.msra.mxu0 %v18400_v13  ;;  %v3058_v1 = vld [vmem:[%s19910_s15 + $0x26d0] sm:$0xff]  ;;  %v18377_v24 = vcombine.high %v2930_v29, %v2934_v4  ;;  %v18376_v49 = vcombine.low %v2930_v29, %v2934_v4 }
 0x6c1   : > { %15918 = vmatprep.subr.bf16.mxu0 %v18393_v43  ;;  %v3062_v10 = vld [vmem:[%s19910_s15 + $0x26f0] sm:$0xff] }
 0x6c2   : > { %15958 = vmatpush2.bf16.msra.mxu1 %v18528_v15  ;;  %v18505_v41 = vcombine.high %v3058_v1, %v3062_v10  ;;  %v2922_v44 = vld [vmem:[%s19910_s15 + $0x2290] sm:$0xff]  ;;  %v18504_v2 = vcombine.low %v3058_v1, %v3062_v10 }
 0x6c3   : > { %15959 = vmatprep.subr.bf16.mxu1 %v18521_v3  ;;  %v2926_v59 = vld [vmem:[%s19910_s15 + $0x22b0] sm:$0xff] }
 0x6c4   : > { %15919 = vmatpush2.bf16.msra.mxu0 %v18392_v14  ;;  %v3050_v31 = vld [vmem:[%s19910_s15 + $0x2690] sm:$0xff]  ;;  %v18369_v13 = vcombine.high %v2922_v44, %v2926_v59  ;;  %v18368_v47 = vcombine.low %v2922_v44, %v2926_v59 }
 0x6c5   : > { %15920 = vmatprep.subr.bf16.mxu0 %v18385_v6  ;;  %v3054_v17 = vld [vmem:[%s19910_s15 + $0x26b0] sm:$0xff] }
 0x6c6   : > { %15960 = vmatpush2.bf16.msra.mxu1 %v18520_v63  ;;  %v18497_v15 = vcombine.high %v3050_v31, %v3054_v17  ;;  %v2914_v43 = vld [vmem:[%s19910_s15 + $0x2250] sm:$0xff]  ;;  %v18496_v56 = vcombine.low %v3050_v31, %v3054_v17 }
 0x6c7   : > { %15961 = vmatprep.subr.bf16.mxu1 %v18513_v58  ;;  %v2918_v3 = vld [vmem:[%s19910_s15 + $0x2270] sm:$0xff] }
 0x6c8   : > { %15921 = vmatpush2.bf16.msra.mxu0 %v18384_v54  ;;  %v3042_v60 = vld [vmem:[%s19910_s15 + $0x2650] sm:$0xff]  ;;  %v18361_v14 = vcombine.high %v2914_v43, %v2918_v3  ;;  %v18360_v1 = vcombine.low %v2914_v43, %v2918_v3 }
 0x6c9   : > { %15922 = vmatprep.subr.bf16.mxu0 %v18377_v24  ;;  %v3046_v33 = vld [vmem:[%s19910_s15 + $0x2670] sm:$0xff] }
 0x6ca   : > { %15962 = vmatpush2.bf16.msra.mxu1 %v18512_v57  ;;  %v18489_v63 = vcombine.high %v3042_v60, %v3046_v33  ;;  %v2906_v6 = vld [vmem:[%s19910_s15 + $0x2210] sm:$0xff]  ;;  %v18488_v10 = vcombine.low %v3042_v60, %v3046_v33 }
 0x6cb   : > { %15963 = vmatprep.subr.bf16.mxu1 %v18505_v41  ;;  %v2910_v58 = vld [vmem:[%s19910_s15 + $0x2230] sm:$0xff] }
 0x6cc   : > { %15923 = vmatpush2.bf16.msra.mxu0 %v18376_v49  ;;  %v3034_v29 = vld [vmem:[%s19910_s15 + $0x2610] sm:$0xff]  ;;  %v18353_v54 = vcombine.high %v2906_v6, %v2910_v58  ;;  %v18352_v31 = vcombine.low %v2906_v6, %v2910_v58 }
 0x6cd   : > { %15924 = vmatprep.subr.bf16.mxu0 %v18369_v13  ;;  %v3038_v4 = vld [vmem:[%s19910_s15 + $0x2630] sm:$0xff] }
 0x6ce   : > { %15964 = vmatpush2.bf16.msra.mxu1 %v18504_v2  ;;  %v18481_v57 = vcombine.high %v3034_v29, %v3038_v4  ;;  %v3154_v24 = vld [vmem:[%s19910_s15 + $0x29d0] sm:$0xff]  ;;  %v18480_v17 = vcombine.low %v3034_v29, %v3038_v4 }
 0x6cf   : > { %15965 = vmatprep.subr.bf16.mxu1 %v18497_v15  ;;  %v3158_v41 = vld [vmem:[%s19910_s15 + $0x29f0] sm:$0xff] }
 0x6d0   : > { %15925 = vmatpush2.bf16.msra.mxu0 %v18368_v47  ;;  %v3282_v44 = vld [vmem:[%s19910_s15 + $0x2dd0] sm:$0xff]  ;;  %v18601_v49 = vcombine.high %v3154_v24, %v3158_v41  ;;  %v18600_v60 = vcombine.low %v3154_v24, %v3158_v41 }
 0x6d1   : > { %15926 = vmatprep.subr.bf16.mxu0 %v18361_v14  ;;  %v3286_v59 = vld [vmem:[%s19910_s15 + $0x2df0] sm:$0xff] }
 0x6d2   : > { %15966 = vmatpush2.bf16.msra.mxu1 %v18496_v56  ;;  %v18729_v2 = vcombine.high %v3282_v44, %v3286_v59  ;;  %v3146_v13 = vld [vmem:[%s19910_s15 + $0x2990] sm:$0xff]  ;;  %v18728_v33 = vcombine.low %v3282_v44, %v3286_v59 }
 0x6d3   : > { %15967 = vmatprep.subr.bf16.mxu1 %v18489_v63  ;;  %v3150_v15 = vld [vmem:[%s19910_s15 + $0x29b0] sm:$0xff] }
 0x6d4   : > { %15927 = vmatpush2.bf16.msra.mxu0 %v18360_v1  ;;  %v3274_v43 = vld [vmem:[%s19910_s15 + $0x2d90] sm:$0xff]  ;;  %v18593_v47 = vcombine.high %v3146_v13, %v3150_v15 }
 0x6d5   : > { %15928 = vmatprep.subr.bf16.mxu0 %v18353_v54  ;;  %v3278_v3 = vld [vmem:[%s19910_s15 + $0x2db0] sm:$0xff] }
 0x6d6   : > { %15968 = vmatpush2.bf16.msra.mxu1 %v18488_v10  ;;  %v18721_v56 = vcombine.high %v3274_v43, %v3278_v3  ;;  %v3138_v14 = vld [vmem:[%s19910_s15 + $0x2950] sm:$0xff]  ;;  %v18592_v10 = vcombine.low %v3146_v13, %v3150_v15 }
 0x6d7   : > { %15969 = vmatprep.subr.bf16.mxu1 %v18481_v57  ;;  %v3142_v63 = vld [vmem:[%s19910_s15 + $0x2970] sm:$0xff]  ;;  %v18720_v57 = vcombine.low %v3274_v43, %v3278_v3 }
 0x6d8   : > { %15929 = vmatpush2.bf16.msra.mxu0 %v18352_v31  ;;  %v3266_v58 = vld [vmem:[%s19910_s15 + $0x2d50] sm:$0xff]  ;;  %v18585_v24 = vcombine.high %v3138_v14, %v3142_v63 }
 0x6d9   : > { %15980 = vmatprep.subr.bf16.mxu0 %v18601_v49  ;;  %v3270_v29 = vld [vmem:[%s19910_s15 + $0x2d70] sm:$0xff] }
 0x6da   : > { %15970 = vmatpush2.bf16.msra.mxu1 %v18480_v17  ;;  %v3130_v31 = vld [vmem:[%s19910_s15 + $0x2910] sm:$0xff] }
 0x6db   : > { %16021 = vmatprep.subr.bf16.mxu1 %v18729_v2  ;;  %v15686_v6 = vpop.f32.mrf.mxu0  ;;  %15931 = vmatmul.mubr.bf16.vlgmr.msra.gmra.mxu0 %v20480_v48  ;;  %v3134_v17 = vld [vmem:[%s19910_s15 + $0x2930] sm:$0xff] }
 0x6dc   : > { %v15687_v4 = vadd.f32 %v15686_v6, %v21683_v16  ;;  %15981 = vmatpush1.bf16.msra.mxu0 %v18600_v60  ;;  %v18713_v16 = vcombine.high %v3266_v58, %v3270_v29  ;;  %16012 = vmatprep.mubr.bf16.mxu0 %v20496_v61  ;;  %v3258_v2 = vld [vmem:[%s19910_s15 + $0x2d10] sm:$0xff]  ;;  %v18712_v60 = vcombine.low %v3266_v58, %v3270_v29 }
 0x6dd   : > { %v15727_v1 = vpop.f32.mrf.mxu1  ;;  %15972 = vmatmul.mubr.bf16.vlgmr.msra.gmra.mxu1 %v20488_v52  ;;  %v15688_v54 = vpop.f32.mrf.mxu0  ;;  %15982 = vmatprep.subr.bf16.mxu0 %v18593_v47  ;;  %v3262_v13 = vld [vmem:[%s19910_s15 + $0x2d30] sm:$0xff] }
 0x6de   : > { %16022 = vmatpush1.bf16.msra.mxu1 %v18728_v33  ;;  %v21756_v41 = vadd.f32 %v15727_v1, %v15687_v4  ;;  %v15689_v44 = vadd.f32 %v15688_v54, %v21691_v51  ;;  %16053 = vmatprep.mubr.bf16.mxu1 %v20503_v18  ;;  %v18584_v51 = vcombine.low %v3138_v14, %v3142_v63  ;;  %v3122_v6 = vld [vmem:[%s19910_s15 + $0x28d0] sm:$0xff] }
 0x6df   : > { %v15729_v59 = vpop.f32.mrf.mxu1  ;;  %16023 = vmatprep.subr.bf16.mxu1 %v18721_v56  ;;  %v15690_v49 = vpop.f32.mrf.mxu0  ;;  %v18577_v33 = vcombine.high %v3130_v31, %v3134_v17  ;;  %v18705_v56 = vcombine.high %v3258_v2, %v3262_v13  ;;  %v3126_v4 = vld [vmem:[%s19910_s15 + $0x28f0] sm:$0xff]  ;;  %v18704_v14 = vcombine.low %v3258_v2, %v3262_v13 }
 0x6e0   : > { %v21765_v15 = vadd.f32 %v15729_v59, %v15689_v44  ;;  %15983 = vmatpush1.bf16.msra.mxu0 %v18592_v10  ;;  %v3250_v1 = vld [vmem:[%s19910_s15 + $0x2cd0] sm:$0xff]  ;;  %v18576_v44 = vcombine.low %v3130_v31, %v3134_v17  ;;  %v18569_v63 = vcombine.high %v3122_v6, %v3126_v4  ;;  %v18568_v59 = vcombine.low %v3122_v6, %v3126_v4 }
 0x6e1   : > { %v15731_v43 = vpop.f32.mrf.mxu1  ;;  %v15691_v3 = vpop.f32.mrf.mxu0  ;;  %15984 = vmatprep.subr.bf16.mxu0 %v18585_v24  ;;  %v3254_v54 = vld [vmem:[%s19910_s15 + $0x2cf0] sm:$0xff] }
 0x6e2   : > { %16024 = vmatpush1.bf16.msra.mxu1 %v18720_v57  ;;  %v18697_v58 = vcombine.high %v3250_v1, %v3254_v54  ;;  %v3114_v29 = vld [vmem:[%s19910_s15 + $0x2890] sm:$0xff] }
 0x6e3   : > { %v15732_v47 = vpop.f32.mrf.mxu1  ;;  %16025 = vmatprep.subr.bf16.mxu1 %v18713_v16  ;;  %v3118_v10 = vld [vmem:[%s19910_s15 + $0x28b0] sm:$0xff]  ;;  %v18696_v16 = vcombine.low %v3250_v1, %v3254_v54 }
 0x6e4   : > { %15985 = vmatpush1.bf16.msra.mxu0 %v18584_v51  ;;  %v3242_v57 = vld [vmem:[%s19910_s15 + $0x2c90] sm:$0xff]  ;;  %v18561_v31 = vcombine.high %v3114_v29, %v3118_v10  ;;  %v18560_v51 = vcombine.low %v3114_v29, %v3118_v10 }
 0x6e5   : > { %15986 = vmatprep.subr.bf16.mxu0 %v18577_v33  ;;  %v3246_v24 = vld [vmem:[%s19910_s15 + $0x2cb0] sm:$0xff] }
 0x6e6   : > { %16026 = vmatpush1.bf16.msra.mxu1 %v18712_v60  ;;  %v18689_v17 = vcombine.high %v3242_v57, %v3246_v24  ;;  %v3106_v49 = vld [vmem:[%s19910_s15 + $0x2850] sm:$0xff]  ;;  %v18688_v3 = vcombine.low %v3242_v57, %v3246_v24 }
 0x6e7   : > { %16027 = vmatprep.subr.bf16.mxu1 %v18705_v56  ;;  %v3110_v2 = vld [vmem:[%s19910_s15 + $0x2870] sm:$0xff] }
 0x6e8   : > { %15987 = vmatpush1.bf16.msra.mxu0 %v18576_v44  ;;  %v3234_v13 = vld [vmem:[%s19910_s15 + $0x2c50] sm:$0xff]  ;;  %v18553_v60 = vcombine.high %v3106_v49, %v3110_v2  ;;  %v18552_v1 = vcombine.low %v3106_v49, %v3110_v2 }
 0x6e9   : > { %15988 = vmatprep.subr.bf16.mxu0 %v18569_v63  ;;  %v3238_v43 = vld [vmem:[%s19910_s15 + $0x2c70] sm:$0xff] }
 0x6ea   : > { %16028 = vmatpush1.bf16.msra.mxu1 %v18704_v14  ;;  %v18681_v33 = vcombine.high %v3234_v13, %v3238_v43  ;;  %v3098_v47 = vld [vmem:[%s19910_s15 + $0x2810] sm:$0xff]  ;;  %v18680_v54 = vcombine.low %v3234_v13, %v3238_v43 }
 0x6eb   : > { %16029 = vmatprep.subr.bf16.mxu1 %v18697_v58  ;;  %v3102_v56 = vld [vmem:[%s19910_s15 + $0x2830] sm:$0xff] }
 0x6ec   : > { %15989 = vmatpush1.bf16.msra.mxu0 %v18568_v59  ;;  %v3226_v6 = vld [vmem:[%s19910_s15 + $0x2c10] sm:$0xff]  ;;  %v18545_v44 = vcombine.high %v3098_v47, %v3102_v56  ;;  %v18544_v57 = vcombine.low %v3098_v47, %v3102_v56 }
 0x6ed   : > { %15990 = vmatprep.subr.bf16.mxu0 %v18561_v31  ;;  %v3230_v4 = vld [vmem:[%s19910_s15 + $0x2c30] sm:$0xff] }
 0x6ee   : > { %16030 = vmatpush1.bf16.msra.mxu1 %v18696_v16  ;;  %v18673_v14 = vcombine.high %v3226_v6, %v3230_v4  ;;  %v3218_v63 = vld [vmem:[%s19910_s15 + $0x2bd0] sm:$0xff]  ;;  %v18672_v24 = vcombine.low %v3226_v6, %v3230_v4 }
 0x6ef   : > { %16031 = vmatprep.subr.bf16.mxu1 %v18689_v17  ;;  %v3222_v58 = vld [vmem:[%s19910_s15 + $0x2bf0] sm:$0xff] }
 0x6f0   : > { %15991 = vmatpush1.bf16.msra.mxu0 %v18560_v51  ;;  %v3346_v29 = vld [vmem:[%s19910_s15 + $0x2fd0] sm:$0xff]  ;;  %v18665_v59 = vcombine.high %v3218_v63, %v3222_v58  ;;  %v18664_v13 = vcombine.low %v3218_v63, %v3222_v58 }
 0x6f1   : > { %15992 = vmatprep.subr.bf16.mxu0 %v18553_v60  ;;  %v3350_v10 = vld [vmem:[%s19910_s15 + $0x2ff0] sm:$0xff] }
 0x6f2   : > { %16032 = vmatpush1.bf16.msra.mxu1 %v18688_v3  ;;  %v18793_v16 = vcombine.high %v3346_v29, %v3350_v10  ;;  %v3210_v31 = vld [vmem:[%s19910_s15 + $0x2b90] sm:$0xff]  ;;  %v18792_v43 = vcombine.low %v3346_v29, %v3350_v10 }
 0x6f3   : > { %16033 = vmatprep.subr.bf16.mxu1 %v18681_v33  ;;  %v3214_v17 = vld [vmem:[%s19910_s15 + $0x2bb0] sm:$0xff] }
 0x6f4   : > { %15993 = vmatpush1.bf16.msra.mxu0 %v18552_v1  ;;  %v3338_v49 = vld [vmem:[%s19910_s15 + $0x2f90] sm:$0xff]  ;;  %v18657_v51 = vcombine.high %v3210_v31, %v3214_v17  ;;  %v18656_v6 = vcombine.low %v3210_v31, %v3214_v17 }
 0x6f5   : > { %15994 = vmatprep.subr.bf16.mxu0 %v18545_v44  ;;  %v3342_v2 = vld [vmem:[%s19910_s15 + $0x2fb0] sm:$0xff] }
 0x6f6   : > { %16034 = vmatpush1.bf16.msra.mxu1 %v18680_v54  ;;  %v18785_v3 = vcombine.high %v3338_v49, %v3342_v2  ;;  %v3202_v60 = vld [vmem:[%s19910_s15 + $0x2b50] sm:$0xff]  ;;  %v18784_v4 = vcombine.low %v3338_v49, %v3342_v2 }
 0x6f7   : > { %16035 = vmatprep.subr.bf16.mxu1 %v18673_v14  ;;  %v3206_v33 = vld [vmem:[%s19910_s15 + $0x2b70] sm:$0xff] }
 0x6f8   : > { %15995 = vmatpush1.bf16.msra.mxu0 %v18544_v57  ;;  %v3330_v47 = vld [vmem:[%s19910_s15 + $0x2f50] sm:$0xff]  ;;  %v18649_v1 = vcombine.high %v3202_v60, %v3206_v33  ;;  %v18648_v29 = vcombine.low %v3202_v60, %v3206_v33 }
 0x6f9   : > { %15996 = vmatprep.subr.bf16.mxu0 %v18665_v59  ;;  %v3334_v56 = vld [vmem:[%s19910_s15 + $0x2f70] sm:$0xff] }
 0x6fa   : > { %16036 = vmatpush1.bf16.msra.mxu1 %v18672_v24  ;;  %v18777_v54 = vcombine.high %v3330_v47, %v3334_v56  ;;  %v3194_v44 = vld [vmem:[%s19910_s15 + $0x2b10] sm:$0xff]  ;;  %v18776_v10 = vcombine.low %v3330_v47, %v3334_v56 }
 0x6fb   : > { %16037 = vmatprep.subr.bf16.mxu1 %v18793_v16  ;;  %v3198_v14 = vld [vmem:[%s19910_s15 + $0x2b30] sm:$0xff] }
 0x6fc   : > { %15997 = vmatpush2.bf16.msra.mxu0 %v18664_v13  ;;  %v3322_v63 = vld [vmem:[%s19910_s15 + $0x2f10] sm:$0xff]  ;;  %v18641_v57 = vcombine.high %v3194_v44, %v3198_v14  ;;  %v18640_v49 = vcombine.low %v3194_v44, %v3198_v14 }
 0x6fd   : > { %15998 = vmatprep.subr.bf16.mxu0 %v18657_v51  ;;  %v3326_v58 = vld [vmem:[%s19910_s15 + $0x2f30] sm:$0xff] }
 0x6fe   : > { %16038 = vmatpush2.bf16.msra.mxu1 %v18792_v43  ;;  %v18769_v24 = vcombine.high %v3322_v63, %v3326_v58  ;;  %v3186_v59 = vld [vmem:[%s19910_s15 + $0x2ad0] sm:$0xff]  ;;  %v18768_v2 = vcombine.low %v3322_v63, %v3326_v58 }
 0x6ff   : > { %16039 = vmatprep.subr.bf16.mxu1 %v18785_v3  ;;  %v3190_v16 = vld [vmem:[%s19910_s15 + $0x2af0] sm:$0xff] }
 0x700   : > { %15999 = vmatpush2.bf16.msra.mxu0 %v18656_v6  ;;  %v3314_v31 = vld [vmem:[%s19910_s15 + $0x2ed0] sm:$0xff]  ;;  %v18633_v13 = vcombine.high %v3186_v59, %v3190_v16  ;;  %v18632_v47 = vcombine.low %v3186_v59, %v3190_v16 }
 0x701   : > { %16000 = vmatprep.subr.bf16.mxu0 %v18649_v1  ;;  %v3318_v17 = vld [vmem:[%s19910_s15 + $0x2ef0] sm:$0xff] }
 0x702   : > { %16040 = vmatpush2.bf16.msra.mxu1 %v18784_v4  ;;  %v18761_v43 = vcombine.high %v3314_v31, %v3318_v17  ;;  %v3178_v51 = vld [vmem:[%s19910_s15 + $0x2a90] sm:$0xff]  ;;  %v18760_v56 = vcombine.low %v3314_v31, %v3318_v17 }
 0x703   : > { %16041 = vmatprep.subr.bf16.mxu1 %v18777_v54  ;;  %v3182_v3 = vld [vmem:[%s19910_s15 + $0x2ab0] sm:$0xff] }
 0x704   : > { %16001 = vmatpush2.bf16.msra.mxu0 %v18648_v29  ;;  %v3306_v60 = vld [vmem:[%s19910_s15 + $0x2e90] sm:$0xff]  ;;  %v18625_v6 = vcombine.high %v3178_v51, %v3182_v3  ;;  %v18624_v63 = vcombine.low %v3178_v51, %v3182_v3 }
 0x705   : > { %16002 = vmatprep.subr.bf16.mxu0 %v18641_v57  ;;  %v3310_v33 = vld [vmem:[%s19910_s15 + $0x2eb0] sm:$0xff] }
 0x706   : > { %16042 = vmatpush2.bf16.msra.mxu1 %v18776_v10  ;;  %v18753_v4 = vcombine.high %v3306_v60, %v3310_v33  ;;  %v3170_v1 = vld [vmem:[%s19910_s15 + $0x2a50] sm:$0xff]  ;;  %v18752_v58 = vcombine.low %v3306_v60, %v3310_v33 }
 0x707   : > { %16043 = vmatprep.subr.bf16.mxu1 %v18769_v24  ;;  %v3174_v54 = vld [vmem:[%s19910_s15 + $0x2a70] sm:$0xff] }
 0x708   : > { %16003 = vmatpush2.bf16.msra.mxu0 %v18640_v49  ;;  %v3298_v44 = vld [vmem:[%s19910_s15 + $0x2e50] sm:$0xff]  ;;  %v18617_v29 = vcombine.high %v3170_v1, %v3174_v54  ;;  %v18616_v31 = vcombine.low %v3170_v1, %v3174_v54 }
 0x709   : > { %16004 = vmatprep.subr.bf16.mxu0 %v18633_v13  ;;  %v3302_v14 = vld [vmem:[%s19910_s15 + $0x2e70] sm:$0xff] }
 0x70a   : > { %16044 = vmatpush2.bf16.msra.mxu1 %v18768_v2  ;;  %v18745_v10 = vcombine.high %v3298_v44, %v3302_v14  ;;  %v3162_v57 = vld [vmem:[%s19910_s15 + $0x2a10] sm:$0xff]  ;;  %v18744_v17 = vcombine.low %v3298_v44, %v3302_v14 }
 0x70b   : > { %16045 = vmatprep.subr.bf16.mxu1 %v18761_v43  ;;  %v3166_v24 = vld [vmem:[%s19910_s15 + $0x2a30] sm:$0xff] }
 0x70c   : > { %16005 = vmatpush2.bf16.msra.mxu0 %v18632_v47  ;;  %v3290_v59 = vld [vmem:[%s19910_s15 + $0x2e10] sm:$0xff]  ;;  %v18609_v49 = vcombine.high %v3162_v57, %v3166_v24  ;;  %v18608_v60 = vcombine.low %v3162_v57, %v3166_v24 }
 0x70d   : > { %16006 = vmatprep.subr.bf16.mxu0 %v18625_v6  ;;  %v3294_v16 = vld [vmem:[%s19910_s15 + $0x2e30] sm:$0xff] }
 0x70e   : > { %16046 = vmatpush2.bf16.msra.mxu1 %v18760_v56  ;;  %v18737_v2 = vcombine.high %v3290_v59, %v3294_v16  ;;  %v3410_v13 = vld [vmem:[%s19910_s15 + $0x31d0] sm:$0xff]  ;;  %v18736_v33 = vcombine.low %v3290_v59, %v3294_v16 }
 0x70f   : > { %16047 = vmatprep.subr.bf16.mxu1 %v18753_v4  ;;  %v3414_v43 = vld [vmem:[%s19910_s15 + $0x31f0] sm:$0xff] }
 0x710   : > { %16007 = vmatpush2.bf16.msra.mxu0 %v18624_v63  ;;  %v3538_v51 = vld [vmem:[%s19910_s15 + $0x35d0] sm:$0xff]  ;;  %v18857_v47 = vcombine.high %v3410_v13, %v3414_v43  ;;  %v18856_v44 = vcombine.low %v3410_v13, %v3414_v43 }
 0x711   : > { %16008 = vmatprep.subr.bf16.mxu0 %v18617_v29  ;;  %v3542_v3 = vld [vmem:[%s19910_s15 + $0x35f0] sm:$0xff] }
 0x712   : > { %16048 = vmatpush2.bf16.msra.mxu1 %v18752_v58  ;;  %v18985_v56 = vcombine.high %v3538_v51, %v3542_v3  ;;  %v3402_v6 = vld [vmem:[%s19910_s15 + $0x3190] sm:$0xff]  ;;  %v18984_v14 = vcombine.low %v3538_v51, %v3542_v3 }
 0x713   : > { %16049 = vmatprep.subr.bf16.mxu1 %v18745_v10  ;;  %v3406_v4 = vld [vmem:[%s19910_s15 + $0x31b0] sm:$0xff] }
 0x714   : > { %16009 = vmatpush2.bf16.msra.mxu0 %v18616_v31  ;;  %v3530_v1 = vld [vmem:[%s19910_s15 + $0x3590] sm:$0xff]  ;;  %v18849_v63 = vcombine.high %v3402_v6, %v3406_v4 }
 0x715   : > { %16010 = vmatprep.subr.bf16.mxu0 %v18609_v49  ;;  %v3534_v54 = vld [vmem:[%s19910_s15 + $0x35b0] sm:$0xff] }
 0x716   : > { %16050 = vmatpush2.bf16.msra.mxu1 %v18744_v17  ;;  %v18977_v58 = vcombine.high %v3530_v1, %v3534_v54  ;;  %v3394_v29 = vld [vmem:[%s19910_s15 + $0x3150] sm:$0xff]  ;;  %v18848_v17 = vcombine.low %v3402_v6, %v3406_v4 }
 0x717   : > { %16051 = vmatprep.subr.bf16.mxu1 %v18737_v2  ;;  %v3398_v10 = vld [vmem:[%s19910_s15 + $0x3170] sm:$0xff]  ;;  %v18976_v2 = vcombine.low %v3530_v1, %v3534_v54 }
 0x718   : > { %16011 = vmatpush2.bf16.msra.mxu0 %v18608_v60  ;;  %v3522_v24 = vld [vmem:[%s19910_s15 + $0x3550] sm:$0xff]  ;;  %v18841_v13 = vcombine.high %v3394_v29, %v3398_v10 }
 0x719   : > { %16062 = vmatprep.subr.bf16.mxu0 %v18857_v47  ;;  %v3526_v59 = vld [vmem:[%s19910_s15 + $0x3570] sm:$0xff] }
 0x71a   : > { %16052 = vmatpush2.bf16.msra.mxu1 %v18736_v33  ;;  %v3386_v60 = vld [vmem:[%s19910_s15 + $0x3110] sm:$0xff] }
 0x71b   : > { %16103 = vmatprep.subr.bf16.mxu1 %v18985_v56  ;;  %v15768_v57 = vpop.f32.mrf.mxu0  ;;  %16013 = vmatmul.mubr.bf16.vlgmr.msra.gmra.mxu0 %v20574_v45  ;;  %v3390_v33 = vld [vmem:[%s19910_s15 + $0x3130] sm:$0xff] }
 0x71c   : > { %v15769_v16 = vadd.f32 %v15768_v57, %v21756_v41  ;;  %16063 = vmatpush1.bf16.msra.mxu0 %v18856_v44  ;;  %v18969_v41 = vcombine.high %v3522_v24, %v3526_v59  ;;  %16094 = vmatprep.mubr.bf16.mxu0 %v20590_v28  ;;  %v3514_v56 = vld [vmem:[%s19910_s15 + $0x3510] sm:$0xff]  ;;  %v18968_v44 = vcombine.low %v3522_v24, %v3526_v59 }
 0x71d   : > { %v15809_v31 = vpop.f32.mrf.mxu1  ;;  %16054 = vmatmul.mubr.bf16.vlgmr.msra.gmra.mxu1 %v20582_v11  ;;  %v15770_v49 = vpop.f32.mrf.mxu0  ;;  %16064 = vmatprep.subr.bf16.mxu0 %v18849_v63  ;;  %v3518_v6 = vld [vmem:[%s19910_s15 + $0x3530] sm:$0xff] }
 0x71e   : > { %16104 = vmatpush1.bf16.msra.mxu1 %v18984_v14  ;;  %v21830_v43 = vadd.f32 %v15809_v31, %v15769_v16  ;;  %v15771_v51 = vadd.f32 %v15770_v49, %v21765_v15  ;;  %16135 = vmatprep.mubr.bf16.mxu1 %v20597_v21  ;;  %v18840_v15 = vcombine.low %v3394_v29, %v3398_v10  ;;  %v3378_v57 = vld [vmem:[%s19910_s15 + $0x30d0] sm:$0xff] }
 0x71f   : > { %v15811_v3 = vpop.f32.mrf.mxu1  ;;  %16105 = vmatprep.subr.bf16.mxu1 %v18977_v58  ;;  %v15772_v47 = vpop.f32.mrf.mxu0  ;;  %v18833_v14 = vcombine.high %v3386_v60, %v3390_v33  ;;  %v18961_v58 = vcombine.high %v3514_v56, %v3518_v6  ;;  %v3382_v16 = vld [vmem:[%s19910_s15 + $0x30f0] sm:$0xff]  ;;  %v18960_v29 = vcombine.low %v3514_v56, %v3518_v6 }
 0x720   : > { %v21839_v4 = vadd.f32 %v15811_v3, %v15771_v51  ;;  %16065 = vmatpush1.bf16.msra.mxu0 %v18848_v17  ;;  %v3506_v31 = vld [vmem:[%s19910_s15 + $0x34d0] sm:$0xff]  ;;  %v18832_v51 = vcombine.low %v3386_v60, %v3390_v33  ;;  %v18825_v10 = vcombine.high %v3378_v57, %v3382_v16  ;;  %v18824_v3 = vcombine.low %v3378_v57, %v3382_v16 }
 0x721   : > { %v15813_v1 = vpop.f32.mrf.mxu1  ;;  %v15773_v54 = vpop.f32.mrf.mxu0  ;;  %16066 = vmatprep.subr.bf16.mxu0 %v18841_v13  ;;  %v3510_v49 = vld [vmem:[%s19910_s15 + $0x34f0] sm:$0xff] }
 0x722   : > { %16106 = vmatpush1.bf16.msra.mxu1 %v18976_v2  ;;  %v18953_v24 = vcombine.high %v3506_v31, %v3510_v49  ;;  %v3370_v59 = vld [vmem:[%s19910_s15 + $0x3090] sm:$0xff] }
 0x723   : > { %v15814_v63 = vpop.f32.mrf.mxu1  ;;  %16107 = vmatprep.subr.bf16.mxu1 %v18969_v41  ;;  %v3374_v17 = vld [vmem:[%s19910_s15 + $0x30b0] sm:$0xff]  ;;  %v18952_v41 = vcombine.low %v3506_v31, %v3510_v49 }
 0x724   : > { %16067 = vmatpush1.bf16.msra.mxu0 %v18840_v15  ;;  %v3498_v2 = vld [vmem:[%s19910_s15 + $0x3490] sm:$0xff]  ;;  %v18817_v60 = vcombine.high %v3370_v59, %v3374_v17  ;;  %v18816_v15 = vcombine.low %v3370_v59, %v3374_v17 }
 0x725   : > { %16068 = vmatprep.subr.bf16.mxu0 %v18833_v14  ;;  %v3502_v13 = vld [vmem:[%s19910_s15 + $0x34b0] sm:$0xff] }
 0x726   : > { %16108 = vmatpush1.bf16.msra.mxu1 %v18968_v44  ;;  %v18945_v33 = vcombine.high %v3498_v2, %v3502_v13  ;;  %v3362_v47 = vld [vmem:[%s19910_s15 + $0x3050] sm:$0xff]  ;;  %v18944_v54 = vcombine.low %v3498_v2, %v3502_v13 }
 0x727   : > { %16109 = vmatprep.subr.bf16.mxu1 %v18961_v58  ;;  %v3366_v56 = vld [vmem:[%s19910_s15 + $0x3070] sm:$0xff] }
 0x728   : > { %16069 = vmatpush1.bf16.msra.mxu0 %v18832_v51  ;;  %v3490_v6 = vld [vmem:[%s19910_s15 + $0x3450] sm:$0xff]  ;;  %v18809_v44 = vcombine.high %v3362_v47, %v3366_v56  ;;  %v18808_v31 = vcombine.low %v3362_v47, %v3366_v56 }
 0x729   : > { %16070 = vmatprep.subr.bf16.mxu0 %v18825_v10  ;;  %v3494_v1 = vld [vmem:[%s19910_s15 + $0x3470] sm:$0xff] }
 0x72a   : > { %16110 = vmatpush1.bf16.msra.mxu1 %v18960_v29  ;;  %v18937_v14 = vcombine.high %v3490_v6, %v3494_v1  ;;  %v3354_v63 = vld [vmem:[%s19910_s15 + $0x3010] sm:$0xff]  ;;  %v18936_v49 = vcombine.low %v3490_v6, %v3494_v1 }
 0x72b   : > { %16111 = vmatprep.subr.bf16.mxu1 %v18953_v24  ;;  %v3358_v58 = vld [vmem:[%s19910_s15 + $0x3030] sm:$0xff] }
 0x72c   : > { %16071 = vmatpush1.bf16.msra.mxu0 %v18824_v3  ;;  %v3482_v57 = vld [vmem:[%s19910_s15 + $0x3410] sm:$0xff]  ;;  %v18801_v51 = vcombine.high %v3354_v63, %v3358_v58  ;;  %v18800_v2 = vcombine.low %v3354_v63, %v3358_v58 }
 0x72d   : > { %16072 = vmatprep.subr.bf16.mxu0 %v18817_v60  ;;  %v3486_v16 = vld [vmem:[%s19910_s15 + $0x3430] sm:$0xff] }
 0x72e   : > { %16112 = vmatpush1.bf16.msra.mxu1 %v18952_v41  ;;  %v18929_v29 = vcombine.high %v3482_v57, %v3486_v16  ;;  %v3474_v10 = vld [vmem:[%s19910_s15 + $0x33d0] sm:$0xff]  ;;  %v18928_v13 = vcombine.low %v3482_v57, %v3486_v16 }
 0x72f   : > { %16113 = vmatprep.subr.bf16.mxu1 %v18945_v33  ;;  %v3478_v24 = vld [vmem:[%s19910_s15 + $0x33f0] sm:$0xff] }
 0x730   : > { %16073 = vmatpush1.bf16.msra.mxu0 %v18816_v15  ;;  %v3602_v59 = vld [vmem:[%s19910_s15 + $0x37d0] sm:$0xff]  ;;  %v18921_v3 = vcombine.high %v3474_v10, %v3478_v24  ;;  %v18920_v6 = vcombine.low %v3474_v10, %v3478_v24 }
 0x731   : > { %16074 = vmatprep.subr.bf16.mxu0 %v18809_v44  ;;  %v3606_v17 = vld [vmem:[%s19910_s15 + $0x37f0] sm:$0xff] }
 0x732   : > { %16114 = vmatpush1.bf16.msra.mxu1 %v18944_v54  ;;  %v19049_v41 = vcombine.high %v3602_v59, %v3606_v17  ;;  %v3466_v60 = vld [vmem:[%s19910_s15 + $0x3390] sm:$0xff]  ;;  %v19048_v1 = vcombine.low %v3602_v59, %v3606_v17 }
 0x733   : > { %16115 = vmatprep.subr.bf16.mxu1 %v18937_v14  ;;  %v3470_v33 = vld [vmem:[%s19910_s15 + $0x33b0] sm:$0xff] }
 0x734   : > { %16075 = vmatpush1.bf16.msra.mxu0 %v18808_v31  ;;  %v3594_v47 = vld [vmem:[%s19910_s15 + $0x3790] sm:$0xff]  ;;  %v18913_v15 = vcombine.high %v3466_v60, %v3470_v33  ;;  %v18912_v57 = vcombine.low %v3466_v60, %v3470_v33 }
 0x735   : > { %16076 = vmatprep.subr.bf16.mxu0 %v18801_v51  ;;  %v3598_v56 = vld [vmem:[%s19910_s15 + $0x37b0] sm:$0xff] }
 0x736   : > { %16116 = vmatpush1.bf16.msra.mxu1 %v18936_v49  ;;  %v19041_v54 = vcombine.high %v3594_v47, %v3598_v56  ;;  %v3458_v44 = vld [vmem:[%s19910_s15 + $0x3350] sm:$0xff]  ;;  %v19040_v16 = vcombine.low %v3594_v47, %v3598_v56 }
 0x737   : > { %16117 = vmatprep.subr.bf16.mxu1 %v18929_v29  ;;  %v3462_v14 = vld [vmem:[%s19910_s15 + $0x3370] sm:$0xff] }
 0x738   : > { %16077 = vmatpush1.bf16.msra.mxu0 %v18800_v2  ;;  %v3586_v63 = vld [vmem:[%s19910_s15 + $0x3750] sm:$0xff]  ;;  %v18905_v31 = vcombine.high %v3458_v44, %v3462_v14  ;;  %v18904_v59 = vcombine.low %v3458_v44, %v3462_v14 }
 0x739   : > { %16078 = vmatprep.subr.bf16.mxu0 %v18921_v3  ;;  %v3590_v58 = vld [vmem:[%s19910_s15 + $0x3770] sm:$0xff] }
 0x73a   : > { %16118 = vmatpush1.bf16.msra.mxu1 %v18928_v13  ;;  %v19033_v49 = vcombine.high %v3586_v63, %v3590_v58  ;;  %v3450_v51 = vld [vmem:[%s19910_s15 + $0x3310] sm:$0xff]  ;;  %v19032_v17 = vcombine.low %v3586_v63, %v3590_v58 }
 0x73b   : > { %16119 = vmatprep.subr.bf16.mxu1 %v19049_v41  ;;  %v3454_v29 = vld [vmem:[%s19910_s15 + $0x3330] sm:$0xff] }
 0x73c   : > { %16079 = vmatpush2.bf16.msra.mxu0 %v18920_v6  ;;  %v3578_v10 = vld [vmem:[%s19910_s15 + $0x3710] sm:$0xff]  ;;  %v18897_v2 = vcombine.high %v3450_v51, %v3454_v29  ;;  %v18896_v47 = vcombine.low %v3450_v51, %v3454_v29 }
 0x73d   : > { %16080 = vmatprep.subr.bf16.mxu0 %v18913_v15  ;;  %v3582_v24 = vld [vmem:[%s19910_s15 + $0x3730] sm:$0xff] }
 0x73e   : > { %16120 = vmatpush2.bf16.msra.mxu1 %v19048_v1  ;;  %v19025_v13 = vcombine.high %v3578_v10, %v3582_v24  ;;  %v3442_v3 = vld [vmem:[%s19910_s15 + $0x32d0] sm:$0xff]  ;;  %v19024_v56 = vcombine.low %v3578_v10, %v3582_v24 }
 0x73f   : > { %16121 = vmatprep.subr.bf16.mxu1 %v19041_v54  ;;  %v3446_v41 = vld [vmem:[%s19910_s15 + $0x32f0] sm:$0xff] }
 0x740   : > { %16081 = vmatpush2.bf16.msra.mxu0 %v18912_v57  ;;  %v3570_v60 = vld [vmem:[%s19910_s15 + $0x36d0] sm:$0xff]  ;;  %v18889_v6 = vcombine.high %v3442_v3, %v3446_v41  ;;  %v18888_v63 = vcombine.low %v3442_v3, %v3446_v41 }
 0x741   : > { %16082 = vmatprep.subr.bf16.mxu0 %v18905_v31  ;;  %v3574_v33 = vld [vmem:[%s19910_s15 + $0x36f0] sm:$0xff] }
 0x742   : > { %16122 = vmatpush2.bf16.msra.mxu1 %v19040_v16  ;;  %v19017_v1 = vcombine.high %v3570_v60, %v3574_v33  ;;  %v3434_v15 = vld [vmem:[%s19910_s15 + $0x3290] sm:$0xff]  ;;  %v19016_v58 = vcombine.low %v3570_v60, %v3574_v33 }
 0x743   : > { %16123 = vmatprep.subr.bf16.mxu1 %v19033_v49  ;;  %v3438_v54 = vld [vmem:[%s19910_s15 + $0x32b0] sm:$0xff] }
 0x744   : > { %16083 = vmatpush2.bf16.msra.mxu0 %v18904_v59  ;;  %v3562_v44 = vld [vmem:[%s19910_s15 + $0x3690] sm:$0xff]  ;;  %v18881_v57 = vcombine.high %v3434_v15, %v3438_v54  ;;  %v18880_v10 = vcombine.low %v3434_v15, %v3438_v54 }
 0x745   : > { %16084 = vmatprep.subr.bf16.mxu0 %v18897_v2  ;;  %v3566_v14 = vld [vmem:[%s19910_s15 + $0x36b0] sm:$0xff] }
 0x746   : > { %16124 = vmatpush2.bf16.msra.mxu1 %v19032_v17  ;;  %v19009_v16 = vcombine.high %v3562_v44, %v3566_v14  ;;  %v3426_v31 = vld [vmem:[%s19910_s15 + $0x3250] sm:$0xff]  ;;  %v19008_v24 = vcombine.low %v3562_v44, %v3566_v14 }
 0x747   : > { %16125 = vmatprep.subr.bf16.mxu1 %v19025_v13  ;;  %v3430_v49 = vld [vmem:[%s19910_s15 + $0x3270] sm:$0xff] }
 0x748   : > { %16085 = vmatpush2.bf16.msra.mxu0 %v18896_v47  ;;  %v3554_v51 = vld [vmem:[%s19910_s15 + $0x3650] sm:$0xff]  ;;  %v18873_v59 = vcombine.high %v3426_v31, %v3430_v49  ;;  %v18872_v60 = vcombine.low %v3426_v31, %v3430_v49 }
 0x749   : > { %16086 = vmatprep.subr.bf16.mxu0 %v18889_v6  ;;  %v3558_v29 = vld [vmem:[%s19910_s15 + $0x3670] sm:$0xff] }
 0x74a   : > { %16126 = vmatpush2.bf16.msra.mxu1 %v19024_v56  ;;  %v19001_v17 = vcombine.high %v3554_v51, %v3558_v29  ;;  %v3418_v2 = vld [vmem:[%s19910_s15 + $0x3210] sm:$0xff]  ;;  %v19000_v33 = vcombine.low %v3554_v51, %v3558_v29 }
 0x74b   : > { %16127 = vmatprep.subr.bf16.mxu1 %v19017_v1  ;;  %v3422_v13 = vld [vmem:[%s19910_s15 + $0x3230] sm:$0xff] }
 0x74c   : > { %16087 = vmatpush2.bf16.msra.mxu0 %v18888_v63  ;;  %v3546_v3 = vld [vmem:[%s19910_s15 + $0x3610] sm:$0xff]  ;;  %v18865_v47 = vcombine.high %v3418_v2, %v3422_v13  ;;  %v18864_v44 = vcombine.low %v3418_v2, %v3422_v13 }
 0x74d   : > { %16088 = vmatprep.subr.bf16.mxu0 %v18881_v57  ;;  %v3550_v41 = vld [vmem:[%s19910_s15 + $0x3630] sm:$0xff] }
 0x74e   : > { %16128 = vmatpush2.bf16.msra.mxu1 %v19016_v58  ;;  %v18993_v56 = vcombine.high %v3546_v3, %v3550_v41  ;;  %v3666_v6 = vld [vmem:[%s19910_s15 + $0x39d0] sm:$0xff]  ;;  %v18992_v14 = vcombine.low %v3546_v3, %v3550_v41 }
 0x74f   : > { %16129 = vmatprep.subr.bf16.mxu1 %v19009_v16  ;;  %v3670_v1 = vld [vmem:[%s19910_s15 + $0x39f0] sm:$0xff] }
 0x750   : > { %16089 = vmatpush2.bf16.msra.mxu0 %v18880_v10  ;;  %v3794_v15 = vld [vmem:[%s19910_s15 + $0x3dd0] sm:$0xff]  ;;  %v19113_v63 = vcombine.high %v3666_v6, %v3670_v1  ;;  %v19112_v51 = vcombine.low %v3666_v6, %v3670_v1 }
 0x751   : > { %16090 = vmatprep.subr.bf16.mxu0 %v18873_v59  ;;  %v3798_v54 = vld [vmem:[%s19910_s15 + $0x3df0] sm:$0xff] }
 0x752   : > { %16130 = vmatpush2.bf16.msra.mxu1 %v19008_v24  ;;  %v19241_v58 = vcombine.high %v3794_v15, %v3798_v54  ;;  %v3658_v57 = vld [vmem:[%s19910_s15 + $0x3990] sm:$0xff]  ;;  %v19240_v29 = vcombine.low %v3794_v15, %v3798_v54 }
 0x753   : > { %16131 = vmatprep.subr.bf16.mxu1 %v19001_v17  ;;  %v3662_v16 = vld [vmem:[%s19910_s15 + $0x39b0] sm:$0xff] }
 0x754   : > { %16091 = vmatpush2.bf16.msra.mxu0 %v18872_v60  ;;  %v3786_v31 = vld [vmem:[%s19910_s15 + $0x3d90] sm:$0xff]  ;;  %v19105_v10 = vcombine.high %v3658_v57, %v3662_v16 }
 0x755   : > { %16092 = vmatprep.subr.bf16.mxu0 %v18865_v47  ;;  %v3790_v49 = vld [vmem:[%s19910_s15 + $0x3db0] sm:$0xff] }
 0x756   : > { %16132 = vmatpush2.bf16.msra.mxu1 %v19000_v33  ;;  %v19233_v24 = vcombine.high %v3786_v31, %v3790_v49  ;;  %v3650_v59 = vld [vmem:[%s19910_s15 + $0x3950] sm:$0xff]  ;;  %v19104_v33 = vcombine.low %v3658_v57, %v3662_v16 }
 0x757   : > { %16133 = vmatprep.subr.bf16.mxu1 %v18993_v56  ;;  %v3654_v17 = vld [vmem:[%s19910_s15 + $0x3970] sm:$0xff]  ;;  %v19232_v56 = vcombine.low %v3786_v31, %v3790_v49 }
 0x758   : > { %16093 = vmatpush2.bf16.msra.mxu0 %v18864_v44  ;;  %v3778_v13 = vld [vmem:[%s19910_s15 + $0x3d50] sm:$0xff]  ;;  %v19097_v6 = vcombine.high %v3650_v59, %v3654_v17 }
 0x759   : > { %16144 = vmatprep.subr.bf16.mxu0 %v19113_v63  ;;  %v3782_v3 = vld [vmem:[%s19910_s15 + $0x3d70] sm:$0xff] }
 0x75a   : > { %16134 = vmatpush2.bf16.msra.mxu1 %v18992_v14  ;;  %v3642_v44 = vld [vmem:[%s19910_s15 + $0x3910] sm:$0xff] }
 0x75b   : > { %16185 = vmatprep.subr.bf16.mxu1 %v19241_v58  ;;  %v15850_v2 = vpop.f32.mrf.mxu0  ;;  %16095 = vmatmul.mubr.bf16.vlgmr.msra.gmra.mxu0 %v20668_v23  ;;  %v3646_v14 = vld [vmem:[%s19910_s15 + $0x3930] sm:$0xff] }
 0x75c   : > { %v15851_v41 = vadd.f32 %v15850_v2, %v21830_v43  ;;  %16145 = vmatpush1.bf16.msra.mxu0 %v19112_v51  ;;  %v19225_v43 = vcombine.high %v3778_v13, %v3782_v3  ;;  %16176 = vmatprep.mubr.bf16.mxu0 %v20684_v37  ;;  %v3770_v58 = vld [vmem:[%s19910_s15 + $0x3d10] sm:$0xff]  ;;  %v19224_v51 = vcombine.low %v3778_v13, %v3782_v3 }
 0x75d   : > { %v15891_v60 = vpop.f32.mrf.mxu1  ;;  %16136 = vmatmul.mubr.bf16.vlgmr.msra.gmra.mxu1 %v20676_v22  ;;  %v15852_v47 = vpop.f32.mrf.mxu0  ;;  %16146 = vmatprep.subr.bf16.mxu0 %v19105_v10  ;;  %v3774_v57 = vld [vmem:[%s19910_s15 + $0x3d30] sm:$0xff] }
 0x75e   : > { %16186 = vmatpush1.bf16.msra.mxu1 %v19240_v29  ;;  %v21904_v1 = vadd.f32 %v15891_v60, %v15851_v41  ;;  %v15853_v15 = vadd.f32 %v15852_v47, %v21839_v4  ;;  %16217 = vmatprep.mubr.bf16.mxu1 %v20691_v42  ;;  %v19096_v4 = vcombine.low %v3650_v59, %v3654_v17  ;;  %v3634_v2 = vld [vmem:[%s19910_s15 + $0x38d0] sm:$0xff] }
 0x75f   : > { %v15893_v54 = vpop.f32.mrf.mxu1  ;;  %16187 = vmatprep.subr.bf16.mxu1 %v19233_v24  ;;  %v15854_v63 = vpop.f32.mrf.mxu0  ;;  %v19089_v29 = vcombine.high %v3642_v44, %v3646_v14  ;;  %v19217_v24 = vcombine.high %v3770_v58, %v3774_v57  ;;  %v3638_v41 = vld [vmem:[%s19910_s15 + $0x38f0] sm:$0xff]  ;;  %v19216_v59 = vcombine.low %v3770_v58, %v3774_v57 }
 0x760   : > { %v21913_v16 = vadd.f32 %v15893_v54, %v15853_v15  ;;  %16147 = vmatpush1.bf16.msra.mxu0 %v19104_v33  ;;  %v3762_v60 = vld [vmem:[%s19910_s15 + $0x3cd0] sm:$0xff]  ;;  %v19088_v15 = vcombine.low %v3642_v44, %v3646_v14  ;;  %v19081_v17 = vcombine.high %v3634_v2, %v3638_v41  ;;  %v19080_v54 = vcombine.low %v3634_v2, %v3638_v41 }
 0x761   : > { %v15895_v31 = vpop.f32.mrf.mxu1  ;;  %v15855_v49 = vpop.f32.mrf.mxu0  ;;  %16148 = vmatprep.subr.bf16.mxu0 %v19097_v6  ;;  %v3766_v47 = vld [vmem:[%s19910_s15 + $0x3cf0] sm:$0xff] }
 0x762   : > { %16188 = vmatpush1.bf16.msra.mxu1 %v19232_v56  ;;  %v19209_v13 = vcombine.high %v3762_v60, %v3766_v47  ;;  %v3626_v3 = vld [vmem:[%s19910_s15 + $0x3890] sm:$0xff] }
 0x763   : > { %v15896_v10 = vpop.f32.mrf.mxu1  ;;  %16189 = vmatprep.subr.bf16.mxu1 %v19225_v43  ;;  %v3630_v33 = vld [vmem:[%s19910_s15 + $0x38b0] sm:$0xff]  ;;  %v19208_v43 = vcombine.low %v3762_v60, %v3766_v47 }
 0x764   : > { %16149 = vmatpush1.bf16.msra.mxu0 %v19096_v4  ;;  %v3754_v56 = vld [vmem:[%s19910_s15 + $0x3c90] sm:$0xff]  ;;  %v19073_v44 = vcombine.high %v3626_v3, %v3630_v33  ;;  %v19072_v4 = vcombine.low %v3626_v3, %v3630_v33 }
 0x765   : > { %16150 = vmatprep.subr.bf16.mxu0 %v19089_v29  ;;  %v3758_v6 = vld [vmem:[%s19910_s15 + $0x3cb0] sm:$0xff] }
 0x766   : > { %16190 = vmatpush1.bf16.msra.mxu1 %v19224_v51  ;;  %v19201_v14 = vcombine.high %v3754_v56, %v3758_v6  ;;  %v3618_v63 = vld [vmem:[%s19910_s15 + $0x3850] sm:$0xff]  ;;  %v19200_v49 = vcombine.low %v3754_v56, %v3758_v6 }
 0x767   : > { %16191 = vmatprep.subr.bf16.mxu1 %v19217_v24  ;;  %v3622_v58 = vld [vmem:[%s19910_s15 + $0x3870] sm:$0xff] }
 0x768   : > { %16151 = vmatpush1.bf16.msra.mxu0 %v19088_v15  ;;  %v3746_v57 = vld [vmem:[%s19910_s15 + $0x3c50] sm:$0xff]  ;;  %v19065_v51 = vcombine.high %v3618_v63, %v3622_v58  ;;  %v19064_v60 = vcombine.low %v3618_v63, %v3622_v58 }
 0x769   : > { %16152 = vmatprep.subr.bf16.mxu0 %v19081_v17  ;;  %v3750_v31 = vld [vmem:[%s19910_s15 + $0x3c70] sm:$0xff] }
 0x76a   : > { %16192 = vmatpush1.bf16.msra.mxu1 %v19216_v59  ;;  %v19193_v29 = vcombine.high %v3746_v57, %v3750_v31  ;;  %v3610_v10 = vld [vmem:[%s19910_s15 + $0x3810] sm:$0xff]  ;;  %v19192_v47 = vcombine.low %v3746_v57, %v3750_v31 }
 0x76b   : > { %16193 = vmatprep.subr.bf16.mxu1 %v19209_v13  ;;  %v3614_v24 = vld [vmem:[%s19910_s15 + $0x3830] sm:$0xff] }
 0x76c   : > { %16153 = vmatpush1.bf16.msra.mxu0 %v19080_v54  ;;  %v3738_v2 = vld [vmem:[%s19910_s15 + $0x3c10] sm:$0xff]  ;;  %v19057_v15 = vcombine.high %v3610_v10, %v3614_v24  ;;  %v19056_v56 = vcombine.low %v3610_v10, %v3614_v24 }
 0x76d   : > { %16154 = vmatprep.subr.bf16.mxu0 %v19073_v44  ;;  %v3742_v41 = vld [vmem:[%s19910_s15 + $0x3c30] sm:$0xff] }
 0x76e   : > { %16194 = vmatpush1.bf16.msra.mxu1 %v19208_v43  ;;  %v19185_v59 = vcombine.high %v3738_v2, %v3742_v41  ;;  %v3730_v17 = vld [vmem:[%s19910_s15 + $0x3bd0] sm:$0xff]  ;;  %v19184_v6 = vcombine.low %v3738_v2, %v3742_v41 }
 0x76f   : > { %16195 = vmatprep.subr.bf16.mxu1 %v19201_v14  ;;  %v3734_v13 = vld [vmem:[%s19910_s15 + $0x3bf0] sm:$0xff] }
 0x770   : > { %16155 = vmatpush1.bf16.msra.mxu0 %v19072_v4  ;;  %v3858_v3 = vld [vmem:[%s19910_s15 + $0x3fd0] sm:$0xff]  ;;  %v19177_v54 = vcombine.high %v3730_v17, %v3734_v13  ;;  %v19176_v57 = vcombine.low %v3730_v17, %v3734_v13 }
 0x771   : > { %16156 = vmatprep.subr.bf16.mxu0 %v19065_v51  ;;  %v3862_v33 = vld [vmem:[%s19910_s15 + $0x3ff0] sm:$0xff] }
 0x772   : > { %16196 = vmatpush1.bf16.msra.mxu1 %v19200_v49  ;;  %v19305_v43 = vcombine.high %v3858_v3, %v3862_v33  ;;  %v3722_v44 = vld [vmem:[%s19910_s15 + $0x3b90] sm:$0xff]  ;;  %v19304_v31 = vcombine.low %v3858_v3, %v3862_v33 }
 0x773   : > { %16197 = vmatprep.subr.bf16.mxu1 %v19193_v29  ;;  %v3726_v14 = vld [vmem:[%s19910_s15 + $0x3bb0] sm:$0xff] }
 0x774   : > { %16157 = vmatpush1.bf16.msra.mxu0 %v19064_v60  ;;  %v3850_v63 = vld [vmem:[%s19910_s15 + $0x3f90] sm:$0xff]  ;;  %v19169_v4 = vcombine.high %v3722_v44, %v3726_v14  ;;  %v19168_v2 = vcombine.low %v3722_v44, %v3726_v14 }
 0x775   : > { %16158 = vmatprep.subr.bf16.mxu0 %v19057_v15  ;;  %v3854_v58 = vld [vmem:[%s19910_s15 + $0x3fb0] sm:$0xff] }
 0x776   : > { %16198 = vmatpush1.bf16.msra.mxu1 %v19192_v47  ;;  %v19297_v49 = vcombine.high %v3850_v63, %v3854_v58  ;;  %v3714_v51 = vld [vmem:[%s19910_s15 + $0x3b50] sm:$0xff]  ;;  %v19296_v41 = vcombine.low %v3850_v63, %v3854_v58 }
 0x777   : > { %16199 = vmatprep.subr.bf16.mxu1 %v19185_v59  ;;  %v3718_v29 = vld [vmem:[%s19910_s15 + $0x3b70] sm:$0xff] }
 0x778   : > { %16159 = vmatpush1.bf16.msra.mxu0 %v19056_v56  ;;  %v3842_v10 = vld [vmem:[%s19910_s15 + $0x3f50] sm:$0xff]  ;;  %v19161_v60 = vcombine.high %v3714_v51, %v3718_v29  ;;  %v19160_v3 = vcombine.low %v3714_v51, %v3718_v29 }
 0x779   : > { %16160 = vmatprep.subr.bf16.mxu0 %v19177_v54  ;;  %v3846_v24 = vld [vmem:[%s19910_s15 + $0x3f70] sm:$0xff] }
 0x77a   : > { %16200 = vmatpush1.bf16.msra.mxu1 %v19184_v6  ;;  %v19289_v47 = vcombine.high %v3842_v10, %v3846_v24  ;;  %v3706_v15 = vld [vmem:[%s19910_s15 + $0x3b10] sm:$0xff]  ;;  %v19288_v33 = vcombine.low %v3842_v10, %v3846_v24 }
 0x77b   : > { %16201 = vmatprep.subr.bf16.mxu1 %v19305_v43  ;;  %v3710_v59 = vld [vmem:[%s19910_s15 + $0x3b30] sm:$0xff] }
 0x77c   : > { %16161 = vmatpush2.bf16.msra.mxu0 %v19176_v57  ;;  %v3834_v17 = vld [vmem:[%s19910_s15 + $0x3f10] sm:$0xff]  ;;  %v19153_v56 = vcombine.high %v3706_v15, %v3710_v59  ;;  %v19152_v63 = vcombine.low %v3706_v15, %v3710_v59 }
 0x77d   : > { %16162 = vmatprep.subr.bf16.mxu0 %v19169_v4  ;;  %v3838_v13 = vld [vmem:[%s19910_s15 + $0x3f30] sm:$0xff] }
 0x77e   : > { %16202 = vmatpush2.bf16.msra.mxu1 %v19304_v31  ;;  %v19281_v6 = vcombine.high %v3834_v17, %v3838_v13  ;;  %v3698_v54 = vld [vmem:[%s19910_s15 + $0x3ad0] sm:$0xff]  ;;  %v19280_v58 = vcombine.low %v3834_v17, %v3838_v13 }
 0x77f   : > { %16203 = vmatprep.subr.bf16.mxu1 %v19297_v49  ;;  %v3702_v43 = vld [vmem:[%s19910_s15 + $0x3af0] sm:$0xff] }
 0x780   : > { %16163 = vmatpush2.bf16.msra.mxu0 %v19168_v2  ;;  %v3826_v44 = vld [vmem:[%s19910_s15 + $0x3ed0] sm:$0xff]  ;;  %v19145_v57 = vcombine.high %v3698_v54, %v3702_v43  ;;  %v19144_v10 = vcombine.low %v3698_v54, %v3702_v43 }
 0x781   : > { %16164 = vmatprep.subr.bf16.mxu0 %v19161_v60  ;;  %v3830_v14 = vld [vmem:[%s19910_s15 + $0x3ef0] sm:$0xff] }
 0x782   : > { %16204 = vmatpush2.bf16.msra.mxu1 %v19296_v41  ;;  %v19273_v31 = vcombine.high %v3826_v44, %v3830_v14  ;;  %v3690_v4 = vld [vmem:[%s19910_s15 + $0x3a90] sm:$0xff]  ;;  %v19272_v24 = vcombine.low %v3826_v44, %v3830_v14 }
 0x783   : > { %16205 = vmatprep.subr.bf16.mxu1 %v19289_v47  ;;  %v3694_v49 = vld [vmem:[%s19910_s15 + $0x3ab0] sm:$0xff] }
 0x784   : > { %16165 = vmatpush2.bf16.msra.mxu0 %v19160_v3  ;;  %v3818_v51 = vld [vmem:[%s19910_s15 + $0x3e90] sm:$0xff]  ;;  %v19137_v2 = vcombine.high %v3690_v4, %v3694_v49  ;;  %v19136_v17 = vcombine.low %v3690_v4, %v3694_v49  ;;  %v2003_v4 = vld [vmem:[%s19910_s15 + $0x5d8] sm:$0xff] }
 0x785   : > { %16166 = vmatprep.subr.bf16.mxu0 %v19153_v56  ;;  %v3822_v29 = vld [vmem:[%s19910_s15 + $0x3eb0] sm:$0xff]  ;;  %v2007_v49 = vld [vmem:[%s19910_s15 + $0x5f8] sm:$0xff] }
 0x786   : > { %16206 = vmatpush2.bf16.msra.mxu1 %v19288_v33  ;;  %v19265_v41 = vcombine.high %v3818_v51, %v3822_v29  ;;  %v3682_v60 = vld [vmem:[%s19910_s15 + $0x3a50] sm:$0xff]  ;;  %v19264_v13 = vcombine.low %v3818_v51, %v3822_v29 }
 0x787   : > { %16207 = vmatprep.subr.bf16.mxu1 %v19281_v6  ;;  %v3686_v47 = vld [vmem:[%s19910_s15 + $0x3a70] sm:$0xff] }
 0x788   : > { %16167 = vmatpush2.bf16.msra.mxu0 %v19152_v63  ;;  %v3810_v15 = vld [vmem:[%s19910_s15 + $0x3e50] sm:$0xff]  ;;  %v19129_v3 = vcombine.high %v3682_v60, %v3686_v47  ;;  %v19128_v44 = vcombine.low %v3682_v60, %v3686_v47  ;;  %v1995_v60 = vld [vmem:[%s19910_s15 + $0x598] sm:$0xff] }
 0x789   : > { %16168 = vmatprep.subr.bf16.mxu0 %v19145_v57  ;;  %v3814_v59 = vld [vmem:[%s19910_s15 + $0x3e70] sm:$0xff]  ;;  %v1875_v57 = vld [vmem:[%s19910_s15 + $0x1d8] sm:$0xff] }
 0x78a   : > { %16208 = vmatpush2.bf16.msra.mxu1 %v19280_v58  ;;  %v19257_v33 = vcombine.high %v3810_v15, %v3814_v59  ;;  %v3674_v56 = vld [vmem:[%s19910_s15 + $0x3a10] sm:$0xff]  ;;  %v19256_v14 = vcombine.low %v3810_v15, %v3814_v59  ;;  %v1999_v47 = vld [vmem:[%s19910_s15 + $0x5b8] sm:$0xff]  ;;  %v17450_v59 = vcombine.low %v2003_v4, %v2007_v49 }
 0x78b   : > { %16209 = vmatprep.subr.bf16.mxu1 %v19273_v31  ;;  %v3678_v6 = vld [vmem:[%s19910_s15 + $0x3a30] sm:$0xff]  ;;  %v1879_v31 = vld [vmem:[%s19910_s15 + $0x1f8] sm:$0xff] }
 0x78c   : > { %16169 = vmatpush2.bf16.msra.mxu0 %v19144_v10  ;;  %v3802_v54 = vld [vmem:[%s19910_s15 + $0x3e10] sm:$0xff]  ;;  %v19121_v63 = vcombine.high %v3674_v56, %v3678_v6  ;;  %v19120_v51 = vcombine.low %v3674_v56, %v3678_v6  ;;  %v17323_v10 = vcombine.high %v1875_v57, %v1879_v31  ;;  %v17322_v15 = vcombine.low %v1875_v57, %v1879_v31  ;;  %v1987_v6 = vld [vmem:[%s19910_s15 + $0x558] sm:$0xff] }
 0x78d   : > { %16170 = vmatprep.subr.bf16.mxu0 %v19137_v2  ;;  %v3806_v43 = vld [vmem:[%s19910_s15 + $0x3e30] sm:$0xff]  ;;  %v1867_v2 = vld [vmem:[%s19910_s15 + $0x198] sm:$0xff] }
 0x78e   : > { %16210 = vmatpush2.bf16.msra.mxu1 %v19272_v24  ;;  %v19249_v58 = vcombine.high %v3802_v54, %v3806_v43  ;;  %v19248_v29 = vcombine.low %v3802_v54, %v3806_v43  ;;  %v17451_v24 = vcombine.high %v2003_v4, %v2007_v49  ;;  %v1991_v54 = vld [vmem:[%s19910_s15 + $0x578] sm:$0xff] }
 0x78f   : > { %16211 = vmatprep.subr.bf16.mxu1 %v19265_v41  ;;  %v1871_v41 = vld [vmem:[%s19910_s15 + $0x1b8] sm:$0xff] }
 0x790   : > { %16171 = vmatpush2.bf16.msra.mxu0 %v19136_v17  ;;  %v17315_v17 = vcombine.high %v1867_v2, %v1871_v41 }
 0x791   : > { %16172 = vmatprep.subr.bf16.mxu0 %v19129_v3  ;;  %v1859_v3 = vld [vmem:[%s19910_s15 + $0x158] sm:$0xff] }
 0x792   : > { %16212 = vmatpush2.bf16.msra.mxu1 %v19264_v13  ;;  %v17443_v13 = vcombine.high %v1995_v60, %v1999_v47 }
 0x793   : > { %16213 = vmatprep.subr.bf16.mxu1 %v19257_v33  ;;  %v1863_v33 = vld [vmem:[%s19910_s15 + $0x178] sm:$0xff] }
 0x794   : > { %16173 = vmatpush2.bf16.msra.mxu0 %v19128_v44  ;;  %v17307_v57 = vcombine.high %v1859_v3, %v1863_v33 }
 0x795   : > { %16174 = vmatprep.subr.bf16.mxu0 %v19121_v63 }
 0x796   : > { %16214 = vmatpush2.bf16.msra.mxu1 %v19256_v14  ;;  %v17314_v14 = vcombine.low %v1867_v2, %v1871_v41  ;;  %v1983_v2 = vld [vmem:[%s19910_s15 + $0x538] sm:$0xff] }
 0x797   : > { %16215 = vmatprep.subr.bf16.mxu1 %v19249_v58  ;;  %v17442_v58 = vcombine.low %v1995_v60, %v1999_v47 }
 0x798   : > { %16175 = vmatpush2.bf16.msra.mxu0 %v19120_v51  ;;  %v1851_v51 = vld [vmem:[%s19910_s15 + $0x118] sm:$0xff] }
 0x799   : > { %16226 = vmatprep.subr.bf16.mxu0 %v17323_v10 }
 0x79a   : > { %16216 = vmatpush2.bf16.msra.mxu1 %v19248_v29  ;;  %v1855_v29 = vld [vmem:[%s19910_s15 + $0x138] sm:$0xff] }
 0x79b   : > { %16267 = vmatprep.subr.bf16.mxu1 %v17451_v24  ;;  %v15932_v56 = vpop.f32.mrf.mxu0  ;;  %16177 = vmatmul.mubr.bf16.vlgmr.msra.gmra.mxu0 %v20762_v30  ;;  %v1979_v24 = vld [vmem:[%s19910_s15 + $0x518] sm:$0xff] }
 0x79c   : > { %v15933_v43 = vadd.f32 %v15932_v56, %v21904_v1  ;;  %16227 = vmatpush1.bf16.msra.mxu0 %v17322_v15  ;;  %v17435_v1 = vcombine.high %v1987_v6, %v1991_v54  ;;  %16258 = vmatprep.mubr.bf16.mxu0 %v20065_v9  ;;  %v17434_v15 = vcombine.low %v1987_v6, %v1991_v54  ;;  %v1971_v56 = vld [vmem:[%s19910_s15 + $0x4d8] sm:$0xff] }
 0x79d   : > { %v15973_v44 = vpop.f32.mrf.mxu1  ;;  %16218 = vmatmul.mubr.bf16.vlgmr.msra.gmra.mxu1 %v20768_v32  ;;  %v15934_v63 = vpop.f32.mrf.mxu0  ;;  %16228 = vmatprep.subr.bf16.mxu0 %v17315_v17  ;;  %v17427_v17 = vcombine.high %v1979_v24, %v1983_v2  ;;  %v1835_v54 = vld [vmem:[%s19910_s15 + $0x98] sm:$0xff] }
 0x79e   : > { %16268 = vmatpush1.bf16.msra.mxu1 %v17450_v59  ;;  %v21978_v31 = vadd.f32 %v15973_v44, %v15933_v43  ;;  %v15935_v4 = vadd.f32 %v15934_v63, %v21913_v16  ;;  %16299 = vmatprep.mubr.bf16.mxu1 %v20069_v12  ;;  %v17306_v16 = vcombine.low %v1859_v3, %v1863_v33  ;;  %v1847_v12 = vld [vmem:[%s19910_s15 + $0xf8] sm:$0xff] }
 0x79f   : > { %v15975_v49 = vpop.f32.mrf.mxu1  ;;  %16269 = vmatprep.subr.bf16.mxu1 %v17443_v13  ;;  %v15936_v10 = vpop.f32.mrf.mxu0  ;;  %v17299_v59 = vcombine.high %v1851_v51, %v1855_v29  ;;  %v1843_v13 = vld [vmem:[%s19910_s15 + $0xd8] sm:$0xff]  ;;  %v17298_v44 = vcombine.low %v1851_v51, %v1855_v29  ;;  %v17426_v3 = vcombine.low %v1979_v24, %v1983_v2 }
 0x7a0   : > { %v21987_v41 = vadd.f32 %v15975_v49, %v15935_v4  ;;  %16229 = vmatpush1.bf16.msra.mxu0 %v17314_v14  ;;  %v1975_v43 = vld [vmem:[%s19910_s15 + $0x4f8] sm:$0xff]  ;;  %v17291_v33 = vcombine.high %v1843_v13, %v1847_v12 }
 0x7a1   : > { %v15977_v60 = vpop.f32.mrf.mxu1  ;;  %v15937_v47 = vpop.f32.mrf.mxu0  ;;  %16230 = vmatprep.subr.bf16.mxu0 %v17307_v57  ;;  %v17419_v6 = vcombine.high %v1971_v56, %v1975_v43  ;;  %v1839_v14 = vld [vmem:[%s19910_s15 + $0xb8] sm:$0xff]  ;;  %v17290_v57 = vcombine.low %v1843_v13, %v1847_v12  ;;  %v17418_v4 = vcombine.low %v1971_v56, %v1975_v43 }
 0x7a2   : > { %16270 = vmatpush1.bf16.msra.mxu1 %v17442_v58  ;;  %v1963_v63 = vld [vmem:[%s19910_s15 + $0x498] sm:$0xff]  ;;  %v17283_v49 = vcombine.high %v1835_v54, %v1839_v14  ;;  %v17282_v2 = vcombine.low %v1835_v54, %v1839_v14 }
 0x7a3   : > { %v15978_v9 = vpop.f32.mrf.mxu1  ;;  %16271 = vmatprep.subr.bf16.mxu1 %v17435_v1  ;;  %v1967_v58 = vld [vmem:[%s19910_s15 + $0x4b8] sm:$0xff] }
 0x7a4   : > { %16231 = vmatpush1.bf16.msra.mxu0 %v17306_v16  ;;  %v17411_v1 = vcombine.high %v1963_v63, %v1967_v58  ;;  %v1827_v51 = vld [vmem:[%s19910_s15 + $0x58] sm:$0xff]  ;;  %v17410_v60 = vcombine.low %v1963_v63, %v1967_v58 }
 0x7a5   : > { %16232 = vmatprep.subr.bf16.mxu0 %v17299_v59  ;;  %v1831_v29 = vld [vmem:[%s19910_s15 + $0x78] sm:$0xff] }
 0x7a6   : > { %16272 = vmatpush1.bf16.msra.mxu1 %v17434_v15  ;;  %v1955_v10 = vld [vmem:[%s19910_s15 + $0x458] sm:$0xff]  ;;  %v17275_v16 = vcombine.high %v1827_v51, %v1831_v29  ;;  %v17274_v13 = vcombine.low %v1827_v51, %v1831_v29 }
 0x7a7   : > { %16273 = vmatprep.subr.bf16.mxu1 %v17427_v17  ;;  %v1959_v24 = vld [vmem:[%s19910_s15 + $0x478] sm:$0xff] }
 0x7a8   : > { %16233 = vmatpush1.bf16.msra.mxu0 %v17298_v44  ;;  %v17403_v47 = vcombine.high %v1955_v10, %v1959_v24  ;;  %v1819_v15 = vld [vmem:[%s19910_s15 + $0x18] sm:$0xff]  ;;  %v17402_v12 = vcombine.low %v1955_v10, %v1959_v24 }
 0x7a9   : > { %16234 = vmatprep.subr.bf16.mxu0 %v17291_v33  ;;  %v1823_v59 = vld [vmem:[%s19910_s15 + $0x38] sm:$0xff] }
 0x7aa   : > { %16274 = vmatpush1.bf16.msra.mxu1 %v17426_v3  ;;  %v1947_v9 = vld [vmem:[%s19910_s15 + $0x418] sm:$0xff]  ;;  %v17267_v56 = vcombine.high %v1819_v15, %v1823_v59  ;;  %v17266_v54 = vcombine.low %v1819_v15, %v1823_v59 }
 0x7ab   : > { %16275 = vmatprep.subr.bf16.mxu1 %v17419_v6  ;;  %v1951_v17 = vld [vmem:[%s19910_s15 + $0x438] sm:$0xff] }
 0x7ac   : > { %16235 = vmatpush1.bf16.msra.mxu0 %v17290_v57  ;;  %v17395_v43 = vcombine.high %v1947_v9, %v1951_v17  ;;  %v1939_v44 = vld [vmem:[%s19910_s15 + $0x3d8] sm:$0xff]  ;;  %v17394_v14 = vcombine.low %v1947_v9, %v1951_v17 }
 0x7ad   : > { %16236 = vmatprep.subr.bf16.mxu0 %v17283_v49  ;;  %v1943_v3 = vld [vmem:[%s19910_s15 + $0x3f8] sm:$0xff] }
 0x7ae   : > { %16276 = vmatpush1.bf16.msra.mxu1 %v17418_v4  ;;  %v2067_v33 = vld [vmem:[%s19910_s15 + $0x7d8] sm:$0xff]  ;;  %v17387_v63 = vcombine.high %v1939_v44, %v1943_v3  ;;  %v17386_v51 = vcombine.low %v1939_v44, %v1943_v3 }
 0x7af   : > { %16277 = vmatprep.subr.bf16.mxu1 %v17411_v1  ;;  %v2071_v6 = vld [vmem:[%s19910_s15 + $0x7f8] sm:$0xff] }
 0x7b0   : > { %16237 = vmatpush1.bf16.msra.mxu0 %v17282_v2  ;;  %v17515_v58 = vcombine.high %v2067_v33, %v2071_v6  ;;  %v1931_v57 = vld [vmem:[%s19910_s15 + $0x398] sm:$0xff]  ;;  %v17514_v29 = vcombine.low %v2067_v33, %v2071_v6 }
 0x7b1   : > { %16238 = vmatprep.subr.bf16.mxu0 %v17275_v16  ;;  %v1935_v4 = vld [vmem:[%s19910_s15 + $0x3b8] sm:$0xff] }
 0x7b2   : > { %16278 = vmatpush1.bf16.msra.mxu1 %v17410_v60  ;;  %v2059_v49 = vld [vmem:[%s19910_s15 + $0x798] sm:$0xff]  ;;  %v17379_v10 = vcombine.high %v1931_v57, %v1935_v4  ;;  %v17378_v15 = vcombine.low %v1931_v57, %v1935_v4 }
 0x7b3   : > { %16279 = vmatprep.subr.bf16.mxu1 %v17403_v47  ;;  %v2063_v1 = vld [vmem:[%s19910_s15 + $0x7b8] sm:$0xff] }
 0x7b4   : > { %16239 = vmatpush1.bf16.msra.mxu0 %v17274_v13  ;;  %v17507_v24 = vcombine.high %v2059_v49, %v2063_v1  ;;  %v1923_v2 = vld [vmem:[%s19910_s15 + $0x358] sm:$0xff]  ;;  %v17506_v59 = vcombine.low %v2059_v49, %v2063_v1 }
 0x7b5   : > { %16240 = vmatprep.subr.bf16.mxu0 %v17267_v56  ;;  %v1927_v60 = vld [vmem:[%s19910_s15 + $0x378] sm:$0xff] }
 0x7b6   : > { %16280 = vmatpush1.bf16.msra.mxu1 %v17402_v12  ;;  %v2051_v16 = vld [vmem:[%s19910_s15 + $0x758] sm:$0xff]  ;;  %v17371_v9 = vcombine.high %v1923_v2, %v1927_v60  ;;  %v17370_v44 = vcombine.low %v1923_v2, %v1927_v60 }
 0x7b7   : > { %16281 = vmatprep.subr.bf16.mxu1 %v17395_v43  ;;  %v2055_v47 = vld [vmem:[%s19910_s15 + $0x778] sm:$0xff] }
 0x7b8   : > { %16241 = vmatpush1.bf16.msra.mxu0 %v17266_v54  ;;  %v17499_v17 = vcombine.high %v2051_v16, %v2055_v47  ;;  %v1915_v13 = vld [vmem:[%s19910_s15 + $0x318] sm:$0xff]  ;;  %v17498_v3 = vcombine.low %v2051_v16, %v2055_v47 }
 0x7b9   : > { %16242 = vmatprep.subr.bf16.mxu0 %v17387_v63  ;;  %v1919_v12 = vld [vmem:[%s19910_s15 + $0x338] sm:$0xff] }
 0x7ba   : > { %16282 = vmatpush1.bf16.msra.mxu1 %v17394_v14  ;;  %v2043_v56 = vld [vmem:[%s19910_s15 + $0x718] sm:$0xff]  ;;  %v17363_v33 = vcombine.high %v1915_v13, %v1919_v12  ;;  %v17362_v57 = vcombine.low %v1915_v13, %v1919_v12 }
 0x7bb   : > { %16283 = vmatprep.subr.bf16.mxu1 %v17515_v58  ;;  %v2047_v43 = vld [vmem:[%s19910_s15 + $0x738] sm:$0xff] }
 0x7bc   : > { %16243 = vmatpush2.bf16.msra.mxu0 %v17386_v51  ;;  %v17491_v6 = vcombine.high %v2043_v56, %v2047_v43  ;;  %v1907_v54 = vld [vmem:[%s19910_s15 + $0x2d8] sm:$0xff]  ;;  %v17490_v4 = vcombine.low %v2043_v56, %v2047_v43 }
 0x7bd   : > { %16244 = vmatprep.subr.bf16.mxu0 %v17379_v10  ;;  %v1911_v14 = vld [vmem:[%s19910_s15 + $0x2f8] sm:$0xff] }
 0x7be   : > { %16284 = vmatpush2.bf16.msra.mxu1 %v17514_v29  ;;  %v2035_v63 = vld [vmem:[%s19910_s15 + $0x6d8] sm:$0xff]  ;;  %v17355_v49 = vcombine.high %v1907_v54, %v1911_v14  ;;  %v17354_v2 = vcombine.low %v1907_v54, %v1911_v14 }
 0x7bf   : > { %16285 = vmatprep.subr.bf16.mxu1 %v17507_v24  ;;  %v2039_v58 = vld [vmem:[%s19910_s15 + $0x6f8] sm:$0xff] }
 0x7c0   : > { %16245 = vmatpush2.bf16.msra.mxu0 %v17378_v15  ;;  %v17483_v1 = vcombine.high %v2035_v63, %v2039_v58  ;;  %v1899_v51 = vld [vmem:[%s19910_s15 + $0x298] sm:$0xff]  ;;  %v17482_v60 = vcombine.low %v2035_v63, %v2039_v58 }
 0x7c1   : > { %16246 = vmatprep.subr.bf16.mxu0 %v17371_v9  ;;  %v1903_v29 = vld [vmem:[%s19910_s15 + $0x2b8] sm:$0xff] }
 0x7c2   : > { %16286 = vmatpush2.bf16.msra.mxu1 %v17506_v59  ;;  %v2027_v10 = vld [vmem:[%s19910_s15 + $0x698] sm:$0xff]  ;;  %v17347_v16 = vcombine.high %v1899_v51, %v1903_v29  ;;  %v17346_v13 = vcombine.low %v1899_v51, %v1903_v29 }
 0x7c3   : > { %16287 = vmatprep.subr.bf16.mxu1 %v17499_v17  ;;  %v2031_v24 = vld [vmem:[%s19910_s15 + $0x6b8] sm:$0xff] }
 0x7c4   : > { %16247 = vmatpush2.bf16.msra.mxu0 %v17370_v44  ;;  %v17475_v47 = vcombine.high %v2027_v10, %v2031_v24  ;;  %v1891_v15 = vld [vmem:[%s19910_s15 + $0x258] sm:$0xff]  ;;  %v17474_v12 = vcombine.low %v2027_v10, %v2031_v24 }
 0x7c5   : > { %16248 = vmatprep.subr.bf16.mxu0 %v17363_v33  ;;  %v1895_v59 = vld [vmem:[%s19910_s15 + $0x278] sm:$0xff] }
 0x7c6   : > { %16288 = vmatpush2.bf16.msra.mxu1 %v17498_v3  ;;  %v2019_v9 = vld [vmem:[%s19910_s15 + $0x658] sm:$0xff]  ;;  %v17339_v56 = vcombine.high %v1891_v15, %v1895_v59  ;;  %v17338_v54 = vcombine.low %v1891_v15, %v1895_v59 }
 0x7c7   : > { %16289 = vmatprep.subr.bf16.mxu1 %v17491_v6  ;;  %v2023_v17 = vld [vmem:[%s19910_s15 + $0x678] sm:$0xff] }
 0x7c8   : > { %16249 = vmatpush2.bf16.msra.mxu0 %v17362_v57  ;;  %v17467_v43 = vcombine.high %v2019_v9, %v2023_v17  ;;  %v1883_v44 = vld [vmem:[%s19910_s15 + $0x218] sm:$0xff]  ;;  %v17466_v14 = vcombine.low %v2019_v9, %v2023_v17 }
 0x7c9   : > { %16250 = vmatprep.subr.bf16.mxu0 %v17355_v49  ;;  %v1887_v3 = vld [vmem:[%s19910_s15 + $0x238] sm:$0xff] }
 0x7ca   : > { %16290 = vmatpush2.bf16.msra.mxu1 %v17490_v4  ;;  %v2011_v33 = vld [vmem:[%s19910_s15 + $0x618] sm:$0xff]  ;;  %v17331_v63 = vcombine.high %v1883_v44, %v1887_v3  ;;  %v17330_v51 = vcombine.low %v1883_v44, %v1887_v3 }
 0x7cb   : > { %16291 = vmatprep.subr.bf16.mxu1 %v17483_v1  ;;  %v2015_v6 = vld [vmem:[%s19910_s15 + $0x638] sm:$0xff] }
 0x7cc   : > { %16251 = vmatpush2.bf16.msra.mxu0 %v17354_v2  ;;  %v17459_v58 = vcombine.high %v2011_v33, %v2015_v6  ;;  %v2131_v57 = vld [vmem:[%s19910_s15 + $0x9d8] sm:$0xff]  ;;  %v17458_v29 = vcombine.low %v2011_v33, %v2015_v6 }
 0x7cd   : > { %16252 = vmatprep.subr.bf16.mxu0 %v17347_v16  ;;  %v2135_v4 = vld [vmem:[%s19910_s15 + $0x9f8] sm:$0xff] }
 0x7ce   : > { %16292 = vmatpush2.bf16.msra.mxu1 %v17482_v60  ;;  %v2259_v49 = vld [vmem:[%s19910_s15 + $0xdd8] sm:$0xff]  ;;  %v17579_v10 = vcombine.high %v2131_v57, %v2135_v4  ;;  %v17578_v15 = vcombine.low %v2131_v57, %v2135_v4 }
 0x7cf   : > { %16293 = vmatprep.subr.bf16.mxu1 %v17475_v47  ;;  %v2263_v1 = vld [vmem:[%s19910_s15 + $0xdf8] sm:$0xff] }
 0x7d0   : > { %16253 = vmatpush2.bf16.msra.mxu0 %v17346_v13  ;;  %v17707_v24 = vcombine.high %v2259_v49, %v2263_v1  ;;  %v2123_v2 = vld [vmem:[%s19910_s15 + $0x998] sm:$0xff]  ;;  %v17706_v59 = vcombine.low %v2259_v49, %v2263_v1 }
 0x7d1   : > { %16254 = vmatprep.subr.bf16.mxu0 %v17339_v56  ;;  %v2127_v60 = vld [vmem:[%s19910_s15 + $0x9b8] sm:$0xff] }
 0x7d2   : > { %16294 = vmatpush2.bf16.msra.mxu1 %v17474_v12  ;;  %v2251_v16 = vld [vmem:[%s19910_s15 + $0xd98] sm:$0xff]  ;;  %v17571_v9 = vcombine.high %v2123_v2, %v2127_v60  ;;  %v17570_v6 = vcombine.low %v2123_v2, %v2127_v60 }
 0x7d3   : > { %16295 = vmatprep.subr.bf16.mxu1 %v17467_v43  ;;  %v2255_v47 = vld [vmem:[%s19910_s15 + $0xdb8] sm:$0xff] }
 0x7d4   : > { %16255 = vmatpush2.bf16.msra.mxu0 %v17338_v54  ;;  %v17699_v17 = vcombine.high %v2251_v16, %v2255_v47  ;;  %v2115_v13 = vld [vmem:[%s19910_s15 + $0x958] sm:$0xff] }
 0x7d5   : > { %16256 = vmatprep.subr.bf16.mxu0 %v17331_v63  ;;  %v2119_v12 = vld [vmem:[%s19910_s15 + $0x978] sm:$0xff] }
 0x7d6   : > { %16296 = vmatpush2.bf16.msra.mxu1 %v17466_v14  ;;  %v2243_v43 = vld [vmem:[%s19910_s15 + $0xd58] sm:$0xff]  ;;  %v17698_v14 = vcombine.low %v2251_v16, %v2255_v47  ;;  %v17563_v63 = vcombine.high %v2115_v13, %v2119_v12 }
 0x7d7   : > { %16297 = vmatprep.subr.bf16.mxu1 %v17459_v58  ;;  %v2247_v44 = vld [vmem:[%s19910_s15 + $0xd78] sm:$0xff] }
 0x7d8   : > { %16257 = vmatpush2.bf16.msra.mxu0 %v17330_v51  ;;  %v2107_v4 = vld [vmem:[%s19910_s15 + $0x918] sm:$0xff]  ;;  %v17690_v2 = vcombine.low %v2243_v43, %v2247_v44 }
 0x7d9   : > { %16308 = vmatprep.subr.bf16.mxu0 %v17579_v10  ;;  %v2111_v49 = vld [vmem:[%s19910_s15 + $0x938] sm:$0xff] }
 0x7da   : > { %16298 = vmatpush2.bf16.msra.mxu1 %v17458_v29  ;;  %v2235_v1 = vld [vmem:[%s19910_s15 + $0xd18] sm:$0xff]  ;;  %v17555_v60 = vcombine.high %v2107_v4, %v2111_v49 }
 0x7db   : > { %16349 = vmatprep.subr.bf16.mxu1 %v17707_v24  ;;  %v16014_v56 = vpop.f32.mrf.mxu0  ;;  %16259 = vmatmul.mubr.bf16.vlgmr.msra.gmra.mxu0 %v20115_v35  ;;  %v2239_v51 = vld [vmem:[%s19910_s15 + $0xd38] sm:$0xff] }
 0x7dc   : > { %v16015_v3 = vadd.f32 %v16014_v56, %v21978_v31  ;;  %16309 = vmatpush1.bf16.msra.mxu0 %v17578_v15  ;;  %v17691_v31 = vcombine.high %v2243_v43, %v2247_v44  ;;  %16340 = vmatprep.mubr.bf16.mxu0 %v20131_v46  ;;  %v17683_v16 = vcombine.high %v2235_v1, %v2239_v51  ;;  %v2099_v47 = vld [vmem:[%s19910_s15 + $0x8d8] sm:$0xff] }
 0x7dd   : > { %v16055_v33 = vpop.f32.mrf.mxu1  ;;  %16300 = vmatmul.mubr.bf16.vlgmr.msra.gmra.mxu1 %v20123_v39  ;;  %v16016_v54 = vpop.f32.mrf.mxu0  ;;  %16310 = vmatprep.subr.bf16.mxu0 %v17571_v9  ;;  %v2227_v15 = vld [vmem:[%s19910_s15 + $0xcd8] sm:$0xff]  ;;  %v17554_v9 = vcombine.low %v2107_v4, %v2111_v49 }
 0x7de   : > { %16350 = vmatpush1.bf16.msra.mxu1 %v17706_v59  ;;  %v22052_v58 = vadd.f32 %v16055_v33, %v16015_v3  ;;  %v16017_v35 = vadd.f32 %v16016_v54, %v21987_v41  ;;  %16381 = vmatprep.mubr.bf16.mxu1 %v20138_v7  ;;  %v17562_v41 = vcombine.low %v2115_v13, %v2119_v12  ;;  %v2103_v7 = vld [vmem:[%s19910_s15 + $0x8f8] sm:$0xff] }
 0x7df   : > { %v16057_v57 = vpop.f32.mrf.mxu1  ;;  %16351 = vmatprep.subr.bf16.mxu1 %v17699_v17  ;;  %v16018_v39 = vpop.f32.mrf.mxu0  ;;  %v2231_v59 = vld [vmem:[%s19910_s15 + $0xcf8] sm:$0xff]  ;;  %v17682_v17 = vcombine.low %v2235_v1, %v2239_v51  ;;  %v17547_v13 = vcombine.high %v2099_v47, %v2103_v7  ;;  %v17546_v33 = vcombine.low %v2099_v47, %v2103_v7 }
 0x7e0   : > { %v22061_v29 = vadd.f32 %v16057_v57, %v16017_v35  ;;  %16311 = vmatpush1.bf16.msra.mxu0 %v17570_v6  ;;  %v17675_v12 = vcombine.high %v2227_v15, %v2231_v59  ;;  %v2091_v56 = vld [vmem:[%s19910_s15 + $0x898] sm:$0xff]  ;;  %v17674_v6 = vcombine.low %v2227_v15, %v2231_v59 }
 0x7e1   : > { %v16059_v10 = vpop.f32.mrf.mxu1  ;;  %v16019_v24 = vpop.f32.mrf.mxu0  ;;  %16312 = vmatprep.subr.bf16.mxu0 %v17563_v63  ;;  %v2095_v43 = vld [vmem:[%s19910_s15 + $0x8b8] sm:$0xff] }
 0x7e2   : > { %16352 = vmatpush1.bf16.msra.mxu1 %v17698_v14  ;;  %v2219_v44 = vld [vmem:[%s19910_s15 + $0xc98] sm:$0xff]  ;;  %v17539_v54 = vcombine.high %v2091_v56, %v2095_v43  ;;  %v17538_v4 = vcombine.low %v2091_v56, %v2095_v43 }
 0x7e3   : > { %v16060_v46 = vpop.f32.mrf.mxu1  ;;  %16353 = vmatprep.subr.bf16.mxu1 %v17691_v31  ;;  %v2223_v3 = vld [vmem:[%s19910_s15 + $0xcb8] sm:$0xff] }
 0x7e4   : > { %16313 = vmatpush1.bf16.msra.mxu0 %v17562_v41  ;;  %v17667_v14 = vcombine.high %v2219_v44, %v2223_v3  ;;  %v2083_v63 = vld [vmem:[%s19910_s15 + $0x858] sm:$0xff]  ;;  %v17666_v49 = vcombine.low %v2219_v44, %v2223_v3 }
 0x7e5   : > { %16314 = vmatprep.subr.bf16.mxu0 %v17555_v60  ;;  %v2087_v35 = vld [vmem:[%s19910_s15 + $0x878] sm:$0xff] }
 0x7e6   : > { %16354 = vmatpush1.bf16.msra.mxu1 %v17690_v2  ;;  %v2211_v57 = vld [vmem:[%s19910_s15 + $0xc58] sm:$0xff]  ;;  %v17531_v39 = vcombine.high %v2083_v63, %v2087_v35  ;;  %v17530_v2 = vcombine.low %v2083_v63, %v2087_v35 }
 0x7e7   : > { %16355 = vmatprep.subr.bf16.mxu1 %v17683_v16  ;;  %v2215_v31 = vld [vmem:[%s19910_s15 + $0xc78] sm:$0xff] }
 0x7e8   : > { %16315 = vmatpush1.bf16.msra.mxu0 %v17554_v9  ;;  %v17659_v1 = vcombine.high %v2211_v57, %v2215_v31  ;;  %v2075_v51 = vld [vmem:[%s19910_s15 + $0x818] sm:$0xff]  ;;  %v17658_v60 = vcombine.low %v2211_v57, %v2215_v31 }
 0x7e9   : > { %16316 = vmatprep.subr.bf16.mxu0 %v17547_v13  ;;  %v2079_v10 = vld [vmem:[%s19910_s15 + $0x838] sm:$0xff] }
 0x7ea   : > { %16356 = vmatpush1.bf16.msra.mxu1 %v17682_v17  ;;  %v2203_v41 = vld [vmem:[%s19910_s15 + $0xc18] sm:$0xff]  ;;  %v17523_v46 = vcombine.high %v2075_v51, %v2079_v10  ;;  %v17522_v9 = vcombine.low %v2075_v51, %v2079_v10 }
 0x7eb   : > { %16357 = vmatprep.subr.bf16.mxu1 %v17675_v12  ;;  %v2207_v24 = vld [vmem:[%s19910_s15 + $0xc38] sm:$0xff] }
 0x7ec   : > { %16317 = vmatpush1.bf16.msra.mxu0 %v17546_v33  ;;  %v17651_v16 = vcombine.high %v2203_v41, %v2207_v24  ;;  %v2195_v47 = vld [vmem:[%s19910_s15 + $0xbd8] sm:$0xff]  ;;  %v17650_v17 = vcombine.low %v2203_v41, %v2207_v24 }
 0x7ed   : > { %16318 = vmatprep.subr.bf16.mxu0 %v17539_v54  ;;  %v2199_v7 = vld [vmem:[%s19910_s15 + $0xbf8] sm:$0xff] }
 0x7ee   : > { %16358 = vmatpush1.bf16.msra.mxu1 %v17674_v6  ;;  %v2323_v15 = vld [vmem:[%s19910_s15 + $0xfd8] sm:$0xff]  ;;  %v17643_v13 = vcombine.high %v2195_v47, %v2199_v7  ;;  %v17642_v33 = vcombine.low %v2195_v47, %v2199_v7 }
 0x7ef   : > { %16359 = vmatprep.subr.bf16.mxu1 %v17667_v14  ;;  %v2327_v59 = vld [vmem:[%s19910_s15 + $0xff8] sm:$0xff] }
 0x7f0   : > { %16319 = vmatpush1.bf16.msra.mxu0 %v17538_v4  ;;  %v17771_v12 = vcombine.high %v2323_v15, %v2327_v59  ;;  %v2187_v56 = vld [vmem:[%s19910_s15 + $0xb98] sm:$0xff]  ;;  %v17770_v6 = vcombine.low %v2323_v15, %v2327_v59 }
 0x7f1   : > { %16320 = vmatprep.subr.bf16.mxu0 %v17531_v39  ;;  %v2191_v43 = vld [vmem:[%s19910_s15 + $0xbb8] sm:$0xff] }
 0x7f2   : > { %16360 = vmatpush1.bf16.msra.mxu1 %v17666_v49  ;;  %v2315_v44 = vld [vmem:[%s19910_s15 + $0xf98] sm:$0xff]  ;;  %v17635_v54 = vcombine.high %v2187_v56, %v2191_v43  ;;  %v17634_v4 = vcombine.low %v2187_v56, %v2191_v43 }
 0x7f3   : > { %16361 = vmatprep.subr.bf16.mxu1 %v17659_v1  ;;  %v2319_v3 = vld [vmem:[%s19910_s15 + $0xfb8] sm:$0xff] }
 0x7f4   : > { %16321 = vmatpush1.bf16.msra.mxu0 %v17530_v2  ;;  %v17763_v14 = vcombine.high %v2315_v44, %v2319_v3  ;;  %v2179_v63 = vld [vmem:[%s19910_s15 + $0xb58] sm:$0xff]  ;;  %v17762_v49 = vcombine.low %v2315_v44, %v2319_v3 }
 0x7f5   : > { %16322 = vmatprep.subr.bf16.mxu0 %v17523_v46  ;;  %v2183_v35 = vld [vmem:[%s19910_s15 + $0xb78] sm:$0xff] }
 0x7f6   : > { %16362 = vmatpush1.bf16.msra.mxu1 %v17658_v60  ;;  %v2307_v57 = vld [vmem:[%s19910_s15 + $0xf58] sm:$0xff]  ;;  %v17627_v39 = vcombine.high %v2179_v63, %v2183_v35  ;;  %v17626_v2 = vcombine.low %v2179_v63, %v2183_v35 }
 0x7f7   : > { %16363 = vmatprep.subr.bf16.mxu1 %v17651_v16  ;;  %v2311_v31 = vld [vmem:[%s19910_s15 + $0xf78] sm:$0xff] }
 0x7f8   : > { %16323 = vmatpush1.bf16.msra.mxu0 %v17522_v9  ;;  %v17755_v1 = vcombine.high %v2307_v57, %v2311_v31  ;;  %v2171_v51 = vld [vmem:[%s19910_s15 + $0xb18] sm:$0xff]  ;;  %v17754_v60 = vcombine.low %v2307_v57, %v2311_v31 }
 0x7f9   : > { %16324 = vmatprep.subr.bf16.mxu0 %v17643_v13  ;;  %v2175_v10 = vld [vmem:[%s19910_s15 + $0xb38] sm:$0xff] }
 0x7fa   : > { %16364 = vmatpush1.bf16.msra.mxu1 %v17650_v17  ;;  %v2299_v41 = vld [vmem:[%s19910_s15 + $0xf18] sm:$0xff]  ;;  %v17619_v46 = vcombine.high %v2171_v51, %v2175_v10  ;;  %v17618_v9 = vcombine.low %v2171_v51, %v2175_v10 }
 0x7fb   : > { %16365 = vmatprep.subr.bf16.mxu1 %v17771_v12  ;;  %v2303_v24 = vld [vmem:[%s19910_s15 + $0xf38] sm:$0xff] }
 0x7fc   : > { %16325 = vmatpush2.bf16.msra.mxu0 %v17642_v33  ;;  %v17747_v16 = vcombine.high %v2299_v41, %v2303_v24  ;;  %v2163_v47 = vld [vmem:[%s19910_s15 + $0xad8] sm:$0xff]  ;;  %v17746_v17 = vcombine.low %v2299_v41, %v2303_v24 }
 0x7fd   : > { %16326 = vmatprep.subr.bf16.mxu0 %v17635_v54  ;;  %v2167_v7 = vld [vmem:[%s19910_s15 + $0xaf8] sm:$0xff] }
 0x7fe   : > { %16366 = vmatpush2.bf16.msra.mxu1 %v17770_v6  ;;  %v2291_v15 = vld [vmem:[%s19910_s15 + $0xed8] sm:$0xff]  ;;  %v17611_v13 = vcombine.high %v2163_v47, %v2167_v7  ;;  %v17610_v33 = vcombine.low %v2163_v47, %v2167_v7 }
 0x7ff   : > { %16367 = vmatprep.subr.bf16.mxu1 %v17763_v14  ;;  %v2295_v59 = vld [vmem:[%s19910_s15 + $0xef8] sm:$0xff] }
 0x800   : > { %16327 = vmatpush2.bf16.msra.mxu0 %v17634_v4  ;;  %v17739_v12 = vcombine.high %v2291_v15, %v2295_v59  ;;  %v2155_v56 = vld [vmem:[%s19910_s15 + $0xa98] sm:$0xff]  ;;  %v17738_v6 = vcombine.low %v2291_v15, %v2295_v59 }
 0x801   : > { %16328 = vmatprep.subr.bf16.mxu0 %v17627_v39  ;;  %v2159_v43 = vld [vmem:[%s19910_s15 + $0xab8] sm:$0xff] }
 0x802   : > { %16368 = vmatpush2.bf16.msra.mxu1 %v17762_v49  ;;  %v2283_v44 = vld [vmem:[%s19910_s15 + $0xe98] sm:$0xff]  ;;  %v17603_v54 = vcombine.high %v2155_v56, %v2159_v43  ;;  %v17602_v4 = vcombine.low %v2155_v56, %v2159_v43 }
 0x803   : > { %16369 = vmatprep.subr.bf16.mxu1 %v17755_v1  ;;  %v2287_v3 = vld [vmem:[%s19910_s15 + $0xeb8] sm:$0xff] }
 0x804   : > { %16329 = vmatpush2.bf16.msra.mxu0 %v17626_v2  ;;  %v17731_v14 = vcombine.high %v2283_v44, %v2287_v3  ;;  %v2147_v63 = vld [vmem:[%s19910_s15 + $0xa58] sm:$0xff]  ;;  %v17730_v49 = vcombine.low %v2283_v44, %v2287_v3 }
 0x805   : > { %16330 = vmatprep.subr.bf16.mxu0 %v17619_v46  ;;  %v2151_v35 = vld [vmem:[%s19910_s15 + $0xa78] sm:$0xff] }
 0x806   : > { %16370 = vmatpush2.bf16.msra.mxu1 %v17754_v60  ;;  %v2275_v57 = vld [vmem:[%s19910_s15 + $0xe58] sm:$0xff]  ;;  %v17595_v39 = vcombine.high %v2147_v63, %v2151_v35  ;;  %v17594_v2 = vcombine.low %v2147_v63, %v2151_v35 }
 0x807   : > { %16371 = vmatprep.subr.bf16.mxu1 %v17747_v16  ;;  %v2279_v31 = vld [vmem:[%s19910_s15 + $0xe78] sm:$0xff] }
 0x808   : > { %16331 = vmatpush2.bf16.msra.mxu0 %v17618_v9  ;;  %v17723_v1 = vcombine.high %v2275_v57, %v2279_v31  ;;  %v2139_v51 = vld [vmem:[%s19910_s15 + $0xa18] sm:$0xff]  ;;  %v17722_v60 = vcombine.low %v2275_v57, %v2279_v31 }
 0x809   : > { %16332 = vmatprep.subr.bf16.mxu0 %v17611_v13  ;;  %v2143_v10 = vld [vmem:[%s19910_s15 + $0xa38] sm:$0xff] }
 0x80a   : > { %16372 = vmatpush2.bf16.msra.mxu1 %v17746_v17  ;;  %v2267_v41 = vld [vmem:[%s19910_s15 + $0xe18] sm:$0xff]  ;;  %v17587_v46 = vcombine.high %v2139_v51, %v2143_v10  ;;  %v17586_v9 = vcombine.low %v2139_v51, %v2143_v10 }
 0x80b   : > { %16373 = vmatprep.subr.bf16.mxu1 %v17739_v12  ;;  %v2271_v24 = vld [vmem:[%s19910_s15 + $0xe38] sm:$0xff] }
 0x80c   : > { %16333 = vmatpush2.bf16.msra.mxu0 %v17610_v33  ;;  %v17715_v16 = vcombine.high %v2267_v41, %v2271_v24  ;;  %v2387_v47 = vld [vmem:[%s19910_s15 + $0x11d8] sm:$0xff]  ;;  %v17714_v17 = vcombine.low %v2267_v41, %v2271_v24 }
 0x80d   : > { %16334 = vmatprep.subr.bf16.mxu0 %v17603_v54  ;;  %v2391_v7 = vld [vmem:[%s19910_s15 + $0x11f8] sm:$0xff] }
 0x80e   : > { %16374 = vmatpush2.bf16.msra.mxu1 %v17738_v6  ;;  %v2515_v15 = vld [vmem:[%s19910_s15 + $0x15d8] sm:$0xff]  ;;  %v17835_v13 = vcombine.high %v2387_v47, %v2391_v7  ;;  %v17834_v33 = vcombine.low %v2387_v47, %v2391_v7 }
 0x80f   : > { %16375 = vmatprep.subr.bf16.mxu1 %v17731_v14  ;;  %v2519_v59 = vld [vmem:[%s19910_s15 + $0x15f8] sm:$0xff] }
 0x810   : > { %16335 = vmatpush2.bf16.msra.mxu0 %v17602_v4  ;;  %v17963_v12 = vcombine.high %v2515_v15, %v2519_v59  ;;  %v2379_v56 = vld [vmem:[%s19910_s15 + $0x1198] sm:$0xff]  ;;  %v17962_v6 = vcombine.low %v2515_v15, %v2519_v59 }
 0x811   : > { %16336 = vmatprep.subr.bf16.mxu0 %v17595_v39  ;;  %v2383_v43 = vld [vmem:[%s19910_s15 + $0x11b8] sm:$0xff] }
 0x812   : > { %16376 = vmatpush2.bf16.msra.mxu1 %v17730_v49  ;;  %v2507_v44 = vld [vmem:[%s19910_s15 + $0x1598] sm:$0xff]  ;;  %v17827_v54 = vcombine.high %v2379_v56, %v2383_v43 }
 0x813   : > { %16377 = vmatprep.subr.bf16.mxu1 %v17723_v1  ;;  %v2511_v3 = vld [vmem:[%s19910_s15 + $0x15b8] sm:$0xff]  ;;  %v17826_v1 = vcombine.low %v2379_v56, %v2383_v43 }
 0x814   : > { %16337 = vmatpush2.bf16.msra.mxu0 %v17594_v2  ;;  %v17955_v14 = vcombine.high %v2507_v44, %v2511_v3  ;;  %v2371_v63 = vld [vmem:[%s19910_s15 + $0x1158] sm:$0xff]  ;;  %v17954_v10 = vcombine.low %v2507_v44, %v2511_v3 }
 0x815   : > { %16338 = vmatprep.subr.bf16.mxu0 %v17587_v46  ;;  %v2375_v35 = vld [vmem:[%s19910_s15 + $0x1178] sm:$0xff] }
 0x816   : > { %16378 = vmatpush2.bf16.msra.mxu1 %v17722_v60  ;;  %v2499_v31 = vld [vmem:[%s19910_s15 + $0x1558] sm:$0xff]  ;;  %v17819_v41 = vcombine.high %v2371_v63, %v2375_v35 }
 0x817   : > { %16379 = vmatprep.subr.bf16.mxu1 %v17715_v16  ;;  %v2503_v4 = vld [vmem:[%s19910_s15 + $0x1578] sm:$0xff] }
 0x818   : > { %16339 = vmatpush2.bf16.msra.mxu0 %v17586_v9  ;;  %v2363_v60 = vld [vmem:[%s19910_s15 + $0x1118] sm:$0xff]  ;;  %v17946_v9 = vcombine.low %v2499_v31, %v2503_v4 }
 0x819   : > { %16390 = vmatprep.subr.bf16.mxu0 %v17835_v13  ;;  %v2367_v46 = vld [vmem:[%s19910_s15 + $0x1138] sm:$0xff] }
 0x81a   : > { %16380 = vmatpush2.bf16.msra.mxu1 %v17714_v17  ;;  %v2491_v16 = vld [vmem:[%s19910_s15 + $0x1518] sm:$0xff]  ;;  %v17811_v17 = vcombine.high %v2363_v60, %v2367_v46  ;;  %v17810_v44 = vcombine.low %v2363_v60, %v2367_v46 }
 0x81b   : > { %16431 = vmatprep.subr.bf16.mxu1 %v17963_v12  ;;  %v16096_v57 = vpop.f32.mrf.mxu0  ;;  %16341 = vmatmul.mubr.bf16.vlgmr.msra.gmra.mxu0 %v20203_v53  ;;  %v2495_v47 = vld [vmem:[%s19910_s15 + $0x1538] sm:$0xff] }
 0x81c   : > { %v16097_v49 = vadd.f32 %v16096_v57, %v22052_v58  ;;  %16391 = vmatpush1.bf16.msra.mxu0 %v17834_v33  ;;  %v17947_v58 = vcombine.high %v2499_v31, %v2503_v4  ;;  %16422 = vmatprep.mubr.bf16.mxu0 %v20219_v62  ;;  %v17939_v13 = vcombine.high %v2491_v16, %v2495_v47  ;;  %v2355_v12 = vld [vmem:[%s19910_s15 + $0x10d8] sm:$0xff] }
 0x81d   : > { %v16137_v39 = vpop.f32.mrf.mxu1  ;;  %16382 = vmatmul.mubr.bf16.vlgmr.msra.gmra.mxu1 %v20211_v8  ;;  %v16098_v51 = vpop.f32.mrf.mxu0  ;;  %16392 = vmatprep.subr.bf16.mxu0 %v17827_v54  ;;  %v2483_v56 = vld [vmem:[%s19910_s15 + $0x14d8] sm:$0xff]  ;;  %v17938_v3 = vcombine.low %v2491_v16, %v2495_v47 }
 0x81e   : > { %16432 = vmatpush1.bf16.msra.mxu1 %v17962_v6  ;;  %v22126_v24 = vadd.f32 %v16137_v39, %v16097_v49  ;;  %v16099_v53 = vadd.f32 %v16098_v51, %v22061_v29  ;;  %16463 = vmatprep.mubr.bf16.mxu1 %v20226_v0  ;;  %v17818_v29 = vcombine.low %v2371_v63, %v2375_v35  ;;  %v2359_v0 = vld [vmem:[%s19910_s15 + $0x10f8] sm:$0xff] }
 0x81f   : > { %v16139_v2 = vpop.f32.mrf.mxu1  ;;  %16433 = vmatprep.subr.bf16.mxu1 %v17955_v14  ;;  %v16100_v8 = vpop.f32.mrf.mxu0  ;;  %v2487_v43 = vld [vmem:[%s19910_s15 + $0x14f8] sm:$0xff]  ;;  %v17803_v33 = vcombine.high %v2355_v12, %v2359_v0  ;;  %v17802_v57 = vcombine.low %v2355_v12, %v2359_v0 }
 0x820   : > { %v22135_v7 = vadd.f32 %v16139_v2, %v16099_v53  ;;  %16393 = vmatpush1.bf16.msra.mxu0 %v17826_v1  ;;  %v17931_v6 = vcombine.high %v2483_v56, %v2487_v43  ;;  %v2347_v54 = vld [vmem:[%s19910_s15 + $0x1098] sm:$0xff]  ;;  %v17930_v31 = vcombine.low %v2483_v56, %v2487_v43 }
 0x821   : > { %v16141_v15 = vpop.f32.mrf.mxu1  ;;  %v16101_v59 = vpop.f32.mrf.mxu0  ;;  %16394 = vmatprep.subr.bf16.mxu0 %v17819_v41  ;;  %v2351_v14 = vld [vmem:[%s19910_s15 + $0x10b8] sm:$0xff] }
 0x822   : > { %16434 = vmatpush1.bf16.msra.mxu1 %v17954_v10  ;;  %v2475_v63 = vld [vmem:[%s19910_s15 + $0x1498] sm:$0xff]  ;;  %v17795_v4 = vcombine.high %v2347_v54, %v2351_v14  ;;  %v17794_v41 = vcombine.low %v2347_v54, %v2351_v14 }
 0x823   : > { %v16142_v62 = vpop.f32.mrf.mxu1  ;;  %16435 = vmatprep.subr.bf16.mxu1 %v17947_v58  ;;  %v2479_v35 = vld [vmem:[%s19910_s15 + $0x14b8] sm:$0xff] }
 0x824   : > { %16395 = vmatpush1.bf16.msra.mxu0 %v17818_v29  ;;  %v17923_v49 = vcombine.high %v2475_v63, %v2479_v35  ;;  %v2339_v39 = vld [vmem:[%s19910_s15 + $0x1058] sm:$0xff]  ;;  %v17922_v53 = vcombine.low %v2475_v63, %v2479_v35 }
 0x825   : > { %16396 = vmatprep.subr.bf16.mxu0 %v17811_v17  ;;  %v2343_v1 = vld [vmem:[%s19910_s15 + $0x1078] sm:$0xff] }
 0x826   : > { %16436 = vmatpush1.bf16.msra.mxu1 %v17946_v9  ;;  %v2467_v51 = vld [vmem:[%s19910_s15 + $0x1458] sm:$0xff]  ;;  %v17787_v2 = vcombine.high %v2339_v39, %v2343_v1  ;;  %v17786_v47 = vcombine.low %v2339_v39, %v2343_v1 }
 0x827   : > { %16437 = vmatprep.subr.bf16.mxu1 %v17939_v13  ;;  %v2471_v10 = vld [vmem:[%s19910_s15 + $0x1478] sm:$0xff] }
 0x828   : > { %16397 = vmatpush1.bf16.msra.mxu0 %v17810_v44  ;;  %v17915_v58 = vcombine.high %v2467_v51, %v2471_v10  ;;  %v2331_v60 = vld [vmem:[%s19910_s15 + $0x1018] sm:$0xff]  ;;  %v17914_v15 = vcombine.low %v2467_v51, %v2471_v10 }
 0x829   : > { %16398 = vmatprep.subr.bf16.mxu0 %v17803_v33  ;;  %v2335_v46 = vld [vmem:[%s19910_s15 + $0x1038] sm:$0xff] }
 0x82a   : > { %16438 = vmatpush1.bf16.msra.mxu1 %v17938_v3  ;;  %v2459_v8 = vld [vmem:[%s19910_s15 + $0x1418] sm:$0xff]  ;;  %v17779_v29 = vcombine.high %v2331_v60, %v2335_v46  ;;  %v17778_v12 = vcombine.low %v2331_v60, %v2335_v46 }
 0x82b   : > { %16439 = vmatprep.subr.bf16.mxu1 %v17931_v6  ;;  %v2463_v16 = vld [vmem:[%s19910_s15 + $0x1438] sm:$0xff] }
 0x82c   : > { %16399 = vmatpush1.bf16.msra.mxu0 %v17802_v57  ;;  %v17907_v59 = vcombine.high %v2459_v8, %v2463_v16  ;;  %v2451_v9 = vld [vmem:[%s19910_s15 + $0x13d8] sm:$0xff]  ;;  %v17906_v0 = vcombine.low %v2459_v8, %v2463_v16 }
 0x82d   : > { %16400 = vmatprep.subr.bf16.mxu0 %v17795_v4  ;;  %v2455_v17 = vld [vmem:[%s19910_s15 + $0x13f8] sm:$0xff] }
 0x82e   : > { %16440 = vmatpush1.bf16.msra.mxu1 %v17930_v31  ;;  %v2579_v62 = vld [vmem:[%s19910_s15 + $0x17d8] sm:$0xff]  ;;  %v17899_v56 = vcombine.high %v2451_v9, %v2455_v17  ;;  %v17898_v54 = vcombine.low %v2451_v9, %v2455_v17 }
 0x82f   : > { %16441 = vmatprep.subr.bf16.mxu1 %v17923_v49  ;;  %v2583_v13 = vld [vmem:[%s19910_s15 + $0x17f8] sm:$0xff] }
 0x830   : > { %16401 = vmatpush1.bf16.msra.mxu0 %v17794_v41  ;;  %v18027_v43 = vcombine.high %v2579_v62, %v2583_v13  ;;  %v2443_v44 = vld [vmem:[%s19910_s15 + $0x1398] sm:$0xff]  ;;  %v18026_v14 = vcombine.low %v2579_v62, %v2583_v13 }
 0x831   : > { %16402 = vmatprep.subr.bf16.mxu0 %v17787_v2  ;;  %v2447_v3 = vld [vmem:[%s19910_s15 + $0x13b8] sm:$0xff] }
 0x832   : > { %16442 = vmatpush1.bf16.msra.mxu1 %v17922_v53  ;;  %v2571_v33 = vld [vmem:[%s19910_s15 + $0x1798] sm:$0xff]  ;;  %v17891_v63 = vcombine.high %v2443_v44, %v2447_v3  ;;  %v17890_v39 = vcombine.low %v2443_v44, %v2447_v3 }
 0x833   : > { %16443 = vmatprep.subr.bf16.mxu1 %v17915_v58  ;;  %v2575_v6 = vld [vmem:[%s19910_s15 + $0x17b8] sm:$0xff] }
 0x834   : > { %16403 = vmatpush1.bf16.msra.mxu0 %v17786_v47  ;;  %v18019_v35 = vcombine.high %v2571_v33, %v2575_v6  ;;  %v2435_v57 = vld [vmem:[%s19910_s15 + $0x1358] sm:$0xff]  ;;  %v18018_v1 = vcombine.low %v2571_v33, %v2575_v6 }
 0x835   : > { %16404 = vmatprep.subr.bf16.mxu0 %v17779_v29  ;;  %v2439_v31 = vld [vmem:[%s19910_s15 + $0x1378] sm:$0xff] }
 0x836   : > { %16444 = vmatpush1.bf16.msra.mxu1 %v17914_v15  ;;  %v2563_v4 = vld [vmem:[%s19910_s15 + $0x1758] sm:$0xff]  ;;  %v17883_v51 = vcombine.high %v2435_v57, %v2439_v31  ;;  %v17882_v60 = vcombine.low %v2435_v57, %v2439_v31 }
 0x837   : > { %16445 = vmatprep.subr.bf16.mxu1 %v17907_v59  ;;  %v2567_v49 = vld [vmem:[%s19910_s15 + $0x1778] sm:$0xff] }
 0x838   : > { %16405 = vmatpush1.bf16.msra.mxu0 %v17778_v12  ;;  %v18011_v10 = vcombine.high %v2563_v4, %v2567_v49  ;;  %v2427_v41 = vld [vmem:[%s19910_s15 + $0x1318] sm:$0xff]  ;;  %v18010_v46 = vcombine.low %v2563_v4, %v2567_v49 }
 0x839   : > { %16406 = vmatprep.subr.bf16.mxu0 %v17899_v56  ;;  %v2431_v53 = vld [vmem:[%s19910_s15 + $0x1338] sm:$0xff] }
 0x83a   : > { %16446 = vmatpush1.bf16.msra.mxu1 %v17906_v0  ;;  %v2555_v2 = vld [vmem:[%s19910_s15 + $0x1718] sm:$0xff]  ;;  %v17875_v8 = vcombine.high %v2427_v41, %v2431_v53  ;;  %v17874_v9 = vcombine.low %v2427_v41, %v2431_v53 }
 0x83b   : > { %16447 = vmatprep.subr.bf16.mxu1 %v18027_v43  ;;  %v2559_v58 = vld [vmem:[%s19910_s15 + $0x1738] sm:$0xff] }
 0x83c   : > { %16407 = vmatpush2.bf16.msra.mxu0 %v17898_v54  ;;  %v18003_v16 = vcombine.high %v2555_v2, %v2559_v58  ;;  %v2419_v47 = vld [vmem:[%s19910_s15 + $0x12d8] sm:$0xff]  ;;  %v18002_v17 = vcombine.low %v2555_v2, %v2559_v58 }
 0x83d   : > { %16408 = vmatprep.subr.bf16.mxu0 %v17891_v63  ;;  %v2423_v15 = vld [vmem:[%s19910_s15 + $0x12f8] sm:$0xff] }
 0x83e   : > { %16448 = vmatpush2.bf16.msra.mxu1 %v18026_v14  ;;  %v2547_v29 = vld [vmem:[%s19910_s15 + $0x16d8] sm:$0xff]  ;;  %v17867_v62 = vcombine.high %v2419_v47, %v2423_v15  ;;  %v17866_v44 = vcombine.low %v2419_v47, %v2423_v15 }
 0x83f   : > { %16449 = vmatprep.subr.bf16.mxu1 %v18019_v35  ;;  %v2551_v59 = vld [vmem:[%s19910_s15 + $0x16f8] sm:$0xff] }
 0x840   : > { %16409 = vmatpush2.bf16.msra.mxu0 %v17890_v39  ;;  %v17995_v13 = vcombine.high %v2547_v29, %v2551_v59  ;;  %v2411_v12 = vld [vmem:[%s19910_s15 + $0x1298] sm:$0xff]  ;;  %v17994_v3 = vcombine.low %v2547_v29, %v2551_v59 }
 0x841   : > { %16410 = vmatprep.subr.bf16.mxu0 %v17883_v51  ;;  %v2415_v0 = vld [vmem:[%s19910_s15 + $0x12b8] sm:$0xff] }
 0x842   : > { %16450 = vmatpush2.bf16.msra.mxu1 %v18018_v1  ;;  %v2539_v56 = vld [vmem:[%s19910_s15 + $0x1698] sm:$0xff]  ;;  %v17859_v33 = vcombine.high %v2411_v12, %v2415_v0  ;;  %v17858_v57 = vcombine.low %v2411_v12, %v2415_v0 }
 0x843   : > { %16451 = vmatprep.subr.bf16.mxu1 %v18011_v10  ;;  %v2543_v43 = vld [vmem:[%s19910_s15 + $0x16b8] sm:$0xff] }
 0x844   : > { %16411 = vmatpush2.bf16.msra.mxu0 %v17882_v60  ;;  %v17987_v6 = vcombine.high %v2539_v56, %v2543_v43  ;;  %v2403_v54 = vld [vmem:[%s19910_s15 + $0x1258] sm:$0xff]  ;;  %v17986_v31 = vcombine.low %v2539_v56, %v2543_v43 }
 0x845   : > { %16412 = vmatprep.subr.bf16.mxu0 %v17875_v8  ;;  %v2407_v14 = vld [vmem:[%s19910_s15 + $0x1278] sm:$0xff] }
 0x846   : > { %16452 = vmatpush2.bf16.msra.mxu1 %v18010_v46  ;;  %v2531_v63 = vld [vmem:[%s19910_s15 + $0x1658] sm:$0xff]  ;;  %v17851_v4 = vcombine.high %v2403_v54, %v2407_v14  ;;  %v17850_v41 = vcombine.low %v2403_v54, %v2407_v14 }
 0x847   : > { %16453 = vmatprep.subr.bf16.mxu1 %v18003_v16  ;;  %v2535_v35 = vld [vmem:[%s19910_s15 + $0x1678] sm:$0xff] }
 0x848   : > { %16413 = vmatpush2.bf16.msra.mxu0 %v17874_v9  ;;  %v17979_v49 = vcombine.high %v2531_v63, %v2535_v35  ;;  %v2395_v39 = vld [vmem:[%s19910_s15 + $0x1218] sm:$0xff]  ;;  %v17978_v53 = vcombine.low %v2531_v63, %v2535_v35 }
 0x849   : > { %16414 = vmatprep.subr.bf16.mxu0 %v17867_v62  ;;  %v2399_v1 = vld [vmem:[%s19910_s15 + $0x1238] sm:$0xff] }
 0x84a   : > { %16454 = vmatpush2.bf16.msra.mxu1 %v18002_v17  ;;  %v2523_v51 = vld [vmem:[%s19910_s15 + $0x1618] sm:$0xff]  ;;  %v17843_v2 = vcombine.high %v2395_v39, %v2399_v1  ;;  %v17842_v47 = vcombine.low %v2395_v39, %v2399_v1 }
 0x84b   : > { %16455 = vmatprep.subr.bf16.mxu1 %v17995_v13  ;;  %v2527_v10 = vld [vmem:[%s19910_s15 + $0x1638] sm:$0xff] }
 0x84c   : > { %16415 = vmatpush2.bf16.msra.mxu0 %v17866_v44  ;;  %v17971_v58 = vcombine.high %v2523_v51, %v2527_v10  ;;  %v2643_v60 = vld [vmem:[%s19910_s15 + $0x19d8] sm:$0xff]  ;;  %v17970_v15 = vcombine.low %v2523_v51, %v2527_v10 }
 0x84d   : > { %16416 = vmatprep.subr.bf16.mxu0 %v17859_v33  ;;  %v2647_v46 = vld [vmem:[%s19910_s15 + $0x19f8] sm:$0xff] }
 0x84e   : > { %16456 = vmatpush2.bf16.msra.mxu1 %v17994_v3  ;;  %v2771_v8 = vld [vmem:[%s19910_s15 + $0x1dd8] sm:$0xff]  ;;  %v18091_v29 = vcombine.high %v2643_v60, %v2647_v46  ;;  %v18090_v12 = vcombine.low %v2643_v60, %v2647_v46 }
 0x84f   : > { %16457 = vmatprep.subr.bf16.mxu1 %v17987_v6  ;;  %v2775_v16 = vld [vmem:[%s19910_s15 + $0x1df8] sm:$0xff] }
 0x850   : > { %16417 = vmatpush2.bf16.msra.mxu0 %v17858_v57  ;;  %v18219_v59 = vcombine.high %v2771_v8, %v2775_v16  ;;  %v2635_v9 = vld [vmem:[%s19910_s15 + $0x1998] sm:$0xff]  ;;  %v18218_v0 = vcombine.low %v2771_v8, %v2775_v16 }
 0x851   : > { %16418 = vmatprep.subr.bf16.mxu0 %v17851_v4  ;;  %v2639_v17 = vld [vmem:[%s19910_s15 + $0x19b8] sm:$0xff] }
 0x852   : > { %16458 = vmatpush2.bf16.msra.mxu1 %v17986_v31  ;;  %v2763_v62 = vld [vmem:[%s19910_s15 + $0x1d98] sm:$0xff]  ;;  %v18083_v56 = vcombine.high %v2635_v9, %v2639_v17  ;;  %v18082_v35 = vcombine.low %v2635_v9, %v2639_v17 }
 0x853   : > { %16459 = vmatprep.subr.bf16.mxu1 %v17979_v49  ;;  %v2767_v13 = vld [vmem:[%s19910_s15 + $0x1db8] sm:$0xff] }
 0x854   : > { %16419 = vmatpush2.bf16.msra.mxu0 %v17850_v41  ;;  %v18211_v43 = vcombine.high %v2763_v62, %v2767_v13  ;;  %v2627_v44 = vld [vmem:[%s19910_s15 + $0x1958] sm:$0xff] }
 0x855   : > { %16420 = vmatprep.subr.bf16.mxu0 %v17843_v2  ;;  %v2631_v3 = vld [vmem:[%s19910_s15 + $0x1978] sm:$0xff] }
 0x856   : > { %16460 = vmatpush2.bf16.msra.mxu1 %v17978_v53  ;;  %v2755_v6 = vld [vmem:[%s19910_s15 + $0x1d58] sm:$0xff]  ;;  %v18075_v49 = vcombine.high %v2627_v44, %v2631_v3  ;;  %v18074_v46 = vcombine.low %v2627_v44, %v2631_v3 }
 0x857   : > { %16461 = vmatprep.subr.bf16.mxu1 %v17971_v58  ;;  %v2759_v54 = vld [vmem:[%s19910_s15 + $0x1d78] sm:$0xff] }
 0x858   : > { %16421 = vmatpush2.bf16.msra.mxu0 %v17842_v47  ;;  %v19473_v57 = vld [vmem:[%s19925_s19] sm:$0xff] }
 0x859   : > { %16472 = vmatprep.subr.bf16.mxu0 %v18091_v29  ;;  %v16912_v31 = vrot.slane %v19473_v57, %v3884_v20  ;;  %v2619_v51 = vld [vmem:[%s19910_s15 + $0x1918] sm:$0xff]  ;;  %v16916_v60 = vrot.slane %v19473_v57, %v3888_v38 }
 0x85a   : > { %16462 = vmatpush2.bf16.msra.mxu1 %v17970_v15  ;;  %v2623_v10 = vld [vmem:[%s19910_s15 + $0x1938] sm:$0xff] }
 0x85b   : > { %16513 = vmatprep.subr.bf16.mxu1 %v18219_v59  ;;  %v16178_v33 = vpop.f32.mrf.mxu0  ;;  %16423 = vmatmul.mubr.bf16.vlgmr.msra.gmra.mxu0 %v20291_v19  ;;  %v18210_v19 = vcombine.low %v2763_v62, %v2767_v13  ;;  %v2747_v53 = vld [vmem:[%s19910_s15 + $0x1d18] sm:$0xff]  ;;  %v18067_v16 = vcombine.high %v2619_v51, %v2623_v10 }
 0x85c   : > { %v16179_v14 = vadd.f32 %v16178_v33, %v22126_v24  ;;  %16473 = vmatpush1.bf16.msra.mxu0 %v18090_v12  ;;  %16504 = vmatprep.mubr.bf16.mxu0 %v20307_v34  ;;  %v2751_v2 = vld [vmem:[%s19910_s15 + $0x1d38] sm:$0xff]  ;;  %v18202_v34 = vcombine.low %v2755_v6, %v2759_v54  ;;  %v18066_v12 = vcombine.low %v2619_v51, %v2623_v10 }
 0x85d   : > { %v16219_v63 = vpop.f32.mrf.mxu1  ;;  %16464 = vmatmul.mubr.bf16.vlgmr.msra.gmra.mxu1 %v20299_v25  ;;  %v16180_v4 = vpop.f32.mrf.mxu0  ;;  %16474 = vmatprep.subr.bf16.mxu0 %v18083_v56  ;;  %v18203_v25 = vcombine.high %v2755_v6, %v2759_v54  ;;  %v18195_v29 = vcombine.high %v2747_v53, %v2751_v2  ;;  %v2611_v59 = vld [vmem:[%s19910_s15 + $0x18d8] sm:$0xff] }
 0x85e   : > { %16514 = vmatpush1.bf16.msra.mxu1 %v18218_v0  ;;  %v16220_v39 = vadd.f32 %v16219_v63, %v16179_v14  ;;  %v16181_v24 = vadd.f32 %v16180_v4, %v22135_v7  ;;  %16545 = vmatprep.mubr.bf16.mxu1 %v20314_v36  ;;  %v2615_v9 = vld [vmem:[%s19910_s15 + $0x18f8] sm:$0xff]  ;;  %v18194_v0 = vcombine.low %v2747_v53, %v2751_v2 }
 0x85f   : > { %v16221_v1 = vpop.f32.mrf.mxu1  ;;  %16515 = vmatprep.subr.bf16.mxu1 %v18211_v43  ;;  %v16182_v41 = vpop.f32.mrf.mxu0  ;;  %v2739_v38 = vld [vmem:[%s19910_s15 + $0x1cd8] sm:$0xff]  ;;  %v18059_v56 = vcombine.high %v2611_v59, %v2615_v9 }
 0x860   : > { %v16886_v20 = vmax.f32 %v16220_v39, 0.0  ;;  %v16222_v58 = vadd.f32 %v16221_v1, %v16181_v24  ;;  %16475 = vmatpush1.bf16.msra.mxu0 %v18082_v35  ;;  %v2743_v17 = vld [vmem:[%s19910_s15 + $0x1cf8] sm:$0xff] }
 0x861   : > { %v16223_v7 = vpop.f32.mrf.mxu1  ;;  %v16183_v8 = vpop.f32.mrf.mxu0  ;;  %16476 = vmatprep.subr.bf16.mxu0 %v18075_v49  ;;  %v18187_v43 = vcombine.high %v2739_v38, %v2743_v17  ;;  %v2603_v44 = vld [vmem:[%s19910_s15 + $0x1898] sm:$0xff]  ;;  %v18186_v14 = vcombine.low %v2739_v38, %v2743_v17 }
 0x862   : > { %16516 = vmatpush1.bf16.msra.mxu1 %v18210_v19  ;;  %v16937_v47 = vmul.f32 %v16912_v31, %v16886_v20  ;;  %v16887_v15 = vmax.f32 %v16222_v58, 0.0  ;;  %v2607_v3 = vld [vmem:[%s19910_s15 + $0x18b8] sm:$0xff] }
 0x863   : > { %v16224_v36 = vpop.f32.mrf.mxu1  ;;  %16517 = vmatprep.subr.bf16.mxu1 %v18203_v25  ;;  %v2731_v6 = vld [vmem:[%s19910_s15 + $0x1c98] sm:$0xff]  ;;  %v18051_v63 = vcombine.high %v2603_v44, %v2607_v3  ;;  %v18050_v49 = vcombine.low %v2603_v44, %v2607_v3 }
 0x864   : > { %v16944_v62 = vadd.f32 %v21616_v40, %v16937_v47  ;;  %v16938_v13 = vmul.f32 %v16916_v60, %v16887_v15  ;;  %16477 = vmatpush1.bf16.msra.mxu0 %v18074_v46  ;;  %v2735_v54 = vld [vmem:[%s19910_s15 + $0x1cb8] sm:$0xff]  ;;  %v18058_v40 = vcombine.low %v2611_v59, %v2615_v9 }
 0x865   : > { %16478 = vmatprep.subr.bf16.mxu0 %v18067_v16  ;;  %v18179_v35 = vcombine.high %v2731_v6, %v2735_v54  ;;  %v2595_v57 = vld [vmem:[%s19910_s15 + $0x1858] sm:$0xff]  ;;  %v18178_v39 = vcombine.low %v2731_v6, %v2735_v54 }
 0x866   : > { %16518 = vmatpush1.bf16.msra.mxu1 %v18202_v34  ;;  %v22219_v33 = vadd.f32 %v16944_v62, %v16938_v13  ;;  %v2599_v31 = vld [vmem:[%s19910_s15 + $0x1878] sm:$0xff] }
 0x867   : > { %16519 = vmatprep.subr.bf16.mxu1 %v18195_v29  ;;  %v2723_v4 = vld [vmem:[%s19910_s15 + $0x1c58] sm:$0xff]  ;;  %v18043_v24 = vcombine.high %v2595_v57, %v2599_v31  ;;  %v18042_v53 = vcombine.low %v2595_v57, %v2599_v31 }
 0x868   : > { %16479 = vmatpush1.bf16.msra.mxu0 %v18066_v12  ;;  %v2727_v19 = vld [vmem:[%s19910_s15 + $0x1c78] sm:$0xff] }
 0x869   : > { %16480 = vmatprep.subr.bf16.mxu0 %v18059_v56  ;;  %v18171_v1 = vcombine.high %v2723_v4, %v2727_v19  ;;  %v2587_v25 = vld [vmem:[%s19910_s15 + $0x1818] sm:$0xff]  ;;  %v18170_v2 = vcombine.low %v2723_v4, %v2727_v19 }
 0x86a   : > { %16520 = vmatpush1.bf16.msra.mxu1 %v18194_v0  ;;  %v2591_v51 = vld [vmem:[%s19910_s15 + $0x1838] sm:$0xff] }
 0x86b   : > { %16521 = vmatprep.subr.bf16.mxu1 %v18187_v43  ;;  %v2715_v10 = vld [vmem:[%s19910_s15 + $0x1c18] sm:$0xff]  ;;  %v18035_v20 = vcombine.high %v2587_v25, %v2591_v51  ;;  %v18034_v34 = vcombine.low %v2587_v25, %v2591_v51 }
 0x86c   : > { %16481 = vmatpush1.bf16.msra.mxu0 %v18058_v40  ;;  %v2719_v41 = vld [vmem:[%s19910_s15 + $0x1c38] sm:$0xff] }
 0x86d   : > { %16482 = vmatprep.subr.bf16.mxu0 %v18051_v63  ;;  %v18163_v58 = vcombine.high %v2715_v10, %v2719_v41  ;;  %v2707_v60 = vld [vmem:[%s19910_s15 + $0x1bd8] sm:$0xff]  ;;  %v18162_v16 = vcombine.low %v2715_v10, %v2719_v41 }
 0x86e   : > { %16522 = vmatpush1.bf16.msra.mxu1 %v18186_v14  ;;  %v2711_v7 = vld [vmem:[%s19910_s15 + $0x1bf8] sm:$0xff] }
 0x86f   : > { %16523 = vmatprep.subr.bf16.mxu1 %v18179_v35  ;;  %v2835_v46 = vld [vmem:[%s19910_s15 + $0x1fd8] sm:$0xff]  ;;  %v18155_v47 = vcombine.high %v2707_v60, %v2711_v7  ;;  %v18154_v38 = vcombine.low %v2707_v60, %v2711_v7 }
 0x870   : > { %16483 = vmatpush1.bf16.msra.mxu0 %v18050_v49  ;;  %v2839_v8 = vld [vmem:[%s19910_s15 + $0x1ff8] sm:$0xff] }
 0x871   : > { %16484 = vmatprep.subr.bf16.mxu0 %v18043_v24  ;;  %v18283_v15 = vcombine.high %v2835_v46, %v2839_v8  ;;  %v2699_v36 = vld [vmem:[%s19910_s15 + $0x1b98] sm:$0xff]  ;;  %v18282_v17 = vcombine.low %v2835_v46, %v2839_v8 }
 0x872   : > { %16524 = vmatpush1.bf16.msra.mxu1 %v18178_v39  ;;  %v2703_v29 = vld [vmem:[%s19910_s15 + $0x1bb8] sm:$0xff] }
 0x873   : > { %16525 = vmatprep.subr.bf16.mxu1 %v18171_v1  ;;  %v2827_v59 = vld [vmem:[%s19910_s15 + $0x1f98] sm:$0xff]  ;;  %v18147_v62 = vcombine.high %v2699_v36, %v2703_v29  ;;  %v18146_v44 = vcombine.low %v2699_v36, %v2703_v29 }
 0x874   : > { %16485 = vmatpush1.bf16.msra.mxu0 %v18042_v53  ;;  %v2831_v9 = vld [vmem:[%s19910_s15 + $0x1fb8] sm:$0xff] }
 0x875   : > { %16486 = vmatprep.subr.bf16.mxu0 %v18035_v20  ;;  %v18275_v13 = vcombine.high %v2827_v59, %v2831_v9  ;;  %v2691_v12 = vld [vmem:[%s19910_s15 + $0x1b58] sm:$0xff]  ;;  %v18274_v3 = vcombine.low %v2827_v59, %v2831_v9 }
 0x876   : > { %16526 = vmatpush1.bf16.msra.mxu1 %v18170_v2  ;;  %v2695_v0 = vld [vmem:[%s19910_s15 + $0x1b78] sm:$0xff] }
 0x877   : > { %16527 = vmatprep.subr.bf16.mxu1 %v18163_v58  ;;  %v2819_v56 = vld [vmem:[%s19910_s15 + $0x1f58] sm:$0xff]  ;;  %v18139_v6 = vcombine.high %v2691_v12, %v2695_v0  ;;  %v18138_v57 = vcombine.low %v2691_v12, %v2695_v0 }
 0x878   : > { %16487 = vmatpush1.bf16.msra.mxu0 %v18034_v34  ;;  %v2823_v43 = vld [vmem:[%s19910_s15 + $0x1f78] sm:$0xff] }
 0x879   : > { %16488 = vmatprep.subr.bf16.mxu0 %v18155_v47  ;;  %v18267_v54 = vcombine.high %v2819_v56, %v2823_v43  ;;  %v2683_v40 = vld [vmem:[%s19910_s15 + $0x1b18] sm:$0xff]  ;;  %v18266_v31 = vcombine.low %v2819_v56, %v2823_v43 }
 0x87a   : > { %16528 = vmatpush1.bf16.msra.mxu1 %v18162_v16  ;;  %v2687_v14 = vld [vmem:[%s19910_s15 + $0x1b38] sm:$0xff] }
 0x87b   : > { %16529 = vmatprep.subr.bf16.mxu1 %v18283_v15  ;;  %v2811_v63 = vld [vmem:[%s19910_s15 + $0x1f18] sm:$0xff]  ;;  %v18131_v4 = vcombine.high %v2683_v40, %v2687_v14  ;;  %v18130_v25 = vcombine.low %v2683_v40, %v2687_v14  ;;  %v3892_v14 = vsub.s32 6, %v20371_v50 }
 0x87c   : > { %16489 = vmatpush2.bf16.msra.mxu0 %v18154_v38  ;;  %v2815_v35 = vld [vmem:[%s19910_s15 + $0x1f38] sm:$0xff] }
 0x87d   : > { %16490 = vmatprep.subr.bf16.mxu0 %v18147_v62  ;;  %v18259_v19 = vcombine.high %v2811_v63, %v2815_v35  ;;  %v2675_v49 = vld [vmem:[%s19910_s15 + $0x1ad8] sm:$0xff]  ;;  %v18258_v51 = vcombine.low %v2811_v63, %v2815_v35 }
 0x87e   : > { %16530 = vmatpush2.bf16.msra.mxu1 %v18282_v17  ;;  %v2679_v39 = vld [vmem:[%s19910_s15 + $0x1af8] sm:$0xff] }
 0x87f   : > { %16531 = vmatprep.subr.bf16.mxu1 %v18275_v13  ;;  %v2803_v24 = vld [vmem:[%s19910_s15 + $0x1ed8] sm:$0xff]  ;;  %v18123_v10 = vcombine.high %v2675_v49, %v2679_v39  ;;  %v18122_v60 = vcombine.low %v2675_v49, %v2679_v39 }
 0x880   : > { %16491 = vmatpush2.bf16.msra.mxu0 %v18146_v44  ;;  %v2807_v1 = vld [vmem:[%s19910_s15 + $0x1ef8] sm:$0xff] }
 0x881   : > { %16492 = vmatprep.subr.bf16.mxu0 %v18139_v6  ;;  %v18251_v41 = vcombine.high %v2803_v24, %v2807_v1  ;;  %v2667_v53 = vld [vmem:[%s19910_s15 + $0x1a98] sm:$0xff]  ;;  %v18250_v7 = vcombine.low %v2803_v24, %v2807_v1  ;;  %v19474_v24 = vld [vmem:[%s19923_s29] sm:$0xff] }
 0x882   : > { %16532 = vmatpush2.bf16.msra.mxu1 %v18274_v3  ;;  %v2671_v2 = vld [vmem:[%s19910_s15 + $0x1ab8] sm:$0xff]  ;;  %v3893_v1 = vrot.slane %v19474_v24, %v3892_v14 }
 0x883   : > { %16533 = vmatprep.subr.bf16.mxu1 %v18267_v54  ;;  %v2795_v20 = vld [vmem:[%s19910_s15 + $0x1e98] sm:$0xff]  ;;  %v18115_v46 = vcombine.high %v2667_v53, %v2671_v2  ;;  %v18114_v36 = vcombine.low %v2667_v53, %v2671_v2 }
 0x884   : > { %16493 = vmatpush2.bf16.msra.mxu0 %v18138_v57  ;;  %v2799_v58 = vld [vmem:[%s19910_s15 + $0x1eb8] sm:$0xff] }
 0x885   : > { %16494 = vmatprep.subr.bf16.mxu0 %v18131_v4  ;;  %v18243_v8 = vcombine.high %v2795_v20, %v2799_v58  ;;  %v2659_v34 = vld [vmem:[%s19910_s15 + $0x1a58] sm:$0xff]  ;;  %v18242_v29 = vcombine.low %v2795_v20, %v2799_v58 }
 0x886   : > { %16534 = vmatpush2.bf16.msra.mxu1 %v18266_v31  ;;  %v2663_v16 = vld [vmem:[%s19910_s15 + $0x1a78] sm:$0xff]  ;;  %v3896_v31 = vsub.s32 7, %v20371_v50 }
 0x887   : > { %16535 = vmatprep.subr.bf16.mxu1 %v18259_v19  ;;  %v2787_v47 = vld [vmem:[%s19910_s15 + $0x1e58] sm:$0xff]  ;;  %v18107_v59 = vcombine.high %v2659_v34, %v2663_v16  ;;  %v18106_v12 = vcombine.low %v2659_v34, %v2663_v16 }
 0x888   : > { %16495 = vmatpush2.bf16.msra.mxu0 %v18130_v25  ;;  %v2791_v15 = vld [vmem:[%s19910_s15 + $0x1e78] sm:$0xff] }
 0x889   : > { %16496 = vmatprep.subr.bf16.mxu0 %v18123_v10  ;;  %v18235_v9 = vcombine.high %v2787_v47, %v2791_v15  ;;  %v2651_v38 = vld [vmem:[%s19910_s15 + $0x1a18] sm:$0xff]  ;;  %v18234_v0 = vcombine.low %v2787_v47, %v2791_v15 }
 0x88a   : > { %16536 = vmatpush2.bf16.msra.mxu1 %v18258_v51  ;;  %v2655_v17 = vld [vmem:[%s19910_s15 + $0x1a38] sm:$0xff] }
 0x88b   : > { %16537 = vmatprep.subr.bf16.mxu1 %v18251_v41  ;;  %v2779_v62 = vld [vmem:[%s19910_s15 + $0x1e18] sm:$0xff]  ;;  %v18099_v56 = vcombine.high %v2651_v38, %v2655_v17  ;;  %v18098_v40 = vcombine.low %v2651_v38, %v2655_v17  ;;  %v3897_v41 = vrot.slane %v19474_v24, %v3896_v31 }
 0x88c   : > { %16497 = vmatpush2.bf16.msra.mxu0 %v18122_v60  ;;  %v2783_v13 = vld [vmem:[%s19910_s15 + $0x1e38] sm:$0xff] }
 0x88d   : > { %16498 = vmatprep.subr.bf16.mxu0 %v18115_v46  ;;  %v18227_v43 = vcombine.high %v2779_v62, %v2783_v13  ;;  %v2899_v44 = vld [vmem:[%s19910_s15 + $0x21d8] sm:$0xff]  ;;  %v18226_v63 = vcombine.low %v2779_v62, %v2783_v13 }
 0x88e   : > { %16538 = vmatpush2.bf16.msra.mxu1 %v18250_v7  ;;  %v2903_v3 = vld [vmem:[%s19910_s15 + $0x21f8] sm:$0xff] }
 0x88f   : > { %16539 = vmatprep.subr.bf16.mxu1 %v18243_v8  ;;  %v3027_v6 = vld [vmem:[%s19910_s15 + $0x25d8] sm:$0xff]  ;;  %v18347_v35 = vcombine.high %v2899_v44, %v2903_v3  ;;  %v18346_v25 = vcombine.low %v2899_v44, %v2903_v3 }
 0x890   : > { %16499 = vmatpush2.bf16.msra.mxu0 %v18114_v36  ;;  %v3031_v54 = vld [vmem:[%s19910_s15 + $0x25f8] sm:$0xff] }
 0x891   : > { %16500 = vmatprep.subr.bf16.mxu0 %v18107_v59  ;;  %v18475_v57 = vcombine.high %v3027_v6, %v3031_v54  ;;  %v2891_v4 = vld [vmem:[%s19910_s15 + $0x2198] sm:$0xff]  ;;  %v18474_v51 = vcombine.low %v3027_v6, %v3031_v54 }
 0x892   : > { %16540 = vmatpush2.bf16.msra.mxu1 %v18242_v29  ;;  %v2895_v19 = vld [vmem:[%s19910_s15 + $0x21b8] sm:$0xff] }
 0x893   : > { %16541 = vmatprep.subr.bf16.mxu1 %v18235_v9  ;;  %v3019_v49 = vld [vmem:[%s19910_s15 + $0x2598] sm:$0xff]  ;;  %v18339_v10 = vcombine.high %v2891_v4, %v2895_v19  ;;  %v18338_v34 = vcombine.low %v2891_v4, %v2895_v19 }
 0x894   : > { %16501 = vmatpush2.bf16.msra.mxu0 %v18106_v12  ;;  %v3023_v39 = vld [vmem:[%s19910_s15 + $0x25b8] sm:$0xff] }
 0x895   : > { %16502 = vmatprep.subr.bf16.mxu0 %v18099_v56  ;;  %v18467_v53 = vcombine.high %v3019_v49, %v3023_v39  ;;  %v2883_v2 = vld [vmem:[%s19910_s15 + $0x2158] sm:$0xff]  ;;  %v18466_v47 = vcombine.low %v3019_v49, %v3023_v39 }
 0x896   : > { %16542 = vmatpush2.bf16.msra.mxu1 %v18234_v0  ;;  %v2887_v20 = vld [vmem:[%s19910_s15 + $0x2178] sm:$0xff] }
 0x897   : > { %16543 = vmatprep.subr.bf16.mxu1 %v18227_v43  ;;  %v3011_v60 = vld [vmem:[%s19910_s15 + $0x2558] sm:$0xff]  ;;  %v18331_v15 = vcombine.high %v2883_v2, %v2887_v20  ;;  %v18330_v0 = vcombine.low %v2883_v2, %v2887_v20 }
 0x898   : > { %16503 = vmatpush2.bf16.msra.mxu0 %v18098_v40  ;;  %v3015_v7 = vld [vmem:[%s19910_s15 + $0x2578] sm:$0xff] }
 0x899   : > { %16554 = vmatprep.subr.bf16.mxu0 %v18347_v35  ;;  %v18459_v59 = vcombine.high %v3011_v60, %v3015_v7  ;;  %v2875_v9 = vld [vmem:[%s19910_s15 + $0x2118] sm:$0xff]  ;;  %v18458_v43 = vcombine.low %v3011_v60, %v3015_v7 }
 0x89a   : > { %16544 = vmatpush2.bf16.msra.mxu1 %v18226_v63  ;;  %v2879_v38 = vld [vmem:[%s19910_s15 + $0x2138] sm:$0xff] }
 0x89b   : > { %16595 = vmatprep.subr.bf16.mxu1 %v18475_v57  ;;  %v16260_v58 = vpop.f32.mrf.mxu0  ;;  %16505 = vmatmul.mubr.bf16.vlgmr.msra.gmra.mxu0 %v20384_v5  ;;  %v3003_v17 = vld [vmem:[%s19910_s15 + $0x2518] sm:$0xff]  ;;  %v18323_v44 = vcombine.high %v2875_v9, %v2879_v38  ;;  %v18322_v63 = vcombine.low %v2875_v9, %v2879_v38 }
 0x89c   : > { %v16261_v46 = vadd.f32 %v16260_v58, %v3893_v1  ;;  %16555 = vmatpush1.bf16.msra.mxu0 %v18346_v25  ;;  %16586 = vmatprep.mubr.bf16.mxu0 %v20404_v26  ;;  %v3007_v62 = vld [vmem:[%s19910_s15 + $0x2538] sm:$0xff] }
 0x89d   : > { %v16301_v8 = vpop.f32.mrf.mxu1  ;;  %16546 = vmatmul.mubr.bf16.vlgmr.msra.gmra.mxu1 %v20394_v27  ;;  %v16262_v16 = vpop.f32.mrf.mxu0  ;;  %16556 = vmatprep.subr.bf16.mxu0 %v18339_v10  ;;  %v18451_v3 = vcombine.high %v3003_v17, %v3007_v62  ;;  %v2867_v6 = vld [vmem:[%s19910_s15 + $0x20d8] sm:$0xff]  ;;  %v18450_v35 = vcombine.low %v3003_v17, %v3007_v62 }
 0x89e   : > { %16596 = vmatpush1.bf16.msra.mxu1 %v18474_v51  ;;  %v22284_v36 = vadd.f32 %v16301_v8, %v16261_v46  ;;  %v16263_v5 = vadd.f32 %v16262_v16, %v3897_v41  ;;  %16627 = vmatprep.mubr.bf16.mxu1 %v20411_v55  ;;  %v2871_v55 = vld [vmem:[%s19910_s15 + $0x20f8] sm:$0xff] }
 0x89f   : > { %v16303_v29 = vpop.f32.mrf.mxu1  ;;  %16597 = vmatprep.subr.bf16.mxu1 %v18467_v53  ;;  %v16264_v27 = vpop.f32.mrf.mxu0  ;;  %v2995_v54 = vld [vmem:[%s19910_s15 + $0x24d8] sm:$0xff]  ;;  %v18315_v57 = vcombine.high %v2867_v6, %v2871_v55  ;;  %v18314_v1 = vcombine.low %v2867_v6, %v2871_v55 }
 0x8a0   : > { %v22292_v13 = vadd.f32 %v16303_v29, %v16263_v5  ;;  %16557 = vmatpush1.bf16.msra.mxu0 %v18338_v34  ;;  %v2999_v40 = vld [vmem:[%s19910_s15 + $0x24f8] sm:$0xff] }
 0x8a1   : > { %v16305_v12 = vpop.f32.mrf.mxu1  ;;  %v16265_v56 = vpop.f32.mrf.mxu0  ;;  %16558 = vmatprep.subr.bf16.mxu0 %v18331_v15  ;;  %v18443_v4 = vcombine.high %v2995_v54, %v2999_v40  ;;  %v2859_v19 = vld [vmem:[%s19910_s15 + $0x2098] sm:$0xff]  ;;  %v18442_v25 = vcombine.low %v2995_v54, %v2999_v40 }
 0x8a2   : > { %16598 = vmatpush1.bf16.msra.mxu1 %v18466_v47  ;;  %v2863_v49 = vld [vmem:[%s19910_s15 + $0x20b8] sm:$0xff] }
 0x8a3   : > { %v16306_v26 = vpop.f32.mrf.mxu1  ;;  %16599 = vmatprep.subr.bf16.mxu1 %v18459_v59  ;;  %v2987_v39 = vld [vmem:[%s19910_s15 + $0x2498] sm:$0xff]  ;;  %v18307_v51 = vcombine.high %v2859_v19, %v2863_v49  ;;  %v18306_v58 = vcombine.low %v2859_v19, %v2863_v49 }
 0x8a4   : > { %16559 = vmatpush1.bf16.msra.mxu0 %v18330_v0  ;;  %v2991_v24 = vld [vmem:[%s19910_s15 + $0x24b8] sm:$0xff] }
 0x8a5   : > { %16560 = vmatprep.subr.bf16.mxu0 %v18323_v44  ;;  %v18435_v10 = vcombine.high %v2987_v39, %v2991_v24  ;;  %v2851_v41 = vld [vmem:[%s19910_s15 + $0x2058] sm:$0xff]  ;;  %v18434_v60 = vcombine.low %v2987_v39, %v2991_v24 }
 0x8a6   : > { %16600 = vmatpush1.bf16.msra.mxu1 %v18458_v43  ;;  %v2855_v53 = vld [vmem:[%s19910_s15 + $0x2078] sm:$0xff] }
 0x8a7   : > { %16601 = vmatprep.subr.bf16.mxu1 %v18451_v3  ;;  %v2979_v2 = vld [vmem:[%s19910_s15 + $0x2458] sm:$0xff]  ;;  %v18299_v7 = vcombine.high %v2851_v41, %v2855_v53  ;;  %v18298_v15 = vcombine.low %v2851_v41, %v2855_v53 }
 0x8a8   : > { %16561 = vmatpush1.bf16.msra.mxu0 %v18322_v63  ;;  %v2983_v20 = vld [vmem:[%s19910_s15 + $0x2478] sm:$0xff] }
 0x8a9   : > { %16562 = vmatprep.subr.bf16.mxu0 %v18315_v57  ;;  %v18427_v46 = vcombine.high %v2979_v2, %v2983_v20  ;;  %v2843_v8 = vld [vmem:[%s19910_s15 + $0x2018] sm:$0xff]  ;;  %v18426_v5 = vcombine.low %v2979_v2, %v2983_v20 }
 0x8aa   : > { %16602 = vmatpush1.bf16.msra.mxu1 %v18450_v35  ;;  %v2847_v34 = vld [vmem:[%s19910_s15 + $0x2038] sm:$0xff] }
 0x8ab   : > { %16603 = vmatprep.subr.bf16.mxu1 %v18443_v4  ;;  %v2971_v16 = vld [vmem:[%s19910_s15 + $0x2418] sm:$0xff]  ;;  %v18291_v29 = vcombine.high %v2843_v8, %v2847_v34  ;;  %v18290_v62 = vcombine.low %v2843_v8, %v2847_v34 }
 0x8ac   : > { %16563 = vmatpush1.bf16.msra.mxu0 %v18314_v1  ;;  %v2975_v47 = vld [vmem:[%s19910_s15 + $0x2438] sm:$0xff] }
 0x8ad   : > { %16564 = vmatprep.subr.bf16.mxu0 %v18307_v51  ;;  %v18419_v59 = vcombine.high %v2971_v16, %v2975_v47  ;;  %v2963_v9 = vld [vmem:[%s19910_s15 + $0x23d8] sm:$0xff]  ;;  %v18418_v12 = vcombine.low %v2971_v16, %v2975_v47 }
 0x8ae   : > { %16604 = vmatpush1.bf16.msra.mxu1 %v18442_v25  ;;  %v2967_v38 = vld [vmem:[%s19910_s15 + $0x23f8] sm:$0xff] }
 0x8af   : > { %16605 = vmatprep.subr.bf16.mxu1 %v18435_v10  ;;  %v3091_v27 = vld [vmem:[%s19910_s15 + $0x27d8] sm:$0xff]  ;;  %v18411_v0 = vcombine.high %v2963_v9, %v2967_v38  ;;  %v18410_v6 = vcombine.low %v2963_v9, %v2967_v38 }
 0x8b0   : > { %16565 = vmatpush1.bf16.msra.mxu0 %v18306_v58  ;;  %v3095_v17 = vld [vmem:[%s19910_s15 + $0x27f8] sm:$0xff] }
 0x8b1   : > { %16566 = vmatprep.subr.bf16.mxu0 %v18299_v7  ;;  %v18539_v56 = vcombine.high %v3091_v27, %v3095_v17  ;;  %v2955_v43 = vld [vmem:[%s19910_s15 + $0x2398] sm:$0xff]  ;;  %v18538_v55 = vcombine.low %v3091_v27, %v3095_v17 }
 0x8b2   : > { %16606 = vmatpush1.bf16.msra.mxu1 %v18434_v60  ;;  %v2959_v44 = vld [vmem:[%s19910_s15 + $0x23b8] sm:$0xff] }
 0x8b3   : > { %16607 = vmatprep.subr.bf16.mxu1 %v18427_v46  ;;  %v3083_v26 = vld [vmem:[%s19910_s15 + $0x2798] sm:$0xff]  ;;  %v18403_v54 = vcombine.high %v2955_v43, %v2959_v44  ;;  %v18402_v19 = vcombine.low %v2955_v43, %v2959_v44 }
 0x8b4   : > { %16567 = vmatpush1.bf16.msra.mxu0 %v18298_v15  ;;  %v3087_v3 = vld [vmem:[%s19910_s15 + $0x27b8] sm:$0xff] }
 0x8b5   : > { %16568 = vmatprep.subr.bf16.mxu0 %v18291_v29  ;;  %v18531_v40 = vcombine.high %v3083_v26, %v3087_v3  ;;  %v2947_v63 = vld [vmem:[%s19910_s15 + $0x2358] sm:$0xff]  ;;  %v18530_v49 = vcombine.low %v3083_v26, %v3087_v3 }
 0x8b6   : > { %16608 = vmatpush1.bf16.msra.mxu1 %v18426_v5  ;;  %v2951_v35 = vld [vmem:[%s19910_s15 + $0x2378] sm:$0xff] }
 0x8b7   : > { %16609 = vmatprep.subr.bf16.mxu1 %v18419_v59  ;;  %v3075_v57 = vld [vmem:[%s19910_s15 + $0x2758] sm:$0xff]  ;;  %v18395_v39 = vcombine.high %v2947_v63, %v2951_v35  ;;  %v18394_v41 = vcombine.low %v2947_v63, %v2951_v35 }
 0x8b8   : > { %16569 = vmatpush1.bf16.msra.mxu0 %v18290_v62  ;;  %v3079_v4 = vld [vmem:[%s19910_s15 + $0x2778] sm:$0xff] }
 0x8b9   : > { %16570 = vmatprep.subr.bf16.mxu0 %v18411_v0  ;;  %v18523_v24 = vcombine.high %v3075_v57, %v3079_v4  ;;  %v2939_v1 = vld [vmem:[%s19910_s15 + $0x2318] sm:$0xff]  ;;  %v18522_v53 = vcombine.low %v3075_v57, %v3079_v4 }
 0x8ba   : > { %16610 = vmatpush1.bf16.msra.mxu1 %v18418_v12  ;;  %v2943_v25 = vld [vmem:[%s19910_s15 + $0x2338] sm:$0xff] }
 0x8bb   : > { %16611 = vmatprep.subr.bf16.mxu1 %v18539_v56  ;;  %v3067_v51 = vld [vmem:[%s19910_s15 + $0x2718] sm:$0xff]  ;;  %v18387_v2 = vcombine.high %v2939_v1, %v2943_v25  ;;  %v18386_v8 = vcombine.low %v2939_v1, %v2943_v25 }
 0x8bc   : > { %16571 = vmatpush2.bf16.msra.mxu0 %v18410_v6  ;;  %v3071_v10 = vld [vmem:[%s19910_s15 + $0x2738] sm:$0xff] }
 0x8bd   : > { %16572 = vmatprep.subr.bf16.mxu0 %v18403_v54  ;;  %v18515_v20 = vcombine.high %v3067_v51, %v3071_v10  ;;  %v2931_v58 = vld [vmem:[%s19910_s15 + $0x22d8] sm:$0xff]  ;;  %v18514_v34 = vcombine.low %v3067_v51, %v3071_v10 }
 0x8be   : > { %16612 = vmatpush2.bf16.msra.mxu1 %v18538_v55  ;;  %v2935_v60 = vld [vmem:[%s19910_s15 + $0x22f8] sm:$0xff] }
 0x8bf   : > { %16613 = vmatprep.subr.bf16.mxu1 %v18531_v40  ;;  %v3059_v7 = vld [vmem:[%s19910_s15 + $0x26d8] sm:$0xff]  ;;  %v18379_v16 = vcombine.high %v2931_v58, %v2935_v60  ;;  %v18378_v9 = vcombine.low %v2931_v58, %v2935_v60 }
 0x8c0   : > { %16573 = vmatpush2.bf16.msra.mxu0 %v18402_v19  ;;  %v3063_v46 = vld [vmem:[%s19910_s15 + $0x26f8] sm:$0xff] }
 0x8c1   : > { %16574 = vmatprep.subr.bf16.mxu0 %v18395_v39  ;;  %v18507_v47 = vcombine.high %v3059_v7, %v3063_v46  ;;  %v2923_v15 = vld [vmem:[%s19910_s15 + $0x2298] sm:$0xff]  ;;  %v18506_v38 = vcombine.low %v3059_v7, %v3063_v46 }
 0x8c2   : > { %16614 = vmatpush2.bf16.msra.mxu1 %v18530_v49  ;;  %v2927_v5 = vld [vmem:[%s19910_s15 + $0x22b8] sm:$0xff] }
 0x8c3   : > { %16615 = vmatprep.subr.bf16.mxu1 %v18523_v24  ;;  %v3051_v29 = vld [vmem:[%s19910_s15 + $0x2698] sm:$0xff]  ;;  %v18371_v27 = vcombine.high %v2923_v15, %v2927_v5  ;;  %v18370_v43 = vcombine.low %v2923_v15, %v2927_v5 }
 0x8c4   : > { %16575 = vmatpush2.bf16.msra.mxu0 %v18394_v41  ;;  %v3055_v59 = vld [vmem:[%s19910_s15 + $0x26b8] sm:$0xff] }
 0x8c5   : > { %16576 = vmatprep.subr.bf16.mxu0 %v18387_v2  ;;  %v18499_v17 = vcombine.high %v3051_v29, %v3055_v59  ;;  %v2915_v62 = vld [vmem:[%s19910_s15 + $0x2258] sm:$0xff]  ;;  %v18498_v44 = vcombine.low %v3051_v29, %v3055_v59 }
 0x8c6   : > { %16616 = vmatpush2.bf16.msra.mxu1 %v18522_v53  ;;  %v2919_v12 = vld [vmem:[%s19910_s15 + $0x2278] sm:$0xff] }
 0x8c7   : > { %16617 = vmatprep.subr.bf16.mxu1 %v18515_v20  ;;  %v3043_v0 = vld [vmem:[%s19910_s15 + $0x2658] sm:$0xff]  ;;  %v18363_v26 = vcombine.high %v2915_v62, %v2919_v12  ;;  %v18362_v63 = vcombine.low %v2915_v62, %v2919_v12 }
 0x8c8   : > { %16577 = vmatpush2.bf16.msra.mxu0 %v18386_v8  ;;  %v3047_v56 = vld [vmem:[%s19910_s15 + $0x2678] sm:$0xff] }
 0x8c9   : > { %16578 = vmatprep.subr.bf16.mxu0 %v18379_v16  ;;  %v18491_v3 = vcombine.high %v3043_v0, %v3047_v56  ;;  %v2907_v6 = vld [vmem:[%s19910_s15 + $0x2218] sm:$0xff]  ;;  %v18490_v35 = vcombine.low %v3043_v0, %v3047_v56 }
 0x8ca   : > { %16618 = vmatpush2.bf16.msra.mxu1 %v18514_v34  ;;  %v2911_v55 = vld [vmem:[%s19910_s15 + $0x2238] sm:$0xff] }
 0x8cb   : > { %16619 = vmatprep.subr.bf16.mxu1 %v18507_v47  ;;  %v3035_v54 = vld [vmem:[%s19910_s15 + $0x2618] sm:$0xff]  ;;  %v18355_v57 = vcombine.high %v2907_v6, %v2911_v55  ;;  %v18354_v1 = vcombine.low %v2907_v6, %v2911_v55 }
 0x8cc   : > { %16579 = vmatpush2.bf16.msra.mxu0 %v18378_v9  ;;  %v3039_v40 = vld [vmem:[%s19910_s15 + $0x2638] sm:$0xff] }
 0x8cd   : > { %16580 = vmatprep.subr.bf16.mxu0 %v18371_v27  ;;  %v18483_v4 = vcombine.high %v3035_v54, %v3039_v40  ;;  %v3155_v19 = vld [vmem:[%s19910_s15 + $0x29d8] sm:$0xff]  ;;  %v18482_v25 = vcombine.low %v3035_v54, %v3039_v40 }
 0x8ce   : > { %16620 = vmatpush2.bf16.msra.mxu1 %v18506_v38  ;;  %v3159_v49 = vld [vmem:[%s19910_s15 + $0x29f8] sm:$0xff] }
 0x8cf   : > { %16621 = vmatprep.subr.bf16.mxu1 %v18499_v17  ;;  %v3283_v39 = vld [vmem:[%s19910_s15 + $0x2dd8] sm:$0xff]  ;;  %v18603_v51 = vcombine.high %v3155_v19, %v3159_v49  ;;  %v18602_v58 = vcombine.low %v3155_v19, %v3159_v49 }
 0x8d0   : > { %16581 = vmatpush2.bf16.msra.mxu0 %v18370_v43  ;;  %v3287_v24 = vld [vmem:[%s19910_s15 + $0x2df8] sm:$0xff] }
 0x8d1   : > { %16582 = vmatprep.subr.bf16.mxu0 %v18363_v26  ;;  %v18731_v10 = vcombine.high %v3283_v39, %v3287_v24  ;;  %v3147_v41 = vld [vmem:[%s19910_s15 + $0x2998] sm:$0xff]  ;;  %v18730_v60 = vcombine.low %v3283_v39, %v3287_v24 }
 0x8d2   : > { %16622 = vmatpush2.bf16.msra.mxu1 %v18498_v44  ;;  %v3151_v53 = vld [vmem:[%s19910_s15 + $0x29b8] sm:$0xff] }
 0x8d3   : > { %16623 = vmatprep.subr.bf16.mxu1 %v18491_v3  ;;  %v3275_v2 = vld [vmem:[%s19910_s15 + $0x2d98] sm:$0xff]  ;;  %v18595_v7 = vcombine.high %v3147_v41, %v3151_v53  ;;  %v18594_v59 = vcombine.low %v3147_v41, %v3151_v53 }
 0x8d4   : > { %16583 = vmatpush2.bf16.msra.mxu0 %v18362_v63  ;;  %v3279_v20 = vld [vmem:[%s19910_s15 + $0x2db8] sm:$0xff] }
 0x8d5   : > { %16584 = vmatprep.subr.bf16.mxu0 %v18355_v57  ;;  %v18723_v46 = vcombine.high %v3275_v2, %v3279_v20  ;;  %v3139_v8 = vld [vmem:[%s19910_s15 + $0x2958] sm:$0xff]  ;;  %v18722_v38 = vcombine.low %v3275_v2, %v3279_v20 }
 0x8d6   : > { %16624 = vmatpush2.bf16.msra.mxu1 %v18490_v35  ;;  %v3143_v34 = vld [vmem:[%s19910_s15 + $0x2978] sm:$0xff] }
 0x8d7   : > { %16625 = vmatprep.subr.bf16.mxu1 %v18483_v4  ;;  %v3267_v47 = vld [vmem:[%s19910_s15 + $0x2d58] sm:$0xff]  ;;  %v18587_v27 = vcombine.high %v3139_v8, %v3143_v34 }
 0x8d8   : > { %16585 = vmatpush2.bf16.msra.mxu0 %v18354_v1  ;;  %v3271_v15 = vld [vmem:[%s19910_s15 + $0x2d78] sm:$0xff] }
 0x8d9   : > { %16636 = vmatprep.subr.bf16.mxu0 %v18603_v51  ;;  %v3131_v12 = vld [vmem:[%s19910_s15 + $0x2918] sm:$0xff]  ;;  %v18714_v6 = vcombine.low %v3267_v47, %v3271_v15 }
 0x8da   : > { %16626 = vmatpush2.bf16.msra.mxu1 %v18482_v25  ;;  %v3135_v0 = vld [vmem:[%s19910_s15 + $0x2938] sm:$0xff] }
 0x8db   : > { %16677 = vmatprep.subr.bf16.mxu1 %v18731_v10  ;;  %v16342_v16 = vpop.f32.mrf.mxu0  ;;  %16587 = vmatmul.mubr.bf16.vlgmr.msra.gmra.mxu0 %v20480_v48  ;;  %v3259_v56 = vld [vmem:[%s19910_s15 + $0x2d18] sm:$0xff]  ;;  %v18579_v55 = vcombine.high %v3131_v12, %v3135_v0  ;;  %v18578_v57 = vcombine.low %v3131_v12, %v3135_v0 }
 0x8dc   : > { %v16343_v5 = vadd.f32 %v16342_v16, %v22284_v36  ;;  %16637 = vmatpush1.bf16.msra.mxu0 %v18602_v58  ;;  %v18715_v36 = vcombine.high %v3267_v47, %v3271_v15  ;;  %16668 = vmatprep.mubr.bf16.mxu0 %v20496_v61  ;;  %v3263_v43 = vld [vmem:[%s19910_s15 + $0x2d38] sm:$0xff] }
 0x8dd   : > { %v16383_v29 = vpop.f32.mrf.mxu1  ;;  %16628 = vmatmul.mubr.bf16.vlgmr.msra.gmra.mxu1 %v20488_v52  ;;  %v16344_v9 = vpop.f32.mrf.mxu0  ;;  %16638 = vmatprep.subr.bf16.mxu0 %v18595_v7  ;;  %v18707_v54 = vcombine.high %v3259_v56, %v3263_v43  ;;  %v3123_v40 = vld [vmem:[%s19910_s15 + $0x28d8] sm:$0xff]  ;;  %v18706_v4 = vcombine.low %v3259_v56, %v3263_v43 }
 0x8de   : > { %16678 = vmatpush1.bf16.msra.mxu1 %v18730_v60  ;;  %v22357_v17 = vadd.f32 %v16383_v29, %v16343_v5  ;;  %v16345_v48 = vadd.f32 %v16344_v9, %v22292_v13  ;;  %16709 = vmatprep.mubr.bf16.mxu1 %v20503_v18  ;;  %v18586_v13 = vcombine.low %v3139_v8, %v3143_v34  ;;  %v3127_v18 = vld [vmem:[%s19910_s15 + $0x28f8] sm:$0xff] }
 0x8df   : > { %v16385_v62 = vpop.f32.mrf.mxu1  ;;  %16679 = vmatprep.subr.bf16.mxu1 %v18723_v46  ;;  %v16346_v52 = vpop.f32.mrf.mxu0  ;;  %v3251_v63 = vld [vmem:[%s19910_s15 + $0x2cd8] sm:$0xff]  ;;  %v18571_v19 = vcombine.high %v3123_v40, %v3127_v18  ;;  %v18570_v51 = vcombine.low %v3123_v40, %v3127_v18 }
 0x8e0   : > { %v22366_v44 = vadd.f32 %v16385_v62, %v16345_v48  ;;  %16639 = vmatpush1.bf16.msra.mxu0 %v18594_v59  ;;  %v3255_v35 = vld [vmem:[%s19910_s15 + $0x2cf8] sm:$0xff] }
 0x8e1   : > { %v16387_v26 = vpop.f32.mrf.mxu1  ;;  %v16347_v3 = vpop.f32.mrf.mxu0  ;;  %16640 = vmatprep.subr.bf16.mxu0 %v18587_v27  ;;  %v18699_v49 = vcombine.high %v3251_v63, %v3255_v35  ;;  %v3115_v39 = vld [vmem:[%s19910_s15 + $0x2898] sm:$0xff]  ;;  %v18698_v10 = vcombine.low %v3251_v63, %v3255_v35 }
 0x8e2   : > { %16680 = vmatpush1.bf16.msra.mxu1 %v18722_v38  ;;  %v3119_v24 = vld [vmem:[%s19910_s15 + $0x28b8] sm:$0xff] }
 0x8e3   : > { %v16388_v61 = vpop.f32.mrf.mxu1  ;;  %16681 = vmatprep.subr.bf16.mxu1 %v18715_v36  ;;  %v3243_v1 = vld [vmem:[%s19910_s15 + $0x2c98] sm:$0xff]  ;;  %v18563_v41 = vcombine.high %v3115_v39, %v3119_v24  ;;  %v18562_v7 = vcombine.low %v3115_v39, %v3119_v24 }
 0x8e4   : > { %16641 = vmatpush1.bf16.msra.mxu0 %v18586_v13  ;;  %v3247_v25 = vld [vmem:[%s19910_s15 + $0x2cb8] sm:$0xff] }
 0x8e5   : > { %16642 = vmatprep.subr.bf16.mxu0 %v18579_v55  ;;  %v18691_v53 = vcombine.high %v3243_v1, %v3247_v25  ;;  %v3107_v2 = vld [vmem:[%s19910_s15 + $0x2858] sm:$0xff]  ;;  %v18690_v46 = vcombine.low %v3243_v1, %v3247_v25 }
 0x8e6   : > { %16682 = vmatpush1.bf16.msra.mxu1 %v18714_v6  ;;  %v3111_v20 = vld [vmem:[%s19910_s15 + $0x2878] sm:$0xff] }
 0x8e7   : > { %16683 = vmatprep.subr.bf16.mxu1 %v18707_v54  ;;  %v3235_v58 = vld [vmem:[%s19910_s15 + $0x2c58] sm:$0xff]  ;;  %v18555_v8 = vcombine.high %v3107_v2, %v3111_v20  ;;  %v18554_v29 = vcombine.low %v3107_v2, %v3111_v20 }
 0x8e8   : > { %16643 = vmatpush1.bf16.msra.mxu0 %v18578_v57  ;;  %v3239_v60 = vld [vmem:[%s19910_s15 + $0x2c78] sm:$0xff] }
 0x8e9   : > { %16644 = vmatprep.subr.bf16.mxu0 %v18571_v19  ;;  %v18683_v34 = vcombine.high %v3235_v58, %v3239_v60  ;;  %v3099_v16 = vld [vmem:[%s19910_s15 + $0x2818] sm:$0xff]  ;;  %v18682_v59 = vcombine.low %v3235_v58, %v3239_v60 }
 0x8ea   : > { %16684 = vmatpush1.bf16.msra.mxu1 %v18706_v4  ;;  %v3103_v47 = vld [vmem:[%s19910_s15 + $0x2838] sm:$0xff] }
 0x8eb   : > { %16685 = vmatprep.subr.bf16.mxu1 %v18699_v49  ;;  %v3227_v15 = vld [vmem:[%s19910_s15 + $0x2c18] sm:$0xff]  ;;  %v18547_v9 = vcombine.high %v3099_v16, %v3103_v47  ;;  %v18546_v12 = vcombine.low %v3099_v16, %v3103_v47 }
 0x8ec   : > { %16645 = vmatpush1.bf16.msra.mxu0 %v18570_v51  ;;  %v3231_v5 = vld [vmem:[%s19910_s15 + $0x2c38] sm:$0xff] }
 0x8ed   : > { %16646 = vmatprep.subr.bf16.mxu0 %v18563_v41  ;;  %v18675_v38 = vcombine.high %v3227_v15, %v3231_v5  ;;  %v3219_v27 = vld [vmem:[%s19910_s15 + $0x2bd8] sm:$0xff]  ;;  %v18674_v0 = vcombine.low %v3227_v15, %v3231_v5 }
 0x8ee   : > { %16686 = vmatpush1.bf16.msra.mxu1 %v18698_v10  ;;  %v3223_v48 = vld [vmem:[%s19910_s15 + $0x2bf8] sm:$0xff] }
 0x8ef   : > { %16687 = vmatprep.subr.bf16.mxu1 %v18691_v53  ;;  %v3347_v62 = vld [vmem:[%s19910_s15 + $0x2fd8] sm:$0xff]  ;;  %v18667_v52 = vcombine.high %v3219_v27, %v3223_v48  ;;  %v18666_v6 = vcombine.low %v3219_v27, %v3223_v48 }
 0x8f0   : > { %16647 = vmatpush1.bf16.msra.mxu0 %v18562_v7  ;;  %v3351_v36 = vld [vmem:[%s19910_s15 + $0x2ff8] sm:$0xff] }
 0x8f1   : > { %16648 = vmatprep.subr.bf16.mxu0 %v18555_v8  ;;  %v18795_v56 = vcombine.high %v3347_v62, %v3351_v36  ;;  %v3211_v43 = vld [vmem:[%s19910_s15 + $0x2b98] sm:$0xff]  ;;  %v18794_v55 = vcombine.low %v3347_v62, %v3351_v36 }
 0x8f2   : > { %16688 = vmatpush1.bf16.msra.mxu1 %v18690_v46  ;;  %v3215_v26 = vld [vmem:[%s19910_s15 + $0x2bb8] sm:$0xff] }
 0x8f3   : > { %16689 = vmatprep.subr.bf16.mxu1 %v18683_v34  ;;  %v3339_v13 = vld [vmem:[%s19910_s15 + $0x2f98] sm:$0xff]  ;;  %v18659_v61 = vcombine.high %v3211_v43, %v3215_v26  ;;  %v18658_v57 = vcombine.low %v3211_v43, %v3215_v26 }
 0x8f4   : > { %16649 = vmatpush1.bf16.msra.mxu0 %v18554_v29  ;;  %v3343_v3 = vld [vmem:[%s19910_s15 + $0x2fb8] sm:$0xff] }
 0x8f5   : > { %16650 = vmatprep.subr.bf16.mxu0 %v18547_v9  ;;  %v18787_v54 = vcombine.high %v3339_v13, %v3343_v3  ;;  %v3203_v40 = vld [vmem:[%s19910_s15 + $0x2b58] sm:$0xff]  ;;  %v18786_v4 = vcombine.low %v3339_v13, %v3343_v3 }
 0x8f6   : > { %16690 = vmatpush1.bf16.msra.mxu1 %v18682_v59  ;;  %v3207_v18 = vld [vmem:[%s19910_s15 + $0x2b78] sm:$0xff] }
 0x8f7   : > { %16691 = vmatprep.subr.bf16.mxu1 %v18675_v38  ;;  %v3331_v63 = vld [vmem:[%s19910_s15 + $0x2f58] sm:$0xff]  ;;  %v18651_v19 = vcombine.high %v3203_v40, %v3207_v18  ;;  %v18650_v51 = vcombine.low %v3203_v40, %v3207_v18 }
 0x8f8   : > { %16651 = vmatpush1.bf16.msra.mxu0 %v18546_v12  ;;  %v3335_v35 = vld [vmem:[%s19910_s15 + $0x2f78] sm:$0xff] }
 0x8f9   : > { %16652 = vmatprep.subr.bf16.mxu0 %v18667_v52  ;;  %v18779_v49 = vcombine.high %v3331_v63, %v3335_v35  ;;  %v3195_v39 = vld [vmem:[%s19910_s15 + $0x2b18] sm:$0xff]  ;;  %v18778_v10 = vcombine.low %v3331_v63, %v3335_v35 }
 0x8fa   : > { %16692 = vmatpush1.bf16.msra.mxu1 %v18674_v0  ;;  %v3199_v24 = vld [vmem:[%s19910_s15 + $0x2b38] sm:$0xff] }
 0x8fb   : > { %16693 = vmatprep.subr.bf16.mxu1 %v18795_v56  ;;  %v3323_v1 = vld [vmem:[%s19910_s15 + $0x2f18] sm:$0xff]  ;;  %v18643_v41 = vcombine.high %v3195_v39, %v3199_v24  ;;  %v18642_v7 = vcombine.low %v3195_v39, %v3199_v24 }
 0x8fc   : > { %16653 = vmatpush2.bf16.msra.mxu0 %v18666_v6  ;;  %v3327_v25 = vld [vmem:[%s19910_s15 + $0x2f38] sm:$0xff] }
 0x8fd   : > { %16654 = vmatprep.subr.bf16.mxu0 %v18659_v61  ;;  %v18771_v53 = vcombine.high %v3323_v1, %v3327_v25  ;;  %v3187_v2 = vld [vmem:[%s19910_s15 + $0x2ad8] sm:$0xff]  ;;  %v18770_v46 = vcombine.low %v3323_v1, %v3327_v25 }
 0x8fe   : > { %16694 = vmatpush2.bf16.msra.mxu1 %v18794_v55  ;;  %v3191_v20 = vld [vmem:[%s19910_s15 + $0x2af8] sm:$0xff] }
 0x8ff   : > { %16695 = vmatprep.subr.bf16.mxu1 %v18787_v54  ;;  %v3315_v58 = vld [vmem:[%s19910_s15 + $0x2ed8] sm:$0xff]  ;;  %v18635_v8 = vcombine.high %v3187_v2, %v3191_v20  ;;  %v18634_v29 = vcombine.low %v3187_v2, %v3191_v20 }
 0x900   : > { %16655 = vmatpush2.bf16.msra.mxu0 %v18658_v57  ;;  %v3319_v60 = vld [vmem:[%s19910_s15 + $0x2ef8] sm:$0xff] }
 0x901   : > { %16656 = vmatprep.subr.bf16.mxu0 %v18651_v19  ;;  %v18763_v34 = vcombine.high %v3315_v58, %v3319_v60  ;;  %v3179_v16 = vld [vmem:[%s19910_s15 + $0x2a98] sm:$0xff]  ;;  %v18762_v59 = vcombine.low %v3315_v58, %v3319_v60 }
 0x902   : > { %16696 = vmatpush2.bf16.msra.mxu1 %v18786_v4  ;;  %v3183_v47 = vld [vmem:[%s19910_s15 + $0x2ab8] sm:$0xff] }
 0x903   : > { %16697 = vmatprep.subr.bf16.mxu1 %v18779_v49  ;;  %v3307_v15 = vld [vmem:[%s19910_s15 + $0x2e98] sm:$0xff]  ;;  %v18627_v9 = vcombine.high %v3179_v16, %v3183_v47  ;;  %v18626_v12 = vcombine.low %v3179_v16, %v3183_v47 }
 0x904   : > { %16657 = vmatpush2.bf16.msra.mxu0 %v18650_v51  ;;  %v3311_v5 = vld [vmem:[%s19910_s15 + $0x2eb8] sm:$0xff] }
 0x905   : > { %16658 = vmatprep.subr.bf16.mxu0 %v18643_v41  ;;  %v18755_v38 = vcombine.high %v3307_v15, %v3311_v5  ;;  %v3171_v27 = vld [vmem:[%s19910_s15 + $0x2a58] sm:$0xff]  ;;  %v18754_v0 = vcombine.low %v3307_v15, %v3311_v5 }
 0x906   : > { %16698 = vmatpush2.bf16.msra.mxu1 %v18778_v10  ;;  %v3175_v48 = vld [vmem:[%s19910_s15 + $0x2a78] sm:$0xff] }
 0x907   : > { %16699 = vmatprep.subr.bf16.mxu1 %v18771_v53  ;;  %v3299_v62 = vld [vmem:[%s19910_s15 + $0x2e58] sm:$0xff]  ;;  %v18619_v52 = vcombine.high %v3171_v27, %v3175_v48  ;;  %v18618_v6 = vcombine.low %v3171_v27, %v3175_v48 }
 0x908   : > { %16659 = vmatpush2.bf16.msra.mxu0 %v18642_v7  ;;  %v3303_v36 = vld [vmem:[%s19910_s15 + $0x2e78] sm:$0xff] }
 0x909   : > { %16660 = vmatprep.subr.bf16.mxu0 %v18635_v8  ;;  %v18747_v56 = vcombine.high %v3299_v62, %v3303_v36  ;;  %v3163_v43 = vld [vmem:[%s19910_s15 + $0x2a18] sm:$0xff]  ;;  %v18746_v55 = vcombine.low %v3299_v62, %v3303_v36 }
 0x90a   : > { %16700 = vmatpush2.bf16.msra.mxu1 %v18770_v46  ;;  %v3167_v26 = vld [vmem:[%s19910_s15 + $0x2a38] sm:$0xff] }
 0x90b   : > { %16701 = vmatprep.subr.bf16.mxu1 %v18763_v34  ;;  %v3291_v13 = vld [vmem:[%s19910_s15 + $0x2e18] sm:$0xff]  ;;  %v18611_v61 = vcombine.high %v3163_v43, %v3167_v26  ;;  %v18610_v57 = vcombine.low %v3163_v43, %v3167_v26 }
 0x90c   : > { %16661 = vmatpush2.bf16.msra.mxu0 %v18634_v29  ;;  %v3295_v3 = vld [vmem:[%s19910_s15 + $0x2e38] sm:$0xff] }
 0x90d   : > { %16662 = vmatprep.subr.bf16.mxu0 %v18627_v9  ;;  %v18739_v54 = vcombine.high %v3291_v13, %v3295_v3  ;;  %v3411_v40 = vld [vmem:[%s19910_s15 + $0x31d8] sm:$0xff]  ;;  %v18738_v4 = vcombine.low %v3291_v13, %v3295_v3 }
 0x90e   : > { %16702 = vmatpush2.bf16.msra.mxu1 %v18762_v59  ;;  %v3415_v18 = vld [vmem:[%s19910_s15 + $0x31f8] sm:$0xff] }
 0x90f   : > { %16703 = vmatprep.subr.bf16.mxu1 %v18755_v38  ;;  %v3539_v63 = vld [vmem:[%s19910_s15 + $0x35d8] sm:$0xff]  ;;  %v18859_v19 = vcombine.high %v3411_v40, %v3415_v18  ;;  %v18858_v51 = vcombine.low %v3411_v40, %v3415_v18 }
 0x910   : > { %16663 = vmatpush2.bf16.msra.mxu0 %v18626_v12  ;;  %v3543_v35 = vld [vmem:[%s19910_s15 + $0x35f8] sm:$0xff] }
 0x911   : > { %16664 = vmatprep.subr.bf16.mxu0 %v18619_v52  ;;  %v18987_v49 = vcombine.high %v3539_v63, %v3543_v35  ;;  %v3403_v39 = vld [vmem:[%s19910_s15 + $0x3198] sm:$0xff]  ;;  %v18986_v10 = vcombine.low %v3539_v63, %v3543_v35 }
 0x912   : > { %16704 = vmatpush2.bf16.msra.mxu1 %v18754_v0  ;;  %v3407_v24 = vld [vmem:[%s19910_s15 + $0x31b8] sm:$0xff] }
 0x913   : > { %16705 = vmatprep.subr.bf16.mxu1 %v18747_v56  ;;  %v3531_v1 = vld [vmem:[%s19910_s15 + $0x3598] sm:$0xff]  ;;  %v18851_v41 = vcombine.high %v3403_v39, %v3407_v24  ;;  %v18850_v34 = vcombine.low %v3403_v39, %v3407_v24 }
 0x914   : > { %16665 = vmatpush2.bf16.msra.mxu0 %v18618_v6  ;;  %v3535_v25 = vld [vmem:[%s19910_s15 + $0x35b8] sm:$0xff] }
 0x915   : > { %16666 = vmatprep.subr.bf16.mxu0 %v18611_v61  ;;  %v18979_v53 = vcombine.high %v3531_v1, %v3535_v25  ;;  %v3395_v2 = vld [vmem:[%s19910_s15 + $0x3158] sm:$0xff]  ;;  %v18978_v47 = vcombine.low %v3531_v1, %v3535_v25 }
 0x916   : > { %16706 = vmatpush2.bf16.msra.mxu1 %v18746_v55  ;;  %v3399_v20 = vld [vmem:[%s19910_s15 + $0x3178] sm:$0xff] }
 0x917   : > { %16707 = vmatprep.subr.bf16.mxu1 %v18739_v54  ;;  %v3523_v60 = vld [vmem:[%s19910_s15 + $0x3558] sm:$0xff]  ;;  %v18843_v15 = vcombine.high %v3395_v2, %v3399_v20 }
 0x918   : > { %16667 = vmatpush2.bf16.msra.mxu0 %v18610_v57  ;;  %v3527_v7 = vld [vmem:[%s19910_s15 + $0x3578] sm:$0xff] }
 0x919   : > { %16718 = vmatprep.subr.bf16.mxu0 %v18859_v19  ;;  %v3387_v59 = vld [vmem:[%s19910_s15 + $0x3118] sm:$0xff]  ;;  %v18970_v12 = vcombine.low %v3523_v60, %v3527_v7 }
 0x91a   : > { %16708 = vmatpush2.bf16.msra.mxu1 %v18738_v4  ;;  %v3391_v9 = vld [vmem:[%s19910_s15 + $0x3138] sm:$0xff] }
 0x91b   : > { %16759 = vmatprep.subr.bf16.mxu1 %v18987_v49  ;;  %v16424_v58 = vpop.f32.mrf.mxu0  ;;  %16669 = vmatmul.mubr.bf16.vlgmr.msra.gmra.mxu0 %v20574_v45  ;;  %v3515_v38 = vld [vmem:[%s19910_s15 + $0x3518] sm:$0xff]  ;;  %v18835_v0 = vcombine.high %v3387_v59, %v3391_v9  ;;  %v18834_v13 = vcombine.low %v3387_v59, %v3391_v9 }
 0x91c   : > { %v16425_v46 = vadd.f32 %v16424_v58, %v22357_v17  ;;  %16719 = vmatpush1.bf16.msra.mxu0 %v18858_v51  ;;  %v18971_v17 = vcombine.high %v3523_v60, %v3527_v7  ;;  %16750 = vmatprep.mubr.bf16.mxu0 %v20590_v28  ;;  %v3519_v27 = vld [vmem:[%s19910_s15 + $0x3538] sm:$0xff] }
 0x91d   : > { %v16465_v8 = vpop.f32.mrf.mxu1  ;;  %16710 = vmatmul.mubr.bf16.vlgmr.msra.gmra.mxu1 %v20582_v11  ;;  %v16426_v16 = vpop.f32.mrf.mxu0  ;;  %16720 = vmatprep.subr.bf16.mxu0 %v18851_v41  ;;  %v18963_v52 = vcombine.high %v3515_v38, %v3519_v27  ;;  %v3379_v56 = vld [vmem:[%s19910_s15 + $0x30d8] sm:$0xff]  ;;  %v18962_v3 = vcombine.low %v3515_v38, %v3519_v27 }
 0x91e   : > { %16760 = vmatpush1.bf16.msra.mxu1 %v18986_v10  ;;  %v22431_v5 = vadd.f32 %v16465_v8, %v16425_v46  ;;  %v16427_v45 = vadd.f32 %v16426_v16, %v22366_v44  ;;  %16791 = vmatprep.mubr.bf16.mxu1 %v20597_v21  ;;  %v18842_v44 = vcombine.low %v3395_v2, %v3399_v20  ;;  %v3383_v21 = vld [vmem:[%s19910_s15 + $0x30f8] sm:$0xff] }
 0x91f   : > { %v16467_v29 = vpop.f32.mrf.mxu1  ;;  %16761 = vmatprep.subr.bf16.mxu1 %v18979_v53  ;;  %v16428_v11 = vpop.f32.mrf.mxu0  ;;  %v3507_v43 = vld [vmem:[%s19910_s15 + $0x34d8] sm:$0xff]  ;;  %v18827_v6 = vcombine.high %v3379_v56, %v3383_v21  ;;  %v18826_v63 = vcombine.low %v3379_v56, %v3383_v21 }
 0x920   : > { %v22440_v48 = vadd.f32 %v16467_v29, %v16427_v45  ;;  %16721 = vmatpush1.bf16.msra.mxu0 %v18850_v34  ;;  %v3511_v26 = vld [vmem:[%s19910_s15 + $0x34f8] sm:$0xff] }
 0x921   : > { %v16469_v62 = vpop.f32.mrf.mxu1  ;;  %v16429_v36 = vpop.f32.mrf.mxu0  ;;  %16722 = vmatprep.subr.bf16.mxu0 %v18843_v15  ;;  %v18955_v55 = vcombine.high %v3507_v43, %v3511_v26  ;;  %v3371_v61 = vld [vmem:[%s19910_s15 + $0x3098] sm:$0xff]  ;;  %v18954_v35 = vcombine.low %v3507_v43, %v3511_v26 }
 0x922   : > { %16762 = vmatpush1.bf16.msra.mxu1 %v18978_v47  ;;  %v3375_v54 = vld [vmem:[%s19910_s15 + $0x30b8] sm:$0xff] }
 0x923   : > { %v16470_v28 = vpop.f32.mrf.mxu1  ;;  %16763 = vmatprep.subr.bf16.mxu1 %v18971_v17  ;;  %v3499_v40 = vld [vmem:[%s19910_s15 + $0x3498] sm:$0xff]  ;;  %v18819_v57 = vcombine.high %v3371_v61, %v3375_v54  ;;  %v18818_v1 = vcombine.low %v3371_v61, %v3375_v54 }
 0x924   : > { %16723 = vmatpush1.bf16.msra.mxu0 %v18842_v44  ;;  %v3503_v18 = vld [vmem:[%s19910_s15 + $0x34b8] sm:$0xff] }
 0x925   : > { %16724 = vmatprep.subr.bf16.mxu0 %v18835_v0  ;;  %v18947_v4 = vcombine.high %v3499_v40, %v3503_v18  ;;  %v3363_v19 = vld [vmem:[%s19910_s15 + $0x3058] sm:$0xff]  ;;  %v18946_v25 = vcombine.low %v3499_v40, %v3503_v18 }
 0x926   : > { %16764 = vmatpush1.bf16.msra.mxu1 %v18970_v12  ;;  %v3367_v49 = vld [vmem:[%s19910_s15 + $0x3078] sm:$0xff] }
 0x927   : > { %16765 = vmatprep.subr.bf16.mxu1 %v18963_v52  ;;  %v3491_v39 = vld [vmem:[%s19910_s15 + $0x3458] sm:$0xff]  ;;  %v18811_v51 = vcombine.high %v3363_v19, %v3367_v49  ;;  %v18810_v58 = vcombine.low %v3363_v19, %v3367_v49 }
 0x928   : > { %16725 = vmatpush1.bf16.msra.mxu0 %v18834_v13  ;;  %v3495_v24 = vld [vmem:[%s19910_s15 + $0x3478] sm:$0xff] }
 0x929   : > { %16726 = vmatprep.subr.bf16.mxu0 %v18827_v6  ;;  %v18939_v10 = vcombine.high %v3491_v39, %v3495_v24  ;;  %v3355_v41 = vld [vmem:[%s19910_s15 + $0x3018] sm:$0xff]  ;;  %v18938_v60 = vcombine.low %v3491_v39, %v3495_v24 }
 0x92a   : > { %16766 = vmatpush1.bf16.msra.mxu1 %v18962_v3  ;;  %v3359_v53 = vld [vmem:[%s19910_s15 + $0x3038] sm:$0xff] }
 0x92b   : > { %16767 = vmatprep.subr.bf16.mxu1 %v18955_v55  ;;  %v3483_v2 = vld [vmem:[%s19910_s15 + $0x3418] sm:$0xff]  ;;  %v18803_v7 = vcombine.high %v3355_v41, %v3359_v53  ;;  %v18802_v15 = vcombine.low %v3355_v41, %v3359_v53 }
 0x92c   : > { %16727 = vmatpush1.bf16.msra.mxu0 %v18826_v63  ;;  %v3487_v20 = vld [vmem:[%s19910_s15 + $0x3438] sm:$0xff] }
 0x92d   : > { %16728 = vmatprep.subr.bf16.mxu0 %v18819_v57  ;;  %v18931_v46 = vcombine.high %v3483_v2, %v3487_v20  ;;  %v3475_v8 = vld [vmem:[%s19910_s15 + $0x33d8] sm:$0xff]  ;;  %v18930_v45 = vcombine.low %v3483_v2, %v3487_v20 }
 0x92e   : > { %16768 = vmatpush1.bf16.msra.mxu1 %v18954_v35  ;;  %v3479_v34 = vld [vmem:[%s19910_s15 + $0x33f8] sm:$0xff] }
 0x92f   : > { %16769 = vmatprep.subr.bf16.mxu1 %v18947_v4  ;;  %v3603_v16 = vld [vmem:[%s19910_s15 + $0x37d8] sm:$0xff]  ;;  %v18923_v29 = vcombine.high %v3475_v8, %v3479_v34  ;;  %v18922_v27 = vcombine.low %v3475_v8, %v3479_v34 }
 0x930   : > { %16729 = vmatpush1.bf16.msra.mxu0 %v18818_v1  ;;  %v3607_v47 = vld [vmem:[%s19910_s15 + $0x37f8] sm:$0xff] }
 0x931   : > { %16730 = vmatprep.subr.bf16.mxu0 %v18811_v51  ;;  %v19051_v17 = vcombine.high %v3603_v16, %v3607_v47  ;;  %v3467_v59 = vld [vmem:[%s19910_s15 + $0x3398] sm:$0xff]  ;;  %v19050_v62 = vcombine.low %v3603_v16, %v3607_v47 }
 0x932   : > { %16770 = vmatpush1.bf16.msra.mxu1 %v18946_v25  ;;  %v3471_v9 = vld [vmem:[%s19910_s15 + $0x33b8] sm:$0xff] }
 0x933   : > { %16771 = vmatprep.subr.bf16.mxu1 %v18939_v10  ;;  %v3595_v11 = vld [vmem:[%s19910_s15 + $0x3798] sm:$0xff]  ;;  %v18915_v44 = vcombine.high %v3467_v59, %v3471_v9  ;;  %v18914_v56 = vcombine.low %v3467_v59, %v3471_v9 }
 0x934   : > { %16731 = vmatpush1.bf16.msra.mxu0 %v18810_v58  ;;  %v3599_v38 = vld [vmem:[%s19910_s15 + $0x37b8] sm:$0xff] }
 0x935   : > { %16732 = vmatprep.subr.bf16.mxu0 %v18803_v7  ;;  %v19043_v36 = vcombine.high %v3595_v11, %v3599_v38  ;;  %v3459_v12 = vld [vmem:[%s19910_s15 + $0x3358] sm:$0xff]  ;;  %v19042_v21 = vcombine.low %v3595_v11, %v3599_v38 }
 0x936   : > { %16772 = vmatpush1.bf16.msra.mxu1 %v18938_v60  ;;  %v3463_v0 = vld [vmem:[%s19910_s15 + $0x3378] sm:$0xff] }
 0x937   : > { %16773 = vmatprep.subr.bf16.mxu1 %v18931_v46  ;;  %v3587_v28 = vld [vmem:[%s19910_s15 + $0x3758] sm:$0xff]  ;;  %v18907_v43 = vcombine.high %v3459_v12, %v3463_v0  ;;  %v18906_v61 = vcombine.low %v3459_v12, %v3463_v0 }
 0x938   : > { %16733 = vmatpush1.bf16.msra.mxu0 %v18802_v15  ;;  %v3591_v52 = vld [vmem:[%s19910_s15 + $0x3778] sm:$0xff] }
 0x939   : > { %16734 = vmatprep.subr.bf16.mxu0 %v18923_v29  ;;  %v19035_v26 = vcombine.high %v3587_v28, %v3591_v52  ;;  %v3451_v13 = vld [vmem:[%s19910_s15 + $0x3318] sm:$0xff]  ;;  %v19034_v54 = vcombine.low %v3587_v28, %v3591_v52 }
 0x93a   : > { %16774 = vmatpush1.bf16.msra.mxu1 %v18930_v45  ;;  %v3455_v3 = vld [vmem:[%s19910_s15 + $0x3338] sm:$0xff] }
 0x93b   : > { %16775 = vmatprep.subr.bf16.mxu1 %v19051_v17  ;;  %v3579_v6 = vld [vmem:[%s19910_s15 + $0x3718] sm:$0xff]  ;;  %v18899_v40 = vcombine.high %v3451_v13, %v3455_v3  ;;  %v18898_v19 = vcombine.low %v3451_v13, %v3455_v3 }
 0x93c   : > { %16735 = vmatpush2.bf16.msra.mxu0 %v18922_v27  ;;  %v3583_v55 = vld [vmem:[%s19910_s15 + $0x3738] sm:$0xff] }
 0x93d   : > { %16736 = vmatprep.subr.bf16.mxu0 %v18915_v44  ;;  %v19027_v18 = vcombine.high %v3579_v6, %v3583_v55  ;;  %v3443_v63 = vld [vmem:[%s19910_s15 + $0x32d8] sm:$0xff]  ;;  %v19026_v49 = vcombine.low %v3579_v6, %v3583_v55 }
 0x93e   : > { %16776 = vmatpush2.bf16.msra.mxu1 %v19050_v62  ;;  %v3447_v35 = vld [vmem:[%s19910_s15 + $0x32f8] sm:$0xff] }
 0x93f   : > { %16777 = vmatprep.subr.bf16.mxu1 %v19043_v36  ;;  %v3571_v57 = vld [vmem:[%s19910_s15 + $0x36d8] sm:$0xff]  ;;  %v18891_v39 = vcombine.high %v3443_v63, %v3447_v35  ;;  %v18890_v41 = vcombine.low %v3443_v63, %v3447_v35 }
 0x940   : > { %16737 = vmatpush2.bf16.msra.mxu0 %v18914_v56  ;;  %v3575_v4 = vld [vmem:[%s19910_s15 + $0x36f8] sm:$0xff] }
 0x941   : > { %16738 = vmatprep.subr.bf16.mxu0 %v18907_v43  ;;  %v19019_v24 = vcombine.high %v3571_v57, %v3575_v4  ;;  %v3435_v1 = vld [vmem:[%s19910_s15 + $0x3298] sm:$0xff]  ;;  %v19018_v53 = vcombine.low %v3571_v57, %v3575_v4 }
 0x942   : > { %16778 = vmatpush2.bf16.msra.mxu1 %v19042_v21  ;;  %v3439_v25 = vld [vmem:[%s19910_s15 + $0x32b8] sm:$0xff] }
 0x943   : > { %16779 = vmatprep.subr.bf16.mxu1 %v19035_v26  ;;  %v3563_v51 = vld [vmem:[%s19910_s15 + $0x3698] sm:$0xff]  ;;  %v18883_v2 = vcombine.high %v3435_v1, %v3439_v25  ;;  %v18882_v8 = vcombine.low %v3435_v1, %v3439_v25 }
 0x944   : > { %16739 = vmatpush2.bf16.msra.mxu0 %v18906_v61  ;;  %v3567_v10 = vld [vmem:[%s19910_s15 + $0x36b8] sm:$0xff] }
 0x945   : > { %16740 = vmatprep.subr.bf16.mxu0 %v18899_v40  ;;  %v19011_v20 = vcombine.high %v3563_v51, %v3567_v10  ;;  %v3427_v58 = vld [vmem:[%s19910_s15 + $0x3258] sm:$0xff]  ;;  %v19010_v34 = vcombine.low %v3563_v51, %v3567_v10 }
 0x946   : > { %16780 = vmatpush2.bf16.msra.mxu1 %v19034_v54  ;;  %v3431_v60 = vld [vmem:[%s19910_s15 + $0x3278] sm:$0xff] }
 0x947   : > { %16781 = vmatprep.subr.bf16.mxu1 %v19027_v18  ;;  %v3555_v7 = vld [vmem:[%s19910_s15 + $0x3658] sm:$0xff]  ;;  %v18875_v16 = vcombine.high %v3427_v58, %v3431_v60  ;;  %v18874_v59 = vcombine.low %v3427_v58, %v3431_v60 }
 0x948   : > { %16741 = vmatpush2.bf16.msra.mxu0 %v18898_v19  ;;  %v3559_v46 = vld [vmem:[%s19910_s15 + $0x3678] sm:$0xff] }
 0x949   : > { %16742 = vmatprep.subr.bf16.mxu0 %v18891_v39  ;;  %v19003_v47 = vcombine.high %v3555_v7, %v3559_v46  ;;  %v3419_v15 = vld [vmem:[%s19910_s15 + $0x3218] sm:$0xff]  ;;  %v19002_v9 = vcombine.low %v3555_v7, %v3559_v46 }
 0x94a   : > { %16782 = vmatpush2.bf16.msra.mxu1 %v19026_v49  ;;  %v3423_v45 = vld [vmem:[%s19910_s15 + $0x3238] sm:$0xff] }
 0x94b   : > { %16783 = vmatprep.subr.bf16.mxu1 %v19019_v24  ;;  %v3547_v29 = vld [vmem:[%s19910_s15 + $0x3618] sm:$0xff]  ;;  %v18867_v11 = vcombine.high %v3419_v15, %v3423_v45  ;;  %v18866_v12 = vcombine.low %v3419_v15, %v3423_v45 }
 0x94c   : > { %16743 = vmatpush2.bf16.msra.mxu0 %v18890_v41  ;;  %v3551_v17 = vld [vmem:[%s19910_s15 + $0x3638] sm:$0xff] }
 0x94d   : > { %16744 = vmatprep.subr.bf16.mxu0 %v18883_v2  ;;  %v18995_v38 = vcombine.high %v3547_v29, %v3551_v17  ;;  %v3667_v27 = vld [vmem:[%s19910_s15 + $0x39d8] sm:$0xff]  ;;  %v18994_v0 = vcombine.low %v3547_v29, %v3551_v17 }
 0x94e   : > { %16784 = vmatpush2.bf16.msra.mxu1 %v19018_v53  ;;  %v3671_v62 = vld [vmem:[%s19910_s15 + $0x39f8] sm:$0xff] }
 0x94f   : > { %16785 = vmatprep.subr.bf16.mxu1 %v19011_v20  ;;  %v3795_v44 = vld [vmem:[%s19910_s15 + $0x3dd8] sm:$0xff]  ;;  %v19115_v28 = vcombine.high %v3667_v27, %v3671_v62  ;;  %v19114_v13 = vcombine.low %v3667_v27, %v3671_v62 }
 0x950   : > { %16745 = vmatpush2.bf16.msra.mxu0 %v18882_v8  ;;  %v3799_v36 = vld [vmem:[%s19910_s15 + $0x3df8] sm:$0xff] }
 0x951   : > { %16746 = vmatprep.subr.bf16.mxu0 %v18875_v16  ;;  %v19243_v52 = vcombine.high %v3795_v44, %v3799_v36  ;;  %v3659_v56 = vld [vmem:[%s19910_s15 + $0x3998] sm:$0xff]  ;;  %v19242_v3 = vcombine.low %v3795_v44, %v3799_v36 }
 0x952   : > { %16786 = vmatpush2.bf16.msra.mxu1 %v19010_v34  ;;  %v3663_v21 = vld [vmem:[%s19910_s15 + $0x39b8] sm:$0xff] }
 0x953   : > { %16787 = vmatprep.subr.bf16.mxu1 %v19003_v47  ;;  %v3787_v43 = vld [vmem:[%s19910_s15 + $0x3d98] sm:$0xff]  ;;  %v19107_v6 = vcombine.high %v3659_v56, %v3663_v21  ;;  %v19106_v4 = vcombine.low %v3659_v56, %v3663_v21 }
 0x954   : > { %16747 = vmatpush2.bf16.msra.mxu0 %v18874_v59  ;;  %v3791_v26 = vld [vmem:[%s19910_s15 + $0x3db8] sm:$0xff] }
 0x955   : > { %16748 = vmatprep.subr.bf16.mxu0 %v18867_v11  ;;  %v19235_v55 = vcombine.high %v3787_v43, %v3791_v26  ;;  %v3651_v61 = vld [vmem:[%s19910_s15 + $0x3958] sm:$0xff]  ;;  %v19234_v49 = vcombine.low %v3787_v43, %v3791_v26 }
 0x956   : > { %16788 = vmatpush2.bf16.msra.mxu1 %v19002_v9  ;;  %v3655_v54 = vld [vmem:[%s19910_s15 + $0x3978] sm:$0xff] }
 0x957   : > { %16789 = vmatprep.subr.bf16.mxu1 %v18995_v38  ;;  %v3779_v18 = vld [vmem:[%s19910_s15 + $0x3d58] sm:$0xff]  ;;  %v19099_v39 = vcombine.high %v3651_v61, %v3655_v54 }
 0x958   : > { %16749 = vmatpush2.bf16.msra.mxu0 %v18866_v12  ;;  %v3783_v63 = vld [vmem:[%s19910_s15 + $0x3d78] sm:$0xff] }
 0x959   : > { %16800 = vmatprep.subr.bf16.mxu0 %v19115_v28  ;;  %v3643_v25 = vld [vmem:[%s19910_s15 + $0x3918] sm:$0xff]  ;;  %v19226_v58 = vcombine.low %v3779_v18, %v3783_v63 }
 0x95a   : > { %16790 = vmatpush2.bf16.msra.mxu1 %v18994_v0  ;;  %v3647_v51 = vld [vmem:[%s19910_s15 + $0x3938] sm:$0xff] }
 0x95b   : > { %16841 = vmatprep.subr.bf16.mxu1 %v19243_v52  ;;  %v16506_v40 = vpop.f32.mrf.mxu0  ;;  %16751 = vmatmul.mubr.bf16.vlgmr.msra.gmra.mxu0 %v20668_v23  ;;  %v3771_v10 = vld [vmem:[%s19910_s15 + $0x3d18] sm:$0xff]  ;;  %v19091_v60 = vcombine.high %v3643_v25, %v3647_v51  ;;  %v19090_v16 = vcombine.low %v3643_v25, %v3647_v51 }
 0x95c   : > { %v16507_v35 = vadd.f32 %v16506_v40, %v22431_v5  ;;  %16801 = vmatpush1.bf16.msra.mxu0 %v19114_v13  ;;  %v19227_v5 = vcombine.high %v3779_v18, %v3783_v63  ;;  %16832 = vmatprep.mubr.bf16.mxu0 %v20684_v37  ;;  %v3775_v41 = vld [vmem:[%s19910_s15 + $0x3d38] sm:$0xff] }
 0x95d   : > { %v16547_v57 = vpop.f32.mrf.mxu1  ;;  %16792 = vmatmul.mubr.bf16.vlgmr.msra.gmra.mxu1 %v20676_v22  ;;  %v16508_v19 = vpop.f32.mrf.mxu0  ;;  %16802 = vmatprep.subr.bf16.mxu0 %v19107_v6  ;;  %v19219_v7 = vcombine.high %v3771_v10, %v3775_v41  ;;  %v3635_v46 = vld [vmem:[%s19910_s15 + $0x38d8] sm:$0xff]  ;;  %v19218_v47 = vcombine.low %v3771_v10, %v3775_v41 }
 0x95e   : > { %16842 = vmatpush1.bf16.msra.mxu1 %v19242_v3  ;;  %v22505_v24 = vadd.f32 %v16547_v57, %v16507_v35  ;;  %v16509_v23 = vadd.f32 %v16508_v19, %v22440_v48  ;;  %16873 = vmatprep.mubr.bf16.mxu1 %v20691_v42  ;;  %v19098_v48 = vcombine.low %v3651_v61, %v3655_v54  ;;  %v3639_v42 = vld [vmem:[%s19910_s15 + $0x38f8] sm:$0xff] }
 0x95f   : > { %v16549_v1 = vpop.f32.mrf.mxu1  ;;  %16843 = vmatprep.subr.bf16.mxu1 %v19235_v55  ;;  %v16510_v22 = vpop.f32.mrf.mxu0  ;;  %v3763_v8 = vld [vmem:[%s19910_s15 + $0x3cd8] sm:$0xff]  ;;  %v19083_v15 = vcombine.high %v3635_v46, %v3639_v42  ;;  %v19082_v11 = vcombine.low %v3635_v46, %v3639_v42 }
 0x960   : > { %v22514_v53 = vadd.f32 %v16549_v1, %v16509_v23  ;;  %16803 = vmatpush1.bf16.msra.mxu0 %v19106_v4  ;;  %v3767_v34 = vld [vmem:[%s19910_s15 + $0x3cf8] sm:$0xff] }
 0x961   : > { %v16551_v2 = vpop.f32.mrf.mxu1  ;;  %v16511_v20 = vpop.f32.mrf.mxu0  ;;  %16804 = vmatprep.subr.bf16.mxu0 %v19099_v39  ;;  %v19211_v45 = vcombine.high %v3763_v8, %v3767_v34  ;;  %v3627_v29 = vld [vmem:[%s19910_s15 + $0x3898] sm:$0xff]  ;;  %v19210_v38 = vcombine.low %v3763_v8, %v3767_v34 }
 0x962   : > { %16844 = vmatpush1.bf16.msra.mxu1 %v19234_v49  ;;  %v3631_v17 = vld [vmem:[%s19910_s15 + $0x38b8] sm:$0xff] }
 0x963   : > { %v16552_v37 = vpop.f32.mrf.mxu1  ;;  %16845 = vmatprep.subr.bf16.mxu1 %v19227_v5  ;;  %v3755_v59 = vld [vmem:[%s19910_s15 + $0x3c98] sm:$0xff]  ;;  %v19075_v27 = vcombine.high %v3627_v29, %v3631_v17  ;;  %v19074_v28 = vcombine.low %v3627_v29, %v3631_v17 }
 0x964   : > { %16805 = vmatpush1.bf16.msra.mxu0 %v19098_v48  ;;  %v3759_v9 = vld [vmem:[%s19910_s15 + $0x3cb8] sm:$0xff] }
 0x965   : > { %16806 = vmatprep.subr.bf16.mxu0 %v19091_v60  ;;  %v19203_v62 = vcombine.high %v3755_v59, %v3759_v9  ;;  %v3619_v44 = vld [vmem:[%s19910_s15 + $0x3858] sm:$0xff]  ;;  %v19202_v52 = vcombine.low %v3755_v59, %v3759_v9 }
 0x966   : > { %16846 = vmatpush1.bf16.msra.mxu1 %v19226_v58  ;;  %v3623_v36 = vld [vmem:[%s19910_s15 + $0x3878] sm:$0xff] }
 0x967   : > { %16847 = vmatprep.subr.bf16.mxu1 %v19219_v7  ;;  %v3747_v12 = vld [vmem:[%s19910_s15 + $0x3c58] sm:$0xff]  ;;  %v19067_v56 = vcombine.high %v3619_v44, %v3623_v36  ;;  %v19066_v6 = vcombine.low %v3619_v44, %v3623_v36 }
 0x968   : > { %16807 = vmatpush1.bf16.msra.mxu0 %v19090_v16  ;;  %v3751_v0 = vld [vmem:[%s19910_s15 + $0x3c78] sm:$0xff] }
 0x969   : > { %16808 = vmatprep.subr.bf16.mxu0 %v19083_v15  ;;  %v19195_v21 = vcombine.high %v3747_v12, %v3751_v0  ;;  %v3611_v43 = vld [vmem:[%s19910_s15 + $0x3818] sm:$0xff]  ;;  %v19194_v55 = vcombine.low %v3747_v12, %v3751_v0 }
 0x96a   : > { %16848 = vmatpush1.bf16.msra.mxu1 %v19218_v47  ;;  %v3615_v26 = vld [vmem:[%s19910_s15 + $0x3838] sm:$0xff] }
 0x96b   : > { %16849 = vmatprep.subr.bf16.mxu1 %v19211_v45  ;;  %v3739_v13 = vld [vmem:[%s19910_s15 + $0x3c18] sm:$0xff]  ;;  %v19059_v61 = vcombine.high %v3611_v43, %v3615_v26  ;;  %v19058_v57 = vcombine.low %v3611_v43, %v3615_v26 }
 0x96c   : > { %16809 = vmatpush1.bf16.msra.mxu0 %v19082_v11  ;;  %v3743_v3 = vld [vmem:[%s19910_s15 + $0x3c38] sm:$0xff] }
 0x96d   : > { %16810 = vmatprep.subr.bf16.mxu0 %v19075_v27  ;;  %v19187_v54 = vcombine.high %v3739_v13, %v3743_v3  ;;  %v3731_v40 = vld [vmem:[%s19910_s15 + $0x3bd8] sm:$0xff]  ;;  %v19186_v4 = vcombine.low %v3739_v13, %v3743_v3 }
 0x96e   : > { %16850 = vmatpush1.bf16.msra.mxu1 %v19210_v38  ;;  %v3735_v18 = vld [vmem:[%s19910_s15 + $0x3bf8] sm:$0xff] }
 0x96f   : > { %16851 = vmatprep.subr.bf16.mxu1 %v19203_v62  ;;  %v3859_v63 = vld [vmem:[%s19910_s15 + $0x3fd8] sm:$0xff]  ;;  %v19179_v19 = vcombine.high %v3731_v40, %v3735_v18  ;;  %v19178_v25 = vcombine.low %v3731_v40, %v3735_v18 }
 0x970   : > { %16811 = vmatpush1.bf16.msra.mxu0 %v19074_v28  ;;  %v3863_v35 = vld [vmem:[%s19910_s15 + $0x3ff8] sm:$0xff] }
 0x971   : > { %16812 = vmatprep.subr.bf16.mxu0 %v19067_v56  ;;  %v19307_v49 = vcombine.high %v3859_v63, %v3863_v35  ;;  %v3723_v39 = vld [vmem:[%s19910_s15 + $0x3b98] sm:$0xff]  ;;  %v19306_v51 = vcombine.low %v3859_v63, %v3863_v35 }
 0x972   : > { %16852 = vmatpush1.bf16.msra.mxu1 %v19202_v52  ;;  %v3727_v23 = vld [vmem:[%s19910_s15 + $0x3bb8] sm:$0xff] }
 0x973   : > { %16853 = vmatprep.subr.bf16.mxu1 %v19195_v21  ;;  %v3851_v1 = vld [vmem:[%s19910_s15 + $0x3f98] sm:$0xff]  ;;  %v19171_v22 = vcombine.high %v3723_v39, %v3727_v23  ;;  %v19170_v58 = vcombine.low %v3723_v39, %v3727_v23 }
 0x974   : > { %16813 = vmatpush1.bf16.msra.mxu0 %v19066_v6  ;;  %v3855_v5 = vld [vmem:[%s19910_s15 + $0x3fb8] sm:$0xff] }
 0x975   : > { %16814 = vmatprep.subr.bf16.mxu0 %v19059_v61  ;;  %v19299_v10 = vcombine.high %v3851_v1, %v3855_v5  ;;  %v3715_v41 = vld [vmem:[%s19910_s15 + $0x3b58] sm:$0xff]  ;;  %v19298_v60 = vcombine.low %v3851_v1, %v3855_v5 }
 0x976   : > { %16854 = vmatpush1.bf16.msra.mxu1 %v19194_v55  ;;  %v3719_v2 = vld [vmem:[%s19910_s15 + $0x3b78] sm:$0xff] }
 0x977   : > { %16855 = vmatprep.subr.bf16.mxu1 %v19187_v54  ;;  %v3843_v48 = vld [vmem:[%s19910_s15 + $0x3f58] sm:$0xff]  ;;  %v19163_v37 = vcombine.high %v3715_v41, %v3719_v2  ;;  %v19162_v16 = vcombine.low %v3715_v41, %v3719_v2 }
 0x978   : > { %16815 = vmatpush1.bf16.msra.mxu0 %v19058_v57  ;;  %v3847_v20 = vld [vmem:[%s19910_s15 + $0x3f78] sm:$0xff] }
 0x979   : > { %16816 = vmatprep.subr.bf16.mxu0 %v19179_v19  ;;  %v19291_v7 = vcombine.high %v3843_v48, %v3847_v20  ;;  %v3707_v46 = vld [vmem:[%s19910_s15 + $0x3b18] sm:$0xff]  ;;  %v19290_v47 = vcombine.low %v3843_v48, %v3847_v20 }
 0x97a   : > { %16856 = vmatpush1.bf16.msra.mxu1 %v19186_v4  ;;  %v3711_v42 = vld [vmem:[%s19910_s15 + $0x3b38] sm:$0xff] }
 0x97b   : > { %16857 = vmatprep.subr.bf16.mxu1 %v19307_v49  ;;  %v3835_v8 = vld [vmem:[%s19910_s15 + $0x3f18] sm:$0xff]  ;;  %v19155_v15 = vcombine.high %v3707_v46, %v3711_v42  ;;  %v19154_v11 = vcombine.low %v3707_v46, %v3711_v42 }
 0x97c   : > { %16817 = vmatpush2.bf16.msra.mxu0 %v19178_v25  ;;  %v3839_v34 = vld [vmem:[%s19910_s15 + $0x3f38] sm:$0xff] }
 0x97d   : > { %16818 = vmatprep.subr.bf16.mxu0 %v19171_v22  ;;  %v19283_v45 = vcombine.high %v3835_v8, %v3839_v34  ;;  %v3699_v29 = vld [vmem:[%s19910_s15 + $0x3ad8] sm:$0xff]  ;;  %v19282_v38 = vcombine.low %v3835_v8, %v3839_v34 }
 0x97e   : > { %16858 = vmatpush2.bf16.msra.mxu1 %v19306_v51  ;;  %v3703_v17 = vld [vmem:[%s19910_s15 + $0x3af8] sm:$0xff] }
 0x97f   : > { %16859 = vmatprep.subr.bf16.mxu1 %v19299_v10  ;;  %v3827_v59 = vld [vmem:[%s19910_s15 + $0x3ed8] sm:$0xff]  ;;  %v19147_v27 = vcombine.high %v3699_v29, %v3703_v17  ;;  %v19146_v28 = vcombine.low %v3699_v29, %v3703_v17 }
 0x980   : > { %16819 = vmatpush2.bf16.msra.mxu0 %v19170_v58  ;;  %v3831_v9 = vld [vmem:[%s19910_s15 + $0x3ef8] sm:$0xff] }
 0x981   : > { %16820 = vmatprep.subr.bf16.mxu0 %v19163_v37  ;;  %v19275_v62 = vcombine.high %v3827_v59, %v3831_v9  ;;  %v3691_v44 = vld [vmem:[%s19910_s15 + $0x3a98] sm:$0xff]  ;;  %v19274_v52 = vcombine.low %v3827_v59, %v3831_v9 }
 0x982   : > { %16860 = vmatpush2.bf16.msra.mxu1 %v19298_v60  ;;  %v3695_v36 = vld [vmem:[%s19910_s15 + $0x3ab8] sm:$0xff] }
 0x983   : > { %16861 = vmatprep.subr.bf16.mxu1 %v19291_v7  ;;  %v3819_v12 = vld [vmem:[%s19910_s15 + $0x3e98] sm:$0xff]  ;;  %v19139_v56 = vcombine.high %v3691_v44, %v3695_v36  ;;  %v19138_v6 = vcombine.low %v3691_v44, %v3695_v36 }
 0x984   : > { %16821 = vmatpush2.bf16.msra.mxu0 %v19162_v16  ;;  %v3823_v0 = vld [vmem:[%s19910_s15 + $0x3eb8] sm:$0xff] }
 0x985   : > { %16822 = vmatprep.subr.bf16.mxu0 %v19155_v15  ;;  %v19267_v21 = vcombine.high %v3819_v12, %v3823_v0  ;;  %v3683_v43 = vld [vmem:[%s19910_s15 + $0x3a58] sm:$0xff]  ;;  %v19266_v55 = vcombine.low %v3819_v12, %v3823_v0 }
 0x986   : > { %16862 = vmatpush2.bf16.msra.mxu1 %v19290_v47  ;;  %v3687_v26 = vld [vmem:[%s19910_s15 + $0x3a78] sm:$0xff] }
 0x987   : > { %16863 = vmatprep.subr.bf16.mxu1 %v19283_v45  ;;  %v3811_v13 = vld [vmem:[%s19910_s15 + $0x3e58] sm:$0xff]  ;;  %v19131_v61 = vcombine.high %v3683_v43, %v3687_v26  ;;  %v19130_v57 = vcombine.low %v3683_v43, %v3687_v26 }
 0x988   : > { %16823 = vmatpush2.bf16.msra.mxu0 %v19154_v11  ;;  %v3815_v3 = vld [vmem:[%s19910_s15 + $0x3e78] sm:$0xff] }
 0x989   : > { %16824 = vmatprep.subr.bf16.mxu0 %v19147_v27  ;;  %v19259_v54 = vcombine.high %v3811_v13, %v3815_v3  ;;  %v3675_v40 = vld [vmem:[%s19910_s15 + $0x3a18] sm:$0xff]  ;;  %v19258_v4 = vcombine.low %v3811_v13, %v3815_v3 }
 0x98a   : > { %16864 = vmatpush2.bf16.msra.mxu1 %v19282_v38  ;;  %v3679_v18 = vld [vmem:[%s19910_s15 + $0x3a38] sm:$0xff] }
 0x98b   : > { %16865 = vmatprep.subr.bf16.mxu1 %v19275_v62  ;;  %v3803_v63 = vld [vmem:[%s19910_s15 + $0x3e18] sm:$0xff]  ;;  %v19123_v19 = vcombine.high %v3675_v40, %v3679_v18  ;;  %v19122_v39 = vcombine.low %v3675_v40, %v3679_v18 }
 0x98c   : > { %16825 = vmatpush2.bf16.msra.mxu0 %v19146_v28  ;;  %v3807_v35 = vld [vmem:[%s19910_s15 + $0x3e38] sm:$0xff] }
 0x98d   : > { %16826 = vmatprep.subr.bf16.mxu0 %v19139_v56  ;;  %v19251_v49 = vcombine.high %v3803_v63, %v3807_v35  ;;  %v19250_v23 = vcombine.low %v3803_v63, %v3807_v35 }
 0x98e   : > { %16866 = vmatpush2.bf16.msra.mxu1 %v19274_v52 }
 0x98f   : > { %16867 = vmatprep.subr.bf16.mxu1 %v19267_v21  ;;  %v19475_v21 = vld [vmem:[%s19925_s19] sm:$0xff] }
 0x990   : > { %16827 = vmatpush2.bf16.msra.mxu0 %v19138_v6  ;;  %v16920_v43 = vrot.slane %v19475_v21, %v3892_v14 }
 0x991   : > { %16828 = vmatprep.subr.bf16.mxu0 %v19131_v61 }
 0x992   : > { %16868 = vmatpush2.bf16.msra.mxu1 %v19266_v55 }
 0x993   : > { %16869 = vmatprep.subr.bf16.mxu1 %v19259_v54  ;;  %v16924_v54 = vrot.slane %v19475_v21, %v3896_v31 }
 0x994   : > { %16829 = vmatpush2.bf16.msra.mxu0 %v19130_v57 }
 0x995   : > { %16830 = vmatprep.subr.bf16.mxu0 %v19123_v19 }
 0x996   : > { %16870 = vmatpush2.bf16.msra.mxu1 %v19258_v4 }
 0x997   : > { %16871 = vmatprep.subr.bf16.mxu1 %v19251_v49  ;;  %v16890_v49 = vld [vmem:[#allocation3] sm:$0xff] }
 0x998   : > { %16831 = vmatpush2.bf16.msra.mxu0 %v19122_v39 }
 0x99a   : > { %16872 = vmatpush2.bf16.msra.mxu1 %v19250_v23 }
 0x99b   : > { %v16588_v1 = vpop.f32.mrf.mxu0  ;;  %16833 = vmatmul.mubr.bf16.vlgmr.msra.gmra.mxu0 %v20762_v30 }
 0x99c   : > { %v16589_v5 = vadd.f32 %v16588_v1, %v22505_v24 }
 0x99d   : > { %v16629_v25 = vpop.f32.mrf.mxu1  ;;  %16874 = vmatmul.mubr.bf16.vlgmr.msra.gmra.mxu1 %v20768_v32  ;;  %v16590_v51 = vpop.f32.mrf.mxu0 }
 0x99e   : > { %v16630_v22 = vadd.f32 %v16629_v25, %v16589_v5  ;;  %v16591_v10 = vadd.f32 %v16590_v51, %v22514_v53 }
 0x99f   : > { %v16631_v41 = vpop.f32.mrf.mxu1  ;;  %v16592_v2 = vpop.f32.mrf.mxu0 }
 0x9a0   : > { %v16632_v48 = vadd.f32 %v16631_v41, %v16591_v10 }
 0x9a1   : > { %v16633_v20 = vpop.f32.mrf.mxu1  ;;  %v16593_v58 = vpop.f32.mrf.mxu0 }
 0x9a3   : > { %v16634_v60 = vpop.f32.mrf.mxu1 }
 0x9db   : > { %v16670_v37 = vpop.f32.mrf.mxu0 }
 0x9dc   : > { %v16671_v7 = vadd.f32 %v16670_v37, %v16630_v22 }
 0x9dd   : > { %v16711_v46 = vpop.f32.mrf.mxu1  ;;  %v16672_v42 = vpop.f32.mrf.mxu0 }
 0x9de   : > { %v16712_v30 = vadd.f32 %v16711_v46, %v16671_v7  ;;  %v16673_v8 = vadd.f32 %v16672_v42, %v16632_v48 }
 0x9df   : > { %v16713_v24 = vpop.f32.mrf.mxu1  ;;  %v16674_v34 = vpop.f32.mrf.mxu0 }
 0x9e0   : > { %v16714_v16 = vadd.f32 %v16713_v24, %v16673_v8 }
 0x9e1   : > { %v16715_v32 = vpop.f32.mrf.mxu1  ;;  %v16675_v47 = vpop.f32.mrf.mxu0 }
 0x9e3   : > { %v16716_v15 = vpop.f32.mrf.mxu1 }
 0xa1b   : > { %v16752_v45 = vpop.f32.mrf.mxu0 }
 0xa1c   : > { %v16753_v27 = vadd.f32 %v16752_v45, %v16712_v30 }
 0xa1d   : > { %v16793_v53 = vpop.f32.mrf.mxu1  ;;  %v16754_v29 = vpop.f32.mrf.mxu0 }
 0xa1e   : > { %v16755_v62 = vadd.f32 %v16754_v29, %v16714_v16  ;;  %v16794_v44 = vadd.f32 %v16793_v53, %v16753_v27 }
 0xa1f   : > { %v16795_v17 = vpop.f32.mrf.mxu1  ;;  %v16756_v59 = vpop.f32.mrf.mxu0 }
 0xa20   : > { %v16796_v12 = vadd.f32 %v16795_v17, %v16755_v62 }
 0xa21   : > { %v16797_v9 = vpop.f32.mrf.mxu1  ;;  %v16757_v11 = vpop.f32.mrf.mxu0 }
 0xa23   : > { %v16798_v38 = vpop.f32.mrf.mxu1 }
 0xa5b   : > { %v16834_v36 = vpop.f32.mrf.mxu0 }
 0xa5c   : > { %v16835_v0 = vadd.f32 %v16834_v36, %v16794_v44 }
 0xa5d   : > { %v16875_v28 = vpop.f32.mrf.mxu1  ;;  %v16836_v52 = vpop.f32.mrf.mxu0 }
 0xa5e   : > { %v16876_v56 = vadd.f32 %v16875_v28, %v16835_v0  ;;  %v16837_v26 = vadd.f32 %v16836_v52, %v16796_v12 }
 0xa5f   : > { %v16877_v13 = vpop.f32.mrf.mxu1  ;;  %v16838_v3 = vpop.f32.mrf.mxu0 }
 0xa60   : > { %v16888_v6 = vmax.f32 %v16876_v56, 0.0  ;;  %v16878_v55 = vadd.f32 %v16877_v13, %v16837_v26 }
 0xa61   : > { %v16879_v61 = vpop.f32.mrf.mxu1  ;;  %v16839_v40 = vpop.f32.mrf.mxu0 }
 0xa62   : > { %v16939_v18 = vmul.f32 %v16920_v43, %v16888_v6  ;;  %v16889_v63 = vmax.f32 %v16878_v55, 0.0 }
 0xa63   : > { %v16880_v35 = vpop.f32.mrf.mxu1 }
 0xa64   : > { %v16940_v57 = vmul.f32 %v16924_v54, %v16889_v63  ;;  %v16946_v4 = vadd.f32 %v22219_v33, %v16939_v18 }
 0xa66   : > { %v16947_v19 = vadd.f32 %v16946_v4, %v16940_v57 }
 0xa68   : > { %16948 = vadd.xlane.f32.xlu0 %v16947_v19 }
 0xaf0   : > { %16956 = sbr.rel (%p19308_p12) target bundleno = 2813 (0xafd), region = 72 }
 0xaf1   : > { %v16949_v14 = vpop.xlane.xlu0 %16948 }
 0xaf2   : > { %v16950_v39 = vadd.f32 %v16949_v14, %v16890_v49 }
 0xaf4   : > { %16952 = vst.msk [vmem:[#allocation3] sm:$0xff] %vm16951_vm2, %v16950_v39 }
 0xafb   : > { %v16957_v23 = vld [vmem:[#allocation3] sm:$0xff] }
 0xafc   : > { %16958 = vst.msk [vmem:[%s19921_s27] sm:$0xff] %vm16951_vm2, %v16957_v23 }
 0xafd PF: > { %s18_s28 = sadd.s32 1, %s19686_s28   ;;  %s22639_s24 = sld [smem:[#allocation15_spill]] }
 0xafe   : > { %p15_p0 = scmp.ge.s32.totalorder %s18_s28, 6   ;;  %s22640_s25 = sld [smem:[#allocation16_spill]] }
 0xaff   : > { %s22641_s26 = sld [smem:[#allocation17_spill]]  ;;  %s22643_s21 = smov %s19662_s22 }
 0xb00   : > { %s22642_s27 = sld [smem:[#allocation18_spill]]  ;;  %s22644_s22 = smov %s19666_s23 }
 0xb01   : > { %s22645_s23 = smov %s19866_s16  ;;  %17 = sbr.rel (!%p15_p0) target bundleno = 10 (0xa), region = 121 }
 0xb06   :  { %16978 = vsyncpa [#allocation5], 1 }
 0xb07   :  { %16980 = vsyncpa [#allocation5 + $0x1], 1 }
 0xb08   :  { %16981 = vsyncpa [#allocation7], 1 }

</bundles_post_ra>
